<compile_context>
chip_gen: v7x
topology: tpu7x:2x2x1
jax: 0.10.0
libtpu: 0.0.40
codegen_flags: <defaults>
</compile_context>

<pallas_src>
import functools
import math

import jax
import jax.numpy as jnp
from jax.experimental import pallas as pl
from jax.experimental.pallas import tpu as pltpu

# ----------------------------- configuration --------------------------------
D_MODEL = 32
D_FFN = 64
N_HEADS = 4
N_LEVELS = 2
N_POINTS = 2
SPATIAL_SHAPES = ((8, 8), (4, 4))          # (H, W) per feature level (static)
LN_EPS = 1e-5

HEAD_DIM = D_MODEL // N_HEADS
OFF_COLS = N_HEADS * N_LEVELS * N_POINTS * 2      # 32 columns of (x, y) offsets
AW_COLS = N_HEADS * N_LEVELS * N_POINTS           # 16 attention-weight logits

LEVEL_STARTS = []
_s = 0
for _h, _w in SPATIAL_SHAPES:
    LEVEL_STARTS.append(_s)
    _s += _h * _w
LEN_IN = _s                                        # 80

# --------------------- packed parameter slab layout ---------------------------
PARAM_LANES = 128
_PARAM_DEFS = (
    # matrices (row-blocks, column 0-aligned)
    ("w_qkv", (D_MODEL, 3 * D_MODEL)),
    ("w_o",   (D_MODEL, D_MODEL)),
    ("w_val", (D_MODEL, D_MODEL)),
    ("w_oa",  (D_MODEL, OFF_COLS + AW_COLS)),
    ("w_out", (D_MODEL, D_MODEL)),
    ("w1",    (D_MODEL, D_FFN)),
    ("w2",    (D_FFN, D_MODEL)),
    # vectors (one row each)
    ("b_qkv", (1, 3 * D_MODEL)),
    ("b_o",   (1, D_MODEL)),
    ("g2",    (1, D_MODEL)),
    ("be2",   (1, D_MODEL)),
    ("b_val", (1, D_MODEL)),
    ("b_oa",  (1, OFF_COLS + AW_COLS)),
    ("b_out", (1, D_MODEL)),
    ("g1",    (1, D_MODEL)),
    ("be1",   (1, D_MODEL)),
    ("b1",    (1, D_FFN)),
    ("b2",    (1, D_MODEL)),
    ("g3",    (1, D_MODEL)),
    ("be3",   (1, D_MODEL)),
)


def _build_layout():
    layout, row = {}, 0
    for name, (r, c) in _PARAM_DEFS:
        layout[name] = (row, r, c)
        row += r
    return layout, ((row + 7) // 8) * 8


PARAM_LAYOUT, PARAM_ROWS = _build_layout()       # 269 rows -> padded to 272


# ------------------------------ in-kernel helpers ----------------------------
def _layernorm(z, g, b):
    mu = jnp.mean(z, axis=-1, keepdims=True)
    var = jnp.mean((z - mu) ** 2, axis=-1, keepdims=True)
    return (z - mu) * jax.lax.rsqrt(var + LN_EPS) * g + b


def _softmax_rows(x):
    x = x - jnp.max(x, axis=-1, keepdims=True)
    e = jnp.exp(x)
    return e * pl.reciprocal(jnp.sum(e, axis=-1, keepdims=True), approx=True)


# ------------------------------ fused decoder kernel -------------------------
def decoder_layer_kernel(tgt_ref, pos_ref, src_ref, refp_ref, p_ref, o_ref,
                         *, B, Lq):
    f32 = jnp.float32
    D, hd = D_MODEL, HEAD_DIM
    nH, nL, nP = N_HEADS, N_LEVELS, N_POINTS
    BLq = B * Lq

    def par(name):
        r0, nr, nc = PARAM_LAYOUT[name]
        return p_ref[r0:r0 + nr, 0:nc]

    x = tgt_ref[...].astype(f32)              # (B*Lq, D) batch folded into rows
    pos = pos_ref[...].astype(f32)

    # ------------------- self attention + residual + norm2 -------------------
    qk_in = x + pos
    w_qkv, b_qkv = par("w_qkv"), par("b_qkv")
    qk = jnp.dot(qk_in, w_qkv[:, :2 * D],
                 preferred_element_type=f32) + b_qkv[:, :2 * D]   # (BLq, 2D)
    v = jnp.dot(x, w_qkv[:, 2 * D:],
                preferred_element_type=f32) + b_qkv[:, 2 * D:]    # (BLq, D)

    scale = 1.0 / math.sqrt(hd)
    dn = (((1,), (1,)), ((), ()))              # contract last dims -> q @ k^T
    s_rows = []
    for b in range(B):
        r0 = b * Lq
        q_b = qk[r0:r0 + Lq, :D] * scale
        k_b = qk[r0:r0 + Lq, D:]
        for h in range(nH):
            s_rows.append(jax.lax.dot_general(
                q_b[:, h * hd:(h + 1) * hd], k_b[:, h * hd:(h + 1) * hd],
                dn, preferred_element_type=f32))                   # (Lq, Lq)
    # one softmax over all (batch, head) row-stacked scores
    p_stack = _softmax_rows(jnp.concatenate(s_rows, axis=0))       # (B*nH*Lq, Lq)

    o_rows = []
    for b in range(B):
        p_b = p_stack[b * nH * Lq:(b + 1) * nH * Lq, :]            # (nH*Lq, Lq)
        pv = jnp.dot(p_b, v[b * Lq:(b + 1) * Lq, :],
                     preferred_element_type=f32)                   # (nH*Lq, D)
        o_rows.append(jnp.concatenate(
            [pv[h * Lq:(h + 1) * Lq, h * hd:(h + 1) * hd] for h in range(nH)],
            axis=1))                                               # (Lq, D)
    o_cat = jnp.concatenate(o_rows, axis=0)                        # (BLq, D)
    tgt2 = jnp.dot(o_cat, par("w_o"), preferred_element_type=f32) + par("b_o")
    tgt_sa = _layernorm(x + tgt2, par("g2"), par("be2"))

    # ------------- deformable cross attention + residual + norm1 -------------
    query = tgt_sa + pos
    value = jnp.dot(src_ref[...].astype(f32), par("w_val"),
                    preferred_element_type=f32) + par("b_val")     # (B*Len_in, D)

    oa = jnp.dot(query, par("w_oa"), preferred_element_type=f32) + par("b_oa")
    off = oa[:, :OFF_COLS]                                         # (BLq, 32)
    awl = oa[:, OFF_COLS:]                                         # (BLq, 16)
    # per-head softmax over (level, point), row-stacked across heads
    aw_stack = _softmax_rows(jnp.concatenate(
        [awl[:, h * nL * nP:(h + 1) * nL * nP] for h in range(nH)],
        axis=0))                                                   # (nH*BLq, 4)

    refp = refp_ref[...].astype(f32)                               # (BLq, 2*nL)

    # pixel-coordinate lanes per level (hoisted; shared by all batches/heads)
    coords = []
    for (H_, W_) in SPATIAL_SHAPES:
        HW = H_ * W_
        ii = jax.lax.broadcasted_iota(jnp.int32, (1, HW), 1).astype(f32)
        cy = jnp.floor(ii * (1.0 / W_))
        cx = ii - cy * float(W_)
        coords.append((cx, cy))

    samp_rows = []
    for b in range(B):
        q0 = b * Lq
        off_b = off[q0:q0 + Lq, :]
        refp_b = refp[q0:q0 + Lq, :]
        acc_b = None
        for l, (H_, W_) in enumerate(SPATIAL_SHAPES):
            HW = H_ * W_
            colx, coly = coords[l]
            v_l = value[b * LEN_IN + LEVEL_STARTS[l]:
                        b * LEN_IN + LEVEL_STARTS[l] + HW, :]      # (HW, D)
            # sampling locations in pixel space (align_corners=False):
            #   px = (ref_x + off_x / W) * W - 0.5 = ref_x*W + off_x - 0.5
            refx = refp_b[:, 2 * l:2 * l + 1] * float(W_) - 0.5
            refy = refp_b[:, 2 * l + 1:2 * l + 2] * float(H_) - 0.5
            a_rows = []
            for h in range(nH):
                aw_bh = aw_stack[h * BLq + q0:h * BLq + q0 + Lq, :]  # (Lq, 4)
                A_h = None
                for p in range(nP):
                    cbase = h * (nL * nP * 2) + l * (nP * 2) + p * 2
                    px = refx + off_b[:, cbase:cbase + 1]
                    py = refy + off_b[:, cbase + 1:cbase + 2]
                    x0 = jnp.floor(px)
                    fx = px - x0
                    y0 = jnp.floor(py)
                    fy = py - y0
                    a_lp = aw_bh[:, l * nP + p:l * nP + p + 1]      # (Lq, 1)
                    # separable bilinear one-hot weights; attention weight folded
                    # into the x factor; out-of-range corners never match any
                    # column -> exact zero padding.
                    wx = (jnp.where(colx == x0, (1.0 - fx) * a_lp, 0.0)
                          + jnp.where(colx == x0 + 1.0, fx * a_lp, 0.0))
                    wy = (jnp.where(coly == y0, 1.0 - fy, 0.0)
                          + jnp.where(coly == y0 + 1.0, fy, 0.0))
                    contrib = wx * wy                               # (Lq, HW)
                    A_h = contrib if A_h is None else A_h + contrib
                a_rows.append(A_h)
            A_stack = jnp.concatenate(a_rows, axis=0)               # (nH*Lq, HW)
            sampled = jnp.dot(A_stack, v_l,
                              preferred_element_type=f32)           # (nH*Lq, D)
            lvl = jnp.concatenate(
                [sampled[h * Lq:(h + 1) * Lq, h * hd:(h + 1) * hd]
                 for h in range(nH)], axis=1)                       # (Lq, D)
            acc_b = lvl if acc_b is None else acc_b + lvl
        samp_rows.append(acc_b)
    samp = jnp.concatenate(samp_rows, axis=0)                       # (BLq, D)

    t2 = jnp.dot(samp, par("w_out"), preferred_element_type=f32) + par("b_out")
    tgt_ca = _layernorm(tgt_sa + t2, par("g1"), par("be1"))

    # ------------------------ FFN + residual + norm3 --------------------------
    hdn = jnp.maximum(
        jnp.dot(tgt_ca, par("w1"), preferred_element_type=f32) + par("b1"), 0.0)
    y = jnp.dot(hdn, par("w2"), preferred_element_type=f32) + par("b2")
    out = _layernorm(tgt_ca + y, par("g3"), par("be3"))

    o_ref[...] = out.astype(o_ref.dtype)


# ------------------------------ wrapper ---------------------------------------
@jax.jit
def decoder_layer_forward(tgt, query_pos, reference_points, src, param_slab):
    """Full MOTR deformable decoder layer forward (self_cross=True path).

    tgt, query_pos: (B, Lq, D); reference_points: (B, Lq, nL, 2);
    src: (B, sum_l H_l*W_l, D); param_slab: packed (PARAM_ROWS, 128) weights.
    """
    B, Lq, D = tgt.shape
    tgt2 = tgt.reshape(B * Lq, D)
    pos2 = query_pos.reshape(B * Lq, D)
    src2 = src.reshape(B * LEN_IN, D)
    refp2 = reference_points.reshape(B * Lq, 2 * N_LEVELS)

    vmem = pl.BlockSpec(memory_space=pltpu.MemorySpace.VMEM)
    out = pl.pallas_call(
        functools.partial(decoder_layer_kernel, B=B, Lq=Lq),
        out_shape=jax.ShapeDtypeStruct((B * Lq, D), jnp.float32),
        in_specs=[vmem, vmem, vmem, vmem, vmem],
        out_specs=vmem,
        cost_estimate=pl.CostEstimate(flops=1_000_000, transcendentals=1_500,
                                      bytes_accessed=180_000),
    )(tgt2, pos2, src2, refp2, param_slab)
    return out.reshape(B, Lq, D)


# ------------------------------- parameters ----------------------------------
def init_params(key):
    ks = jax.random.split(key, 16)

    def w(i, shape, scale=0.05):
        return jax.random.normal(ks[i], shape, dtype=jnp.float32) * scale

    D, F = D_MODEL, D_FFN
    nH, nL, nP = N_HEADS, N_LEVELS, N_POINTS
    return {
        # self-attention (nn.MultiheadAttention); weights stored (in, out)
        "wq": w(0, (D, D)), "bq": jnp.zeros((D,), jnp.float32),
        "wk": w(1, (D, D)), "bk": jnp.zeros((D,), jnp.float32),
        "wv": w(2, (D, D)), "bv": jnp.zeros((D,), jnp.float32),
        "wo": w(3, (D, D)), "bo": jnp.zeros((D,), jnp.float32),
        "norm2_g": jnp.ones((D,), jnp.float32), "norm2_b": jnp.zeros((D,), jnp.float32),
        # MSDeformAttn
        "w_value": w(4, (D, D)), "b_value": w(5, (D,), 0.02),
        "w_off": w(6, (D, nH * nL * nP * 2), 0.02), "b_off": w(7, (nH * nL * nP * 2,), 0.1),
        "w_aw": w(8, (D, nH * nL * nP)), "b_aw": jnp.zeros((nH * nL * nP,), jnp.float32),
        "w_out": w(9, (D, D)), "b_out": jnp.zeros((D,), jnp.float32),
        "norm1_g": jnp.ones((D,), jnp.float32), "norm1_b": jnp.zeros((D,), jnp.float32),
        # FFN
        "w1": w(10, (D, F)), "b1": jnp.zeros((F,), jnp.float32),
        "w2": w(11, (F, D)), "b2": jnp.zeros((D,), jnp.float32),
        "norm3_g": jnp.ones((D,), jnp.float32), "norm3_b": jnp.zeros((D,), jnp.float32),
    }


def prepare_params(p):
    """Pack all weights/biases/LN params into ONE 128-lane slab (done once)."""
    r = lambda a: a.reshape(1, -1).astype(jnp.float32)
    vals = {
        "w_qkv": jnp.concatenate([p["wq"], p["wk"], p["wv"]], axis=1),
        "b_qkv": r(jnp.concatenate([p["bq"], p["bk"], p["bv"]])),
        "w_o": p["wo"], "b_o": r(p["bo"]),
        "g2": r(p["norm2_g"]), "be2": r(p["norm2_b"]),
        "w_val": p["w_value"], "b_val": r(p["b_value"]),
        "w_oa": jnp.concatenate([p["w_off"], p["w_aw"]], axis=1),
        "b_oa": r(jnp.concatenate([p["b_off"], p["b_aw"]])),
        "w_out": p["w_out"], "b_out": r(p["b_out"]),
        "g1": r(p["norm1_g"]), "be1": r(p["norm1_b"]),
        "w1": p["w1"], "b1": r(p["b1"]),
        "w2": p["w2"], "b2": r(p["b2"]),
        "g3": r(p["norm3_g"]), "be3": r(p["norm3_b"]),
    }
    slab = jnp.zeros((PARAM_ROWS, PARAM_LANES), jnp.float32)
    for name, (r0, nr, nc) in PARAM_LAYOUT.items():
        val = jnp.asarray(vals[name], jnp.float32)
        assert val.shape == (nr, nc), (name, val.shape, (nr, nc))
        slab = slab.at[r0:r0 + nr, :nc].set(val)
    return slab


# ---------------------------------- main --------------------------------------
if __name__ == "__main__":
    key = jax.random.PRNGKey(0)
    k1, k2, k3, k4, kp = jax.random.split(key, 5)

    B, Lq = 2, 8

    tgt = jax.random.normal(k1, (B, Lq, D_MODEL), jnp.float32)
    query_pos = jax.random.normal(k2, (B, Lq, D_MODEL), jnp.float32)
    src = jax.random.normal(k3, (B, LEN_IN, D_MODEL), jnp.float32)
    reference_points = jax.random.uniform(k4, (B, Lq, N_LEVELS, 2),
                                          minval=0.25, maxval=0.75,
                                          dtype=jnp.float32)

    params = init_params(kp)
    param_slab = prepare_params(params)

    out = decoder_layer_forward(tgt, query_pos, reference_points, src, param_slab)
    out = jax.block_until_ready(out)

    assert out.shape == (B, Lq, D_MODEL)
    assert bool(jnp.all(jnp.isfinite(out)))
    print("KERNEL_OK")
</pallas_src>

<mosaic_0001>
module attributes {stable_mosaic.version = 11 : i64} {
  func.func @decoder_layer_kernel(%arg0: memref<16x32xf32, #tpu.memory_space<vmem>>, %arg1: memref<16x32xf32, #tpu.memory_space<vmem>>, %arg2: memref<160x32xf32, #tpu.memory_space<vmem>>, %arg3: memref<16x4xf32, #tpu.memory_space<vmem>>, %arg4: memref<272x128xf32, #tpu.memory_space<vmem>>, %arg5: memref<16x32xf32, #tpu.memory_space<vmem>>) attributes {dimension_semantics = [], scalar_prefetch = 0 : i64, scratch_operands = 0 : i64, tpu.core_type = #tpu.core_type<tc>} {
    %c0 = arith.constant 0 : index
    %c0_0 = arith.constant 0 : index
    %0 = vector.load %arg0[%c0, %c0_0] : memref<16x32xf32, #tpu.memory_space<vmem>>, vector<16x32xf32>
    %c0_1 = arith.constant 0 : index
    %c0_2 = arith.constant 0 : index
    %1 = vector.load %arg1[%c0_1, %c0_2] : memref<16x32xf32, #tpu.memory_space<vmem>>, vector<16x32xf32>
    %2 = arith.addf %0, %1 : vector<16x32xf32>
    %c0_3 = arith.constant 0 : index
    %c0_4 = arith.constant 0 : index
    %3 = vector.load %arg4[%c0_3, %c0_4] : memref<272x128xf32, #tpu.memory_space<vmem>>, vector<32x96xf32>
    %c256 = arith.constant 256 : index
    %c0_5 = arith.constant 0 : index
    %4 = vector.load %arg4[%c256, %c0_5] : memref<272x128xf32, #tpu.memory_space<vmem>>, vector<1x96xf32>
    %5 = vector.extract_strided_slice %3 {offsets = [0, 0], sizes = [32, 64], strides = [1, 1]} : vector<32x96xf32> to vector<32x64xf32>
    %cst = arith.constant dense<0.000000e+00> : vector<16x64xf32>
    %6 = tpu.matmul %2, %5, %cst {dimension_numbers = #tpu.dot_dimension_numbers<[1], [0], [0], [1], [0, 0, 1, 1], [], []>} : vector<16x32xf32>, vector<32x64xf32>, vector<16x64xf32> -> vector<16x64xf32>
    %7 = vector.extract_strided_slice %4 {offsets = [0, 0], sizes = [1, 64], strides = [1, 1]} : vector<1x96xf32> to vector<1x64xf32>
    %8 = vector.broadcast %7 : vector<1x64xf32> to vector<16x64xf32>
    %9 = arith.addf %6, %8 : vector<16x64xf32>
    %10 = vector.extract_strided_slice %3 {offsets = [0, 64], sizes = [32, 32], strides = [1, 1]} : vector<32x96xf32> to vector<32x32xf32>
    %cst_6 = arith.constant dense<0.000000e+00> : vector<16x32xf32>
    %11 = tpu.matmul %0, %10, %cst_6 {dimension_numbers = #tpu.dot_dimension_numbers<[1], [0], [0], [1], [0, 0, 1, 1], [], []>} : vector<16x32xf32>, vector<32x32xf32>, vector<16x32xf32> -> vector<16x32xf32>
    %12 = vector.extract_strided_slice %4 {offsets = [0, 64], sizes = [1, 32], strides = [1, 1]} : vector<1x96xf32> to vector<1x32xf32>
    %13 = vector.broadcast %12 : vector<1x32xf32> to vector<16x32xf32>
    %14 = arith.addf %11, %13 : vector<16x32xf32>
    %15 = vector.extract_strided_slice %9 {offsets = [0, 0], sizes = [8, 32], strides = [1, 1]} : vector<16x64xf32> to vector<8x32xf32>
    %cst_7 = arith.constant 0.353553385 : f32
    %16 = vector.broadcast %cst_7 : f32 to vector<8x32xf32>
    %17 = arith.mulf %15, %16 : vector<8x32xf32>
    %18 = vector.extract_strided_slice %9 {offsets = [0, 32], sizes = [8, 32], strides = [1, 1]} : vector<16x64xf32> to vector<8x32xf32>
    %19 = vector.extract_strided_slice %17 {offsets = [0, 0], sizes = [8, 8], strides = [1, 1]} : vector<8x32xf32> to vector<8x8xf32>
    %20 = vector.extract_strided_slice %18 {offsets = [0, 0], sizes = [8, 8], strides = [1, 1]} : vector<8x32xf32> to vector<8x8xf32>
    %cst_8 = arith.constant dense<0.000000e+00> : vector<8x8xf32>
    %21 = tpu.matmul %19, %20, %cst_8 {dimension_numbers = #tpu.dot_dimension_numbers<[1], [1], [0], [0], [0, 0, 1, 0], [], []>} : vector<8x8xf32>, vector<8x8xf32>, vector<8x8xf32> -> vector<8x8xf32>
    %22 = vector.extract_strided_slice %17 {offsets = [0, 8], sizes = [8, 8], strides = [1, 1]} : vector<8x32xf32> to vector<8x8xf32>
    %23 = vector.extract_strided_slice %18 {offsets = [0, 8], sizes = [8, 8], strides = [1, 1]} : vector<8x32xf32> to vector<8x8xf32>
    %cst_9 = arith.constant dense<0.000000e+00> : vector<8x8xf32>
    %24 = tpu.matmul %22, %23, %cst_9 {dimension_numbers = #tpu.dot_dimension_numbers<[1], [1], [0], [0], [0, 0, 1, 0], [], []>} : vector<8x8xf32>, vector<8x8xf32>, vector<8x8xf32> -> vector<8x8xf32>
    %25 = vector.extract_strided_slice %17 {offsets = [0, 16], sizes = [8, 8], strides = [1, 1]} : vector<8x32xf32> to vector<8x8xf32>
    %26 = vector.extract_strided_slice %18 {offsets = [0, 16], sizes = [8, 8], strides = [1, 1]} : vector<8x32xf32> to vector<8x8xf32>
    %cst_10 = arith.constant dense<0.000000e+00> : vector<8x8xf32>
    %27 = tpu.matmul %25, %26, %cst_10 {dimension_numbers = #tpu.dot_dimension_numbers<[1], [1], [0], [0], [0, 0, 1, 0], [], []>} : vector<8x8xf32>, vector<8x8xf32>, vector<8x8xf32> -> vector<8x8xf32>
    %28 = vector.extract_strided_slice %17 {offsets = [0, 24], sizes = [8, 8], strides = [1, 1]} : vector<8x32xf32> to vector<8x8xf32>
    %29 = vector.extract_strided_slice %18 {offsets = [0, 24], sizes = [8, 8], strides = [1, 1]} : vector<8x32xf32> to vector<8x8xf32>
    %cst_11 = arith.constant dense<0.000000e+00> : vector<8x8xf32>
    %30 = tpu.matmul %28, %29, %cst_11 {dimension_numbers = #tpu.dot_dimension_numbers<[1], [1], [0], [0], [0, 0, 1, 0], [], []>} : vector<8x8xf32>, vector<8x8xf32>, vector<8x8xf32> -> vector<8x8xf32>
    %31 = vector.extract_strided_slice %9 {offsets = [8, 0], sizes = [8, 32], strides = [1, 1]} : vector<16x64xf32> to vector<8x32xf32>
    %cst_12 = arith.constant 0.353553385 : f32
    %32 = vector.broadcast %cst_12 : f32 to vector<8x32xf32>
    %33 = arith.mulf %31, %32 : vector<8x32xf32>
    %34 = vector.extract_strided_slice %9 {offsets = [8, 32], sizes = [8, 32], strides = [1, 1]} : vector<16x64xf32> to vector<8x32xf32>
    %35 = vector.extract_strided_slice %33 {offsets = [0, 0], sizes = [8, 8], strides = [1, 1]} : vector<8x32xf32> to vector<8x8xf32>
    %36 = vector.extract_strided_slice %34 {offsets = [0, 0], sizes = [8, 8], strides = [1, 1]} : vector<8x32xf32> to vector<8x8xf32>
    %cst_13 = arith.constant dense<0.000000e+00> : vector<8x8xf32>
    %37 = tpu.matmul %35, %36, %cst_13 {dimension_numbers = #tpu.dot_dimension_numbers<[1], [1], [0], [0], [0, 0, 1, 0], [], []>} : vector<8x8xf32>, vector<8x8xf32>, vector<8x8xf32> -> vector<8x8xf32>
    %38 = vector.extract_strided_slice %33 {offsets = [0, 8], sizes = [8, 8], strides = [1, 1]} : vector<8x32xf32> to vector<8x8xf32>
    %39 = vector.extract_strided_slice %34 {offsets = [0, 8], sizes = [8, 8], strides = [1, 1]} : vector<8x32xf32> to vector<8x8xf32>
    %cst_14 = arith.constant dense<0.000000e+00> : vector<8x8xf32>
    %40 = tpu.matmul %38, %39, %cst_14 {dimension_numbers = #tpu.dot_dimension_numbers<[1], [1], [0], [0], [0, 0, 1, 0], [], []>} : vector<8x8xf32>, vector<8x8xf32>, vector<8x8xf32> -> vector<8x8xf32>
    %41 = vector.extract_strided_slice %33 {offsets = [0, 16], sizes = [8, 8], strides = [1, 1]} : vector<8x32xf32> to vector<8x8xf32>
    %42 = vector.extract_strided_slice %34 {offsets = [0, 16], sizes = [8, 8], strides = [1, 1]} : vector<8x32xf32> to vector<8x8xf32>
    %cst_15 = arith.constant dense<0.000000e+00> : vector<8x8xf32>
    %43 = tpu.matmul %41, %42, %cst_15 {dimension_numbers = #tpu.dot_dimension_numbers<[1], [1], [0], [0], [0, 0, 1, 0], [], []>} : vector<8x8xf32>, vector<8x8xf32>, vector<8x8xf32> -> vector<8x8xf32>
    %44 = vector.extract_strided_slice %33 {offsets = [0, 24], sizes = [8, 8], strides = [1, 1]} : vector<8x32xf32> to vector<8x8xf32>
    %45 = vector.extract_strided_slice %34 {offsets = [0, 24], sizes = [8, 8], strides = [1, 1]} : vector<8x32xf32> to vector<8x8xf32>
    %cst_16 = arith.constant dense<0.000000e+00> : vector<8x8xf32>
    %46 = tpu.matmul %44, %45, %cst_16 {dimension_numbers = #tpu.dot_dimension_numbers<[1], [1], [0], [0], [0, 0, 1, 0], [], []>} : vector<8x8xf32>, vector<8x8xf32>, vector<8x8xf32> -> vector<8x8xf32>
    %47 = tpu.concatenate %21, %24, %27, %30, %37, %40, %43, %46 in 0 : vector<8x8xf32>, vector<8x8xf32>, vector<8x8xf32>, vector<8x8xf32>, vector<8x8xf32>, vector<8x8xf32>, vector<8x8xf32>, vector<8x8xf32> -> vector<64x8xf32>
    %cst_17 = arith.constant dense<0xFF800000> : vector<64xf32>
    %48 = vector.multi_reduction <maximumf>, %47, %cst_17 [1] : vector<64x8xf32> to vector<64xf32>
    %49 = vector.shape_cast %48 : vector<64xf32> to vector<64x1xf32>
    %50 = vector.broadcast %49 : vector<64x1xf32> to vector<64x8xf32>
    %51 = arith.subf %47, %50 : vector<64x8xf32>
    %52 = math.exp %51 : vector<64x8xf32>
    %cst_18 = arith.constant dense<0.000000e+00> : vector<64xf32>
    %53 = vector.multi_reduction <add>, %52, %cst_18 [1] : vector<64x8xf32> to vector<64xf32>
    %54 = vector.shape_cast %53 : vector<64xf32> to vector<64x1xf32>
    %55 = tpu.reciprocal %54 {approx = true} : vector<64x1xf32> -> vector<64x1xf32>
    %56 = vector.broadcast %55 : vector<64x1xf32> to vector<64x8xf32>
    %57 = arith.mulf %52, %56 : vector<64x8xf32>
    %58 = vector.extract_strided_slice %57 {offsets = [0, 0], sizes = [32, 8], strides = [1, 1]} : vector<64x8xf32> to vector<32x8xf32>
    %59 = vector.extract_strided_slice %14 {offsets = [0, 0], sizes = [8, 32], strides = [1, 1]} : vector<16x32xf32> to vector<8x32xf32>
    %cst_19 = arith.constant dense<0.000000e+00> : vector<32x32xf32>
    %60 = tpu.matmul %58, %59, %cst_19 {dimension_numbers = #tpu.dot_dimension_numbers<[1], [0], [0], [1], [0, 0, 1, 1], [], []>} : vector<32x8xf32>, vector<8x32xf32>, vector<32x32xf32> -> vector<32x32xf32>
    %61 = vector.extract_strided_slice %60 {offsets = [0, 0], sizes = [8, 8], strides = [1, 1]} : vector<32x32xf32> to vector<8x8xf32>
    %62 = vector.extract_strided_slice %60 {offsets = [8, 8], sizes = [8, 8], strides = [1, 1]} : vector<32x32xf32> to vector<8x8xf32>
    %63 = vector.extract_strided_slice %60 {offsets = [16, 16], sizes = [8, 8], strides = [1, 1]} : vector<32x32xf32> to vector<8x8xf32>
    %64 = vector.extract_strided_slice %60 {offsets = [24, 24], sizes = [8, 8], strides = [1, 1]} : vector<32x32xf32> to vector<8x8xf32>
    %65 = tpu.concatenate %61, %62, %63, %64 in 1 : vector<8x8xf32>, vector<8x8xf32>, vector<8x8xf32>, vector<8x8xf32> -> vector<8x32xf32>
    %66 = vector.extract_strided_slice %57 {offsets = [32, 0], sizes = [32, 8], strides = [1, 1]} : vector<64x8xf32> to vector<32x8xf32>
    %67 = vector.extract_strided_slice %14 {offsets = [8, 0], sizes = [8, 32], strides = [1, 1]} : vector<16x32xf32> to vector<8x32xf32>
    %cst_20 = arith.constant dense<0.000000e+00> : vector<32x32xf32>
    %68 = tpu.matmul %66, %67, %cst_20 {dimension_numbers = #tpu.dot_dimension_numbers<[1], [0], [0], [1], [0, 0, 1, 1], [], []>} : vector<32x8xf32>, vector<8x32xf32>, vector<32x32xf32> -> vector<32x32xf32>
    %69 = vector.extract_strided_slice %68 {offsets = [0, 0], sizes = [8, 8], strides = [1, 1]} : vector<32x32xf32> to vector<8x8xf32>
    %70 = vector.extract_strided_slice %68 {offsets = [8, 8], sizes = [8, 8], strides = [1, 1]} : vector<32x32xf32> to vector<8x8xf32>
    %71 = vector.extract_strided_slice %68 {offsets = [16, 16], sizes = [8, 8], strides = [1, 1]} : vector<32x32xf32> to vector<8x8xf32>
    %72 = vector.extract_strided_slice %68 {offsets = [24, 24], sizes = [8, 8], strides = [1, 1]} : vector<32x32xf32> to vector<8x8xf32>
    %73 = tpu.concatenate %69, %70, %71, %72 in 1 : vector<8x8xf32>, vector<8x8xf32>, vector<8x8xf32>, vector<8x8xf32> -> vector<8x32xf32>
    %74 = tpu.concatenate %65, %73 in 0 : vector<8x32xf32>, vector<8x32xf32> -> vector<16x32xf32>
    %c32 = arith.constant 32 : index
    %c0_21 = arith.constant 0 : index
    %75 = vector.load %arg4[%c32, %c0_21] : memref<272x128xf32, #tpu.memory_space<vmem>>, vector<32x32xf32>
    %cst_22 = arith.constant dense<0.000000e+00> : vector<16x32xf32>
    %76 = tpu.matmul %74, %75, %cst_22 {dimension_numbers = #tpu.dot_dimension_numbers<[1], [0], [0], [1], [0, 0, 1, 1], [], []>} : vector<16x32xf32>, vector<32x32xf32>, vector<16x32xf32> -> vector<16x32xf32>
    %c257 = arith.constant 257 : index
    %c0_23 = arith.constant 0 : index
    %77 = vector.load %arg4[%c257, %c0_23] : memref<272x128xf32, #tpu.memory_space<vmem>>, vector<1x32xf32>
    %78 = vector.broadcast %77 : vector<1x32xf32> to vector<16x32xf32>
    %79 = arith.addf %76, %78 : vector<16x32xf32>
    %80 = arith.addf %0, %79 : vector<16x32xf32>
    %c258 = arith.constant 258 : index
    %c0_24 = arith.constant 0 : index
    %81 = vector.load %arg4[%c258, %c0_24] : memref<272x128xf32, #tpu.memory_space<vmem>>, vector<1x32xf32>
    %c259 = arith.constant 259 : index
    %c0_25 = arith.constant 0 : index
    %82 = vector.load %arg4[%c259, %c0_25] : memref<272x128xf32, #tpu.memory_space<vmem>>, vector<1x32xf32>
    %cst_26 = arith.constant dense<0.000000e+00> : vector<16xf32>
    %83 = vector.multi_reduction <add>, %80, %cst_26 [1] : vector<16x32xf32> to vector<16xf32>
    %84 = vector.shape_cast %83 : vector<16xf32> to vector<16x1xf32>
    %cst_27 = arith.constant 3.200000e+01 : f32
    %85 = vector.broadcast %cst_27 : f32 to vector<16x1xf32>
    %86 = arith.divf %84, %85 : vector<16x1xf32>
    %87 = vector.broadcast %86 : vector<16x1xf32> to vector<16x32xf32>
    %88 = arith.subf %80, %87 : vector<16x32xf32>
    %89 = arith.mulf %88, %88 : vector<16x32xf32>
    %cst_28 = arith.constant dense<0.000000e+00> : vector<16xf32>
    %90 = vector.multi_reduction <add>, %89, %cst_28 [1] : vector<16x32xf32> to vector<16xf32>
    %91 = vector.shape_cast %90 : vector<16xf32> to vector<16x1xf32>
    %cst_29 = arith.constant 3.200000e+01 : f32
    %92 = vector.broadcast %cst_29 : f32 to vector<16x1xf32>
    %93 = arith.divf %91, %92 : vector<16x1xf32>
    %94 = vector.broadcast %86 : vector<16x1xf32> to vector<16x32xf32>
    %95 = arith.subf %80, %94 : vector<16x32xf32>
    %cst_30 = arith.constant 9.99999974E-6 : f32
    %96 = vector.broadcast %cst_30 : f32 to vector<16x1xf32>
    %97 = arith.addf %93, %96 : vector<16x1xf32>
    %98 = math.rsqrt %97 : vector<16x1xf32>
    %99 = vector.broadcast %98 : vector<16x1xf32> to vector<16x32xf32>
    %100 = arith.mulf %95, %99 : vector<16x32xf32>
    %101 = vector.broadcast %81 : vector<1x32xf32> to vector<16x32xf32>
    %102 = arith.mulf %100, %101 : vector<16x32xf32>
    %103 = vector.broadcast %82 : vector<1x32xf32> to vector<16x32xf32>
    %104 = arith.addf %102, %103 : vector<16x32xf32>
    %105 = arith.addf %104, %1 : vector<16x32xf32>
    %c0_31 = arith.constant 0 : index
    %c0_32 = arith.constant 0 : index
    %106 = vector.load %arg2[%c0_31, %c0_32] : memref<160x32xf32, #tpu.memory_space<vmem>>, vector<160x32xf32>
    %c64 = arith.constant 64 : index
    %c0_33 = arith.constant 0 : index
    %107 = vector.load %arg4[%c64, %c0_33] : memref<272x128xf32, #tpu.memory_space<vmem>>, vector<32x32xf32>
    %cst_34 = arith.constant dense<0.000000e+00> : vector<160x32xf32>
    %108 = tpu.matmul %106, %107, %cst_34 {dimension_numbers = #tpu.dot_dimension_numbers<[1], [0], [0], [1], [0, 0, 1, 1], [], []>} : vector<160x32xf32>, vector<32x32xf32>, vector<160x32xf32> -> vector<160x32xf32>
    %c260 = arith.constant 260 : index
    %c0_35 = arith.constant 0 : index
    %109 = vector.load %arg4[%c260, %c0_35] : memref<272x128xf32, #tpu.memory_space<vmem>>, vector<1x32xf32>
    %110 = vector.broadcast %109 : vector<1x32xf32> to vector<160x32xf32>
    %111 = arith.addf %108, %110 : vector<160x32xf32>
    %c96 = arith.constant 96 : index
    %c0_36 = arith.constant 0 : index
    %112 = vector.load %arg4[%c96, %c0_36] : memref<272x128xf32, #tpu.memory_space<vmem>>, vector<32x48xf32>
    %cst_37 = arith.constant dense<0.000000e+00> : vector<16x48xf32>
    %113 = tpu.matmul %105, %112, %cst_37 {dimension_numbers = #tpu.dot_dimension_numbers<[1], [0], [0], [1], [0, 0, 1, 1], [], []>} : vector<16x32xf32>, vector<32x48xf32>, vector<16x48xf32> -> vector<16x48xf32>
    %c261 = arith.constant 261 : index
    %c0_38 = arith.constant 0 : index
    %114 = vector.load %arg4[%c261, %c0_38] : memref<272x128xf32, #tpu.memory_space<vmem>>, vector<1x48xf32>
    %115 = vector.broadcast %114 : vector<1x48xf32> to vector<16x48xf32>
    %116 = arith.addf %113, %115 : vector<16x48xf32>
    %117 = vector.extract_strided_slice %116 {offsets = [0, 0], sizes = [16, 32], strides = [1, 1]} : vector<16x48xf32> to vector<16x32xf32>
    %118 = vector.extract_strided_slice %116 {offsets = [0, 32], sizes = [16, 16], strides = [1, 1]} : vector<16x48xf32> to vector<16x16xf32>
    %119 = vector.extract_strided_slice %118 {offsets = [0, 0], sizes = [16, 4], strides = [1, 1]} : vector<16x16xf32> to vector<16x4xf32>
    %120 = vector.extract_strided_slice %118 {offsets = [0, 4], sizes = [16, 4], strides = [1, 1]} : vector<16x16xf32> to vector<16x4xf32>
    %121 = vector.extract_strided_slice %118 {offsets = [0, 8], sizes = [16, 4], strides = [1, 1]} : vector<16x16xf32> to vector<16x4xf32>
    %122 = vector.extract_strided_slice %118 {offsets = [0, 12], sizes = [16, 4], strides = [1, 1]} : vector<16x16xf32> to vector<16x4xf32>
    %123 = tpu.concatenate %119, %120, %121, %122 in 0 : vector<16x4xf32>, vector<16x4xf32>, vector<16x4xf32>, vector<16x4xf32> -> vector<64x4xf32>
    %cst_39 = arith.constant dense<0xFF800000> : vector<64xf32>
    %124 = vector.multi_reduction <maximumf>, %123, %cst_39 [1] : vector<64x4xf32> to vector<64xf32>
    %125 = vector.shape_cast %124 : vector<64xf32> to vector<64x1xf32>
    %126 = vector.broadcast %125 : vector<64x1xf32> to vector<64x4xf32>
    %127 = arith.subf %123, %126 : vector<64x4xf32>
    %128 = math.exp %127 : vector<64x4xf32>
    %cst_40 = arith.constant dense<0.000000e+00> : vector<64xf32>
    %129 = vector.multi_reduction <add>, %128, %cst_40 [1] : vector<64x4xf32> to vector<64xf32>
    %130 = vector.shape_cast %129 : vector<64xf32> to vector<64x1xf32>
    %131 = tpu.reciprocal %130 {approx = true} : vector<64x1xf32> -> vector<64x1xf32>
    %132 = vector.broadcast %131 : vector<64x1xf32> to vector<64x4xf32>
    %133 = arith.mulf %128, %132 : vector<64x4xf32>
    %c0_41 = arith.constant 0 : index
    %c0_42 = arith.constant 0 : index
    %134 = vector.load %arg3[%c0_41, %c0_42] : memref<16x4xf32, #tpu.memory_space<vmem>>, vector<16x4xf32>
    %135 = tpu.iota {dimensions = array<i32: 1>} : vector<1x64xi32>
    %136 = arith.sitofp %135 : vector<1x64xi32> to vector<1x64xf32>
    %cst_43 = arith.constant 1.250000e-01 : f32
    %137 = vector.broadcast %cst_43 : f32 to vector<1x64xf32>
    %138 = arith.mulf %136, %137 : vector<1x64xf32>
    %139 = math.floor %138 : vector<1x64xf32>
    %cst_44 = arith.constant 8.000000e+00 : f32
    %140 = vector.broadcast %cst_44 : f32 to vector<1x64xf32>
    %141 = arith.mulf %139, %140 : vector<1x64xf32>
    %142 = arith.subf %136, %141 : vector<1x64xf32>
    %143 = tpu.iota {dimensions = array<i32: 1>} : vector<1x16xi32>
    %144 = arith.sitofp %143 : vector<1x16xi32> to vector<1x16xf32>
    %cst_45 = arith.constant 2.500000e-01 : f32
    %145 = vector.broadcast %cst_45 : f32 to vector<1x16xf32>
    %146 = arith.mulf %144, %145 : vector<1x16xf32>
    %147 = math.floor %146 : vector<1x16xf32>
    %cst_46 = arith.constant 4.000000e+00 : f32
    %148 = vector.broadcast %cst_46 : f32 to vector<1x16xf32>
    %149 = arith.mulf %147, %148 : vector<1x16xf32>
    %150 = arith.subf %144, %149 : vector<1x16xf32>
    %151 = vector.extract_strided_slice %117 {offsets = [0, 0], sizes = [8, 32], strides = [1, 1]} : vector<16x32xf32> to vector<8x32xf32>
    %152 = vector.extract_strided_slice %134 {offsets = [0, 0], sizes = [8, 4], strides = [1, 1]} : vector<16x4xf32> to vector<8x4xf32>
    %153 = vector.extract_strided_slice %111 {offsets = [0, 0], sizes = [64, 32], strides = [1, 1]} : vector<160x32xf32> to vector<64x32xf32>
    %154 = vector.extract_strided_slice %152 {offsets = [0, 0], sizes = [8, 1], strides = [1, 1]} : vector<8x4xf32> to vector<8x1xf32>
    %cst_47 = arith.constant 8.000000e+00 : f32
    %155 = vector.broadcast %cst_47 : f32 to vector<8x1xf32>
    %156 = arith.mulf %154, %155 : vector<8x1xf32>
    %cst_48 = arith.constant 5.000000e-01 : f32
    %157 = vector.broadcast %cst_48 : f32 to vector<8x1xf32>
    %158 = arith.subf %156, %157 : vector<8x1xf32>
    %159 = vector.extract_strided_slice %152 {offsets = [0, 1], sizes = [8, 1], strides = [1, 1]} : vector<8x4xf32> to vector<8x1xf32>
    %cst_49 = arith.constant 8.000000e+00 : f32
    %160 = vector.broadcast %cst_49 : f32 to vector<8x1xf32>
    %161 = arith.mulf %159, %160 : vector<8x1xf32>
    %cst_50 = arith.constant 5.000000e-01 : f32
    %162 = vector.broadcast %cst_50 : f32 to vector<8x1xf32>
    %163 = arith.subf %161, %162 : vector<8x1xf32>
    %164 = vector.extract_strided_slice %133 {offsets = [0, 0], sizes = [8, 4], strides = [1, 1]} : vector<64x4xf32> to vector<8x4xf32>
    %165 = vector.extract_strided_slice %151 {offsets = [0, 0], sizes = [8, 1], strides = [1, 1]} : vector<8x32xf32> to vector<8x1xf32>
    %166 = arith.addf %158, %165 : vector<8x1xf32>
    %167 = vector.extract_strided_slice %151 {offsets = [0, 1], sizes = [8, 1], strides = [1, 1]} : vector<8x32xf32> to vector<8x1xf32>
    %168 = arith.addf %163, %167 : vector<8x1xf32>
    %169 = math.floor %166 : vector<8x1xf32>
    %170 = arith.subf %166, %169 : vector<8x1xf32>
    %171 = math.floor %168 : vector<8x1xf32>
    %172 = arith.subf %168, %171 : vector<8x1xf32>
    %173 = vector.extract_strided_slice %164 {offsets = [0, 0], sizes = [8, 1], strides = [1, 1]} : vector<8x4xf32> to vector<8x1xf32>
    %174 = vector.broadcast %142 : vector<1x64xf32> to vector<8x64xf32>
    %175 = vector.broadcast %169 : vector<8x1xf32> to vector<8x64xf32>
    %176 = arith.cmpf oeq, %174, %175 : vector<8x64xf32>
    %cst_51 = arith.constant 1.000000e+00 : f32
    %177 = vector.broadcast %cst_51 : f32 to vector<8x1xf32>
    %178 = arith.subf %177, %170 : vector<8x1xf32>
    %179 = arith.mulf %178, %173 : vector<8x1xf32>
    %cst_52 = arith.constant 0.000000e+00 : f32
    %180 = vector.shape_cast %179 : vector<8x1xf32> to vector<8x1xf32>
    %181 = vector.broadcast %180 : vector<8x1xf32> to vector<8x64xf32>
    %182 = vector.broadcast %cst_52 : f32 to vector<8x64xf32>
    %183 = arith.select %176, %181, %182 : vector<8x64xi1>, vector<8x64xf32>
    %cst_53 = arith.constant 1.000000e+00 : f32
    %184 = vector.broadcast %cst_53 : f32 to vector<8x1xf32>
    %185 = arith.addf %169, %184 : vector<8x1xf32>
    %186 = vector.broadcast %142 : vector<1x64xf32> to vector<8x64xf32>
    %187 = vector.broadcast %185 : vector<8x1xf32> to vector<8x64xf32>
    %188 = arith.cmpf oeq, %186, %187 : vector<8x64xf32>
    %189 = arith.mulf %170, %173 : vector<8x1xf32>
    %cst_54 = arith.constant 0.000000e+00 : f32
    %190 = vector.shape_cast %189 : vector<8x1xf32> to vector<8x1xf32>
    %191 = vector.broadcast %190 : vector<8x1xf32> to vector<8x64xf32>
    %192 = vector.broadcast %cst_54 : f32 to vector<8x64xf32>
    %193 = arith.select %188, %191, %192 : vector<8x64xi1>, vector<8x64xf32>
    %194 = arith.addf %183, %193 : vector<8x64xf32>
    %195 = vector.broadcast %139 : vector<1x64xf32> to vector<8x64xf32>
    %196 = vector.broadcast %171 : vector<8x1xf32> to vector<8x64xf32>
    %197 = arith.cmpf oeq, %195, %196 : vector<8x64xf32>
    %cst_55 = arith.constant 1.000000e+00 : f32
    %198 = vector.broadcast %cst_55 : f32 to vector<8x1xf32>
    %199 = arith.subf %198, %172 : vector<8x1xf32>
    %cst_56 = arith.constant 0.000000e+00 : f32
    %200 = vector.shape_cast %199 : vector<8x1xf32> to vector<8x1xf32>
    %201 = vector.broadcast %200 : vector<8x1xf32> to vector<8x64xf32>
    %202 = vector.broadcast %cst_56 : f32 to vector<8x64xf32>
    %203 = arith.select %197, %201, %202 : vector<8x64xi1>, vector<8x64xf32>
    %cst_57 = arith.constant 1.000000e+00 : f32
    %204 = vector.broadcast %cst_57 : f32 to vector<8x1xf32>
    %205 = arith.addf %171, %204 : vector<8x1xf32>
    %206 = vector.broadcast %139 : vector<1x64xf32> to vector<8x64xf32>
    %207 = vector.broadcast %205 : vector<8x1xf32> to vector<8x64xf32>
    %208 = arith.cmpf oeq, %206, %207 : vector<8x64xf32>
    %cst_58 = arith.constant 0.000000e+00 : f32
    %209 = vector.shape_cast %172 : vector<8x1xf32> to vector<8x1xf32>
    %210 = vector.broadcast %209 : vector<8x1xf32> to vector<8x64xf32>
    %211 = vector.broadcast %cst_58 : f32 to vector<8x64xf32>
    %212 = arith.select %208, %210, %211 : vector<8x64xi1>, vector<8x64xf32>
    %213 = arith.addf %203, %212 : vector<8x64xf32>
    %214 = arith.mulf %194, %213 : vector<8x64xf32>
    %215 = vector.extract_strided_slice %151 {offsets = [0, 2], sizes = [8, 1], strides = [1, 1]} : vector<8x32xf32> to vector<8x1xf32>
    %216 = arith.addf %158, %215 : vector<8x1xf32>
    %217 = vector.extract_strided_slice %151 {offsets = [0, 3], sizes = [8, 1], strides = [1, 1]} : vector<8x32xf32> to vector<8x1xf32>
    %218 = arith.addf %163, %217 : vector<8x1xf32>
    %219 = math.floor %216 : vector<8x1xf32>
    %220 = arith.subf %216, %219 : vector<8x1xf32>
    %221 = math.floor %218 : vector<8x1xf32>
    %222 = arith.subf %218, %221 : vector<8x1xf32>
    %223 = vector.extract_strided_slice %164 {offsets = [0, 1], sizes = [8, 1], strides = [1, 1]} : vector<8x4xf32> to vector<8x1xf32>
    %224 = vector.broadcast %142 : vector<1x64xf32> to vector<8x64xf32>
    %225 = vector.broadcast %219 : vector<8x1xf32> to vector<8x64xf32>
    %226 = arith.cmpf oeq, %224, %225 : vector<8x64xf32>
    %cst_59 = arith.constant 1.000000e+00 : f32
    %227 = vector.broadcast %cst_59 : f32 to vector<8x1xf32>
    %228 = arith.subf %227, %220 : vector<8x1xf32>
    %229 = arith.mulf %228, %223 : vector<8x1xf32>
    %cst_60 = arith.constant 0.000000e+00 : f32
    %230 = vector.shape_cast %229 : vector<8x1xf32> to vector<8x1xf32>
    %231 = vector.broadcast %230 : vector<8x1xf32> to vector<8x64xf32>
    %232 = vector.broadcast %cst_60 : f32 to vector<8x64xf32>
    %233 = arith.select %226, %231, %232 : vector<8x64xi1>, vector<8x64xf32>
    %cst_61 = arith.constant 1.000000e+00 : f32
    %234 = vector.broadcast %cst_61 : f32 to vector<8x1xf32>
    %235 = arith.addf %219, %234 : vector<8x1xf32>
    %236 = vector.broadcast %142 : vector<1x64xf32> to vector<8x64xf32>
    %237 = vector.broadcast %235 : vector<8x1xf32> to vector<8x64xf32>
    %238 = arith.cmpf oeq, %236, %237 : vector<8x64xf32>
    %239 = arith.mulf %220, %223 : vector<8x1xf32>
    %cst_62 = arith.constant 0.000000e+00 : f32
    %240 = vector.shape_cast %239 : vector<8x1xf32> to vector<8x1xf32>
    %241 = vector.broadcast %240 : vector<8x1xf32> to vector<8x64xf32>
    %242 = vector.broadcast %cst_62 : f32 to vector<8x64xf32>
    %243 = arith.select %238, %241, %242 : vector<8x64xi1>, vector<8x64xf32>
    %244 = arith.addf %233, %243 : vector<8x64xf32>
    %245 = vector.broadcast %139 : vector<1x64xf32> to vector<8x64xf32>
    %246 = vector.broadcast %221 : vector<8x1xf32> to vector<8x64xf32>
    %247 = arith.cmpf oeq, %245, %246 : vector<8x64xf32>
    %cst_63 = arith.constant 1.000000e+00 : f32
    %248 = vector.broadcast %cst_63 : f32 to vector<8x1xf32>
    %249 = arith.subf %248, %222 : vector<8x1xf32>
    %cst_64 = arith.constant 0.000000e+00 : f32
    %250 = vector.shape_cast %249 : vector<8x1xf32> to vector<8x1xf32>
    %251 = vector.broadcast %250 : vector<8x1xf32> to vector<8x64xf32>
    %252 = vector.broadcast %cst_64 : f32 to vector<8x64xf32>
    %253 = arith.select %247, %251, %252 : vector<8x64xi1>, vector<8x64xf32>
    %cst_65 = arith.constant 1.000000e+00 : f32
    %254 = vector.broadcast %cst_65 : f32 to vector<8x1xf32>
    %255 = arith.addf %221, %254 : vector<8x1xf32>
    %256 = vector.broadcast %139 : vector<1x64xf32> to vector<8x64xf32>
    %257 = vector.broadcast %255 : vector<8x1xf32> to vector<8x64xf32>
    %258 = arith.cmpf oeq, %256, %257 : vector<8x64xf32>
    %cst_66 = arith.constant 0.000000e+00 : f32
    %259 = vector.shape_cast %222 : vector<8x1xf32> to vector<8x1xf32>
    %260 = vector.broadcast %259 : vector<8x1xf32> to vector<8x64xf32>
    %261 = vector.broadcast %cst_66 : f32 to vector<8x64xf32>
    %262 = arith.select %258, %260, %261 : vector<8x64xi1>, vector<8x64xf32>
    %263 = arith.addf %253, %262 : vector<8x64xf32>
    %264 = arith.mulf %244, %263 : vector<8x64xf32>
    %265 = arith.addf %214, %264 : vector<8x64xf32>
    %266 = vector.extract_strided_slice %133 {offsets = [16, 0], sizes = [8, 4], strides = [1, 1]} : vector<64x4xf32> to vector<8x4xf32>
    %267 = vector.extract_strided_slice %151 {offsets = [0, 8], sizes = [8, 1], strides = [1, 1]} : vector<8x32xf32> to vector<8x1xf32>
    %268 = arith.addf %158, %267 : vector<8x1xf32>
    %269 = vector.extract_strided_slice %151 {offsets = [0, 9], sizes = [8, 1], strides = [1, 1]} : vector<8x32xf32> to vector<8x1xf32>
    %270 = arith.addf %163, %269 : vector<8x1xf32>
    %271 = math.floor %268 : vector<8x1xf32>
    %272 = arith.subf %268, %271 : vector<8x1xf32>
    %273 = math.floor %270 : vector<8x1xf32>
    %274 = arith.subf %270, %273 : vector<8x1xf32>
    %275 = vector.extract_strided_slice %266 {offsets = [0, 0], sizes = [8, 1], strides = [1, 1]} : vector<8x4xf32> to vector<8x1xf32>
    %276 = vector.broadcast %142 : vector<1x64xf32> to vector<8x64xf32>
    %277 = vector.broadcast %271 : vector<8x1xf32> to vector<8x64xf32>
    %278 = arith.cmpf oeq, %276, %277 : vector<8x64xf32>
    %cst_67 = arith.constant 1.000000e+00 : f32
    %279 = vector.broadcast %cst_67 : f32 to vector<8x1xf32>
    %280 = arith.subf %279, %272 : vector<8x1xf32>
    %281 = arith.mulf %280, %275 : vector<8x1xf32>
    %cst_68 = arith.constant 0.000000e+00 : f32
    %282 = vector.shape_cast %281 : vector<8x1xf32> to vector<8x1xf32>
    %283 = vector.broadcast %282 : vector<8x1xf32> to vector<8x64xf32>
    %284 = vector.broadcast %cst_68 : f32 to vector<8x64xf32>
    %285 = arith.select %278, %283, %284 : vector<8x64xi1>, vector<8x64xf32>
    %cst_69 = arith.constant 1.000000e+00 : f32
    %286 = vector.broadcast %cst_69 : f32 to vector<8x1xf32>
    %287 = arith.addf %271, %286 : vector<8x1xf32>
    %288 = vector.broadcast %142 : vector<1x64xf32> to vector<8x64xf32>
    %289 = vector.broadcast %287 : vector<8x1xf32> to vector<8x64xf32>
    %290 = arith.cmpf oeq, %288, %289 : vector<8x64xf32>
    %291 = arith.mulf %272, %275 : vector<8x1xf32>
    %cst_70 = arith.constant 0.000000e+00 : f32
    %292 = vector.shape_cast %291 : vector<8x1xf32> to vector<8x1xf32>
    %293 = vector.broadcast %292 : vector<8x1xf32> to vector<8x64xf32>
    %294 = vector.broadcast %cst_70 : f32 to vector<8x64xf32>
    %295 = arith.select %290, %293, %294 : vector<8x64xi1>, vector<8x64xf32>
    %296 = arith.addf %285, %295 : vector<8x64xf32>
    %297 = vector.broadcast %139 : vector<1x64xf32> to vector<8x64xf32>
    %298 = vector.broadcast %273 : vector<8x1xf32> to vector<8x64xf32>
    %299 = arith.cmpf oeq, %297, %298 : vector<8x64xf32>
    %cst_71 = arith.constant 1.000000e+00 : f32
    %300 = vector.broadcast %cst_71 : f32 to vector<8x1xf32>
    %301 = arith.subf %300, %274 : vector<8x1xf32>
    %cst_72 = arith.constant 0.000000e+00 : f32
    %302 = vector.shape_cast %301 : vector<8x1xf32> to vector<8x1xf32>
    %303 = vector.broadcast %302 : vector<8x1xf32> to vector<8x64xf32>
    %304 = vector.broadcast %cst_72 : f32 to vector<8x64xf32>
    %305 = arith.select %299, %303, %304 : vector<8x64xi1>, vector<8x64xf32>
    %cst_73 = arith.constant 1.000000e+00 : f32
    %306 = vector.broadcast %cst_73 : f32 to vector<8x1xf32>
    %307 = arith.addf %273, %306 : vector<8x1xf32>
    %308 = vector.broadcast %139 : vector<1x64xf32> to vector<8x64xf32>
    %309 = vector.broadcast %307 : vector<8x1xf32> to vector<8x64xf32>
    %310 = arith.cmpf oeq, %308, %309 : vector<8x64xf32>
    %cst_74 = arith.constant 0.000000e+00 : f32
    %311 = vector.shape_cast %274 : vector<8x1xf32> to vector<8x1xf32>
    %312 = vector.broadcast %311 : vector<8x1xf32> to vector<8x64xf32>
    %313 = vector.broadcast %cst_74 : f32 to vector<8x64xf32>
    %314 = arith.select %310, %312, %313 : vector<8x64xi1>, vector<8x64xf32>
    %315 = arith.addf %305, %314 : vector<8x64xf32>
    %316 = arith.mulf %296, %315 : vector<8x64xf32>
    %317 = vector.extract_strided_slice %151 {offsets = [0, 10], sizes = [8, 1], strides = [1, 1]} : vector<8x32xf32> to vector<8x1xf32>
    %318 = arith.addf %158, %317 : vector<8x1xf32>
    %319 = vector.extract_strided_slice %151 {offsets = [0, 11], sizes = [8, 1], strides = [1, 1]} : vector<8x32xf32> to vector<8x1xf32>
    %320 = arith.addf %163, %319 : vector<8x1xf32>
    %321 = math.floor %318 : vector<8x1xf32>
    %322 = arith.subf %318, %321 : vector<8x1xf32>
    %323 = math.floor %320 : vector<8x1xf32>
    %324 = arith.subf %320, %323 : vector<8x1xf32>
    %325 = vector.extract_strided_slice %266 {offsets = [0, 1], sizes = [8, 1], strides = [1, 1]} : vector<8x4xf32> to vector<8x1xf32>
    %326 = vector.broadcast %142 : vector<1x64xf32> to vector<8x64xf32>
    %327 = vector.broadcast %321 : vector<8x1xf32> to vector<8x64xf32>
    %328 = arith.cmpf oeq, %326, %327 : vector<8x64xf32>
    %cst_75 = arith.constant 1.000000e+00 : f32
    %329 = vector.broadcast %cst_75 : f32 to vector<8x1xf32>
    %330 = arith.subf %329, %322 : vector<8x1xf32>
    %331 = arith.mulf %330, %325 : vector<8x1xf32>
    %cst_76 = arith.constant 0.000000e+00 : f32
    %332 = vector.shape_cast %331 : vector<8x1xf32> to vector<8x1xf32>
    %333 = vector.broadcast %332 : vector<8x1xf32> to vector<8x64xf32>
    %334 = vector.broadcast %cst_76 : f32 to vector<8x64xf32>
    %335 = arith.select %328, %333, %334 : vector<8x64xi1>, vector<8x64xf32>
    %cst_77 = arith.constant 1.000000e+00 : f32
    %336 = vector.broadcast %cst_77 : f32 to vector<8x1xf32>
    %337 = arith.addf %321, %336 : vector<8x1xf32>
    %338 = vector.broadcast %142 : vector<1x64xf32> to vector<8x64xf32>
    %339 = vector.broadcast %337 : vector<8x1xf32> to vector<8x64xf32>
    %340 = arith.cmpf oeq, %338, %339 : vector<8x64xf32>
    %341 = arith.mulf %322, %325 : vector<8x1xf32>
    %cst_78 = arith.constant 0.000000e+00 : f32
    %342 = vector.shape_cast %341 : vector<8x1xf32> to vector<8x1xf32>
    %343 = vector.broadcast %342 : vector<8x1xf32> to vector<8x64xf32>
    %344 = vector.broadcast %cst_78 : f32 to vector<8x64xf32>
    %345 = arith.select %340, %343, %344 : vector<8x64xi1>, vector<8x64xf32>
    %346 = arith.addf %335, %345 : vector<8x64xf32>
    %347 = vector.broadcast %139 : vector<1x64xf32> to vector<8x64xf32>
    %348 = vector.broadcast %323 : vector<8x1xf32> to vector<8x64xf32>
    %349 = arith.cmpf oeq, %347, %348 : vector<8x64xf32>
    %cst_79 = arith.constant 1.000000e+00 : f32
    %350 = vector.broadcast %cst_79 : f32 to vector<8x1xf32>
    %351 = arith.subf %350, %324 : vector<8x1xf32>
    %cst_80 = arith.constant 0.000000e+00 : f32
    %352 = vector.shape_cast %351 : vector<8x1xf32> to vector<8x1xf32>
    %353 = vector.broadcast %352 : vector<8x1xf32> to vector<8x64xf32>
    %354 = vector.broadcast %cst_80 : f32 to vector<8x64xf32>
    %355 = arith.select %349, %353, %354 : vector<8x64xi1>, vector<8x64xf32>
    %cst_81 = arith.constant 1.000000e+00 : f32
    %356 = vector.broadcast %cst_81 : f32 to vector<8x1xf32>
    %357 = arith.addf %323, %356 : vector<8x1xf32>
    %358 = vector.broadcast %139 : vector<1x64xf32> to vector<8x64xf32>
    %359 = vector.broadcast %357 : vector<8x1xf32> to vector<8x64xf32>
    %360 = arith.cmpf oeq, %358, %359 : vector<8x64xf32>
    %cst_82 = arith.constant 0.000000e+00 : f32
    %361 = vector.shape_cast %324 : vector<8x1xf32> to vector<8x1xf32>
    %362 = vector.broadcast %361 : vector<8x1xf32> to vector<8x64xf32>
    %363 = vector.broadcast %cst_82 : f32 to vector<8x64xf32>
    %364 = arith.select %360, %362, %363 : vector<8x64xi1>, vector<8x64xf32>
    %365 = arith.addf %355, %364 : vector<8x64xf32>
    %366 = arith.mulf %346, %365 : vector<8x64xf32>
    %367 = arith.addf %316, %366 : vector<8x64xf32>
    %368 = vector.extract_strided_slice %133 {offsets = [32, 0], sizes = [8, 4], strides = [1, 1]} : vector<64x4xf32> to vector<8x4xf32>
    %369 = vector.extract_strided_slice %151 {offsets = [0, 16], sizes = [8, 1], strides = [1, 1]} : vector<8x32xf32> to vector<8x1xf32>
    %370 = arith.addf %158, %369 : vector<8x1xf32>
    %371 = vector.extract_strided_slice %151 {offsets = [0, 17], sizes = [8, 1], strides = [1, 1]} : vector<8x32xf32> to vector<8x1xf32>
    %372 = arith.addf %163, %371 : vector<8x1xf32>
    %373 = math.floor %370 : vector<8x1xf32>
    %374 = arith.subf %370, %373 : vector<8x1xf32>
    %375 = math.floor %372 : vector<8x1xf32>
    %376 = arith.subf %372, %375 : vector<8x1xf32>
    %377 = vector.extract_strided_slice %368 {offsets = [0, 0], sizes = [8, 1], strides = [1, 1]} : vector<8x4xf32> to vector<8x1xf32>
    %378 = vector.broadcast %142 : vector<1x64xf32> to vector<8x64xf32>
    %379 = vector.broadcast %373 : vector<8x1xf32> to vector<8x64xf32>
    %380 = arith.cmpf oeq, %378, %379 : vector<8x64xf32>
    %cst_83 = arith.constant 1.000000e+00 : f32
    %381 = vector.broadcast %cst_83 : f32 to vector<8x1xf32>
    %382 = arith.subf %381, %374 : vector<8x1xf32>
    %383 = arith.mulf %382, %377 : vector<8x1xf32>
    %cst_84 = arith.constant 0.000000e+00 : f32
    %384 = vector.shape_cast %383 : vector<8x1xf32> to vector<8x1xf32>
    %385 = vector.broadcast %384 : vector<8x1xf32> to vector<8x64xf32>
    %386 = vector.broadcast %cst_84 : f32 to vector<8x64xf32>
    %387 = arith.select %380, %385, %386 : vector<8x64xi1>, vector<8x64xf32>
    %cst_85 = arith.constant 1.000000e+00 : f32
    %388 = vector.broadcast %cst_85 : f32 to vector<8x1xf32>
    %389 = arith.addf %373, %388 : vector<8x1xf32>
    %390 = vector.broadcast %142 : vector<1x64xf32> to vector<8x64xf32>
    %391 = vector.broadcast %389 : vector<8x1xf32> to vector<8x64xf32>
    %392 = arith.cmpf oeq, %390, %391 : vector<8x64xf32>
    %393 = arith.mulf %374, %377 : vector<8x1xf32>
    %cst_86 = arith.constant 0.000000e+00 : f32
    %394 = vector.shape_cast %393 : vector<8x1xf32> to vector<8x1xf32>
    %395 = vector.broadcast %394 : vector<8x1xf32> to vector<8x64xf32>
    %396 = vector.broadcast %cst_86 : f32 to vector<8x64xf32>
    %397 = arith.select %392, %395, %396 : vector<8x64xi1>, vector<8x64xf32>
    %398 = arith.addf %387, %397 : vector<8x64xf32>
    %399 = vector.broadcast %139 : vector<1x64xf32> to vector<8x64xf32>
    %400 = vector.broadcast %375 : vector<8x1xf32> to vector<8x64xf32>
    %401 = arith.cmpf oeq, %399, %400 : vector<8x64xf32>
    %cst_87 = arith.constant 1.000000e+00 : f32
    %402 = vector.broadcast %cst_87 : f32 to vector<8x1xf32>
    %403 = arith.subf %402, %376 : vector<8x1xf32>
    %cst_88 = arith.constant 0.000000e+00 : f32
    %404 = vector.shape_cast %403 : vector<8x1xf32> to vector<8x1xf32>
    %405 = vector.broadcast %404 : vector<8x1xf32> to vector<8x64xf32>
    %406 = vector.broadcast %cst_88 : f32 to vector<8x64xf32>
    %407 = arith.select %401, %405, %406 : vector<8x64xi1>, vector<8x64xf32>
    %cst_89 = arith.constant 1.000000e+00 : f32
    %408 = vector.broadcast %cst_89 : f32 to vector<8x1xf32>
    %409 = arith.addf %375, %408 : vector<8x1xf32>
    %410 = vector.broadcast %139 : vector<1x64xf32> to vector<8x64xf32>
    %411 = vector.broadcast %409 : vector<8x1xf32> to vector<8x64xf32>
    %412 = arith.cmpf oeq, %410, %411 : vector<8x64xf32>
    %cst_90 = arith.constant 0.000000e+00 : f32
    %413 = vector.shape_cast %376 : vector<8x1xf32> to vector<8x1xf32>
    %414 = vector.broadcast %413 : vector<8x1xf32> to vector<8x64xf32>
    %415 = vector.broadcast %cst_90 : f32 to vector<8x64xf32>
    %416 = arith.select %412, %414, %415 : vector<8x64xi1>, vector<8x64xf32>
    %417 = arith.addf %407, %416 : vector<8x64xf32>
    %418 = arith.mulf %398, %417 : vector<8x64xf32>
    %419 = vector.extract_strided_slice %151 {offsets = [0, 18], sizes = [8, 1], strides = [1, 1]} : vector<8x32xf32> to vector<8x1xf32>
    %420 = arith.addf %158, %419 : vector<8x1xf32>
    %421 = vector.extract_strided_slice %151 {offsets = [0, 19], sizes = [8, 1], strides = [1, 1]} : vector<8x32xf32> to vector<8x1xf32>
    %422 = arith.addf %163, %421 : vector<8x1xf32>
    %423 = math.floor %420 : vector<8x1xf32>
    %424 = arith.subf %420, %423 : vector<8x1xf32>
    %425 = math.floor %422 : vector<8x1xf32>
    %426 = arith.subf %422, %425 : vector<8x1xf32>
    %427 = vector.extract_strided_slice %368 {offsets = [0, 1], sizes = [8, 1], strides = [1, 1]} : vector<8x4xf32> to vector<8x1xf32>
    %428 = vector.broadcast %142 : vector<1x64xf32> to vector<8x64xf32>
    %429 = vector.broadcast %423 : vector<8x1xf32> to vector<8x64xf32>
    %430 = arith.cmpf oeq, %428, %429 : vector<8x64xf32>
    %cst_91 = arith.constant 1.000000e+00 : f32
    %431 = vector.broadcast %cst_91 : f32 to vector<8x1xf32>
    %432 = arith.subf %431, %424 : vector<8x1xf32>
    %433 = arith.mulf %432, %427 : vector<8x1xf32>
    %cst_92 = arith.constant 0.000000e+00 : f32
    %434 = vector.shape_cast %433 : vector<8x1xf32> to vector<8x1xf32>
    %435 = vector.broadcast %434 : vector<8x1xf32> to vector<8x64xf32>
    %436 = vector.broadcast %cst_92 : f32 to vector<8x64xf32>
    %437 = arith.select %430, %435, %436 : vector<8x64xi1>, vector<8x64xf32>
    %cst_93 = arith.constant 1.000000e+00 : f32
    %438 = vector.broadcast %cst_93 : f32 to vector<8x1xf32>
    %439 = arith.addf %423, %438 : vector<8x1xf32>
    %440 = vector.broadcast %142 : vector<1x64xf32> to vector<8x64xf32>
    %441 = vector.broadcast %439 : vector<8x1xf32> to vector<8x64xf32>
    %442 = arith.cmpf oeq, %440, %441 : vector<8x64xf32>
    %443 = arith.mulf %424, %427 : vector<8x1xf32>
    %cst_94 = arith.constant 0.000000e+00 : f32
    %444 = vector.shape_cast %443 : vector<8x1xf32> to vector<8x1xf32>
    %445 = vector.broadcast %444 : vector<8x1xf32> to vector<8x64xf32>
    %446 = vector.broadcast %cst_94 : f32 to vector<8x64xf32>
    %447 = arith.select %442, %445, %446 : vector<8x64xi1>, vector<8x64xf32>
    %448 = arith.addf %437, %447 : vector<8x64xf32>
    %449 = vector.broadcast %139 : vector<1x64xf32> to vector<8x64xf32>
    %450 = vector.broadcast %425 : vector<8x1xf32> to vector<8x64xf32>
    %451 = arith.cmpf oeq, %449, %450 : vector<8x64xf32>
    %cst_95 = arith.constant 1.000000e+00 : f32
    %452 = vector.broadcast %cst_95 : f32 to vector<8x1xf32>
    %453 = arith.subf %452, %426 : vector<8x1xf32>
    %cst_96 = arith.constant 0.000000e+00 : f32
    %454 = vector.shape_cast %453 : vector<8x1xf32> to vector<8x1xf32>
    %455 = vector.broadcast %454 : vector<8x1xf32> to vector<8x64xf32>
    %456 = vector.broadcast %cst_96 : f32 to vector<8x64xf32>
    %457 = arith.select %451, %455, %456 : vector<8x64xi1>, vector<8x64xf32>
    %cst_97 = arith.constant 1.000000e+00 : f32
    %458 = vector.broadcast %cst_97 : f32 to vector<8x1xf32>
    %459 = arith.addf %425, %458 : vector<8x1xf32>
    %460 = vector.broadcast %139 : vector<1x64xf32> to vector<8x64xf32>
    %461 = vector.broadcast %459 : vector<8x1xf32> to vector<8x64xf32>
    %462 = arith.cmpf oeq, %460, %461 : vector<8x64xf32>
    %cst_98 = arith.constant 0.000000e+00 : f32
    %463 = vector.shape_cast %426 : vector<8x1xf32> to vector<8x1xf32>
    %464 = vector.broadcast %463 : vector<8x1xf32> to vector<8x64xf32>
    %465 = vector.broadcast %cst_98 : f32 to vector<8x64xf32>
    %466 = arith.select %462, %464, %465 : vector<8x64xi1>, vector<8x64xf32>
    %467 = arith.addf %457, %466 : vector<8x64xf32>
    %468 = arith.mulf %448, %467 : vector<8x64xf32>
    %469 = arith.addf %418, %468 : vector<8x64xf32>
    %470 = vector.extract_strided_slice %133 {offsets = [48, 0], sizes = [8, 4], strides = [1, 1]} : vector<64x4xf32> to vector<8x4xf32>
    %471 = vector.extract_strided_slice %151 {offsets = [0, 24], sizes = [8, 1], strides = [1, 1]} : vector<8x32xf32> to vector<8x1xf32>
    %472 = arith.addf %158, %471 : vector<8x1xf32>
    %473 = vector.extract_strided_slice %151 {offsets = [0, 25], sizes = [8, 1], strides = [1, 1]} : vector<8x32xf32> to vector<8x1xf32>
    %474 = arith.addf %163, %473 : vector<8x1xf32>
    %475 = math.floor %472 : vector<8x1xf32>
    %476 = arith.subf %472, %475 : vector<8x1xf32>
    %477 = math.floor %474 : vector<8x1xf32>
    %478 = arith.subf %474, %477 : vector<8x1xf32>
    %479 = vector.extract_strided_slice %470 {offsets = [0, 0], sizes = [8, 1], strides = [1, 1]} : vector<8x4xf32> to vector<8x1xf32>
    %480 = vector.broadcast %142 : vector<1x64xf32> to vector<8x64xf32>
    %481 = vector.broadcast %475 : vector<8x1xf32> to vector<8x64xf32>
    %482 = arith.cmpf oeq, %480, %481 : vector<8x64xf32>
    %cst_99 = arith.constant 1.000000e+00 : f32
    %483 = vector.broadcast %cst_99 : f32 to vector<8x1xf32>
    %484 = arith.subf %483, %476 : vector<8x1xf32>
    %485 = arith.mulf %484, %479 : vector<8x1xf32>
    %cst_100 = arith.constant 0.000000e+00 : f32
    %486 = vector.shape_cast %485 : vector<8x1xf32> to vector<8x1xf32>
    %487 = vector.broadcast %486 : vector<8x1xf32> to vector<8x64xf32>
    %488 = vector.broadcast %cst_100 : f32 to vector<8x64xf32>
    %489 = arith.select %482, %487, %488 : vector<8x64xi1>, vector<8x64xf32>
    %cst_101 = arith.constant 1.000000e+00 : f32
    %490 = vector.broadcast %cst_101 : f32 to vector<8x1xf32>
    %491 = arith.addf %475, %490 : vector<8x1xf32>
    %492 = vector.broadcast %142 : vector<1x64xf32> to vector<8x64xf32>
    %493 = vector.broadcast %491 : vector<8x1xf32> to vector<8x64xf32>
    %494 = arith.cmpf oeq, %492, %493 : vector<8x64xf32>
    %495 = arith.mulf %476, %479 : vector<8x1xf32>
    %cst_102 = arith.constant 0.000000e+00 : f32
    %496 = vector.shape_cast %495 : vector<8x1xf32> to vector<8x1xf32>
    %497 = vector.broadcast %496 : vector<8x1xf32> to vector<8x64xf32>
    %498 = vector.broadcast %cst_102 : f32 to vector<8x64xf32>
    %499 = arith.select %494, %497, %498 : vector<8x64xi1>, vector<8x64xf32>
    %500 = arith.addf %489, %499 : vector<8x64xf32>
    %501 = vector.broadcast %139 : vector<1x64xf32> to vector<8x64xf32>
    %502 = vector.broadcast %477 : vector<8x1xf32> to vector<8x64xf32>
    %503 = arith.cmpf oeq, %501, %502 : vector<8x64xf32>
    %cst_103 = arith.constant 1.000000e+00 : f32
    %504 = vector.broadcast %cst_103 : f32 to vector<8x1xf32>
    %505 = arith.subf %504, %478 : vector<8x1xf32>
    %cst_104 = arith.constant 0.000000e+00 : f32
    %506 = vector.shape_cast %505 : vector<8x1xf32> to vector<8x1xf32>
    %507 = vector.broadcast %506 : vector<8x1xf32> to vector<8x64xf32>
    %508 = vector.broadcast %cst_104 : f32 to vector<8x64xf32>
    %509 = arith.select %503, %507, %508 : vector<8x64xi1>, vector<8x64xf32>
    %cst_105 = arith.constant 1.000000e+00 : f32
    %510 = vector.broadcast %cst_105 : f32 to vector<8x1xf32>
    %511 = arith.addf %477, %510 : vector<8x1xf32>
    %512 = vector.broadcast %139 : vector<1x64xf32> to vector<8x64xf32>
    %513 = vector.broadcast %511 : vector<8x1xf32> to vector<8x64xf32>
    %514 = arith.cmpf oeq, %512, %513 : vector<8x64xf32>
    %cst_106 = arith.constant 0.000000e+00 : f32
    %515 = vector.shape_cast %478 : vector<8x1xf32> to vector<8x1xf32>
    %516 = vector.broadcast %515 : vector<8x1xf32> to vector<8x64xf32>
    %517 = vector.broadcast %cst_106 : f32 to vector<8x64xf32>
    %518 = arith.select %514, %516, %517 : vector<8x64xi1>, vector<8x64xf32>
    %519 = arith.addf %509, %518 : vector<8x64xf32>
    %520 = arith.mulf %500, %519 : vector<8x64xf32>
    %521 = vector.extract_strided_slice %151 {offsets = [0, 26], sizes = [8, 1], strides = [1, 1]} : vector<8x32xf32> to vector<8x1xf32>
    %522 = arith.addf %158, %521 : vector<8x1xf32>
    %523 = vector.extract_strided_slice %151 {offsets = [0, 27], sizes = [8, 1], strides = [1, 1]} : vector<8x32xf32> to vector<8x1xf32>
    %524 = arith.addf %163, %523 : vector<8x1xf32>
    %525 = math.floor %522 : vector<8x1xf32>
    %526 = arith.subf %522, %525 : vector<8x1xf32>
    %527 = math.floor %524 : vector<8x1xf32>
    %528 = arith.subf %524, %527 : vector<8x1xf32>
    %529 = vector.extract_strided_slice %470 {offsets = [0, 1], sizes = [8, 1], strides = [1, 1]} : vector<8x4xf32> to vector<8x1xf32>
    %530 = vector.broadcast %142 : vector<1x64xf32> to vector<8x64xf32>
    %531 = vector.broadcast %525 : vector<8x1xf32> to vector<8x64xf32>
    %532 = arith.cmpf oeq, %530, %531 : vector<8x64xf32>
    %cst_107 = arith.constant 1.000000e+00 : f32
    %533 = vector.broadcast %cst_107 : f32 to vector<8x1xf32>
    %534 = arith.subf %533, %526 : vector<8x1xf32>
    %535 = arith.mulf %534, %529 : vector<8x1xf32>
    %cst_108 = arith.constant 0.000000e+00 : f32
    %536 = vector.shape_cast %535 : vector<8x1xf32> to vector<8x1xf32>
    %537 = vector.broadcast %536 : vector<8x1xf32> to vector<8x64xf32>
    %538 = vector.broadcast %cst_108 : f32 to vector<8x64xf32>
    %539 = arith.select %532, %537, %538 : vector<8x64xi1>, vector<8x64xf32>
    %cst_109 = arith.constant 1.000000e+00 : f32
    %540 = vector.broadcast %cst_109 : f32 to vector<8x1xf32>
    %541 = arith.addf %525, %540 : vector<8x1xf32>
    %542 = vector.broadcast %142 : vector<1x64xf32> to vector<8x64xf32>
    %543 = vector.broadcast %541 : vector<8x1xf32> to vector<8x64xf32>
    %544 = arith.cmpf oeq, %542, %543 : vector<8x64xf32>
    %545 = arith.mulf %526, %529 : vector<8x1xf32>
    %cst_110 = arith.constant 0.000000e+00 : f32
    %546 = vector.shape_cast %545 : vector<8x1xf32> to vector<8x1xf32>
    %547 = vector.broadcast %546 : vector<8x1xf32> to vector<8x64xf32>
    %548 = vector.broadcast %cst_110 : f32 to vector<8x64xf32>
    %549 = arith.select %544, %547, %548 : vector<8x64xi1>, vector<8x64xf32>
    %550 = arith.addf %539, %549 : vector<8x64xf32>
    %551 = vector.broadcast %139 : vector<1x64xf32> to vector<8x64xf32>
    %552 = vector.broadcast %527 : vector<8x1xf32> to vector<8x64xf32>
    %553 = arith.cmpf oeq, %551, %552 : vector<8x64xf32>
    %cst_111 = arith.constant 1.000000e+00 : f32
    %554 = vector.broadcast %cst_111 : f32 to vector<8x1xf32>
    %555 = arith.subf %554, %528 : vector<8x1xf32>
    %cst_112 = arith.constant 0.000000e+00 : f32
    %556 = vector.shape_cast %555 : vector<8x1xf32> to vector<8x1xf32>
    %557 = vector.broadcast %556 : vector<8x1xf32> to vector<8x64xf32>
    %558 = vector.broadcast %cst_112 : f32 to vector<8x64xf32>
    %559 = arith.select %553, %557, %558 : vector<8x64xi1>, vector<8x64xf32>
    %cst_113 = arith.constant 1.000000e+00 : f32
    %560 = vector.broadcast %cst_113 : f32 to vector<8x1xf32>
    %561 = arith.addf %527, %560 : vector<8x1xf32>
    %562 = vector.broadcast %139 : vector<1x64xf32> to vector<8x64xf32>
    %563 = vector.broadcast %561 : vector<8x1xf32> to vector<8x64xf32>
    %564 = arith.cmpf oeq, %562, %563 : vector<8x64xf32>
    %cst_114 = arith.constant 0.000000e+00 : f32
    %565 = vector.shape_cast %528 : vector<8x1xf32> to vector<8x1xf32>
    %566 = vector.broadcast %565 : vector<8x1xf32> to vector<8x64xf32>
    %567 = vector.broadcast %cst_114 : f32 to vector<8x64xf32>
    %568 = arith.select %564, %566, %567 : vector<8x64xi1>, vector<8x64xf32>
    %569 = arith.addf %559, %568 : vector<8x64xf32>
    %570 = arith.mulf %550, %569 : vector<8x64xf32>
    %571 = arith.addf %520, %570 : vector<8x64xf32>
    %572 = tpu.concatenate %265, %367, %469, %571 in 0 : vector<8x64xf32>, vector<8x64xf32>, vector<8x64xf32>, vector<8x64xf32> -> vector<32x64xf32>
    %cst_115 = arith.constant dense<0.000000e+00> : vector<32x32xf32>
    %573 = tpu.matmul %572, %153, %cst_115 {dimension_numbers = #tpu.dot_dimension_numbers<[1], [0], [0], [1], [0, 0, 1, 1], [], []>} : vector<32x64xf32>, vector<64x32xf32>, vector<32x32xf32> -> vector<32x32xf32>
    %574 = vector.extract_strided_slice %573 {offsets = [0, 0], sizes = [8, 8], strides = [1, 1]} : vector<32x32xf32> to vector<8x8xf32>
    %575 = vector.extract_strided_slice %573 {offsets = [8, 8], sizes = [8, 8], strides = [1, 1]} : vector<32x32xf32> to vector<8x8xf32>
    %576 = vector.extract_strided_slice %573 {offsets = [16, 16], sizes = [8, 8], strides = [1, 1]} : vector<32x32xf32> to vector<8x8xf32>
    %577 = vector.extract_strided_slice %573 {offsets = [24, 24], sizes = [8, 8], strides = [1, 1]} : vector<32x32xf32> to vector<8x8xf32>
    %578 = tpu.concatenate %574, %575, %576, %577 in 1 : vector<8x8xf32>, vector<8x8xf32>, vector<8x8xf32>, vector<8x8xf32> -> vector<8x32xf32>
    %579 = vector.extract_strided_slice %111 {offsets = [64, 0], sizes = [16, 32], strides = [1, 1]} : vector<160x32xf32> to vector<16x32xf32>
    %580 = vector.extract_strided_slice %152 {offsets = [0, 2], sizes = [8, 1], strides = [1, 1]} : vector<8x4xf32> to vector<8x1xf32>
    %cst_116 = arith.constant 4.000000e+00 : f32
    %581 = vector.broadcast %cst_116 : f32 to vector<8x1xf32>
    %582 = arith.mulf %580, %581 : vector<8x1xf32>
    %cst_117 = arith.constant 5.000000e-01 : f32
    %583 = vector.broadcast %cst_117 : f32 to vector<8x1xf32>
    %584 = arith.subf %582, %583 : vector<8x1xf32>
    %585 = vector.extract_strided_slice %152 {offsets = [0, 3], sizes = [8, 1], strides = [1, 1]} : vector<8x4xf32> to vector<8x1xf32>
    %cst_118 = arith.constant 4.000000e+00 : f32
    %586 = vector.broadcast %cst_118 : f32 to vector<8x1xf32>
    %587 = arith.mulf %585, %586 : vector<8x1xf32>
    %cst_119 = arith.constant 5.000000e-01 : f32
    %588 = vector.broadcast %cst_119 : f32 to vector<8x1xf32>
    %589 = arith.subf %587, %588 : vector<8x1xf32>
    %590 = vector.extract_strided_slice %133 {offsets = [0, 0], sizes = [8, 4], strides = [1, 1]} : vector<64x4xf32> to vector<8x4xf32>
    %591 = vector.extract_strided_slice %151 {offsets = [0, 4], sizes = [8, 1], strides = [1, 1]} : vector<8x32xf32> to vector<8x1xf32>
    %592 = arith.addf %584, %591 : vector<8x1xf32>
    %593 = vector.extract_strided_slice %151 {offsets = [0, 5], sizes = [8, 1], strides = [1, 1]} : vector<8x32xf32> to vector<8x1xf32>
    %594 = arith.addf %589, %593 : vector<8x1xf32>
    %595 = math.floor %592 : vector<8x1xf32>
    %596 = arith.subf %592, %595 : vector<8x1xf32>
    %597 = math.floor %594 : vector<8x1xf32>
    %598 = arith.subf %594, %597 : vector<8x1xf32>
    %599 = vector.extract_strided_slice %590 {offsets = [0, 2], sizes = [8, 1], strides = [1, 1]} : vector<8x4xf32> to vector<8x1xf32>
    %600 = vector.broadcast %150 : vector<1x16xf32> to vector<8x16xf32>
    %601 = vector.broadcast %595 : vector<8x1xf32> to vector<8x16xf32>
    %602 = arith.cmpf oeq, %600, %601 : vector<8x16xf32>
    %cst_120 = arith.constant 1.000000e+00 : f32
    %603 = vector.broadcast %cst_120 : f32 to vector<8x1xf32>
    %604 = arith.subf %603, %596 : vector<8x1xf32>
    %605 = arith.mulf %604, %599 : vector<8x1xf32>
    %cst_121 = arith.constant 0.000000e+00 : f32
    %606 = vector.shape_cast %605 : vector<8x1xf32> to vector<8x1xf32>
    %607 = vector.broadcast %606 : vector<8x1xf32> to vector<8x16xf32>
    %608 = vector.broadcast %cst_121 : f32 to vector<8x16xf32>
    %609 = arith.select %602, %607, %608 : vector<8x16xi1>, vector<8x16xf32>
    %cst_122 = arith.constant 1.000000e+00 : f32
    %610 = vector.broadcast %cst_122 : f32 to vector<8x1xf32>
    %611 = arith.addf %595, %610 : vector<8x1xf32>
    %612 = vector.broadcast %150 : vector<1x16xf32> to vector<8x16xf32>
    %613 = vector.broadcast %611 : vector<8x1xf32> to vector<8x16xf32>
    %614 = arith.cmpf oeq, %612, %613 : vector<8x16xf32>
    %615 = arith.mulf %596, %599 : vector<8x1xf32>
    %cst_123 = arith.constant 0.000000e+00 : f32
    %616 = vector.shape_cast %615 : vector<8x1xf32> to vector<8x1xf32>
    %617 = vector.broadcast %616 : vector<8x1xf32> to vector<8x16xf32>
    %618 = vector.broadcast %cst_123 : f32 to vector<8x16xf32>
    %619 = arith.select %614, %617, %618 : vector<8x16xi1>, vector<8x16xf32>
    %620 = arith.addf %609, %619 : vector<8x16xf32>
    %621 = vector.broadcast %147 : vector<1x16xf32> to vector<8x16xf32>
    %622 = vector.broadcast %597 : vector<8x1xf32> to vector<8x16xf32>
    %623 = arith.cmpf oeq, %621, %622 : vector<8x16xf32>
    %cst_124 = arith.constant 1.000000e+00 : f32
    %624 = vector.broadcast %cst_124 : f32 to vector<8x1xf32>
    %625 = arith.subf %624, %598 : vector<8x1xf32>
    %cst_125 = arith.constant 0.000000e+00 : f32
    %626 = vector.shape_cast %625 : vector<8x1xf32> to vector<8x1xf32>
    %627 = vector.broadcast %626 : vector<8x1xf32> to vector<8x16xf32>
    %628 = vector.broadcast %cst_125 : f32 to vector<8x16xf32>
    %629 = arith.select %623, %627, %628 : vector<8x16xi1>, vector<8x16xf32>
    %cst_126 = arith.constant 1.000000e+00 : f32
    %630 = vector.broadcast %cst_126 : f32 to vector<8x1xf32>
    %631 = arith.addf %597, %630 : vector<8x1xf32>
    %632 = vector.broadcast %147 : vector<1x16xf32> to vector<8x16xf32>
    %633 = vector.broadcast %631 : vector<8x1xf32> to vector<8x16xf32>
    %634 = arith.cmpf oeq, %632, %633 : vector<8x16xf32>
    %cst_127 = arith.constant 0.000000e+00 : f32
    %635 = vector.shape_cast %598 : vector<8x1xf32> to vector<8x1xf32>
    %636 = vector.broadcast %635 : vector<8x1xf32> to vector<8x16xf32>
    %637 = vector.broadcast %cst_127 : f32 to vector<8x16xf32>
    %638 = arith.select %634, %636, %637 : vector<8x16xi1>, vector<8x16xf32>
    %639 = arith.addf %629, %638 : vector<8x16xf32>
    %640 = arith.mulf %620, %639 : vector<8x16xf32>
    %641 = vector.extract_strided_slice %151 {offsets = [0, 6], sizes = [8, 1], strides = [1, 1]} : vector<8x32xf32> to vector<8x1xf32>
    %642 = arith.addf %584, %641 : vector<8x1xf32>
    %643 = vector.extract_strided_slice %151 {offsets = [0, 7], sizes = [8, 1], strides = [1, 1]} : vector<8x32xf32> to vector<8x1xf32>
    %644 = arith.addf %589, %643 : vector<8x1xf32>
    %645 = math.floor %642 : vector<8x1xf32>
    %646 = arith.subf %642, %645 : vector<8x1xf32>
    %647 = math.floor %644 : vector<8x1xf32>
    %648 = arith.subf %644, %647 : vector<8x1xf32>
    %649 = vector.extract_strided_slice %590 {offsets = [0, 3], sizes = [8, 1], strides = [1, 1]} : vector<8x4xf32> to vector<8x1xf32>
    %650 = vector.broadcast %150 : vector<1x16xf32> to vector<8x16xf32>
    %651 = vector.broadcast %645 : vector<8x1xf32> to vector<8x16xf32>
    %652 = arith.cmpf oeq, %650, %651 : vector<8x16xf32>
    %cst_128 = arith.constant 1.000000e+00 : f32
    %653 = vector.broadcast %cst_128 : f32 to vector<8x1xf32>
    %654 = arith.subf %653, %646 : vector<8x1xf32>
    %655 = arith.mulf %654, %649 : vector<8x1xf32>
    %cst_129 = arith.constant 0.000000e+00 : f32
    %656 = vector.shape_cast %655 : vector<8x1xf32> to vector<8x1xf32>
    %657 = vector.broadcast %656 : vector<8x1xf32> to vector<8x16xf32>
    %658 = vector.broadcast %cst_129 : f32 to vector<8x16xf32>
    %659 = arith.select %652, %657, %658 : vector<8x16xi1>, vector<8x16xf32>
    %cst_130 = arith.constant 1.000000e+00 : f32
    %660 = vector.broadcast %cst_130 : f32 to vector<8x1xf32>
    %661 = arith.addf %645, %660 : vector<8x1xf32>
    %662 = vector.broadcast %150 : vector<1x16xf32> to vector<8x16xf32>
    %663 = vector.broadcast %661 : vector<8x1xf32> to vector<8x16xf32>
    %664 = arith.cmpf oeq, %662, %663 : vector<8x16xf32>
    %665 = arith.mulf %646, %649 : vector<8x1xf32>
    %cst_131 = arith.constant 0.000000e+00 : f32
    %666 = vector.shape_cast %665 : vector<8x1xf32> to vector<8x1xf32>
    %667 = vector.broadcast %666 : vector<8x1xf32> to vector<8x16xf32>
    %668 = vector.broadcast %cst_131 : f32 to vector<8x16xf32>
    %669 = arith.select %664, %667, %668 : vector<8x16xi1>, vector<8x16xf32>
    %670 = arith.addf %659, %669 : vector<8x16xf32>
    %671 = vector.broadcast %147 : vector<1x16xf32> to vector<8x16xf32>
    %672 = vector.broadcast %647 : vector<8x1xf32> to vector<8x16xf32>
    %673 = arith.cmpf oeq, %671, %672 : vector<8x16xf32>
    %cst_132 = arith.constant 1.000000e+00 : f32
    %674 = vector.broadcast %cst_132 : f32 to vector<8x1xf32>
    %675 = arith.subf %674, %648 : vector<8x1xf32>
    %cst_133 = arith.constant 0.000000e+00 : f32
    %676 = vector.shape_cast %675 : vector<8x1xf32> to vector<8x1xf32>
    %677 = vector.broadcast %676 : vector<8x1xf32> to vector<8x16xf32>
    %678 = vector.broadcast %cst_133 : f32 to vector<8x16xf32>
    %679 = arith.select %673, %677, %678 : vector<8x16xi1>, vector<8x16xf32>
    %cst_134 = arith.constant 1.000000e+00 : f32
    %680 = vector.broadcast %cst_134 : f32 to vector<8x1xf32>
    %681 = arith.addf %647, %680 : vector<8x1xf32>
    %682 = vector.broadcast %147 : vector<1x16xf32> to vector<8x16xf32>
    %683 = vector.broadcast %681 : vector<8x1xf32> to vector<8x16xf32>
    %684 = arith.cmpf oeq, %682, %683 : vector<8x16xf32>
    %cst_135 = arith.constant 0.000000e+00 : f32
    %685 = vector.shape_cast %648 : vector<8x1xf32> to vector<8x1xf32>
    %686 = vector.broadcast %685 : vector<8x1xf32> to vector<8x16xf32>
    %687 = vector.broadcast %cst_135 : f32 to vector<8x16xf32>
    %688 = arith.select %684, %686, %687 : vector<8x16xi1>, vector<8x16xf32>
    %689 = arith.addf %679, %688 : vector<8x16xf32>
    %690 = arith.mulf %670, %689 : vector<8x16xf32>
    %691 = arith.addf %640, %690 : vector<8x16xf32>
    %692 = vector.extract_strided_slice %133 {offsets = [16, 0], sizes = [8, 4], strides = [1, 1]} : vector<64x4xf32> to vector<8x4xf32>
    %693 = vector.extract_strided_slice %151 {offsets = [0, 12], sizes = [8, 1], strides = [1, 1]} : vector<8x32xf32> to vector<8x1xf32>
    %694 = arith.addf %584, %693 : vector<8x1xf32>
    %695 = vector.extract_strided_slice %151 {offsets = [0, 13], sizes = [8, 1], strides = [1, 1]} : vector<8x32xf32> to vector<8x1xf32>
    %696 = arith.addf %589, %695 : vector<8x1xf32>
    %697 = math.floor %694 : vector<8x1xf32>
    %698 = arith.subf %694, %697 : vector<8x1xf32>
    %699 = math.floor %696 : vector<8x1xf32>
    %700 = arith.subf %696, %699 : vector<8x1xf32>
    %701 = vector.extract_strided_slice %692 {offsets = [0, 2], sizes = [8, 1], strides = [1, 1]} : vector<8x4xf32> to vector<8x1xf32>
    %702 = vector.broadcast %150 : vector<1x16xf32> to vector<8x16xf32>
    %703 = vector.broadcast %697 : vector<8x1xf32> to vector<8x16xf32>
    %704 = arith.cmpf oeq, %702, %703 : vector<8x16xf32>
    %cst_136 = arith.constant 1.000000e+00 : f32
    %705 = vector.broadcast %cst_136 : f32 to vector<8x1xf32>
    %706 = arith.subf %705, %698 : vector<8x1xf32>
    %707 = arith.mulf %706, %701 : vector<8x1xf32>
    %cst_137 = arith.constant 0.000000e+00 : f32
    %708 = vector.shape_cast %707 : vector<8x1xf32> to vector<8x1xf32>
    %709 = vector.broadcast %708 : vector<8x1xf32> to vector<8x16xf32>
    %710 = vector.broadcast %cst_137 : f32 to vector<8x16xf32>
    %711 = arith.select %704, %709, %710 : vector<8x16xi1>, vector<8x16xf32>
    %cst_138 = arith.constant 1.000000e+00 : f32
    %712 = vector.broadcast %cst_138 : f32 to vector<8x1xf32>
    %713 = arith.addf %697, %712 : vector<8x1xf32>
    %714 = vector.broadcast %150 : vector<1x16xf32> to vector<8x16xf32>
    %715 = vector.broadcast %713 : vector<8x1xf32> to vector<8x16xf32>
    %716 = arith.cmpf oeq, %714, %715 : vector<8x16xf32>
    %717 = arith.mulf %698, %701 : vector<8x1xf32>
    %cst_139 = arith.constant 0.000000e+00 : f32
    %718 = vector.shape_cast %717 : vector<8x1xf32> to vector<8x1xf32>
    %719 = vector.broadcast %718 : vector<8x1xf32> to vector<8x16xf32>
    %720 = vector.broadcast %cst_139 : f32 to vector<8x16xf32>
    %721 = arith.select %716, %719, %720 : vector<8x16xi1>, vector<8x16xf32>
    %722 = arith.addf %711, %721 : vector<8x16xf32>
    %723 = vector.broadcast %147 : vector<1x16xf32> to vector<8x16xf32>
    %724 = vector.broadcast %699 : vector<8x1xf32> to vector<8x16xf32>
    %725 = arith.cmpf oeq, %723, %724 : vector<8x16xf32>
    %cst_140 = arith.constant 1.000000e+00 : f32
    %726 = vector.broadcast %cst_140 : f32 to vector<8x1xf32>
    %727 = arith.subf %726, %700 : vector<8x1xf32>
    %cst_141 = arith.constant 0.000000e+00 : f32
    %728 = vector.shape_cast %727 : vector<8x1xf32> to vector<8x1xf32>
    %729 = vector.broadcast %728 : vector<8x1xf32> to vector<8x16xf32>
    %730 = vector.broadcast %cst_141 : f32 to vector<8x16xf32>
    %731 = arith.select %725, %729, %730 : vector<8x16xi1>, vector<8x16xf32>
    %cst_142 = arith.constant 1.000000e+00 : f32
    %732 = vector.broadcast %cst_142 : f32 to vector<8x1xf32>
    %733 = arith.addf %699, %732 : vector<8x1xf32>
    %734 = vector.broadcast %147 : vector<1x16xf32> to vector<8x16xf32>
    %735 = vector.broadcast %733 : vector<8x1xf32> to vector<8x16xf32>
    %736 = arith.cmpf oeq, %734, %735 : vector<8x16xf32>
    %cst_143 = arith.constant 0.000000e+00 : f32
    %737 = vector.shape_cast %700 : vector<8x1xf32> to vector<8x1xf32>
    %738 = vector.broadcast %737 : vector<8x1xf32> to vector<8x16xf32>
    %739 = vector.broadcast %cst_143 : f32 to vector<8x16xf32>
    %740 = arith.select %736, %738, %739 : vector<8x16xi1>, vector<8x16xf32>
    %741 = arith.addf %731, %740 : vector<8x16xf32>
    %742 = arith.mulf %722, %741 : vector<8x16xf32>
    %743 = vector.extract_strided_slice %151 {offsets = [0, 14], sizes = [8, 1], strides = [1, 1]} : vector<8x32xf32> to vector<8x1xf32>
    %744 = arith.addf %584, %743 : vector<8x1xf32>
    %745 = vector.extract_strided_slice %151 {offsets = [0, 15], sizes = [8, 1], strides = [1, 1]} : vector<8x32xf32> to vector<8x1xf32>
    %746 = arith.addf %589, %745 : vector<8x1xf32>
    %747 = math.floor %744 : vector<8x1xf32>
    %748 = arith.subf %744, %747 : vector<8x1xf32>
    %749 = math.floor %746 : vector<8x1xf32>
    %750 = arith.subf %746, %749 : vector<8x1xf32>
    %751 = vector.extract_strided_slice %692 {offsets = [0, 3], sizes = [8, 1], strides = [1, 1]} : vector<8x4xf32> to vector<8x1xf32>
    %752 = vector.broadcast %150 : vector<1x16xf32> to vector<8x16xf32>
    %753 = vector.broadcast %747 : vector<8x1xf32> to vector<8x16xf32>
    %754 = arith.cmpf oeq, %752, %753 : vector<8x16xf32>
    %cst_144 = arith.constant 1.000000e+00 : f32
    %755 = vector.broadcast %cst_144 : f32 to vector<8x1xf32>
    %756 = arith.subf %755, %748 : vector<8x1xf32>
    %757 = arith.mulf %756, %751 : vector<8x1xf32>
    %cst_145 = arith.constant 0.000000e+00 : f32
    %758 = vector.shape_cast %757 : vector<8x1xf32> to vector<8x1xf32>
    %759 = vector.broadcast %758 : vector<8x1xf32> to vector<8x16xf32>
    %760 = vector.broadcast %cst_145 : f32 to vector<8x16xf32>
    %761 = arith.select %754, %759, %760 : vector<8x16xi1>, vector<8x16xf32>
    %cst_146 = arith.constant 1.000000e+00 : f32
    %762 = vector.broadcast %cst_146 : f32 to vector<8x1xf32>
    %763 = arith.addf %747, %762 : vector<8x1xf32>
    %764 = vector.broadcast %150 : vector<1x16xf32> to vector<8x16xf32>
    %765 = vector.broadcast %763 : vector<8x1xf32> to vector<8x16xf32>
    %766 = arith.cmpf oeq, %764, %765 : vector<8x16xf32>
    %767 = arith.mulf %748, %751 : vector<8x1xf32>
    %cst_147 = arith.constant 0.000000e+00 : f32
    %768 = vector.shape_cast %767 : vector<8x1xf32> to vector<8x1xf32>
    %769 = vector.broadcast %768 : vector<8x1xf32> to vector<8x16xf32>
    %770 = vector.broadcast %cst_147 : f32 to vector<8x16xf32>
    %771 = arith.select %766, %769, %770 : vector<8x16xi1>, vector<8x16xf32>
    %772 = arith.addf %761, %771 : vector<8x16xf32>
    %773 = vector.broadcast %147 : vector<1x16xf32> to vector<8x16xf32>
    %774 = vector.broadcast %749 : vector<8x1xf32> to vector<8x16xf32>
    %775 = arith.cmpf oeq, %773, %774 : vector<8x16xf32>
    %cst_148 = arith.constant 1.000000e+00 : f32
    %776 = vector.broadcast %cst_148 : f32 to vector<8x1xf32>
    %777 = arith.subf %776, %750 : vector<8x1xf32>
    %cst_149 = arith.constant 0.000000e+00 : f32
    %778 = vector.shape_cast %777 : vector<8x1xf32> to vector<8x1xf32>
    %779 = vector.broadcast %778 : vector<8x1xf32> to vector<8x16xf32>
    %780 = vector.broadcast %cst_149 : f32 to vector<8x16xf32>
    %781 = arith.select %775, %779, %780 : vector<8x16xi1>, vector<8x16xf32>
    %cst_150 = arith.constant 1.000000e+00 : f32
    %782 = vector.broadcast %cst_150 : f32 to vector<8x1xf32>
    %783 = arith.addf %749, %782 : vector<8x1xf32>
    %784 = vector.broadcast %147 : vector<1x16xf32> to vector<8x16xf32>
    %785 = vector.broadcast %783 : vector<8x1xf32> to vector<8x16xf32>
    %786 = arith.cmpf oeq, %784, %785 : vector<8x16xf32>
    %cst_151 = arith.constant 0.000000e+00 : f32
    %787 = vector.shape_cast %750 : vector<8x1xf32> to vector<8x1xf32>
    %788 = vector.broadcast %787 : vector<8x1xf32> to vector<8x16xf32>
    %789 = vector.broadcast %cst_151 : f32 to vector<8x16xf32>
    %790 = arith.select %786, %788, %789 : vector<8x16xi1>, vector<8x16xf32>
    %791 = arith.addf %781, %790 : vector<8x16xf32>
    %792 = arith.mulf %772, %791 : vector<8x16xf32>
    %793 = arith.addf %742, %792 : vector<8x16xf32>
    %794 = vector.extract_strided_slice %133 {offsets = [32, 0], sizes = [8, 4], strides = [1, 1]} : vector<64x4xf32> to vector<8x4xf32>
    %795 = vector.extract_strided_slice %151 {offsets = [0, 20], sizes = [8, 1], strides = [1, 1]} : vector<8x32xf32> to vector<8x1xf32>
    %796 = arith.addf %584, %795 : vector<8x1xf32>
    %797 = vector.extract_strided_slice %151 {offsets = [0, 21], sizes = [8, 1], strides = [1, 1]} : vector<8x32xf32> to vector<8x1xf32>
    %798 = arith.addf %589, %797 : vector<8x1xf32>
    %799 = math.floor %796 : vector<8x1xf32>
    %800 = arith.subf %796, %799 : vector<8x1xf32>
    %801 = math.floor %798 : vector<8x1xf32>
    %802 = arith.subf %798, %801 : vector<8x1xf32>
    %803 = vector.extract_strided_slice %794 {offsets = [0, 2], sizes = [8, 1], strides = [1, 1]} : vector<8x4xf32> to vector<8x1xf32>
    %804 = vector.broadcast %150 : vector<1x16xf32> to vector<8x16xf32>
    %805 = vector.broadcast %799 : vector<8x1xf32> to vector<8x16xf32>
    %806 = arith.cmpf oeq, %804, %805 : vector<8x16xf32>
    %cst_152 = arith.constant 1.000000e+00 : f32
    %807 = vector.broadcast %cst_152 : f32 to vector<8x1xf32>
    %808 = arith.subf %807, %800 : vector<8x1xf32>
    %809 = arith.mulf %808, %803 : vector<8x1xf32>
    %cst_153 = arith.constant 0.000000e+00 : f32
    %810 = vector.shape_cast %809 : vector<8x1xf32> to vector<8x1xf32>
    %811 = vector.broadcast %810 : vector<8x1xf32> to vector<8x16xf32>
    %812 = vector.broadcast %cst_153 : f32 to vector<8x16xf32>
    %813 = arith.select %806, %811, %812 : vector<8x16xi1>, vector<8x16xf32>
    %cst_154 = arith.constant 1.000000e+00 : f32
    %814 = vector.broadcast %cst_154 : f32 to vector<8x1xf32>
    %815 = arith.addf %799, %814 : vector<8x1xf32>
    %816 = vector.broadcast %150 : vector<1x16xf32> to vector<8x16xf32>
    %817 = vector.broadcast %815 : vector<8x1xf32> to vector<8x16xf32>
    %818 = arith.cmpf oeq, %816, %817 : vector<8x16xf32>
    %819 = arith.mulf %800, %803 : vector<8x1xf32>
    %cst_155 = arith.constant 0.000000e+00 : f32
    %820 = vector.shape_cast %819 : vector<8x1xf32> to vector<8x1xf32>
    %821 = vector.broadcast %820 : vector<8x1xf32> to vector<8x16xf32>
    %822 = vector.broadcast %cst_155 : f32 to vector<8x16xf32>
    %823 = arith.select %818, %821, %822 : vector<8x16xi1>, vector<8x16xf32>
    %824 = arith.addf %813, %823 : vector<8x16xf32>
    %825 = vector.broadcast %147 : vector<1x16xf32> to vector<8x16xf32>
    %826 = vector.broadcast %801 : vector<8x1xf32> to vector<8x16xf32>
    %827 = arith.cmpf oeq, %825, %826 : vector<8x16xf32>
    %cst_156 = arith.constant 1.000000e+00 : f32
    %828 = vector.broadcast %cst_156 : f32 to vector<8x1xf32>
    %829 = arith.subf %828, %802 : vector<8x1xf32>
    %cst_157 = arith.constant 0.000000e+00 : f32
    %830 = vector.shape_cast %829 : vector<8x1xf32> to vector<8x1xf32>
    %831 = vector.broadcast %830 : vector<8x1xf32> to vector<8x16xf32>
    %832 = vector.broadcast %cst_157 : f32 to vector<8x16xf32>
    %833 = arith.select %827, %831, %832 : vector<8x16xi1>, vector<8x16xf32>
    %cst_158 = arith.constant 1.000000e+00 : f32
    %834 = vector.broadcast %cst_158 : f32 to vector<8x1xf32>
    %835 = arith.addf %801, %834 : vector<8x1xf32>
    %836 = vector.broadcast %147 : vector<1x16xf32> to vector<8x16xf32>
    %837 = vector.broadcast %835 : vector<8x1xf32> to vector<8x16xf32>
    %838 = arith.cmpf oeq, %836, %837 : vector<8x16xf32>
    %cst_159 = arith.constant 0.000000e+00 : f32
    %839 = vector.shape_cast %802 : vector<8x1xf32> to vector<8x1xf32>
    %840 = vector.broadcast %839 : vector<8x1xf32> to vector<8x16xf32>
    %841 = vector.broadcast %cst_159 : f32 to vector<8x16xf32>
    %842 = arith.select %838, %840, %841 : vector<8x16xi1>, vector<8x16xf32>
    %843 = arith.addf %833, %842 : vector<8x16xf32>
    %844 = arith.mulf %824, %843 : vector<8x16xf32>
    %845 = vector.extract_strided_slice %151 {offsets = [0, 22], sizes = [8, 1], strides = [1, 1]} : vector<8x32xf32> to vector<8x1xf32>
    %846 = arith.addf %584, %845 : vector<8x1xf32>
    %847 = vector.extract_strided_slice %151 {offsets = [0, 23], sizes = [8, 1], strides = [1, 1]} : vector<8x32xf32> to vector<8x1xf32>
    %848 = arith.addf %589, %847 : vector<8x1xf32>
    %849 = math.floor %846 : vector<8x1xf32>
    %850 = arith.subf %846, %849 : vector<8x1xf32>
    %851 = math.floor %848 : vector<8x1xf32>
    %852 = arith.subf %848, %851 : vector<8x1xf32>
    %853 = vector.extract_strided_slice %794 {offsets = [0, 3], sizes = [8, 1], strides = [1, 1]} : vector<8x4xf32> to vector<8x1xf32>
    %854 = vector.broadcast %150 : vector<1x16xf32> to vector<8x16xf32>
    %855 = vector.broadcast %849 : vector<8x1xf32> to vector<8x16xf32>
    %856 = arith.cmpf oeq, %854, %855 : vector<8x16xf32>
    %cst_160 = arith.constant 1.000000e+00 : f32
    %857 = vector.broadcast %cst_160 : f32 to vector<8x1xf32>
    %858 = arith.subf %857, %850 : vector<8x1xf32>
    %859 = arith.mulf %858, %853 : vector<8x1xf32>
    %cst_161 = arith.constant 0.000000e+00 : f32
    %860 = vector.shape_cast %859 : vector<8x1xf32> to vector<8x1xf32>
    %861 = vector.broadcast %860 : vector<8x1xf32> to vector<8x16xf32>
    %862 = vector.broadcast %cst_161 : f32 to vector<8x16xf32>
    %863 = arith.select %856, %861, %862 : vector<8x16xi1>, vector<8x16xf32>
    %cst_162 = arith.constant 1.000000e+00 : f32
    %864 = vector.broadcast %cst_162 : f32 to vector<8x1xf32>
    %865 = arith.addf %849, %864 : vector<8x1xf32>
    %866 = vector.broadcast %150 : vector<1x16xf32> to vector<8x16xf32>
    %867 = vector.broadcast %865 : vector<8x1xf32> to vector<8x16xf32>
    %868 = arith.cmpf oeq, %866, %867 : vector<8x16xf32>
    %869 = arith.mulf %850, %853 : vector<8x1xf32>
    %cst_163 = arith.constant 0.000000e+00 : f32
    %870 = vector.shape_cast %869 : vector<8x1xf32> to vector<8x1xf32>
    %871 = vector.broadcast %870 : vector<8x1xf32> to vector<8x16xf32>
    %872 = vector.broadcast %cst_163 : f32 to vector<8x16xf32>
    %873 = arith.select %868, %871, %872 : vector<8x16xi1>, vector<8x16xf32>
    %874 = arith.addf %863, %873 : vector<8x16xf32>
    %875 = vector.broadcast %147 : vector<1x16xf32> to vector<8x16xf32>
    %876 = vector.broadcast %851 : vector<8x1xf32> to vector<8x16xf32>
    %877 = arith.cmpf oeq, %875, %876 : vector<8x16xf32>
    %cst_164 = arith.constant 1.000000e+00 : f32
    %878 = vector.broadcast %cst_164 : f32 to vector<8x1xf32>
    %879 = arith.subf %878, %852 : vector<8x1xf32>
    %cst_165 = arith.constant 0.000000e+00 : f32
    %880 = vector.shape_cast %879 : vector<8x1xf32> to vector<8x1xf32>
    %881 = vector.broadcast %880 : vector<8x1xf32> to vector<8x16xf32>
    %882 = vector.broadcast %cst_165 : f32 to vector<8x16xf32>
    %883 = arith.select %877, %881, %882 : vector<8x16xi1>, vector<8x16xf32>
    %cst_166 = arith.constant 1.000000e+00 : f32
    %884 = vector.broadcast %cst_166 : f32 to vector<8x1xf32>
    %885 = arith.addf %851, %884 : vector<8x1xf32>
    %886 = vector.broadcast %147 : vector<1x16xf32> to vector<8x16xf32>
    %887 = vector.broadcast %885 : vector<8x1xf32> to vector<8x16xf32>
    %888 = arith.cmpf oeq, %886, %887 : vector<8x16xf32>
    %cst_167 = arith.constant 0.000000e+00 : f32
    %889 = vector.shape_cast %852 : vector<8x1xf32> to vector<8x1xf32>
    %890 = vector.broadcast %889 : vector<8x1xf32> to vector<8x16xf32>
    %891 = vector.broadcast %cst_167 : f32 to vector<8x16xf32>
    %892 = arith.select %888, %890, %891 : vector<8x16xi1>, vector<8x16xf32>
    %893 = arith.addf %883, %892 : vector<8x16xf32>
    %894 = arith.mulf %874, %893 : vector<8x16xf32>
    %895 = arith.addf %844, %894 : vector<8x16xf32>
    %896 = vector.extract_strided_slice %133 {offsets = [48, 0], sizes = [8, 4], strides = [1, 1]} : vector<64x4xf32> to vector<8x4xf32>
    %897 = vector.extract_strided_slice %151 {offsets = [0, 28], sizes = [8, 1], strides = [1, 1]} : vector<8x32xf32> to vector<8x1xf32>
    %898 = arith.addf %584, %897 : vector<8x1xf32>
    %899 = vector.extract_strided_slice %151 {offsets = [0, 29], sizes = [8, 1], strides = [1, 1]} : vector<8x32xf32> to vector<8x1xf32>
    %900 = arith.addf %589, %899 : vector<8x1xf32>
    %901 = math.floor %898 : vector<8x1xf32>
    %902 = arith.subf %898, %901 : vector<8x1xf32>
    %903 = math.floor %900 : vector<8x1xf32>
    %904 = arith.subf %900, %903 : vector<8x1xf32>
    %905 = vector.extract_strided_slice %896 {offsets = [0, 2], sizes = [8, 1], strides = [1, 1]} : vector<8x4xf32> to vector<8x1xf32>
    %906 = vector.broadcast %150 : vector<1x16xf32> to vector<8x16xf32>
    %907 = vector.broadcast %901 : vector<8x1xf32> to vector<8x16xf32>
    %908 = arith.cmpf oeq, %906, %907 : vector<8x16xf32>
    %cst_168 = arith.constant 1.000000e+00 : f32
    %909 = vector.broadcast %cst_168 : f32 to vector<8x1xf32>
    %910 = arith.subf %909, %902 : vector<8x1xf32>
    %911 = arith.mulf %910, %905 : vector<8x1xf32>
    %cst_169 = arith.constant 0.000000e+00 : f32
    %912 = vector.shape_cast %911 : vector<8x1xf32> to vector<8x1xf32>
    %913 = vector.broadcast %912 : vector<8x1xf32> to vector<8x16xf32>
    %914 = vector.broadcast %cst_169 : f32 to vector<8x16xf32>
    %915 = arith.select %908, %913, %914 : vector<8x16xi1>, vector<8x16xf32>
    %cst_170 = arith.constant 1.000000e+00 : f32
    %916 = vector.broadcast %cst_170 : f32 to vector<8x1xf32>
    %917 = arith.addf %901, %916 : vector<8x1xf32>
    %918 = vector.broadcast %150 : vector<1x16xf32> to vector<8x16xf32>
    %919 = vector.broadcast %917 : vector<8x1xf32> to vector<8x16xf32>
    %920 = arith.cmpf oeq, %918, %919 : vector<8x16xf32>
    %921 = arith.mulf %902, %905 : vector<8x1xf32>
    %cst_171 = arith.constant 0.000000e+00 : f32
    %922 = vector.shape_cast %921 : vector<8x1xf32> to vector<8x1xf32>
    %923 = vector.broadcast %922 : vector<8x1xf32> to vector<8x16xf32>
    %924 = vector.broadcast %cst_171 : f32 to vector<8x16xf32>
    %925 = arith.select %920, %923, %924 : vector<8x16xi1>, vector<8x16xf32>
    %926 = arith.addf %915, %925 : vector<8x16xf32>
    %927 = vector.broadcast %147 : vector<1x16xf32> to vector<8x16xf32>
    %928 = vector.broadcast %903 : vector<8x1xf32> to vector<8x16xf32>
    %929 = arith.cmpf oeq, %927, %928 : vector<8x16xf32>
    %cst_172 = arith.constant 1.000000e+00 : f32
    %930 = vector.broadcast %cst_172 : f32 to vector<8x1xf32>
    %931 = arith.subf %930, %904 : vector<8x1xf32>
    %cst_173 = arith.constant 0.000000e+00 : f32
    %932 = vector.shape_cast %931 : vector<8x1xf32> to vector<8x1xf32>
    %933 = vector.broadcast %932 : vector<8x1xf32> to vector<8x16xf32>
    %934 = vector.broadcast %cst_173 : f32 to vector<8x16xf32>
    %935 = arith.select %929, %933, %934 : vector<8x16xi1>, vector<8x16xf32>
    %cst_174 = arith.constant 1.000000e+00 : f32
    %936 = vector.broadcast %cst_174 : f32 to vector<8x1xf32>
    %937 = arith.addf %903, %936 : vector<8x1xf32>
    %938 = vector.broadcast %147 : vector<1x16xf32> to vector<8x16xf32>
    %939 = vector.broadcast %937 : vector<8x1xf32> to vector<8x16xf32>
    %940 = arith.cmpf oeq, %938, %939 : vector<8x16xf32>
    %cst_175 = arith.constant 0.000000e+00 : f32
    %941 = vector.shape_cast %904 : vector<8x1xf32> to vector<8x1xf32>
    %942 = vector.broadcast %941 : vector<8x1xf32> to vector<8x16xf32>
    %943 = vector.broadcast %cst_175 : f32 to vector<8x16xf32>
    %944 = arith.select %940, %942, %943 : vector<8x16xi1>, vector<8x16xf32>
    %945 = arith.addf %935, %944 : vector<8x16xf32>
    %946 = arith.mulf %926, %945 : vector<8x16xf32>
    %947 = vector.extract_strided_slice %151 {offsets = [0, 30], sizes = [8, 1], strides = [1, 1]} : vector<8x32xf32> to vector<8x1xf32>
    %948 = arith.addf %584, %947 : vector<8x1xf32>
    %949 = vector.extract_strided_slice %151 {offsets = [0, 31], sizes = [8, 1], strides = [1, 1]} : vector<8x32xf32> to vector<8x1xf32>
    %950 = arith.addf %589, %949 : vector<8x1xf32>
    %951 = math.floor %948 : vector<8x1xf32>
    %952 = arith.subf %948, %951 : vector<8x1xf32>
    %953 = math.floor %950 : vector<8x1xf32>
    %954 = arith.subf %950, %953 : vector<8x1xf32>
    %955 = vector.extract_strided_slice %896 {offsets = [0, 3], sizes = [8, 1], strides = [1, 1]} : vector<8x4xf32> to vector<8x1xf32>
    %956 = vector.broadcast %150 : vector<1x16xf32> to vector<8x16xf32>
    %957 = vector.broadcast %951 : vector<8x1xf32> to vector<8x16xf32>
    %958 = arith.cmpf oeq, %956, %957 : vector<8x16xf32>
    %cst_176 = arith.constant 1.000000e+00 : f32
    %959 = vector.broadcast %cst_176 : f32 to vector<8x1xf32>
    %960 = arith.subf %959, %952 : vector<8x1xf32>
    %961 = arith.mulf %960, %955 : vector<8x1xf32>
    %cst_177 = arith.constant 0.000000e+00 : f32
    %962 = vector.shape_cast %961 : vector<8x1xf32> to vector<8x1xf32>
    %963 = vector.broadcast %962 : vector<8x1xf32> to vector<8x16xf32>
    %964 = vector.broadcast %cst_177 : f32 to vector<8x16xf32>
    %965 = arith.select %958, %963, %964 : vector<8x16xi1>, vector<8x16xf32>
    %cst_178 = arith.constant 1.000000e+00 : f32
    %966 = vector.broadcast %cst_178 : f32 to vector<8x1xf32>
    %967 = arith.addf %951, %966 : vector<8x1xf32>
    %968 = vector.broadcast %150 : vector<1x16xf32> to vector<8x16xf32>
    %969 = vector.broadcast %967 : vector<8x1xf32> to vector<8x16xf32>
    %970 = arith.cmpf oeq, %968, %969 : vector<8x16xf32>
    %971 = arith.mulf %952, %955 : vector<8x1xf32>
    %cst_179 = arith.constant 0.000000e+00 : f32
    %972 = vector.shape_cast %971 : vector<8x1xf32> to vector<8x1xf32>
    %973 = vector.broadcast %972 : vector<8x1xf32> to vector<8x16xf32>
    %974 = vector.broadcast %cst_179 : f32 to vector<8x16xf32>
    %975 = arith.select %970, %973, %974 : vector<8x16xi1>, vector<8x16xf32>
    %976 = arith.addf %965, %975 : vector<8x16xf32>
    %977 = vector.broadcast %147 : vector<1x16xf32> to vector<8x16xf32>
    %978 = vector.broadcast %953 : vector<8x1xf32> to vector<8x16xf32>
    %979 = arith.cmpf oeq, %977, %978 : vector<8x16xf32>
    %cst_180 = arith.constant 1.000000e+00 : f32
    %980 = vector.broadcast %cst_180 : f32 to vector<8x1xf32>
    %981 = arith.subf %980, %954 : vector<8x1xf32>
    %cst_181 = arith.constant 0.000000e+00 : f32
    %982 = vector.shape_cast %981 : vector<8x1xf32> to vector<8x1xf32>
    %983 = vector.broadcast %982 : vector<8x1xf32> to vector<8x16xf32>
    %984 = vector.broadcast %cst_181 : f32 to vector<8x16xf32>
    %985 = arith.select %979, %983, %984 : vector<8x16xi1>, vector<8x16xf32>
    %cst_182 = arith.constant 1.000000e+00 : f32
    %986 = vector.broadcast %cst_182 : f32 to vector<8x1xf32>
    %987 = arith.addf %953, %986 : vector<8x1xf32>
    %988 = vector.broadcast %147 : vector<1x16xf32> to vector<8x16xf32>
    %989 = vector.broadcast %987 : vector<8x1xf32> to vector<8x16xf32>
    %990 = arith.cmpf oeq, %988, %989 : vector<8x16xf32>
    %cst_183 = arith.constant 0.000000e+00 : f32
    %991 = vector.shape_cast %954 : vector<8x1xf32> to vector<8x1xf32>
    %992 = vector.broadcast %991 : vector<8x1xf32> to vector<8x16xf32>
    %993 = vector.broadcast %cst_183 : f32 to vector<8x16xf32>
    %994 = arith.select %990, %992, %993 : vector<8x16xi1>, vector<8x16xf32>
    %995 = arith.addf %985, %994 : vector<8x16xf32>
    %996 = arith.mulf %976, %995 : vector<8x16xf32>
    %997 = arith.addf %946, %996 : vector<8x16xf32>
    %998 = tpu.concatenate %691, %793, %895, %997 in 0 : vector<8x16xf32>, vector<8x16xf32>, vector<8x16xf32>, vector<8x16xf32> -> vector<32x16xf32>
    %cst_184 = arith.constant dense<0.000000e+00> : vector<32x32xf32>
    %999 = tpu.matmul %998, %579, %cst_184 {dimension_numbers = #tpu.dot_dimension_numbers<[1], [0], [0], [1], [0, 0, 1, 1], [], []>} : vector<32x16xf32>, vector<16x32xf32>, vector<32x32xf32> -> vector<32x32xf32>
    %1000 = vector.extract_strided_slice %999 {offsets = [0, 0], sizes = [8, 8], strides = [1, 1]} : vector<32x32xf32> to vector<8x8xf32>
    %1001 = vector.extract_strided_slice %999 {offsets = [8, 8], sizes = [8, 8], strides = [1, 1]} : vector<32x32xf32> to vector<8x8xf32>
    %1002 = vector.extract_strided_slice %999 {offsets = [16, 16], sizes = [8, 8], strides = [1, 1]} : vector<32x32xf32> to vector<8x8xf32>
    %1003 = vector.extract_strided_slice %999 {offsets = [24, 24], sizes = [8, 8], strides = [1, 1]} : vector<32x32xf32> to vector<8x8xf32>
    %1004 = tpu.concatenate %1000, %1001, %1002, %1003 in 1 : vector<8x8xf32>, vector<8x8xf32>, vector<8x8xf32>, vector<8x8xf32> -> vector<8x32xf32>
    %1005 = arith.addf %578, %1004 : vector<8x32xf32>
    %1006 = vector.extract_strided_slice %117 {offsets = [8, 0], sizes = [8, 32], strides = [1, 1]} : vector<16x32xf32> to vector<8x32xf32>
    %1007 = vector.extract_strided_slice %134 {offsets = [8, 0], sizes = [8, 4], strides = [1, 1]} : vector<16x4xf32> to vector<8x4xf32>
    %1008 = vector.extract_strided_slice %111 {offsets = [80, 0], sizes = [64, 32], strides = [1, 1]} : vector<160x32xf32> to vector<64x32xf32>
    %1009 = vector.extract_strided_slice %1007 {offsets = [0, 0], sizes = [8, 1], strides = [1, 1]} : vector<8x4xf32> to vector<8x1xf32>
    %cst_185 = arith.constant 8.000000e+00 : f32
    %1010 = vector.broadcast %cst_185 : f32 to vector<8x1xf32>
    %1011 = arith.mulf %1009, %1010 : vector<8x1xf32>
    %cst_186 = arith.constant 5.000000e-01 : f32
    %1012 = vector.broadcast %cst_186 : f32 to vector<8x1xf32>
    %1013 = arith.subf %1011, %1012 : vector<8x1xf32>
    %1014 = vector.extract_strided_slice %1007 {offsets = [0, 1], sizes = [8, 1], strides = [1, 1]} : vector<8x4xf32> to vector<8x1xf32>
    %cst_187 = arith.constant 8.000000e+00 : f32
    %1015 = vector.broadcast %cst_187 : f32 to vector<8x1xf32>
    %1016 = arith.mulf %1014, %1015 : vector<8x1xf32>
    %cst_188 = arith.constant 5.000000e-01 : f32
    %1017 = vector.broadcast %cst_188 : f32 to vector<8x1xf32>
    %1018 = arith.subf %1016, %1017 : vector<8x1xf32>
    %1019 = vector.extract_strided_slice %133 {offsets = [8, 0], sizes = [8, 4], strides = [1, 1]} : vector<64x4xf32> to vector<8x4xf32>
    %1020 = vector.extract_strided_slice %1006 {offsets = [0, 0], sizes = [8, 1], strides = [1, 1]} : vector<8x32xf32> to vector<8x1xf32>
    %1021 = arith.addf %1013, %1020 : vector<8x1xf32>
    %1022 = vector.extract_strided_slice %1006 {offsets = [0, 1], sizes = [8, 1], strides = [1, 1]} : vector<8x32xf32> to vector<8x1xf32>
    %1023 = arith.addf %1018, %1022 : vector<8x1xf32>
    %1024 = math.floor %1021 : vector<8x1xf32>
    %1025 = arith.subf %1021, %1024 : vector<8x1xf32>
    %1026 = math.floor %1023 : vector<8x1xf32>
    %1027 = arith.subf %1023, %1026 : vector<8x1xf32>
    %1028 = vector.extract_strided_slice %1019 {offsets = [0, 0], sizes = [8, 1], strides = [1, 1]} : vector<8x4xf32> to vector<8x1xf32>
    %1029 = vector.broadcast %142 : vector<1x64xf32> to vector<8x64xf32>
    %1030 = vector.broadcast %1024 : vector<8x1xf32> to vector<8x64xf32>
    %1031 = arith.cmpf oeq, %1029, %1030 : vector<8x64xf32>
    %cst_189 = arith.constant 1.000000e+00 : f32
    %1032 = vector.broadcast %cst_189 : f32 to vector<8x1xf32>
    %1033 = arith.subf %1032, %1025 : vector<8x1xf32>
    %1034 = arith.mulf %1033, %1028 : vector<8x1xf32>
    %cst_190 = arith.constant 0.000000e+00 : f32
    %1035 = vector.shape_cast %1034 : vector<8x1xf32> to vector<8x1xf32>
    %1036 = vector.broadcast %1035 : vector<8x1xf32> to vector<8x64xf32>
    %1037 = vector.broadcast %cst_190 : f32 to vector<8x64xf32>
    %1038 = arith.select %1031, %1036, %1037 : vector<8x64xi1>, vector<8x64xf32>
    %cst_191 = arith.constant 1.000000e+00 : f32
    %1039 = vector.broadcast %cst_191 : f32 to vector<8x1xf32>
    %1040 = arith.addf %1024, %1039 : vector<8x1xf32>
    %1041 = vector.broadcast %142 : vector<1x64xf32> to vector<8x64xf32>
    %1042 = vector.broadcast %1040 : vector<8x1xf32> to vector<8x64xf32>
    %1043 = arith.cmpf oeq, %1041, %1042 : vector<8x64xf32>
    %1044 = arith.mulf %1025, %1028 : vector<8x1xf32>
    %cst_192 = arith.constant 0.000000e+00 : f32
    %1045 = vector.shape_cast %1044 : vector<8x1xf32> to vector<8x1xf32>
    %1046 = vector.broadcast %1045 : vector<8x1xf32> to vector<8x64xf32>
    %1047 = vector.broadcast %cst_192 : f32 to vector<8x64xf32>
    %1048 = arith.select %1043, %1046, %1047 : vector<8x64xi1>, vector<8x64xf32>
    %1049 = arith.addf %1038, %1048 : vector<8x64xf32>
    %1050 = vector.broadcast %139 : vector<1x64xf32> to vector<8x64xf32>
    %1051 = vector.broadcast %1026 : vector<8x1xf32> to vector<8x64xf32>
    %1052 = arith.cmpf oeq, %1050, %1051 : vector<8x64xf32>
    %cst_193 = arith.constant 1.000000e+00 : f32
    %1053 = vector.broadcast %cst_193 : f32 to vector<8x1xf32>
    %1054 = arith.subf %1053, %1027 : vector<8x1xf32>
    %cst_194 = arith.constant 0.000000e+00 : f32
    %1055 = vector.shape_cast %1054 : vector<8x1xf32> to vector<8x1xf32>
    %1056 = vector.broadcast %1055 : vector<8x1xf32> to vector<8x64xf32>
    %1057 = vector.broadcast %cst_194 : f32 to vector<8x64xf32>
    %1058 = arith.select %1052, %1056, %1057 : vector<8x64xi1>, vector<8x64xf32>
    %cst_195 = arith.constant 1.000000e+00 : f32
    %1059 = vector.broadcast %cst_195 : f32 to vector<8x1xf32>
    %1060 = arith.addf %1026, %1059 : vector<8x1xf32>
    %1061 = vector.broadcast %139 : vector<1x64xf32> to vector<8x64xf32>
    %1062 = vector.broadcast %1060 : vector<8x1xf32> to vector<8x64xf32>
    %1063 = arith.cmpf oeq, %1061, %1062 : vector<8x64xf32>
    %cst_196 = arith.constant 0.000000e+00 : f32
    %1064 = vector.shape_cast %1027 : vector<8x1xf32> to vector<8x1xf32>
    %1065 = vector.broadcast %1064 : vector<8x1xf32> to vector<8x64xf32>
    %1066 = vector.broadcast %cst_196 : f32 to vector<8x64xf32>
    %1067 = arith.select %1063, %1065, %1066 : vector<8x64xi1>, vector<8x64xf32>
    %1068 = arith.addf %1058, %1067 : vector<8x64xf32>
    %1069 = arith.mulf %1049, %1068 : vector<8x64xf32>
    %1070 = vector.extract_strided_slice %1006 {offsets = [0, 2], sizes = [8, 1], strides = [1, 1]} : vector<8x32xf32> to vector<8x1xf32>
    %1071 = arith.addf %1013, %1070 : vector<8x1xf32>
    %1072 = vector.extract_strided_slice %1006 {offsets = [0, 3], sizes = [8, 1], strides = [1, 1]} : vector<8x32xf32> to vector<8x1xf32>
    %1073 = arith.addf %1018, %1072 : vector<8x1xf32>
    %1074 = math.floor %1071 : vector<8x1xf32>
    %1075 = arith.subf %1071, %1074 : vector<8x1xf32>
    %1076 = math.floor %1073 : vector<8x1xf32>
    %1077 = arith.subf %1073, %1076 : vector<8x1xf32>
    %1078 = vector.extract_strided_slice %1019 {offsets = [0, 1], sizes = [8, 1], strides = [1, 1]} : vector<8x4xf32> to vector<8x1xf32>
    %1079 = vector.broadcast %142 : vector<1x64xf32> to vector<8x64xf32>
    %1080 = vector.broadcast %1074 : vector<8x1xf32> to vector<8x64xf32>
    %1081 = arith.cmpf oeq, %1079, %1080 : vector<8x64xf32>
    %cst_197 = arith.constant 1.000000e+00 : f32
    %1082 = vector.broadcast %cst_197 : f32 to vector<8x1xf32>
    %1083 = arith.subf %1082, %1075 : vector<8x1xf32>
    %1084 = arith.mulf %1083, %1078 : vector<8x1xf32>
    %cst_198 = arith.constant 0.000000e+00 : f32
    %1085 = vector.shape_cast %1084 : vector<8x1xf32> to vector<8x1xf32>
    %1086 = vector.broadcast %1085 : vector<8x1xf32> to vector<8x64xf32>
    %1087 = vector.broadcast %cst_198 : f32 to vector<8x64xf32>
    %1088 = arith.select %1081, %1086, %1087 : vector<8x64xi1>, vector<8x64xf32>
    %cst_199 = arith.constant 1.000000e+00 : f32
    %1089 = vector.broadcast %cst_199 : f32 to vector<8x1xf32>
    %1090 = arith.addf %1074, %1089 : vector<8x1xf32>
    %1091 = vector.broadcast %142 : vector<1x64xf32> to vector<8x64xf32>
    %1092 = vector.broadcast %1090 : vector<8x1xf32> to vector<8x64xf32>
    %1093 = arith.cmpf oeq, %1091, %1092 : vector<8x64xf32>
    %1094 = arith.mulf %1075, %1078 : vector<8x1xf32>
    %cst_200 = arith.constant 0.000000e+00 : f32
    %1095 = vector.shape_cast %1094 : vector<8x1xf32> to vector<8x1xf32>
    %1096 = vector.broadcast %1095 : vector<8x1xf32> to vector<8x64xf32>
    %1097 = vector.broadcast %cst_200 : f32 to vector<8x64xf32>
    %1098 = arith.select %1093, %1096, %1097 : vector<8x64xi1>, vector<8x64xf32>
    %1099 = arith.addf %1088, %1098 : vector<8x64xf32>
    %1100 = vector.broadcast %139 : vector<1x64xf32> to vector<8x64xf32>
    %1101 = vector.broadcast %1076 : vector<8x1xf32> to vector<8x64xf32>
    %1102 = arith.cmpf oeq, %1100, %1101 : vector<8x64xf32>
    %cst_201 = arith.constant 1.000000e+00 : f32
    %1103 = vector.broadcast %cst_201 : f32 to vector<8x1xf32>
    %1104 = arith.subf %1103, %1077 : vector<8x1xf32>
    %cst_202 = arith.constant 0.000000e+00 : f32
    %1105 = vector.shape_cast %1104 : vector<8x1xf32> to vector<8x1xf32>
    %1106 = vector.broadcast %1105 : vector<8x1xf32> to vector<8x64xf32>
    %1107 = vector.broadcast %cst_202 : f32 to vector<8x64xf32>
    %1108 = arith.select %1102, %1106, %1107 : vector<8x64xi1>, vector<8x64xf32>
    %cst_203 = arith.constant 1.000000e+00 : f32
    %1109 = vector.broadcast %cst_203 : f32 to vector<8x1xf32>
    %1110 = arith.addf %1076, %1109 : vector<8x1xf32>
    %1111 = vector.broadcast %139 : vector<1x64xf32> to vector<8x64xf32>
    %1112 = vector.broadcast %1110 : vector<8x1xf32> to vector<8x64xf32>
    %1113 = arith.cmpf oeq, %1111, %1112 : vector<8x64xf32>
    %cst_204 = arith.constant 0.000000e+00 : f32
    %1114 = vector.shape_cast %1077 : vector<8x1xf32> to vector<8x1xf32>
    %1115 = vector.broadcast %1114 : vector<8x1xf32> to vector<8x64xf32>
    %1116 = vector.broadcast %cst_204 : f32 to vector<8x64xf32>
    %1117 = arith.select %1113, %1115, %1116 : vector<8x64xi1>, vector<8x64xf32>
    %1118 = arith.addf %1108, %1117 : vector<8x64xf32>
    %1119 = arith.mulf %1099, %1118 : vector<8x64xf32>
    %1120 = arith.addf %1069, %1119 : vector<8x64xf32>
    %1121 = vector.extract_strided_slice %133 {offsets = [24, 0], sizes = [8, 4], strides = [1, 1]} : vector<64x4xf32> to vector<8x4xf32>
    %1122 = vector.extract_strided_slice %1006 {offsets = [0, 8], sizes = [8, 1], strides = [1, 1]} : vector<8x32xf32> to vector<8x1xf32>
    %1123 = arith.addf %1013, %1122 : vector<8x1xf32>
    %1124 = vector.extract_strided_slice %1006 {offsets = [0, 9], sizes = [8, 1], strides = [1, 1]} : vector<8x32xf32> to vector<8x1xf32>
    %1125 = arith.addf %1018, %1124 : vector<8x1xf32>
    %1126 = math.floor %1123 : vector<8x1xf32>
    %1127 = arith.subf %1123, %1126 : vector<8x1xf32>
    %1128 = math.floor %1125 : vector<8x1xf32>
    %1129 = arith.subf %1125, %1128 : vector<8x1xf32>
    %1130 = vector.extract_strided_slice %1121 {offsets = [0, 0], sizes = [8, 1], strides = [1, 1]} : vector<8x4xf32> to vector<8x1xf32>
    %1131 = vector.broadcast %142 : vector<1x64xf32> to vector<8x64xf32>
    %1132 = vector.broadcast %1126 : vector<8x1xf32> to vector<8x64xf32>
    %1133 = arith.cmpf oeq, %1131, %1132 : vector<8x64xf32>
    %cst_205 = arith.constant 1.000000e+00 : f32
    %1134 = vector.broadcast %cst_205 : f32 to vector<8x1xf32>
    %1135 = arith.subf %1134, %1127 : vector<8x1xf32>
    %1136 = arith.mulf %1135, %1130 : vector<8x1xf32>
    %cst_206 = arith.constant 0.000000e+00 : f32
    %1137 = vector.shape_cast %1136 : vector<8x1xf32> to vector<8x1xf32>
    %1138 = vector.broadcast %1137 : vector<8x1xf32> to vector<8x64xf32>
    %1139 = vector.broadcast %cst_206 : f32 to vector<8x64xf32>
    %1140 = arith.select %1133, %1138, %1139 : vector<8x64xi1>, vector<8x64xf32>
    %cst_207 = arith.constant 1.000000e+00 : f32
    %1141 = vector.broadcast %cst_207 : f32 to vector<8x1xf32>
    %1142 = arith.addf %1126, %1141 : vector<8x1xf32>
    %1143 = vector.broadcast %142 : vector<1x64xf32> to vector<8x64xf32>
    %1144 = vector.broadcast %1142 : vector<8x1xf32> to vector<8x64xf32>
    %1145 = arith.cmpf oeq, %1143, %1144 : vector<8x64xf32>
    %1146 = arith.mulf %1127, %1130 : vector<8x1xf32>
    %cst_208 = arith.constant 0.000000e+00 : f32
    %1147 = vector.shape_cast %1146 : vector<8x1xf32> to vector<8x1xf32>
    %1148 = vector.broadcast %1147 : vector<8x1xf32> to vector<8x64xf32>
    %1149 = vector.broadcast %cst_208 : f32 to vector<8x64xf32>
    %1150 = arith.select %1145, %1148, %1149 : vector<8x64xi1>, vector<8x64xf32>
    %1151 = arith.addf %1140, %1150 : vector<8x64xf32>
    %1152 = vector.broadcast %139 : vector<1x64xf32> to vector<8x64xf32>
    %1153 = vector.broadcast %1128 : vector<8x1xf32> to vector<8x64xf32>
    %1154 = arith.cmpf oeq, %1152, %1153 : vector<8x64xf32>
    %cst_209 = arith.constant 1.000000e+00 : f32
    %1155 = vector.broadcast %cst_209 : f32 to vector<8x1xf32>
    %1156 = arith.subf %1155, %1129 : vector<8x1xf32>
    %cst_210 = arith.constant 0.000000e+00 : f32
    %1157 = vector.shape_cast %1156 : vector<8x1xf32> to vector<8x1xf32>
    %1158 = vector.broadcast %1157 : vector<8x1xf32> to vector<8x64xf32>
    %1159 = vector.broadcast %cst_210 : f32 to vector<8x64xf32>
    %1160 = arith.select %1154, %1158, %1159 : vector<8x64xi1>, vector<8x64xf32>
    %cst_211 = arith.constant 1.000000e+00 : f32
    %1161 = vector.broadcast %cst_211 : f32 to vector<8x1xf32>
    %1162 = arith.addf %1128, %1161 : vector<8x1xf32>
    %1163 = vector.broadcast %139 : vector<1x64xf32> to vector<8x64xf32>
    %1164 = vector.broadcast %1162 : vector<8x1xf32> to vector<8x64xf32>
    %1165 = arith.cmpf oeq, %1163, %1164 : vector<8x64xf32>
    %cst_212 = arith.constant 0.000000e+00 : f32
    %1166 = vector.shape_cast %1129 : vector<8x1xf32> to vector<8x1xf32>
    %1167 = vector.broadcast %1166 : vector<8x1xf32> to vector<8x64xf32>
    %1168 = vector.broadcast %cst_212 : f32 to vector<8x64xf32>
    %1169 = arith.select %1165, %1167, %1168 : vector<8x64xi1>, vector<8x64xf32>
    %1170 = arith.addf %1160, %1169 : vector<8x64xf32>
    %1171 = arith.mulf %1151, %1170 : vector<8x64xf32>
    %1172 = vector.extract_strided_slice %1006 {offsets = [0, 10], sizes = [8, 1], strides = [1, 1]} : vector<8x32xf32> to vector<8x1xf32>
    %1173 = arith.addf %1013, %1172 : vector<8x1xf32>
    %1174 = vector.extract_strided_slice %1006 {offsets = [0, 11], sizes = [8, 1], strides = [1, 1]} : vector<8x32xf32> to vector<8x1xf32>
    %1175 = arith.addf %1018, %1174 : vector<8x1xf32>
    %1176 = math.floor %1173 : vector<8x1xf32>
    %1177 = arith.subf %1173, %1176 : vector<8x1xf32>
    %1178 = math.floor %1175 : vector<8x1xf32>
    %1179 = arith.subf %1175, %1178 : vector<8x1xf32>
    %1180 = vector.extract_strided_slice %1121 {offsets = [0, 1], sizes = [8, 1], strides = [1, 1]} : vector<8x4xf32> to vector<8x1xf32>
    %1181 = vector.broadcast %142 : vector<1x64xf32> to vector<8x64xf32>
    %1182 = vector.broadcast %1176 : vector<8x1xf32> to vector<8x64xf32>
    %1183 = arith.cmpf oeq, %1181, %1182 : vector<8x64xf32>
    %cst_213 = arith.constant 1.000000e+00 : f32
    %1184 = vector.broadcast %cst_213 : f32 to vector<8x1xf32>
    %1185 = arith.subf %1184, %1177 : vector<8x1xf32>
    %1186 = arith.mulf %1185, %1180 : vector<8x1xf32>
    %cst_214 = arith.constant 0.000000e+00 : f32
    %1187 = vector.shape_cast %1186 : vector<8x1xf32> to vector<8x1xf32>
    %1188 = vector.broadcast %1187 : vector<8x1xf32> to vector<8x64xf32>
    %1189 = vector.broadcast %cst_214 : f32 to vector<8x64xf32>
    %1190 = arith.select %1183, %1188, %1189 : vector<8x64xi1>, vector<8x64xf32>
    %cst_215 = arith.constant 1.000000e+00 : f32
    %1191 = vector.broadcast %cst_215 : f32 to vector<8x1xf32>
    %1192 = arith.addf %1176, %1191 : vector<8x1xf32>
    %1193 = vector.broadcast %142 : vector<1x64xf32> to vector<8x64xf32>
    %1194 = vector.broadcast %1192 : vector<8x1xf32> to vector<8x64xf32>
    %1195 = arith.cmpf oeq, %1193, %1194 : vector<8x64xf32>
    %1196 = arith.mulf %1177, %1180 : vector<8x1xf32>
    %cst_216 = arith.constant 0.000000e+00 : f32
    %1197 = vector.shape_cast %1196 : vector<8x1xf32> to vector<8x1xf32>
    %1198 = vector.broadcast %1197 : vector<8x1xf32> to vector<8x64xf32>
    %1199 = vector.broadcast %cst_216 : f32 to vector<8x64xf32>
    %1200 = arith.select %1195, %1198, %1199 : vector<8x64xi1>, vector<8x64xf32>
    %1201 = arith.addf %1190, %1200 : vector<8x64xf32>
    %1202 = vector.broadcast %139 : vector<1x64xf32> to vector<8x64xf32>
    %1203 = vector.broadcast %1178 : vector<8x1xf32> to vector<8x64xf32>
    %1204 = arith.cmpf oeq, %1202, %1203 : vector<8x64xf32>
    %cst_217 = arith.constant 1.000000e+00 : f32
    %1205 = vector.broadcast %cst_217 : f32 to vector<8x1xf32>
    %1206 = arith.subf %1205, %1179 : vector<8x1xf32>
    %cst_218 = arith.constant 0.000000e+00 : f32
    %1207 = vector.shape_cast %1206 : vector<8x1xf32> to vector<8x1xf32>
    %1208 = vector.broadcast %1207 : vector<8x1xf32> to vector<8x64xf32>
    %1209 = vector.broadcast %cst_218 : f32 to vector<8x64xf32>
    %1210 = arith.select %1204, %1208, %1209 : vector<8x64xi1>, vector<8x64xf32>
    %cst_219 = arith.constant 1.000000e+00 : f32
    %1211 = vector.broadcast %cst_219 : f32 to vector<8x1xf32>
    %1212 = arith.addf %1178, %1211 : vector<8x1xf32>
    %1213 = vector.broadcast %139 : vector<1x64xf32> to vector<8x64xf32>
    %1214 = vector.broadcast %1212 : vector<8x1xf32> to vector<8x64xf32>
    %1215 = arith.cmpf oeq, %1213, %1214 : vector<8x64xf32>
    %cst_220 = arith.constant 0.000000e+00 : f32
    %1216 = vector.shape_cast %1179 : vector<8x1xf32> to vector<8x1xf32>
    %1217 = vector.broadcast %1216 : vector<8x1xf32> to vector<8x64xf32>
    %1218 = vector.broadcast %cst_220 : f32 to vector<8x64xf32>
    %1219 = arith.select %1215, %1217, %1218 : vector<8x64xi1>, vector<8x64xf32>
    %1220 = arith.addf %1210, %1219 : vector<8x64xf32>
    %1221 = arith.mulf %1201, %1220 : vector<8x64xf32>
    %1222 = arith.addf %1171, %1221 : vector<8x64xf32>
    %1223 = vector.extract_strided_slice %133 {offsets = [40, 0], sizes = [8, 4], strides = [1, 1]} : vector<64x4xf32> to vector<8x4xf32>
    %1224 = vector.extract_strided_slice %1006 {offsets = [0, 16], sizes = [8, 1], strides = [1, 1]} : vector<8x32xf32> to vector<8x1xf32>
    %1225 = arith.addf %1013, %1224 : vector<8x1xf32>
    %1226 = vector.extract_strided_slice %1006 {offsets = [0, 17], sizes = [8, 1], strides = [1, 1]} : vector<8x32xf32> to vector<8x1xf32>
    %1227 = arith.addf %1018, %1226 : vector<8x1xf32>
    %1228 = math.floor %1225 : vector<8x1xf32>
    %1229 = arith.subf %1225, %1228 : vector<8x1xf32>
    %1230 = math.floor %1227 : vector<8x1xf32>
    %1231 = arith.subf %1227, %1230 : vector<8x1xf32>
    %1232 = vector.extract_strided_slice %1223 {offsets = [0, 0], sizes = [8, 1], strides = [1, 1]} : vector<8x4xf32> to vector<8x1xf32>
    %1233 = vector.broadcast %142 : vector<1x64xf32> to vector<8x64xf32>
    %1234 = vector.broadcast %1228 : vector<8x1xf32> to vector<8x64xf32>
    %1235 = arith.cmpf oeq, %1233, %1234 : vector<8x64xf32>
    %cst_221 = arith.constant 1.000000e+00 : f32
    %1236 = vector.broadcast %cst_221 : f32 to vector<8x1xf32>
    %1237 = arith.subf %1236, %1229 : vector<8x1xf32>
    %1238 = arith.mulf %1237, %1232 : vector<8x1xf32>
    %cst_222 = arith.constant 0.000000e+00 : f32
    %1239 = vector.shape_cast %1238 : vector<8x1xf32> to vector<8x1xf32>
    %1240 = vector.broadcast %1239 : vector<8x1xf32> to vector<8x64xf32>
    %1241 = vector.broadcast %cst_222 : f32 to vector<8x64xf32>
    %1242 = arith.select %1235, %1240, %1241 : vector<8x64xi1>, vector<8x64xf32>
    %cst_223 = arith.constant 1.000000e+00 : f32
    %1243 = vector.broadcast %cst_223 : f32 to vector<8x1xf32>
    %1244 = arith.addf %1228, %1243 : vector<8x1xf32>
    %1245 = vector.broadcast %142 : vector<1x64xf32> to vector<8x64xf32>
    %1246 = vector.broadcast %1244 : vector<8x1xf32> to vector<8x64xf32>
    %1247 = arith.cmpf oeq, %1245, %1246 : vector<8x64xf32>
    %1248 = arith.mulf %1229, %1232 : vector<8x1xf32>
    %cst_224 = arith.constant 0.000000e+00 : f32
    %1249 = vector.shape_cast %1248 : vector<8x1xf32> to vector<8x1xf32>
    %1250 = vector.broadcast %1249 : vector<8x1xf32> to vector<8x64xf32>
    %1251 = vector.broadcast %cst_224 : f32 to vector<8x64xf32>
    %1252 = arith.select %1247, %1250, %1251 : vector<8x64xi1>, vector<8x64xf32>
    %1253 = arith.addf %1242, %1252 : vector<8x64xf32>
    %1254 = vector.broadcast %139 : vector<1x64xf32> to vector<8x64xf32>
    %1255 = vector.broadcast %1230 : vector<8x1xf32> to vector<8x64xf32>
    %1256 = arith.cmpf oeq, %1254, %1255 : vector<8x64xf32>
    %cst_225 = arith.constant 1.000000e+00 : f32
    %1257 = vector.broadcast %cst_225 : f32 to vector<8x1xf32>
    %1258 = arith.subf %1257, %1231 : vector<8x1xf32>
    %cst_226 = arith.constant 0.000000e+00 : f32
    %1259 = vector.shape_cast %1258 : vector<8x1xf32> to vector<8x1xf32>
    %1260 = vector.broadcast %1259 : vector<8x1xf32> to vector<8x64xf32>
    %1261 = vector.broadcast %cst_226 : f32 to vector<8x64xf32>
    %1262 = arith.select %1256, %1260, %1261 : vector<8x64xi1>, vector<8x64xf32>
    %cst_227 = arith.constant 1.000000e+00 : f32
    %1263 = vector.broadcast %cst_227 : f32 to vector<8x1xf32>
    %1264 = arith.addf %1230, %1263 : vector<8x1xf32>
    %1265 = vector.broadcast %139 : vector<1x64xf32> to vector<8x64xf32>
    %1266 = vector.broadcast %1264 : vector<8x1xf32> to vector<8x64xf32>
    %1267 = arith.cmpf oeq, %1265, %1266 : vector<8x64xf32>
    %cst_228 = arith.constant 0.000000e+00 : f32
    %1268 = vector.shape_cast %1231 : vector<8x1xf32> to vector<8x1xf32>
    %1269 = vector.broadcast %1268 : vector<8x1xf32> to vector<8x64xf32>
    %1270 = vector.broadcast %cst_228 : f32 to vector<8x64xf32>
    %1271 = arith.select %1267, %1269, %1270 : vector<8x64xi1>, vector<8x64xf32>
    %1272 = arith.addf %1262, %1271 : vector<8x64xf32>
    %1273 = arith.mulf %1253, %1272 : vector<8x64xf32>
    %1274 = vector.extract_strided_slice %1006 {offsets = [0, 18], sizes = [8, 1], strides = [1, 1]} : vector<8x32xf32> to vector<8x1xf32>
    %1275 = arith.addf %1013, %1274 : vector<8x1xf32>
    %1276 = vector.extract_strided_slice %1006 {offsets = [0, 19], sizes = [8, 1], strides = [1, 1]} : vector<8x32xf32> to vector<8x1xf32>
    %1277 = arith.addf %1018, %1276 : vector<8x1xf32>
    %1278 = math.floor %1275 : vector<8x1xf32>
    %1279 = arith.subf %1275, %1278 : vector<8x1xf32>
    %1280 = math.floor %1277 : vector<8x1xf32>
    %1281 = arith.subf %1277, %1280 : vector<8x1xf32>
    %1282 = vector.extract_strided_slice %1223 {offsets = [0, 1], sizes = [8, 1], strides = [1, 1]} : vector<8x4xf32> to vector<8x1xf32>
    %1283 = vector.broadcast %142 : vector<1x64xf32> to vector<8x64xf32>
    %1284 = vector.broadcast %1278 : vector<8x1xf32> to vector<8x64xf32>
    %1285 = arith.cmpf oeq, %1283, %1284 : vector<8x64xf32>
    %cst_229 = arith.constant 1.000000e+00 : f32
    %1286 = vector.broadcast %cst_229 : f32 to vector<8x1xf32>
    %1287 = arith.subf %1286, %1279 : vector<8x1xf32>
    %1288 = arith.mulf %1287, %1282 : vector<8x1xf32>
    %cst_230 = arith.constant 0.000000e+00 : f32
    %1289 = vector.shape_cast %1288 : vector<8x1xf32> to vector<8x1xf32>
    %1290 = vector.broadcast %1289 : vector<8x1xf32> to vector<8x64xf32>
    %1291 = vector.broadcast %cst_230 : f32 to vector<8x64xf32>
    %1292 = arith.select %1285, %1290, %1291 : vector<8x64xi1>, vector<8x64xf32>
    %cst_231 = arith.constant 1.000000e+00 : f32
    %1293 = vector.broadcast %cst_231 : f32 to vector<8x1xf32>
    %1294 = arith.addf %1278, %1293 : vector<8x1xf32>
    %1295 = vector.broadcast %142 : vector<1x64xf32> to vector<8x64xf32>
    %1296 = vector.broadcast %1294 : vector<8x1xf32> to vector<8x64xf32>
    %1297 = arith.cmpf oeq, %1295, %1296 : vector<8x64xf32>
    %1298 = arith.mulf %1279, %1282 : vector<8x1xf32>
    %cst_232 = arith.constant 0.000000e+00 : f32
    %1299 = vector.shape_cast %1298 : vector<8x1xf32> to vector<8x1xf32>
    %1300 = vector.broadcast %1299 : vector<8x1xf32> to vector<8x64xf32>
    %1301 = vector.broadcast %cst_232 : f32 to vector<8x64xf32>
    %1302 = arith.select %1297, %1300, %1301 : vector<8x64xi1>, vector<8x64xf32>
    %1303 = arith.addf %1292, %1302 : vector<8x64xf32>
    %1304 = vector.broadcast %139 : vector<1x64xf32> to vector<8x64xf32>
    %1305 = vector.broadcast %1280 : vector<8x1xf32> to vector<8x64xf32>
    %1306 = arith.cmpf oeq, %1304, %1305 : vector<8x64xf32>
    %cst_233 = arith.constant 1.000000e+00 : f32
    %1307 = vector.broadcast %cst_233 : f32 to vector<8x1xf32>
    %1308 = arith.subf %1307, %1281 : vector<8x1xf32>
    %cst_234 = arith.constant 0.000000e+00 : f32
    %1309 = vector.shape_cast %1308 : vector<8x1xf32> to vector<8x1xf32>
    %1310 = vector.broadcast %1309 : vector<8x1xf32> to vector<8x64xf32>
    %1311 = vector.broadcast %cst_234 : f32 to vector<8x64xf32>
    %1312 = arith.select %1306, %1310, %1311 : vector<8x64xi1>, vector<8x64xf32>
    %cst_235 = arith.constant 1.000000e+00 : f32
    %1313 = vector.broadcast %cst_235 : f32 to vector<8x1xf32>
    %1314 = arith.addf %1280, %1313 : vector<8x1xf32>
    %1315 = vector.broadcast %139 : vector<1x64xf32> to vector<8x64xf32>
    %1316 = vector.broadcast %1314 : vector<8x1xf32> to vector<8x64xf32>
    %1317 = arith.cmpf oeq, %1315, %1316 : vector<8x64xf32>
    %cst_236 = arith.constant 0.000000e+00 : f32
    %1318 = vector.shape_cast %1281 : vector<8x1xf32> to vector<8x1xf32>
    %1319 = vector.broadcast %1318 : vector<8x1xf32> to vector<8x64xf32>
    %1320 = vector.broadcast %cst_236 : f32 to vector<8x64xf32>
    %1321 = arith.select %1317, %1319, %1320 : vector<8x64xi1>, vector<8x64xf32>
    %1322 = arith.addf %1312, %1321 : vector<8x64xf32>
    %1323 = arith.mulf %1303, %1322 : vector<8x64xf32>
    %1324 = arith.addf %1273, %1323 : vector<8x64xf32>
    %1325 = vector.extract_strided_slice %133 {offsets = [56, 0], sizes = [8, 4], strides = [1, 1]} : vector<64x4xf32> to vector<8x4xf32>
    %1326 = vector.extract_strided_slice %1006 {offsets = [0, 24], sizes = [8, 1], strides = [1, 1]} : vector<8x32xf32> to vector<8x1xf32>
    %1327 = arith.addf %1013, %1326 : vector<8x1xf32>
    %1328 = vector.extract_strided_slice %1006 {offsets = [0, 25], sizes = [8, 1], strides = [1, 1]} : vector<8x32xf32> to vector<8x1xf32>
    %1329 = arith.addf %1018, %1328 : vector<8x1xf32>
    %1330 = math.floor %1327 : vector<8x1xf32>
    %1331 = arith.subf %1327, %1330 : vector<8x1xf32>
    %1332 = math.floor %1329 : vector<8x1xf32>
    %1333 = arith.subf %1329, %1332 : vector<8x1xf32>
    %1334 = vector.extract_strided_slice %1325 {offsets = [0, 0], sizes = [8, 1], strides = [1, 1]} : vector<8x4xf32> to vector<8x1xf32>
    %1335 = vector.broadcast %142 : vector<1x64xf32> to vector<8x64xf32>
    %1336 = vector.broadcast %1330 : vector<8x1xf32> to vector<8x64xf32>
    %1337 = arith.cmpf oeq, %1335, %1336 : vector<8x64xf32>
    %cst_237 = arith.constant 1.000000e+00 : f32
    %1338 = vector.broadcast %cst_237 : f32 to vector<8x1xf32>
    %1339 = arith.subf %1338, %1331 : vector<8x1xf32>
    %1340 = arith.mulf %1339, %1334 : vector<8x1xf32>
    %cst_238 = arith.constant 0.000000e+00 : f32
    %1341 = vector.shape_cast %1340 : vector<8x1xf32> to vector<8x1xf32>
    %1342 = vector.broadcast %1341 : vector<8x1xf32> to vector<8x64xf32>
    %1343 = vector.broadcast %cst_238 : f32 to vector<8x64xf32>
    %1344 = arith.select %1337, %1342, %1343 : vector<8x64xi1>, vector<8x64xf32>
    %cst_239 = arith.constant 1.000000e+00 : f32
    %1345 = vector.broadcast %cst_239 : f32 to vector<8x1xf32>
    %1346 = arith.addf %1330, %1345 : vector<8x1xf32>
    %1347 = vector.broadcast %142 : vector<1x64xf32> to vector<8x64xf32>
    %1348 = vector.broadcast %1346 : vector<8x1xf32> to vector<8x64xf32>
    %1349 = arith.cmpf oeq, %1347, %1348 : vector<8x64xf32>
    %1350 = arith.mulf %1331, %1334 : vector<8x1xf32>
    %cst_240 = arith.constant 0.000000e+00 : f32
    %1351 = vector.shape_cast %1350 : vector<8x1xf32> to vector<8x1xf32>
    %1352 = vector.broadcast %1351 : vector<8x1xf32> to vector<8x64xf32>
    %1353 = vector.broadcast %cst_240 : f32 to vector<8x64xf32>
    %1354 = arith.select %1349, %1352, %1353 : vector<8x64xi1>, vector<8x64xf32>
    %1355 = arith.addf %1344, %1354 : vector<8x64xf32>
    %1356 = vector.broadcast %139 : vector<1x64xf32> to vector<8x64xf32>
    %1357 = vector.broadcast %1332 : vector<8x1xf32> to vector<8x64xf32>
    %1358 = arith.cmpf oeq, %1356, %1357 : vector<8x64xf32>
    %cst_241 = arith.constant 1.000000e+00 : f32
    %1359 = vector.broadcast %cst_241 : f32 to vector<8x1xf32>
    %1360 = arith.subf %1359, %1333 : vector<8x1xf32>
    %cst_242 = arith.constant 0.000000e+00 : f32
    %1361 = vector.shape_cast %1360 : vector<8x1xf32> to vector<8x1xf32>
    %1362 = vector.broadcast %1361 : vector<8x1xf32> to vector<8x64xf32>
    %1363 = vector.broadcast %cst_242 : f32 to vector<8x64xf32>
    %1364 = arith.select %1358, %1362, %1363 : vector<8x64xi1>, vector<8x64xf32>
    %cst_243 = arith.constant 1.000000e+00 : f32
    %1365 = vector.broadcast %cst_243 : f32 to vector<8x1xf32>
    %1366 = arith.addf %1332, %1365 : vector<8x1xf32>
    %1367 = vector.broadcast %139 : vector<1x64xf32> to vector<8x64xf32>
    %1368 = vector.broadcast %1366 : vector<8x1xf32> to vector<8x64xf32>
    %1369 = arith.cmpf oeq, %1367, %1368 : vector<8x64xf32>
    %cst_244 = arith.constant 0.000000e+00 : f32
    %1370 = vector.shape_cast %1333 : vector<8x1xf32> to vector<8x1xf32>
    %1371 = vector.broadcast %1370 : vector<8x1xf32> to vector<8x64xf32>
    %1372 = vector.broadcast %cst_244 : f32 to vector<8x64xf32>
    %1373 = arith.select %1369, %1371, %1372 : vector<8x64xi1>, vector<8x64xf32>
    %1374 = arith.addf %1364, %1373 : vector<8x64xf32>
    %1375 = arith.mulf %1355, %1374 : vector<8x64xf32>
    %1376 = vector.extract_strided_slice %1006 {offsets = [0, 26], sizes = [8, 1], strides = [1, 1]} : vector<8x32xf32> to vector<8x1xf32>
    %1377 = arith.addf %1013, %1376 : vector<8x1xf32>
    %1378 = vector.extract_strided_slice %1006 {offsets = [0, 27], sizes = [8, 1], strides = [1, 1]} : vector<8x32xf32> to vector<8x1xf32>
    %1379 = arith.addf %1018, %1378 : vector<8x1xf32>
    %1380 = math.floor %1377 : vector<8x1xf32>
    %1381 = arith.subf %1377, %1380 : vector<8x1xf32>
    %1382 = math.floor %1379 : vector<8x1xf32>
    %1383 = arith.subf %1379, %1382 : vector<8x1xf32>
    %1384 = vector.extract_strided_slice %1325 {offsets = [0, 1], sizes = [8, 1], strides = [1, 1]} : vector<8x4xf32> to vector<8x1xf32>
    %1385 = vector.broadcast %142 : vector<1x64xf32> to vector<8x64xf32>
    %1386 = vector.broadcast %1380 : vector<8x1xf32> to vector<8x64xf32>
    %1387 = arith.cmpf oeq, %1385, %1386 : vector<8x64xf32>
    %cst_245 = arith.constant 1.000000e+00 : f32
    %1388 = vector.broadcast %cst_245 : f32 to vector<8x1xf32>
    %1389 = arith.subf %1388, %1381 : vector<8x1xf32>
    %1390 = arith.mulf %1389, %1384 : vector<8x1xf32>
    %cst_246 = arith.constant 0.000000e+00 : f32
    %1391 = vector.shape_cast %1390 : vector<8x1xf32> to vector<8x1xf32>
    %1392 = vector.broadcast %1391 : vector<8x1xf32> to vector<8x64xf32>
    %1393 = vector.broadcast %cst_246 : f32 to vector<8x64xf32>
    %1394 = arith.select %1387, %1392, %1393 : vector<8x64xi1>, vector<8x64xf32>
    %cst_247 = arith.constant 1.000000e+00 : f32
    %1395 = vector.broadcast %cst_247 : f32 to vector<8x1xf32>
    %1396 = arith.addf %1380, %1395 : vector<8x1xf32>
    %1397 = vector.broadcast %142 : vector<1x64xf32> to vector<8x64xf32>
    %1398 = vector.broadcast %1396 : vector<8x1xf32> to vector<8x64xf32>
    %1399 = arith.cmpf oeq, %1397, %1398 : vector<8x64xf32>
    %1400 = arith.mulf %1381, %1384 : vector<8x1xf32>
    %cst_248 = arith.constant 0.000000e+00 : f32
    %1401 = vector.shape_cast %1400 : vector<8x1xf32> to vector<8x1xf32>
    %1402 = vector.broadcast %1401 : vector<8x1xf32> to vector<8x64xf32>
    %1403 = vector.broadcast %cst_248 : f32 to vector<8x64xf32>
    %1404 = arith.select %1399, %1402, %1403 : vector<8x64xi1>, vector<8x64xf32>
    %1405 = arith.addf %1394, %1404 : vector<8x64xf32>
    %1406 = vector.broadcast %139 : vector<1x64xf32> to vector<8x64xf32>
    %1407 = vector.broadcast %1382 : vector<8x1xf32> to vector<8x64xf32>
    %1408 = arith.cmpf oeq, %1406, %1407 : vector<8x64xf32>
    %cst_249 = arith.constant 1.000000e+00 : f32
    %1409 = vector.broadcast %cst_249 : f32 to vector<8x1xf32>
    %1410 = arith.subf %1409, %1383 : vector<8x1xf32>
    %cst_250 = arith.constant 0.000000e+00 : f32
    %1411 = vector.shape_cast %1410 : vector<8x1xf32> to vector<8x1xf32>
    %1412 = vector.broadcast %1411 : vector<8x1xf32> to vector<8x64xf32>
    %1413 = vector.broadcast %cst_250 : f32 to vector<8x64xf32>
    %1414 = arith.select %1408, %1412, %1413 : vector<8x64xi1>, vector<8x64xf32>
    %cst_251 = arith.constant 1.000000e+00 : f32
    %1415 = vector.broadcast %cst_251 : f32 to vector<8x1xf32>
    %1416 = arith.addf %1382, %1415 : vector<8x1xf32>
    %1417 = vector.broadcast %139 : vector<1x64xf32> to vector<8x64xf32>
    %1418 = vector.broadcast %1416 : vector<8x1xf32> to vector<8x64xf32>
    %1419 = arith.cmpf oeq, %1417, %1418 : vector<8x64xf32>
    %cst_252 = arith.constant 0.000000e+00 : f32
    %1420 = vector.shape_cast %1383 : vector<8x1xf32> to vector<8x1xf32>
    %1421 = vector.broadcast %1420 : vector<8x1xf32> to vector<8x64xf32>
    %1422 = vector.broadcast %cst_252 : f32 to vector<8x64xf32>
    %1423 = arith.select %1419, %1421, %1422 : vector<8x64xi1>, vector<8x64xf32>
    %1424 = arith.addf %1414, %1423 : vector<8x64xf32>
    %1425 = arith.mulf %1405, %1424 : vector<8x64xf32>
    %1426 = arith.addf %1375, %1425 : vector<8x64xf32>
    %1427 = tpu.concatenate %1120, %1222, %1324, %1426 in 0 : vector<8x64xf32>, vector<8x64xf32>, vector<8x64xf32>, vector<8x64xf32> -> vector<32x64xf32>
    %cst_253 = arith.constant dense<0.000000e+00> : vector<32x32xf32>
    %1428 = tpu.matmul %1427, %1008, %cst_253 {dimension_numbers = #tpu.dot_dimension_numbers<[1], [0], [0], [1], [0, 0, 1, 1], [], []>} : vector<32x64xf32>, vector<64x32xf32>, vector<32x32xf32> -> vector<32x32xf32>
    %1429 = vector.extract_strided_slice %1428 {offsets = [0, 0], sizes = [8, 8], strides = [1, 1]} : vector<32x32xf32> to vector<8x8xf32>
    %1430 = vector.extract_strided_slice %1428 {offsets = [8, 8], sizes = [8, 8], strides = [1, 1]} : vector<32x32xf32> to vector<8x8xf32>
    %1431 = vector.extract_strided_slice %1428 {offsets = [16, 16], sizes = [8, 8], strides = [1, 1]} : vector<32x32xf32> to vector<8x8xf32>
    %1432 = vector.extract_strided_slice %1428 {offsets = [24, 24], sizes = [8, 8], strides = [1, 1]} : vector<32x32xf32> to vector<8x8xf32>
    %1433 = tpu.concatenate %1429, %1430, %1431, %1432 in 1 : vector<8x8xf32>, vector<8x8xf32>, vector<8x8xf32>, vector<8x8xf32> -> vector<8x32xf32>
    %1434 = vector.extract_strided_slice %111 {offsets = [144, 0], sizes = [16, 32], strides = [1, 1]} : vector<160x32xf32> to vector<16x32xf32>
    %1435 = vector.extract_strided_slice %1007 {offsets = [0, 2], sizes = [8, 1], strides = [1, 1]} : vector<8x4xf32> to vector<8x1xf32>
    %cst_254 = arith.constant 4.000000e+00 : f32
    %1436 = vector.broadcast %cst_254 : f32 to vector<8x1xf32>
    %1437 = arith.mulf %1435, %1436 : vector<8x1xf32>
    %cst_255 = arith.constant 5.000000e-01 : f32
    %1438 = vector.broadcast %cst_255 : f32 to vector<8x1xf32>
    %1439 = arith.subf %1437, %1438 : vector<8x1xf32>
    %1440 = vector.extract_strided_slice %1007 {offsets = [0, 3], sizes = [8, 1], strides = [1, 1]} : vector<8x4xf32> to vector<8x1xf32>
    %cst_256 = arith.constant 4.000000e+00 : f32
    %1441 = vector.broadcast %cst_256 : f32 to vector<8x1xf32>
    %1442 = arith.mulf %1440, %1441 : vector<8x1xf32>
    %cst_257 = arith.constant 5.000000e-01 : f32
    %1443 = vector.broadcast %cst_257 : f32 to vector<8x1xf32>
    %1444 = arith.subf %1442, %1443 : vector<8x1xf32>
    %1445 = vector.extract_strided_slice %133 {offsets = [8, 0], sizes = [8, 4], strides = [1, 1]} : vector<64x4xf32> to vector<8x4xf32>
    %1446 = vector.extract_strided_slice %1006 {offsets = [0, 4], sizes = [8, 1], strides = [1, 1]} : vector<8x32xf32> to vector<8x1xf32>
    %1447 = arith.addf %1439, %1446 : vector<8x1xf32>
    %1448 = vector.extract_strided_slice %1006 {offsets = [0, 5], sizes = [8, 1], strides = [1, 1]} : vector<8x32xf32> to vector<8x1xf32>
    %1449 = arith.addf %1444, %1448 : vector<8x1xf32>
    %1450 = math.floor %1447 : vector<8x1xf32>
    %1451 = arith.subf %1447, %1450 : vector<8x1xf32>
    %1452 = math.floor %1449 : vector<8x1xf32>
    %1453 = arith.subf %1449, %1452 : vector<8x1xf32>
    %1454 = vector.extract_strided_slice %1445 {offsets = [0, 2], sizes = [8, 1], strides = [1, 1]} : vector<8x4xf32> to vector<8x1xf32>
    %1455 = vector.broadcast %150 : vector<1x16xf32> to vector<8x16xf32>
    %1456 = vector.broadcast %1450 : vector<8x1xf32> to vector<8x16xf32>
    %1457 = arith.cmpf oeq, %1455, %1456 : vector<8x16xf32>
    %cst_258 = arith.constant 1.000000e+00 : f32
    %1458 = vector.broadcast %cst_258 : f32 to vector<8x1xf32>
    %1459 = arith.subf %1458, %1451 : vector<8x1xf32>
    %1460 = arith.mulf %1459, %1454 : vector<8x1xf32>
    %cst_259 = arith.constant 0.000000e+00 : f32
    %1461 = vector.shape_cast %1460 : vector<8x1xf32> to vector<8x1xf32>
    %1462 = vector.broadcast %1461 : vector<8x1xf32> to vector<8x16xf32>
    %1463 = vector.broadcast %cst_259 : f32 to vector<8x16xf32>
    %1464 = arith.select %1457, %1462, %1463 : vector<8x16xi1>, vector<8x16xf32>
    %cst_260 = arith.constant 1.000000e+00 : f32
    %1465 = vector.broadcast %cst_260 : f32 to vector<8x1xf32>
    %1466 = arith.addf %1450, %1465 : vector<8x1xf32>
    %1467 = vector.broadcast %150 : vector<1x16xf32> to vector<8x16xf32>
    %1468 = vector.broadcast %1466 : vector<8x1xf32> to vector<8x16xf32>
    %1469 = arith.cmpf oeq, %1467, %1468 : vector<8x16xf32>
    %1470 = arith.mulf %1451, %1454 : vector<8x1xf32>
    %cst_261 = arith.constant 0.000000e+00 : f32
    %1471 = vector.shape_cast %1470 : vector<8x1xf32> to vector<8x1xf32>
    %1472 = vector.broadcast %1471 : vector<8x1xf32> to vector<8x16xf32>
    %1473 = vector.broadcast %cst_261 : f32 to vector<8x16xf32>
    %1474 = arith.select %1469, %1472, %1473 : vector<8x16xi1>, vector<8x16xf32>
    %1475 = arith.addf %1464, %1474 : vector<8x16xf32>
    %1476 = vector.broadcast %147 : vector<1x16xf32> to vector<8x16xf32>
    %1477 = vector.broadcast %1452 : vector<8x1xf32> to vector<8x16xf32>
    %1478 = arith.cmpf oeq, %1476, %1477 : vector<8x16xf32>
    %cst_262 = arith.constant 1.000000e+00 : f32
    %1479 = vector.broadcast %cst_262 : f32 to vector<8x1xf32>
    %1480 = arith.subf %1479, %1453 : vector<8x1xf32>
    %cst_263 = arith.constant 0.000000e+00 : f32
    %1481 = vector.shape_cast %1480 : vector<8x1xf32> to vector<8x1xf32>
    %1482 = vector.broadcast %1481 : vector<8x1xf32> to vector<8x16xf32>
    %1483 = vector.broadcast %cst_263 : f32 to vector<8x16xf32>
    %1484 = arith.select %1478, %1482, %1483 : vector<8x16xi1>, vector<8x16xf32>
    %cst_264 = arith.constant 1.000000e+00 : f32
    %1485 = vector.broadcast %cst_264 : f32 to vector<8x1xf32>
    %1486 = arith.addf %1452, %1485 : vector<8x1xf32>
    %1487 = vector.broadcast %147 : vector<1x16xf32> to vector<8x16xf32>
    %1488 = vector.broadcast %1486 : vector<8x1xf32> to vector<8x16xf32>
    %1489 = arith.cmpf oeq, %1487, %1488 : vector<8x16xf32>
    %cst_265 = arith.constant 0.000000e+00 : f32
    %1490 = vector.shape_cast %1453 : vector<8x1xf32> to vector<8x1xf32>
    %1491 = vector.broadcast %1490 : vector<8x1xf32> to vector<8x16xf32>
    %1492 = vector.broadcast %cst_265 : f32 to vector<8x16xf32>
    %1493 = arith.select %1489, %1491, %1492 : vector<8x16xi1>, vector<8x16xf32>
    %1494 = arith.addf %1484, %1493 : vector<8x16xf32>
    %1495 = arith.mulf %1475, %1494 : vector<8x16xf32>
    %1496 = vector.extract_strided_slice %1006 {offsets = [0, 6], sizes = [8, 1], strides = [1, 1]} : vector<8x32xf32> to vector<8x1xf32>
    %1497 = arith.addf %1439, %1496 : vector<8x1xf32>
    %1498 = vector.extract_strided_slice %1006 {offsets = [0, 7], sizes = [8, 1], strides = [1, 1]} : vector<8x32xf32> to vector<8x1xf32>
    %1499 = arith.addf %1444, %1498 : vector<8x1xf32>
    %1500 = math.floor %1497 : vector<8x1xf32>
    %1501 = arith.subf %1497, %1500 : vector<8x1xf32>
    %1502 = math.floor %1499 : vector<8x1xf32>
    %1503 = arith.subf %1499, %1502 : vector<8x1xf32>
    %1504 = vector.extract_strided_slice %1445 {offsets = [0, 3], sizes = [8, 1], strides = [1, 1]} : vector<8x4xf32> to vector<8x1xf32>
    %1505 = vector.broadcast %150 : vector<1x16xf32> to vector<8x16xf32>
    %1506 = vector.broadcast %1500 : vector<8x1xf32> to vector<8x16xf32>
    %1507 = arith.cmpf oeq, %1505, %1506 : vector<8x16xf32>
    %cst_266 = arith.constant 1.000000e+00 : f32
    %1508 = vector.broadcast %cst_266 : f32 to vector<8x1xf32>
    %1509 = arith.subf %1508, %1501 : vector<8x1xf32>
    %1510 = arith.mulf %1509, %1504 : vector<8x1xf32>
    %cst_267 = arith.constant 0.000000e+00 : f32
    %1511 = vector.shape_cast %1510 : vector<8x1xf32> to vector<8x1xf32>
    %1512 = vector.broadcast %1511 : vector<8x1xf32> to vector<8x16xf32>
    %1513 = vector.broadcast %cst_267 : f32 to vector<8x16xf32>
    %1514 = arith.select %1507, %1512, %1513 : vector<8x16xi1>, vector<8x16xf32>
    %cst_268 = arith.constant 1.000000e+00 : f32
    %1515 = vector.broadcast %cst_268 : f32 to vector<8x1xf32>
    %1516 = arith.addf %1500, %1515 : vector<8x1xf32>
    %1517 = vector.broadcast %150 : vector<1x16xf32> to vector<8x16xf32>
    %1518 = vector.broadcast %1516 : vector<8x1xf32> to vector<8x16xf32>
    %1519 = arith.cmpf oeq, %1517, %1518 : vector<8x16xf32>
    %1520 = arith.mulf %1501, %1504 : vector<8x1xf32>
    %cst_269 = arith.constant 0.000000e+00 : f32
    %1521 = vector.shape_cast %1520 : vector<8x1xf32> to vector<8x1xf32>
    %1522 = vector.broadcast %1521 : vector<8x1xf32> to vector<8x16xf32>
    %1523 = vector.broadcast %cst_269 : f32 to vector<8x16xf32>
    %1524 = arith.select %1519, %1522, %1523 : vector<8x16xi1>, vector<8x16xf32>
    %1525 = arith.addf %1514, %1524 : vector<8x16xf32>
    %1526 = vector.broadcast %147 : vector<1x16xf32> to vector<8x16xf32>
    %1527 = vector.broadcast %1502 : vector<8x1xf32> to vector<8x16xf32>
    %1528 = arith.cmpf oeq, %1526, %1527 : vector<8x16xf32>
    %cst_270 = arith.constant 1.000000e+00 : f32
    %1529 = vector.broadcast %cst_270 : f32 to vector<8x1xf32>
    %1530 = arith.subf %1529, %1503 : vector<8x1xf32>
    %cst_271 = arith.constant 0.000000e+00 : f32
    %1531 = vector.shape_cast %1530 : vector<8x1xf32> to vector<8x1xf32>
    %1532 = vector.broadcast %1531 : vector<8x1xf32> to vector<8x16xf32>
    %1533 = vector.broadcast %cst_271 : f32 to vector<8x16xf32>
    %1534 = arith.select %1528, %1532, %1533 : vector<8x16xi1>, vector<8x16xf32>
    %cst_272 = arith.constant 1.000000e+00 : f32
    %1535 = vector.broadcast %cst_272 : f32 to vector<8x1xf32>
    %1536 = arith.addf %1502, %1535 : vector<8x1xf32>
    %1537 = vector.broadcast %147 : vector<1x16xf32> to vector<8x16xf32>
    %1538 = vector.broadcast %1536 : vector<8x1xf32> to vector<8x16xf32>
    %1539 = arith.cmpf oeq, %1537, %1538 : vector<8x16xf32>
    %cst_273 = arith.constant 0.000000e+00 : f32
    %1540 = vector.shape_cast %1503 : vector<8x1xf32> to vector<8x1xf32>
    %1541 = vector.broadcast %1540 : vector<8x1xf32> to vector<8x16xf32>
    %1542 = vector.broadcast %cst_273 : f32 to vector<8x16xf32>
    %1543 = arith.select %1539, %1541, %1542 : vector<8x16xi1>, vector<8x16xf32>
    %1544 = arith.addf %1534, %1543 : vector<8x16xf32>
    %1545 = arith.mulf %1525, %1544 : vector<8x16xf32>
    %1546 = arith.addf %1495, %1545 : vector<8x16xf32>
    %1547 = vector.extract_strided_slice %133 {offsets = [24, 0], sizes = [8, 4], strides = [1, 1]} : vector<64x4xf32> to vector<8x4xf32>
    %1548 = vector.extract_strided_slice %1006 {offsets = [0, 12], sizes = [8, 1], strides = [1, 1]} : vector<8x32xf32> to vector<8x1xf32>
    %1549 = arith.addf %1439, %1548 : vector<8x1xf32>
    %1550 = vector.extract_strided_slice %1006 {offsets = [0, 13], sizes = [8, 1], strides = [1, 1]} : vector<8x32xf32> to vector<8x1xf32>
    %1551 = arith.addf %1444, %1550 : vector<8x1xf32>
    %1552 = math.floor %1549 : vector<8x1xf32>
    %1553 = arith.subf %1549, %1552 : vector<8x1xf32>
    %1554 = math.floor %1551 : vector<8x1xf32>
    %1555 = arith.subf %1551, %1554 : vector<8x1xf32>
    %1556 = vector.extract_strided_slice %1547 {offsets = [0, 2], sizes = [8, 1], strides = [1, 1]} : vector<8x4xf32> to vector<8x1xf32>
    %1557 = vector.broadcast %150 : vector<1x16xf32> to vector<8x16xf32>
    %1558 = vector.broadcast %1552 : vector<8x1xf32> to vector<8x16xf32>
    %1559 = arith.cmpf oeq, %1557, %1558 : vector<8x16xf32>
    %cst_274 = arith.constant 1.000000e+00 : f32
    %1560 = vector.broadcast %cst_274 : f32 to vector<8x1xf32>
    %1561 = arith.subf %1560, %1553 : vector<8x1xf32>
    %1562 = arith.mulf %1561, %1556 : vector<8x1xf32>
    %cst_275 = arith.constant 0.000000e+00 : f32
    %1563 = vector.shape_cast %1562 : vector<8x1xf32> to vector<8x1xf32>
    %1564 = vector.broadcast %1563 : vector<8x1xf32> to vector<8x16xf32>
    %1565 = vector.broadcast %cst_275 : f32 to vector<8x16xf32>
    %1566 = arith.select %1559, %1564, %1565 : vector<8x16xi1>, vector<8x16xf32>
    %cst_276 = arith.constant 1.000000e+00 : f32
    %1567 = vector.broadcast %cst_276 : f32 to vector<8x1xf32>
    %1568 = arith.addf %1552, %1567 : vector<8x1xf32>
    %1569 = vector.broadcast %150 : vector<1x16xf32> to vector<8x16xf32>
    %1570 = vector.broadcast %1568 : vector<8x1xf32> to vector<8x16xf32>
    %1571 = arith.cmpf oeq, %1569, %1570 : vector<8x16xf32>
    %1572 = arith.mulf %1553, %1556 : vector<8x1xf32>
    %cst_277 = arith.constant 0.000000e+00 : f32
    %1573 = vector.shape_cast %1572 : vector<8x1xf32> to vector<8x1xf32>
    %1574 = vector.broadcast %1573 : vector<8x1xf32> to vector<8x16xf32>
    %1575 = vector.broadcast %cst_277 : f32 to vector<8x16xf32>
    %1576 = arith.select %1571, %1574, %1575 : vector<8x16xi1>, vector<8x16xf32>
    %1577 = arith.addf %1566, %1576 : vector<8x16xf32>
    %1578 = vector.broadcast %147 : vector<1x16xf32> to vector<8x16xf32>
    %1579 = vector.broadcast %1554 : vector<8x1xf32> to vector<8x16xf32>
    %1580 = arith.cmpf oeq, %1578, %1579 : vector<8x16xf32>
    %cst_278 = arith.constant 1.000000e+00 : f32
    %1581 = vector.broadcast %cst_278 : f32 to vector<8x1xf32>
    %1582 = arith.subf %1581, %1555 : vector<8x1xf32>
    %cst_279 = arith.constant 0.000000e+00 : f32
    %1583 = vector.shape_cast %1582 : vector<8x1xf32> to vector<8x1xf32>
    %1584 = vector.broadcast %1583 : vector<8x1xf32> to vector<8x16xf32>
    %1585 = vector.broadcast %cst_279 : f32 to vector<8x16xf32>
    %1586 = arith.select %1580, %1584, %1585 : vector<8x16xi1>, vector<8x16xf32>
    %cst_280 = arith.constant 1.000000e+00 : f32
    %1587 = vector.broadcast %cst_280 : f32 to vector<8x1xf32>
    %1588 = arith.addf %1554, %1587 : vector<8x1xf32>
    %1589 = vector.broadcast %147 : vector<1x16xf32> to vector<8x16xf32>
    %1590 = vector.broadcast %1588 : vector<8x1xf32> to vector<8x16xf32>
    %1591 = arith.cmpf oeq, %1589, %1590 : vector<8x16xf32>
    %cst_281 = arith.constant 0.000000e+00 : f32
    %1592 = vector.shape_cast %1555 : vector<8x1xf32> to vector<8x1xf32>
    %1593 = vector.broadcast %1592 : vector<8x1xf32> to vector<8x16xf32>
    %1594 = vector.broadcast %cst_281 : f32 to vector<8x16xf32>
    %1595 = arith.select %1591, %1593, %1594 : vector<8x16xi1>, vector<8x16xf32>
    %1596 = arith.addf %1586, %1595 : vector<8x16xf32>
    %1597 = arith.mulf %1577, %1596 : vector<8x16xf32>
    %1598 = vector.extract_strided_slice %1006 {offsets = [0, 14], sizes = [8, 1], strides = [1, 1]} : vector<8x32xf32> to vector<8x1xf32>
    %1599 = arith.addf %1439, %1598 : vector<8x1xf32>
    %1600 = vector.extract_strided_slice %1006 {offsets = [0, 15], sizes = [8, 1], strides = [1, 1]} : vector<8x32xf32> to vector<8x1xf32>
    %1601 = arith.addf %1444, %1600 : vector<8x1xf32>
    %1602 = math.floor %1599 : vector<8x1xf32>
    %1603 = arith.subf %1599, %1602 : vector<8x1xf32>
    %1604 = math.floor %1601 : vector<8x1xf32>
    %1605 = arith.subf %1601, %1604 : vector<8x1xf32>
    %1606 = vector.extract_strided_slice %1547 {offsets = [0, 3], sizes = [8, 1], strides = [1, 1]} : vector<8x4xf32> to vector<8x1xf32>
    %1607 = vector.broadcast %150 : vector<1x16xf32> to vector<8x16xf32>
    %1608 = vector.broadcast %1602 : vector<8x1xf32> to vector<8x16xf32>
    %1609 = arith.cmpf oeq, %1607, %1608 : vector<8x16xf32>
    %cst_282 = arith.constant 1.000000e+00 : f32
    %1610 = vector.broadcast %cst_282 : f32 to vector<8x1xf32>
    %1611 = arith.subf %1610, %1603 : vector<8x1xf32>
    %1612 = arith.mulf %1611, %1606 : vector<8x1xf32>
    %cst_283 = arith.constant 0.000000e+00 : f32
    %1613 = vector.shape_cast %1612 : vector<8x1xf32> to vector<8x1xf32>
    %1614 = vector.broadcast %1613 : vector<8x1xf32> to vector<8x16xf32>
    %1615 = vector.broadcast %cst_283 : f32 to vector<8x16xf32>
    %1616 = arith.select %1609, %1614, %1615 : vector<8x16xi1>, vector<8x16xf32>
    %cst_284 = arith.constant 1.000000e+00 : f32
    %1617 = vector.broadcast %cst_284 : f32 to vector<8x1xf32>
    %1618 = arith.addf %1602, %1617 : vector<8x1xf32>
    %1619 = vector.broadcast %150 : vector<1x16xf32> to vector<8x16xf32>
    %1620 = vector.broadcast %1618 : vector<8x1xf32> to vector<8x16xf32>
    %1621 = arith.cmpf oeq, %1619, %1620 : vector<8x16xf32>
    %1622 = arith.mulf %1603, %1606 : vector<8x1xf32>
    %cst_285 = arith.constant 0.000000e+00 : f32
    %1623 = vector.shape_cast %1622 : vector<8x1xf32> to vector<8x1xf32>
    %1624 = vector.broadcast %1623 : vector<8x1xf32> to vector<8x16xf32>
    %1625 = vector.broadcast %cst_285 : f32 to vector<8x16xf32>
    %1626 = arith.select %1621, %1624, %1625 : vector<8x16xi1>, vector<8x16xf32>
    %1627 = arith.addf %1616, %1626 : vector<8x16xf32>
    %1628 = vector.broadcast %147 : vector<1x16xf32> to vector<8x16xf32>
    %1629 = vector.broadcast %1604 : vector<8x1xf32> to vector<8x16xf32>
    %1630 = arith.cmpf oeq, %1628, %1629 : vector<8x16xf32>
    %cst_286 = arith.constant 1.000000e+00 : f32
    %1631 = vector.broadcast %cst_286 : f32 to vector<8x1xf32>
    %1632 = arith.subf %1631, %1605 : vector<8x1xf32>
    %cst_287 = arith.constant 0.000000e+00 : f32
    %1633 = vector.shape_cast %1632 : vector<8x1xf32> to vector<8x1xf32>
    %1634 = vector.broadcast %1633 : vector<8x1xf32> to vector<8x16xf32>
    %1635 = vector.broadcast %cst_287 : f32 to vector<8x16xf32>
    %1636 = arith.select %1630, %1634, %1635 : vector<8x16xi1>, vector<8x16xf32>
    %cst_288 = arith.constant 1.000000e+00 : f32
    %1637 = vector.broadcast %cst_288 : f32 to vector<8x1xf32>
    %1638 = arith.addf %1604, %1637 : vector<8x1xf32>
    %1639 = vector.broadcast %147 : vector<1x16xf32> to vector<8x16xf32>
    %1640 = vector.broadcast %1638 : vector<8x1xf32> to vector<8x16xf32>
    %1641 = arith.cmpf oeq, %1639, %1640 : vector<8x16xf32>
    %cst_289 = arith.constant 0.000000e+00 : f32
    %1642 = vector.shape_cast %1605 : vector<8x1xf32> to vector<8x1xf32>
    %1643 = vector.broadcast %1642 : vector<8x1xf32> to vector<8x16xf32>
    %1644 = vector.broadcast %cst_289 : f32 to vector<8x16xf32>
    %1645 = arith.select %1641, %1643, %1644 : vector<8x16xi1>, vector<8x16xf32>
    %1646 = arith.addf %1636, %1645 : vector<8x16xf32>
    %1647 = arith.mulf %1627, %1646 : vector<8x16xf32>
    %1648 = arith.addf %1597, %1647 : vector<8x16xf32>
    %1649 = vector.extract_strided_slice %133 {offsets = [40, 0], sizes = [8, 4], strides = [1, 1]} : vector<64x4xf32> to vector<8x4xf32>
    %1650 = vector.extract_strided_slice %1006 {offsets = [0, 20], sizes = [8, 1], strides = [1, 1]} : vector<8x32xf32> to vector<8x1xf32>
    %1651 = arith.addf %1439, %1650 : vector<8x1xf32>
    %1652 = vector.extract_strided_slice %1006 {offsets = [0, 21], sizes = [8, 1], strides = [1, 1]} : vector<8x32xf32> to vector<8x1xf32>
    %1653 = arith.addf %1444, %1652 : vector<8x1xf32>
    %1654 = math.floor %1651 : vector<8x1xf32>
    %1655 = arith.subf %1651, %1654 : vector<8x1xf32>
    %1656 = math.floor %1653 : vector<8x1xf32>
    %1657 = arith.subf %1653, %1656 : vector<8x1xf32>
    %1658 = vector.extract_strided_slice %1649 {offsets = [0, 2], sizes = [8, 1], strides = [1, 1]} : vector<8x4xf32> to vector<8x1xf32>
    %1659 = vector.broadcast %150 : vector<1x16xf32> to vector<8x16xf32>
    %1660 = vector.broadcast %1654 : vector<8x1xf32> to vector<8x16xf32>
    %1661 = arith.cmpf oeq, %1659, %1660 : vector<8x16xf32>
    %cst_290 = arith.constant 1.000000e+00 : f32
    %1662 = vector.broadcast %cst_290 : f32 to vector<8x1xf32>
    %1663 = arith.subf %1662, %1655 : vector<8x1xf32>
    %1664 = arith.mulf %1663, %1658 : vector<8x1xf32>
    %cst_291 = arith.constant 0.000000e+00 : f32
    %1665 = vector.shape_cast %1664 : vector<8x1xf32> to vector<8x1xf32>
    %1666 = vector.broadcast %1665 : vector<8x1xf32> to vector<8x16xf32>
    %1667 = vector.broadcast %cst_291 : f32 to vector<8x16xf32>
    %1668 = arith.select %1661, %1666, %1667 : vector<8x16xi1>, vector<8x16xf32>
    %cst_292 = arith.constant 1.000000e+00 : f32
    %1669 = vector.broadcast %cst_292 : f32 to vector<8x1xf32>
    %1670 = arith.addf %1654, %1669 : vector<8x1xf32>
    %1671 = vector.broadcast %150 : vector<1x16xf32> to vector<8x16xf32>
    %1672 = vector.broadcast %1670 : vector<8x1xf32> to vector<8x16xf32>
    %1673 = arith.cmpf oeq, %1671, %1672 : vector<8x16xf32>
    %1674 = arith.mulf %1655, %1658 : vector<8x1xf32>
    %cst_293 = arith.constant 0.000000e+00 : f32
    %1675 = vector.shape_cast %1674 : vector<8x1xf32> to vector<8x1xf32>
    %1676 = vector.broadcast %1675 : vector<8x1xf32> to vector<8x16xf32>
    %1677 = vector.broadcast %cst_293 : f32 to vector<8x16xf32>
    %1678 = arith.select %1673, %1676, %1677 : vector<8x16xi1>, vector<8x16xf32>
    %1679 = arith.addf %1668, %1678 : vector<8x16xf32>
    %1680 = vector.broadcast %147 : vector<1x16xf32> to vector<8x16xf32>
    %1681 = vector.broadcast %1656 : vector<8x1xf32> to vector<8x16xf32>
    %1682 = arith.cmpf oeq, %1680, %1681 : vector<8x16xf32>
    %cst_294 = arith.constant 1.000000e+00 : f32
    %1683 = vector.broadcast %cst_294 : f32 to vector<8x1xf32>
    %1684 = arith.subf %1683, %1657 : vector<8x1xf32>
    %cst_295 = arith.constant 0.000000e+00 : f32
    %1685 = vector.shape_cast %1684 : vector<8x1xf32> to vector<8x1xf32>
    %1686 = vector.broadcast %1685 : vector<8x1xf32> to vector<8x16xf32>
    %1687 = vector.broadcast %cst_295 : f32 to vector<8x16xf32>
    %1688 = arith.select %1682, %1686, %1687 : vector<8x16xi1>, vector<8x16xf32>
    %cst_296 = arith.constant 1.000000e+00 : f32
    %1689 = vector.broadcast %cst_296 : f32 to vector<8x1xf32>
    %1690 = arith.addf %1656, %1689 : vector<8x1xf32>
    %1691 = vector.broadcast %147 : vector<1x16xf32> to vector<8x16xf32>
    %1692 = vector.broadcast %1690 : vector<8x1xf32> to vector<8x16xf32>
    %1693 = arith.cmpf oeq, %1691, %1692 : vector<8x16xf32>
    %cst_297 = arith.constant 0.000000e+00 : f32
    %1694 = vector.shape_cast %1657 : vector<8x1xf32> to vector<8x1xf32>
    %1695 = vector.broadcast %1694 : vector<8x1xf32> to vector<8x16xf32>
    %1696 = vector.broadcast %cst_297 : f32 to vector<8x16xf32>
    %1697 = arith.select %1693, %1695, %1696 : vector<8x16xi1>, vector<8x16xf32>
    %1698 = arith.addf %1688, %1697 : vector<8x16xf32>
    %1699 = arith.mulf %1679, %1698 : vector<8x16xf32>
    %1700 = vector.extract_strided_slice %1006 {offsets = [0, 22], sizes = [8, 1], strides = [1, 1]} : vector<8x32xf32> to vector<8x1xf32>
    %1701 = arith.addf %1439, %1700 : vector<8x1xf32>
    %1702 = vector.extract_strided_slice %1006 {offsets = [0, 23], sizes = [8, 1], strides = [1, 1]} : vector<8x32xf32> to vector<8x1xf32>
    %1703 = arith.addf %1444, %1702 : vector<8x1xf32>
    %1704 = math.floor %1701 : vector<8x1xf32>
    %1705 = arith.subf %1701, %1704 : vector<8x1xf32>
    %1706 = math.floor %1703 : vector<8x1xf32>
    %1707 = arith.subf %1703, %1706 : vector<8x1xf32>
    %1708 = vector.extract_strided_slice %1649 {offsets = [0, 3], sizes = [8, 1], strides = [1, 1]} : vector<8x4xf32> to vector<8x1xf32>
    %1709 = vector.broadcast %150 : vector<1x16xf32> to vector<8x16xf32>
    %1710 = vector.broadcast %1704 : vector<8x1xf32> to vector<8x16xf32>
    %1711 = arith.cmpf oeq, %1709, %1710 : vector<8x16xf32>
    %cst_298 = arith.constant 1.000000e+00 : f32
    %1712 = vector.broadcast %cst_298 : f32 to vector<8x1xf32>
    %1713 = arith.subf %1712, %1705 : vector<8x1xf32>
    %1714 = arith.mulf %1713, %1708 : vector<8x1xf32>
    %cst_299 = arith.constant 0.000000e+00 : f32
    %1715 = vector.shape_cast %1714 : vector<8x1xf32> to vector<8x1xf32>
    %1716 = vector.broadcast %1715 : vector<8x1xf32> to vector<8x16xf32>
    %1717 = vector.broadcast %cst_299 : f32 to vector<8x16xf32>
    %1718 = arith.select %1711, %1716, %1717 : vector<8x16xi1>, vector<8x16xf32>
    %cst_300 = arith.constant 1.000000e+00 : f32
    %1719 = vector.broadcast %cst_300 : f32 to vector<8x1xf32>
    %1720 = arith.addf %1704, %1719 : vector<8x1xf32>
    %1721 = vector.broadcast %150 : vector<1x16xf32> to vector<8x16xf32>
    %1722 = vector.broadcast %1720 : vector<8x1xf32> to vector<8x16xf32>
    %1723 = arith.cmpf oeq, %1721, %1722 : vector<8x16xf32>
    %1724 = arith.mulf %1705, %1708 : vector<8x1xf32>
    %cst_301 = arith.constant 0.000000e+00 : f32
    %1725 = vector.shape_cast %1724 : vector<8x1xf32> to vector<8x1xf32>
    %1726 = vector.broadcast %1725 : vector<8x1xf32> to vector<8x16xf32>
    %1727 = vector.broadcast %cst_301 : f32 to vector<8x16xf32>
    %1728 = arith.select %1723, %1726, %1727 : vector<8x16xi1>, vector<8x16xf32>
    %1729 = arith.addf %1718, %1728 : vector<8x16xf32>
    %1730 = vector.broadcast %147 : vector<1x16xf32> to vector<8x16xf32>
    %1731 = vector.broadcast %1706 : vector<8x1xf32> to vector<8x16xf32>
    %1732 = arith.cmpf oeq, %1730, %1731 : vector<8x16xf32>
    %cst_302 = arith.constant 1.000000e+00 : f32
    %1733 = vector.broadcast %cst_302 : f32 to vector<8x1xf32>
    %1734 = arith.subf %1733, %1707 : vector<8x1xf32>
    %cst_303 = arith.constant 0.000000e+00 : f32
    %1735 = vector.shape_cast %1734 : vector<8x1xf32> to vector<8x1xf32>
    %1736 = vector.broadcast %1735 : vector<8x1xf32> to vector<8x16xf32>
    %1737 = vector.broadcast %cst_303 : f32 to vector<8x16xf32>
    %1738 = arith.select %1732, %1736, %1737 : vector<8x16xi1>, vector<8x16xf32>
    %cst_304 = arith.constant 1.000000e+00 : f32
    %1739 = vector.broadcast %cst_304 : f32 to vector<8x1xf32>
    %1740 = arith.addf %1706, %1739 : vector<8x1xf32>
    %1741 = vector.broadcast %147 : vector<1x16xf32> to vector<8x16xf32>
    %1742 = vector.broadcast %1740 : vector<8x1xf32> to vector<8x16xf32>
    %1743 = arith.cmpf oeq, %1741, %1742 : vector<8x16xf32>
    %cst_305 = arith.constant 0.000000e+00 : f32
    %1744 = vector.shape_cast %1707 : vector<8x1xf32> to vector<8x1xf32>
    %1745 = vector.broadcast %1744 : vector<8x1xf32> to vector<8x16xf32>
    %1746 = vector.broadcast %cst_305 : f32 to vector<8x16xf32>
    %1747 = arith.select %1743, %1745, %1746 : vector<8x16xi1>, vector<8x16xf32>
    %1748 = arith.addf %1738, %1747 : vector<8x16xf32>
    %1749 = arith.mulf %1729, %1748 : vector<8x16xf32>
    %1750 = arith.addf %1699, %1749 : vector<8x16xf32>
    %1751 = vector.extract_strided_slice %133 {offsets = [56, 0], sizes = [8, 4], strides = [1, 1]} : vector<64x4xf32> to vector<8x4xf32>
    %1752 = vector.extract_strided_slice %1006 {offsets = [0, 28], sizes = [8, 1], strides = [1, 1]} : vector<8x32xf32> to vector<8x1xf32>
    %1753 = arith.addf %1439, %1752 : vector<8x1xf32>
    %1754 = vector.extract_strided_slice %1006 {offsets = [0, 29], sizes = [8, 1], strides = [1, 1]} : vector<8x32xf32> to vector<8x1xf32>
    %1755 = arith.addf %1444, %1754 : vector<8x1xf32>
    %1756 = math.floor %1753 : vector<8x1xf32>
    %1757 = arith.subf %1753, %1756 : vector<8x1xf32>
    %1758 = math.floor %1755 : vector<8x1xf32>
    %1759 = arith.subf %1755, %1758 : vector<8x1xf32>
    %1760 = vector.extract_strided_slice %1751 {offsets = [0, 2], sizes = [8, 1], strides = [1, 1]} : vector<8x4xf32> to vector<8x1xf32>
    %1761 = vector.broadcast %150 : vector<1x16xf32> to vector<8x16xf32>
    %1762 = vector.broadcast %1756 : vector<8x1xf32> to vector<8x16xf32>
    %1763 = arith.cmpf oeq, %1761, %1762 : vector<8x16xf32>
    %cst_306 = arith.constant 1.000000e+00 : f32
    %1764 = vector.broadcast %cst_306 : f32 to vector<8x1xf32>
    %1765 = arith.subf %1764, %1757 : vector<8x1xf32>
    %1766 = arith.mulf %1765, %1760 : vector<8x1xf32>
    %cst_307 = arith.constant 0.000000e+00 : f32
    %1767 = vector.shape_cast %1766 : vector<8x1xf32> to vector<8x1xf32>
    %1768 = vector.broadcast %1767 : vector<8x1xf32> to vector<8x16xf32>
    %1769 = vector.broadcast %cst_307 : f32 to vector<8x16xf32>
    %1770 = arith.select %1763, %1768, %1769 : vector<8x16xi1>, vector<8x16xf32>
    %cst_308 = arith.constant 1.000000e+00 : f32
    %1771 = vector.broadcast %cst_308 : f32 to vector<8x1xf32>
    %1772 = arith.addf %1756, %1771 : vector<8x1xf32>
    %1773 = vector.broadcast %150 : vector<1x16xf32> to vector<8x16xf32>
    %1774 = vector.broadcast %1772 : vector<8x1xf32> to vector<8x16xf32>
    %1775 = arith.cmpf oeq, %1773, %1774 : vector<8x16xf32>
    %1776 = arith.mulf %1757, %1760 : vector<8x1xf32>
    %cst_309 = arith.constant 0.000000e+00 : f32
    %1777 = vector.shape_cast %1776 : vector<8x1xf32> to vector<8x1xf32>
    %1778 = vector.broadcast %1777 : vector<8x1xf32> to vector<8x16xf32>
    %1779 = vector.broadcast %cst_309 : f32 to vector<8x16xf32>
    %1780 = arith.select %1775, %1778, %1779 : vector<8x16xi1>, vector<8x16xf32>
    %1781 = arith.addf %1770, %1780 : vector<8x16xf32>
    %1782 = vector.broadcast %147 : vector<1x16xf32> to vector<8x16xf32>
    %1783 = vector.broadcast %1758 : vector<8x1xf32> to vector<8x16xf32>
    %1784 = arith.cmpf oeq, %1782, %1783 : vector<8x16xf32>
    %cst_310 = arith.constant 1.000000e+00 : f32
    %1785 = vector.broadcast %cst_310 : f32 to vector<8x1xf32>
    %1786 = arith.subf %1785, %1759 : vector<8x1xf32>
    %cst_311 = arith.constant 0.000000e+00 : f32
    %1787 = vector.shape_cast %1786 : vector<8x1xf32> to vector<8x1xf32>
    %1788 = vector.broadcast %1787 : vector<8x1xf32> to vector<8x16xf32>
    %1789 = vector.broadcast %cst_311 : f32 to vector<8x16xf32>
    %1790 = arith.select %1784, %1788, %1789 : vector<8x16xi1>, vector<8x16xf32>
    %cst_312 = arith.constant 1.000000e+00 : f32
    %1791 = vector.broadcast %cst_312 : f32 to vector<8x1xf32>
    %1792 = arith.addf %1758, %1791 : vector<8x1xf32>
    %1793 = vector.broadcast %147 : vector<1x16xf32> to vector<8x16xf32>
    %1794 = vector.broadcast %1792 : vector<8x1xf32> to vector<8x16xf32>
    %1795 = arith.cmpf oeq, %1793, %1794 : vector<8x16xf32>
    %cst_313 = arith.constant 0.000000e+00 : f32
    %1796 = vector.shape_cast %1759 : vector<8x1xf32> to vector<8x1xf32>
    %1797 = vector.broadcast %1796 : vector<8x1xf32> to vector<8x16xf32>
    %1798 = vector.broadcast %cst_313 : f32 to vector<8x16xf32>
    %1799 = arith.select %1795, %1797, %1798 : vector<8x16xi1>, vector<8x16xf32>
    %1800 = arith.addf %1790, %1799 : vector<8x16xf32>
    %1801 = arith.mulf %1781, %1800 : vector<8x16xf32>
    %1802 = vector.extract_strided_slice %1006 {offsets = [0, 30], sizes = [8, 1], strides = [1, 1]} : vector<8x32xf32> to vector<8x1xf32>
    %1803 = arith.addf %1439, %1802 : vector<8x1xf32>
    %1804 = vector.extract_strided_slice %1006 {offsets = [0, 31], sizes = [8, 1], strides = [1, 1]} : vector<8x32xf32> to vector<8x1xf32>
    %1805 = arith.addf %1444, %1804 : vector<8x1xf32>
    %1806 = math.floor %1803 : vector<8x1xf32>
    %1807 = arith.subf %1803, %1806 : vector<8x1xf32>
    %1808 = math.floor %1805 : vector<8x1xf32>
    %1809 = arith.subf %1805, %1808 : vector<8x1xf32>
    %1810 = vector.extract_strided_slice %1751 {offsets = [0, 3], sizes = [8, 1], strides = [1, 1]} : vector<8x4xf32> to vector<8x1xf32>
    %1811 = vector.broadcast %150 : vector<1x16xf32> to vector<8x16xf32>
    %1812 = vector.broadcast %1806 : vector<8x1xf32> to vector<8x16xf32>
    %1813 = arith.cmpf oeq, %1811, %1812 : vector<8x16xf32>
    %cst_314 = arith.constant 1.000000e+00 : f32
    %1814 = vector.broadcast %cst_314 : f32 to vector<8x1xf32>
    %1815 = arith.subf %1814, %1807 : vector<8x1xf32>
    %1816 = arith.mulf %1815, %1810 : vector<8x1xf32>
    %cst_315 = arith.constant 0.000000e+00 : f32
    %1817 = vector.shape_cast %1816 : vector<8x1xf32> to vector<8x1xf32>
    %1818 = vector.broadcast %1817 : vector<8x1xf32> to vector<8x16xf32>
    %1819 = vector.broadcast %cst_315 : f32 to vector<8x16xf32>
    %1820 = arith.select %1813, %1818, %1819 : vector<8x16xi1>, vector<8x16xf32>
    %cst_316 = arith.constant 1.000000e+00 : f32
    %1821 = vector.broadcast %cst_316 : f32 to vector<8x1xf32>
    %1822 = arith.addf %1806, %1821 : vector<8x1xf32>
    %1823 = vector.broadcast %150 : vector<1x16xf32> to vector<8x16xf32>
    %1824 = vector.broadcast %1822 : vector<8x1xf32> to vector<8x16xf32>
    %1825 = arith.cmpf oeq, %1823, %1824 : vector<8x16xf32>
    %1826 = arith.mulf %1807, %1810 : vector<8x1xf32>
    %cst_317 = arith.constant 0.000000e+00 : f32
    %1827 = vector.shape_cast %1826 : vector<8x1xf32> to vector<8x1xf32>
    %1828 = vector.broadcast %1827 : vector<8x1xf32> to vector<8x16xf32>
    %1829 = vector.broadcast %cst_317 : f32 to vector<8x16xf32>
    %1830 = arith.select %1825, %1828, %1829 : vector<8x16xi1>, vector<8x16xf32>
    %1831 = arith.addf %1820, %1830 : vector<8x16xf32>
    %1832 = vector.broadcast %147 : vector<1x16xf32> to vector<8x16xf32>
    %1833 = vector.broadcast %1808 : vector<8x1xf32> to vector<8x16xf32>
    %1834 = arith.cmpf oeq, %1832, %1833 : vector<8x16xf32>
    %cst_318 = arith.constant 1.000000e+00 : f32
    %1835 = vector.broadcast %cst_318 : f32 to vector<8x1xf32>
    %1836 = arith.subf %1835, %1809 : vector<8x1xf32>
    %cst_319 = arith.constant 0.000000e+00 : f32
    %1837 = vector.shape_cast %1836 : vector<8x1xf32> to vector<8x1xf32>
    %1838 = vector.broadcast %1837 : vector<8x1xf32> to vector<8x16xf32>
    %1839 = vector.broadcast %cst_319 : f32 to vector<8x16xf32>
    %1840 = arith.select %1834, %1838, %1839 : vector<8x16xi1>, vector<8x16xf32>
    %cst_320 = arith.constant 1.000000e+00 : f32
    %1841 = vector.broadcast %cst_320 : f32 to vector<8x1xf32>
    %1842 = arith.addf %1808, %1841 : vector<8x1xf32>
    %1843 = vector.broadcast %147 : vector<1x16xf32> to vector<8x16xf32>
    %1844 = vector.broadcast %1842 : vector<8x1xf32> to vector<8x16xf32>
    %1845 = arith.cmpf oeq, %1843, %1844 : vector<8x16xf32>
    %cst_321 = arith.constant 0.000000e+00 : f32
    %1846 = vector.shape_cast %1809 : vector<8x1xf32> to vector<8x1xf32>
    %1847 = vector.broadcast %1846 : vector<8x1xf32> to vector<8x16xf32>
    %1848 = vector.broadcast %cst_321 : f32 to vector<8x16xf32>
    %1849 = arith.select %1845, %1847, %1848 : vector<8x16xi1>, vector<8x16xf32>
    %1850 = arith.addf %1840, %1849 : vector<8x16xf32>
    %1851 = arith.mulf %1831, %1850 : vector<8x16xf32>
    %1852 = arith.addf %1801, %1851 : vector<8x16xf32>
    %1853 = tpu.concatenate %1546, %1648, %1750, %1852 in 0 : vector<8x16xf32>, vector<8x16xf32>, vector<8x16xf32>, vector<8x16xf32> -> vector<32x16xf32>
    %cst_322 = arith.constant dense<0.000000e+00> : vector<32x32xf32>
    %1854 = tpu.matmul %1853, %1434, %cst_322 {dimension_numbers = #tpu.dot_dimension_numbers<[1], [0], [0], [1], [0, 0, 1, 1], [], []>} : vector<32x16xf32>, vector<16x32xf32>, vector<32x32xf32> -> vector<32x32xf32>
    %1855 = vector.extract_strided_slice %1854 {offsets = [0, 0], sizes = [8, 8], strides = [1, 1]} : vector<32x32xf32> to vector<8x8xf32>
    %1856 = vector.extract_strided_slice %1854 {offsets = [8, 8], sizes = [8, 8], strides = [1, 1]} : vector<32x32xf32> to vector<8x8xf32>
    %1857 = vector.extract_strided_slice %1854 {offsets = [16, 16], sizes = [8, 8], strides = [1, 1]} : vector<32x32xf32> to vector<8x8xf32>
    %1858 = vector.extract_strided_slice %1854 {offsets = [24, 24], sizes = [8, 8], strides = [1, 1]} : vector<32x32xf32> to vector<8x8xf32>
    %1859 = tpu.concatenate %1855, %1856, %1857, %1858 in 1 : vector<8x8xf32>, vector<8x8xf32>, vector<8x8xf32>, vector<8x8xf32> -> vector<8x32xf32>
    %1860 = arith.addf %1433, %1859 : vector<8x32xf32>
    %1861 = tpu.concatenate %1005, %1860 in 0 : vector<8x32xf32>, vector<8x32xf32> -> vector<16x32xf32>
    %c128 = arith.constant 128 : index
    %c0_323 = arith.constant 0 : index
    %1862 = vector.load %arg4[%c128, %c0_323] : memref<272x128xf32, #tpu.memory_space<vmem>>, vector<32x32xf32>
    %cst_324 = arith.constant dense<0.000000e+00> : vector<16x32xf32>
    %1863 = tpu.matmul %1861, %1862, %cst_324 {dimension_numbers = #tpu.dot_dimension_numbers<[1], [0], [0], [1], [0, 0, 1, 1], [], []>} : vector<16x32xf32>, vector<32x32xf32>, vector<16x32xf32> -> vector<16x32xf32>
    %c262 = arith.constant 262 : index
    %c0_325 = arith.constant 0 : index
    %1864 = vector.load %arg4[%c262, %c0_325] : memref<272x128xf32, #tpu.memory_space<vmem>>, vector<1x32xf32>
    %1865 = vector.broadcast %1864 : vector<1x32xf32> to vector<16x32xf32>
    %1866 = arith.addf %1863, %1865 : vector<16x32xf32>
    %1867 = arith.addf %104, %1866 : vector<16x32xf32>
    %c263 = arith.constant 263 : index
    %c0_326 = arith.constant 0 : index
    %1868 = vector.load %arg4[%c263, %c0_326] : memref<272x128xf32, #tpu.memory_space<vmem>>, vector<1x32xf32>
    %c264 = arith.constant 264 : index
    %c0_327 = arith.constant 0 : index
    %1869 = vector.load %arg4[%c264, %c0_327] : memref<272x128xf32, #tpu.memory_space<vmem>>, vector<1x32xf32>
    %cst_328 = arith.constant dense<0.000000e+00> : vector<16xf32>
    %1870 = vector.multi_reduction <add>, %1867, %cst_328 [1] : vector<16x32xf32> to vector<16xf32>
    %1871 = vector.shape_cast %1870 : vector<16xf32> to vector<16x1xf32>
    %cst_329 = arith.constant 3.200000e+01 : f32
    %1872 = vector.broadcast %cst_329 : f32 to vector<16x1xf32>
    %1873 = arith.divf %1871, %1872 : vector<16x1xf32>
    %1874 = vector.broadcast %1873 : vector<16x1xf32> to vector<16x32xf32>
    %1875 = arith.subf %1867, %1874 : vector<16x32xf32>
    %1876 = arith.mulf %1875, %1875 : vector<16x32xf32>
    %cst_330 = arith.constant dense<0.000000e+00> : vector<16xf32>
    %1877 = vector.multi_reduction <add>, %1876, %cst_330 [1] : vector<16x32xf32> to vector<16xf32>
    %1878 = vector.shape_cast %1877 : vector<16xf32> to vector<16x1xf32>
    %cst_331 = arith.constant 3.200000e+01 : f32
    %1879 = vector.broadcast %cst_331 : f32 to vector<16x1xf32>
    %1880 = arith.divf %1878, %1879 : vector<16x1xf32>
    %1881 = vector.broadcast %1873 : vector<16x1xf32> to vector<16x32xf32>
    %1882 = arith.subf %1867, %1881 : vector<16x32xf32>
    %cst_332 = arith.constant 9.99999974E-6 : f32
    %1883 = vector.broadcast %cst_332 : f32 to vector<16x1xf32>
    %1884 = arith.addf %1880, %1883 : vector<16x1xf32>
    %1885 = math.rsqrt %1884 : vector<16x1xf32>
    %1886 = vector.broadcast %1885 : vector<16x1xf32> to vector<16x32xf32>
    %1887 = arith.mulf %1882, %1886 : vector<16x32xf32>
    %1888 = vector.broadcast %1868 : vector<1x32xf32> to vector<16x32xf32>
    %1889 = arith.mulf %1887, %1888 : vector<16x32xf32>
    %1890 = vector.broadcast %1869 : vector<1x32xf32> to vector<16x32xf32>
    %1891 = arith.addf %1889, %1890 : vector<16x32xf32>
    %c160 = arith.constant 160 : index
    %c0_333 = arith.constant 0 : index
    %1892 = vector.load %arg4[%c160, %c0_333] : memref<272x128xf32, #tpu.memory_space<vmem>>, vector<32x64xf32>
    %cst_334 = arith.constant dense<0.000000e+00> : vector<16x64xf32>
    %1893 = tpu.matmul %1891, %1892, %cst_334 {dimension_numbers = #tpu.dot_dimension_numbers<[1], [0], [0], [1], [0, 0, 1, 1], [], []>} : vector<16x32xf32>, vector<32x64xf32>, vector<16x64xf32> -> vector<16x64xf32>
    %c265 = arith.constant 265 : index
    %c0_335 = arith.constant 0 : index
    %1894 = vector.load %arg4[%c265, %c0_335] : memref<272x128xf32, #tpu.memory_space<vmem>>, vector<1x64xf32>
    %1895 = vector.broadcast %1894 : vector<1x64xf32> to vector<16x64xf32>
    %1896 = arith.addf %1893, %1895 : vector<16x64xf32>
    %cst_336 = arith.constant 0.000000e+00 : f32
    %1897 = vector.broadcast %cst_336 : f32 to vector<16x64xf32>
    %1898 = arith.maximumf %1896, %1897 : vector<16x64xf32>
    %c192 = arith.constant 192 : index
    %c0_337 = arith.constant 0 : index
    %1899 = vector.load %arg4[%c192, %c0_337] : memref<272x128xf32, #tpu.memory_space<vmem>>, vector<64x32xf32>
    %cst_338 = arith.constant dense<0.000000e+00> : vector<16x32xf32>
    %1900 = tpu.matmul %1898, %1899, %cst_338 {dimension_numbers = #tpu.dot_dimension_numbers<[1], [0], [0], [1], [0, 0, 1, 1], [], []>} : vector<16x64xf32>, vector<64x32xf32>, vector<16x32xf32> -> vector<16x32xf32>
    %c266 = arith.constant 266 : index
    %c0_339 = arith.constant 0 : index
    %1901 = vector.load %arg4[%c266, %c0_339] : memref<272x128xf32, #tpu.memory_space<vmem>>, vector<1x32xf32>
    %1902 = vector.broadcast %1901 : vector<1x32xf32> to vector<16x32xf32>
    %1903 = arith.addf %1900, %1902 : vector<16x32xf32>
    %1904 = arith.addf %1891, %1903 : vector<16x32xf32>
    %c267 = arith.constant 267 : index
    %c0_340 = arith.constant 0 : index
    %1905 = vector.load %arg4[%c267, %c0_340] : memref<272x128xf32, #tpu.memory_space<vmem>>, vector<1x32xf32>
    %c268 = arith.constant 268 : index
    %c0_341 = arith.constant 0 : index
    %1906 = vector.load %arg4[%c268, %c0_341] : memref<272x128xf32, #tpu.memory_space<vmem>>, vector<1x32xf32>
    %cst_342 = arith.constant dense<0.000000e+00> : vector<16xf32>
    %1907 = vector.multi_reduction <add>, %1904, %cst_342 [1] : vector<16x32xf32> to vector<16xf32>
    %1908 = vector.shape_cast %1907 : vector<16xf32> to vector<16x1xf32>
    %cst_343 = arith.constant 3.200000e+01 : f32
    %1909 = vector.broadcast %cst_343 : f32 to vector<16x1xf32>
    %1910 = arith.divf %1908, %1909 : vector<16x1xf32>
    %1911 = vector.broadcast %1910 : vector<16x1xf32> to vector<16x32xf32>
    %1912 = arith.subf %1904, %1911 : vector<16x32xf32>
    %1913 = arith.mulf %1912, %1912 : vector<16x32xf32>
    %cst_344 = arith.constant dense<0.000000e+00> : vector<16xf32>
    %1914 = vector.multi_reduction <add>, %1913, %cst_344 [1] : vector<16x32xf32> to vector<16xf32>
    %1915 = vector.shape_cast %1914 : vector<16xf32> to vector<16x1xf32>
    %cst_345 = arith.constant 3.200000e+01 : f32
    %1916 = vector.broadcast %cst_345 : f32 to vector<16x1xf32>
    %1917 = arith.divf %1915, %1916 : vector<16x1xf32>
    %1918 = vector.broadcast %1910 : vector<16x1xf32> to vector<16x32xf32>
    %1919 = arith.subf %1904, %1918 : vector<16x32xf32>
    %cst_346 = arith.constant 9.99999974E-6 : f32
    %1920 = vector.broadcast %cst_346 : f32 to vector<16x1xf32>
    %1921 = arith.addf %1917, %1920 : vector<16x1xf32>
    %1922 = math.rsqrt %1921 : vector<16x1xf32>
    %1923 = vector.broadcast %1922 : vector<16x1xf32> to vector<16x32xf32>
    %1924 = arith.mulf %1919, %1923 : vector<16x32xf32>
    %1925 = vector.broadcast %1905 : vector<1x32xf32> to vector<16x32xf32>
    %1926 = arith.mulf %1924, %1925 : vector<16x32xf32>
    %1927 = vector.broadcast %1906 : vector<1x32xf32> to vector<16x32xf32>
    %1928 = arith.addf %1926, %1927 : vector<16x32xf32>
    %c0_347 = arith.constant 0 : index
    %c0_348 = arith.constant 0 : index
    %1929 = vector.load %arg5[%c0_347, %c0_348] : memref<16x32xf32, #tpu.memory_space<vmem>>, vector<16x32xf32>
    tpu.vector_store %arg5[%c0_347, %c0_348], %1928 {strides = array<i32>} : memref<16x32xf32, #tpu.memory_space<vmem>>, vector<16x32xf32>,
    return
  }
}

</mosaic_0001>

<bundles_post_ra>
// kernel: decoder_layer_forward.1
= control target key start
LH: loop header
LB: loop body
LE: loop exit
PB: predicated region body
PF: predicated region fallthrough
CT: control target
= control target key end

     0   :  { %10 = vsyncpa [#allocation3], 0  ;;  %s7684_s0 = inlined_call_operand.vmem [shape: f32[16,32], index: 0, kind: input, shape index: {}]   ;;  %s7685_s1 = inlined_call_operand.hbm [shape: f32[16,32], index: 1, kind: input, shape index: {}]   ;;  %s7686_s2 = inlined_call_operand.vmem [shape: f32[160,32], index: 2, kind: input, shape index: {}]   ;;  %s7687_s3 = inlined_call_operand.vmem [shape: f32[16,4], index: 3, kind: input, shape index: {}]   ;;  %s7688_s4 = inlined_call_operand.vmem [shape: f32[272,128], index: 4, kind: input, shape index: {}]   ;;  %s7689_s5 = inlined_call_operand.hbm [shape: f32[16,32], index: 5, kind: output, shape index: {}]  }
   0x1   :  { %11 = vsyncpa [#allocation4], 0  ;;  %s5384_s18 = smov [#allocation2]   ;;  %s5336_s22 = scalar_lea.hbm %s7685_s1, 256 }
   0x2   :  { %s19_s19 = sshll.u32 %s5384_s18, 4  ;;  %p5337_p0 = scmp.ne.s32.totalorder %s7685_s1, %s5336_s22  ;;  %s20_s19 = int_to_ptr.vmem [resolvable:$true] %s19_s19 }
   0x3   :  { %p5340_p1 = scmp.lt.u32.totalorder %s5336_s22, %s7685_s1 }
   0x5   :  { %p5342_p2 = pnand %p5340_p1, %p5337_p0 }
   0x7   :  { %5345 = shalt.err (!%p5342_p2)
}
   0x8   :  { %s5346_s27 = scalar_lea.vmem %s20_s19, 256  ;;  %p5351_p4 = scmp.lt.s32.totalorder %s20_s19, %s20_s19 }
   0x9   :  { %p5347_p3 = scmp.ne.s32.totalorder %s20_s19, %s5346_s27  ;;  %p5352_p5 = scmp.lt.s32.totalorder %s5346_s27, %s5346_s27 }
   0xb   :  { %p5353_p6 = por %p5352_p5, %p5351_p4 }
   0xd   :  { %p5354_p7 = pnand %p5353_p6, %p5347_p3 }
   0xf   :  { %5357 = shalt.err (!%p5354_p7)
}
  0x10   :  { %s5385_s28 = smov 128   ;;  %s5386_s29 = smov 8  }
  0x11   :  { %25 = dma.hbm_to_vmem [thread:$0]  %s7685_s1, 256, %s20_s19, [#allocation3], %s5385_s28, %s5385_s28, %s5386_s29  }
  0x12   :  { %5380 = dma.done.wait [#allocation3], 256  }
  0x13   :  { %5381 = vsyncadd [#allocation3], 4294967040  ;;  %v41_v0 = vld [vmem:[%s7688_s4] sm:$0xff]  ;;  %v42_v1 = vld [vmem:[%s7688_s4 + $0x8] sm:$0xff]  ;;  %vm50_vm0 = vcmask 261120   ;;  %s5387_s16 = smov 64  }
  0x14   :  { %v43_v2 = vld [vmem:[%s7688_s4 + $0x10] sm:$0xff]  ;;  %v4952_v3 = vpack.c.bf16 %v42_v1, %v41_v0  ;;  %v44_v4 = vld [vmem:[%s7688_s4 + $0x18] sm:$0xff]  ;;  %v5471_v5 = vld [vmem:[%s7684_s0] sm:$0xff]  ;;  %v5091_v7 = vpack.i.bf16 %v42_v1, %v41_v0  ;;  %v5388_v22 = vmov 0.0   ;;  %vm5389_vm1 = vmmov 0   ;;  %s5390_s20 = smov 88  }
  0x15   :  { %v5473_v6 = vld [vmem:[#allocation2] sm:$0xff]  ;;  %v4956_v8 = vpack.c.bf16 %v44_v4, %v43_v2  ;;  %v5096_v10 = vpack.i.bf16 %v44_v4, %v43_v2  ;;  %v5482_v11 = vld [vmem:[%s7684_s0 + $0x8] sm:$0xff]  ;;  %4731 = vmatprep.subr.mxu0 %v5388_v22  ;;  %4733 = vmatprep.mubr.msk.f32.mxu0 %vm5389_vm1, %v5388_v22  ;;  %s5391_s21 = smov 96   ;;  %s5392_s22 = smov 72   ;;  %vm237_vm2 = vcmask 64512   ;;  %vm1046_vm3 = vcmask 130048  }
  0x16   :  { %v39_v9 = vadd.f32 %v5473_v6, %v5471_v5  ;;  %4953 = vmatprep.subr.bf16.mxu1 %v4952_v3  ;;  %5092 = vrot.lane.b32.xlu0 %v5091_v7, %s5387_s16  ;;  %v5484_v12 = vld [vmem:[#allocation2 + $0x8] sm:$0xff]  ;;  %v5503_v23 = vld [vmem:[%s7688_s4 + $0x100] ss:$0 sm:$0xff]  ;;  %s5393_s23 = smov 120   ;;  %s5394_s24 = smov 80   ;;  %vm1048_vm4 = vcmask 195584  }
  0x17   :  { %4955 = vmatpush3.bf16.msra.mxu1 %v4952_v3  ;;  %v40_v13 = vadd.f32 %v5484_v12, %v5482_v11  ;;  %s5395_s25 = smov 104   ;;  %s5396_s26 = smov 112   ;;  %vm1649_vm5 = vcmask 294144   ;;  %vm1730_vm6 = vcmask 31744  }
  0x18   :  { %4717 = vmatprep.mubr.msk.f32.mxu1 %vm50_vm0, %v39_v9  ;;  %4957 = vmatprep.subr.bf16.mxu1 %v4956_v8  ;;  %s5398_s7 = smov 118   ;;  %s5399_s8 = smov 124  }
  0x19   :  { %s5400_s9 = smov 110   ;;  %s5401_s10 = smov 116  }
  0x1a   :  { %5097 = vrot.lane.b32.xlu0 %v5096_v10, %s5387_s16  ;;  %s5402_s11 = smov 100   ;;  %s5403_s12 = smov 126  }
  0x1b   :  { %4959 = vmatpush3.bf16.msra.mxu1 %v4956_v8  ;;  %s5404_s13 = smov 108   ;;  %s5405_s14 = smov 102  }
  0x1e   :  { %4718 = vmatmul.mubr.msk.f32.vlgmr.msra.gmra.mrb[0].mxu1 %vm50_vm0, %v40_v13 }
  0x1f   :  { %4728 = vmatprep.mubr.msk.f32.mxu1 %vm50_vm0, %v5471_v5 }
  0x88   :  { %v5093_v14 = vpop.permute.xlu0 %5092 }
  0x89   :  { %v5095_v15 = vunpack.i.h.bf16 %v5093_v14  ;;  %v5094_v16 = vunpack.i.l.bf16 %v5093_v14 }
  0x8b   :  { %v4960_v17 = vpack.c.bf16 %v5095_v15, %v5094_v16 }
  0x8c   :  { %v5098_v18 = vpop.permute.xlu0 %5097 }
  0x8d   :  { %v5100_v19 = vunpack.i.h.bf16 %v5098_v18  ;;  %v5099_v20 = vunpack.i.l.bf16 %v5098_v18  ;;  %4961 = vmatprep.subr.bf16.mxu1 %v4960_v17 }
  0x8e   :  { %4963 = vmatpush3.bf16.msra.mxu1 %v4960_v17 }
  0x8f   :  { %v4964_v21 = vpack.c.bf16 %v5100_v19, %v5099_v20 }
  0x91   :  { %4965 = vmatprep.subr.bf16.mxu1 %v4964_v21 }
  0x92   :  { %4967 = vmatpush3.bf16.msra.mxu1 %v4964_v21 }
  0x93   :  { %4736 = vmatprep.subr.mxu1 %v5388_v22 }
  0x95   :  { %4729 = vmatmul.mubr.msk.f32.vlgmr.msra.gmra.mrb[2].mxu1 %vm50_vm0, %v5482_v11 }
  0x96   :  { %4738 = vmatprep.mubr.msk.f32.mxu1 %vm5389_vm1, %v5388_v22 }
  0xf1   :  { %v4719_v24 = vpop.f32.mrb[0].mxu1 }
  0xf2   :  { %v129_v25 = vadd.f32 %v4719_v24, %v5503_v23  ;;  %v123_v26 = vpop.f32.mrb[1].mxu1 }
  0xf3   :  { %v124_v27 = vadd.f32 %v5503_v23, %v123_v26 }
  0xf4   :  { %628 = vrot.lane.b32.xlu0 %v129_v25, %s5390_s20  ;;  %549 = vrot.lane.b32.xlu1 %v129_v25, %s5391_s21  ;;  %v547_v29 = vmul.f32 0.35355338, %v129_v25 }
  0xf5   :  { %v233_v28 = vmul.f32 0.35355338, %v124_v27 }
  0xf8   :  { %471 = vrot.lane.b32.xlu0 %v124_v27, %s5392_s22  ;;  %235 = vrot.lane.b32.xlu1 %v124_v27, %s5391_s21 }
  0xfc   :  { %315 = vrot.lane.b32.xlu1 %v124_v27, %s5390_s20  ;;  %313 = vrot.lane.b32.xlu0 %v233_v28, %s5393_s23 }
 0x100   :  { %393 = vrot.lane.b32.xlu1 %v124_v27, %s5394_s24  ;;  %469 = vrot.lane.b32.xlu0 %v233_v28, %s5395_s25 }
 0x104   :  { %391 = vrot.lane.b32.xlu1 %v233_v28, %s5396_s26  ;;  %706 = vrot.lane.b32.xlu0 %v129_v25, %s5394_s24 }
 0x108   :  { %626 = vrot.lane.b32.xlu1 %v547_v29, %s5393_s23  ;;  %704 = vrot.lane.b32.xlu0 %v547_v29, %s5396_s26 }
 0x10c   :  { %784 = vrot.lane.b32.xlu1 %v129_v25, %s5392_s22 }
 0x110   :  { %782 = vrot.lane.b32.xlu1 %v547_v29, %s5395_s25 }
 0x166   :  { %v629_v30 = vpop.permute.xlu0 %628  ;;  %v550_v31 = vpop.permute.xlu1 %549 }
 0x168   :  { %v5522_v36 = vpop.f32.mrb[2].mxu1 }
 0x169   :  { %v5551_v45 = vpop.f32.mrb[3].mxu1 }
 0x16a   :  { %v472_v32 = vpop.permute.xlu0 %471  ;;  %v236_v33 = vpop.permute.xlu1 %235 }
 0x16b   :  { %4732 = vmatpush3.xpose.msk.msra.mxu0 %vm237_vm2, %v236_v33 }
 0x16c   :  { %4741 = vmatprep.subr.mxu0 %v5388_v22 }
 0x16e   :  { %v316_v34 = vpop.permute.xlu1 %315  ;;  %v314_v35 = vpop.permute.xlu0 %313  ;;  %4734 = vmatmul.mubr.msk.f32.vlgmr.msra.gmra.mrb[0].mxu0 %vm237_vm2, %v233_v28 }
 0x16f   :  { %4737 = vmatpush3.xpose.msk.msra.mxu1 %vm237_vm2, %v316_v34  ;;  %4743 = vmatprep.mubr.msk.f32.mxu0 %vm5389_vm1, %v5388_v22 }
 0x170   :  { %4746 = vmatprep.subr.mxu1 %v5388_v22 }
 0x172   :  { %v394_v37 = vpop.permute.xlu1 %393  ;;  %4739 = vmatmul.mubr.msk.f32.vlgmr.msra.gmra.mrb[4].mxu1 %vm237_vm2, %v314_v35  ;;  %v470_v38 = vpop.permute.xlu0 %469 }
 0x173   :  { %4742 = vmatpush3.xpose.msk.msra.mxu0 %vm237_vm2, %v394_v37  ;;  %4747 = vmatpush3.xpose.msk.msra.mxu1 %vm237_vm2, %v472_v32 }
 0x174   :  { %4748 = vmatprep.mubr.msk.f32.mxu1 %vm5389_vm1, %v5388_v22  ;;  %4756 = vmatprep.subr.mxu1 %v5388_v22 }
 0x175   :  { %4751 = vmatprep.subr.mxu0 %v5388_v22 }
 0x176   :  { %v392_v39 = vpop.permute.xlu1 %391  ;;  %4749 = vmatmul.mubr.msk.f32.vlgmr.msra.gmra.mrb[6].mxu1 %vm237_vm2, %v470_v38  ;;  %v707_v40 = vpop.permute.xlu0 %706 }
 0x177   :  { %4744 = vmatmul.mubr.msk.f32.vlgmr.msra.gmra.mrb[2].mxu0 %vm237_vm2, %v392_v39  ;;  %4757 = vmatpush3.xpose.msk.msra.mxu1 %vm237_vm2, %v629_v30 }
 0x178   :  { %4752 = vmatpush3.xpose.msk.msra.mxu0 %vm237_vm2, %v550_v31  ;;  %4758 = vmatprep.mubr.msk.f32.mxu1 %vm5389_vm1, %v5388_v22 }
 0x179   :  { %4753 = vmatprep.mubr.msk.f32.mxu0 %vm5389_vm1, %v5388_v22  ;;  %4761 = vmatprep.subr.mxu0 %v5388_v22 }
 0x17a   :  { %v627_v41 = vpop.permute.xlu1 %626  ;;  %4766 = vmatprep.subr.mxu1 %v5388_v22  ;;  %v705_v42 = vpop.permute.xlu0 %704 }
 0x17b   :  { %4754 = vmatmul.mubr.msk.f32.vlgmr.msra.gmra.mrb[4].mxu0 %vm237_vm2, %v547_v29  ;;  %4759 = vmatmul.mubr.msk.f32.vlgmr.msra.gmra.mrb[8].mxu1 %vm237_vm2, %v627_v41 }
 0x17c   :  { %4762 = vmatpush3.xpose.msk.msra.mxu0 %vm237_vm2, %v707_v40  ;;  %4763 = vmatprep.mubr.msk.f32.mxu0 %vm5389_vm1, %v5388_v22 }
 0x17d   :  { %4768 = vmatprep.mubr.msk.f32.mxu1 %vm5389_vm1, %v5388_v22  ;;  %vm2284_vm1 = vcmask 523264  }
 0x17e   :  { %v785_v43 = vpop.permute.xlu1 %784 }
 0x17f   :  { %4764 = vmatmul.mubr.msk.f32.vlgmr.msra.gmra.mrb[6].mxu0 %vm237_vm2, %v705_v42  ;;  %4767 = vmatpush3.xpose.msk.msra.mxu1 %vm237_vm2, %v785_v43 }
 0x182   :  { %v783_v44 = vpop.permute.xlu1 %782 }
 0x183   :  { %4769 = vmatmul.mubr.msk.f32.vlgmr.msra.gmra.mrb[10].mxu1 %vm237_vm2, %v783_v44 }
 0x241   :  { %v309_v46 = vpop.f32.mrb[0].mxu0 }
 0x242   :  { %v4735_v47 = vpop.f32.mrb[1].mxu0  ;;  %v860_v48 = vsel %vm237_vm2, %v309_v46, -inf }
 0x243   :  { %861 = vmax.xlane.f32.xlu0 %v860_v48 }
 0x245   :  { %v387_v49 = vpop.f32.mrb[4].mxu1 }
 0x246   :  { %v4740_v50 = vpop.f32.mrb[5].mxu1  ;;  %v863_v51 = vsel %vm237_vm2, %v387_v49, -inf }
 0x247   :  { %864 = vmax.xlane.f32.xlu1 %v863_v51 }
 0x249   :  { %v543_v52 = vpop.f32.mrb[6].mxu1 }
 0x24a   :  { %v465_v53 = vpop.f32.mrb[2].mxu0  ;;  %v4750_v54 = vpop.f32.mrb[7].mxu1  ;;  %v869_v55 = vsel %vm237_vm2, %v543_v52, -inf }
 0x24b   :  { %870 = vmax.xlane.f32.xlu0 %v869_v55  ;;  %v4745_v56 = vpop.f32.mrb[3].mxu0  ;;  %v866_v57 = vsel %vm237_vm2, %v465_v53, -inf }
 0x24c   :  { %867 = vmax.xlane.f32.xlu1 %v866_v57 }
 0x24e   :  { %v622_v58 = vpop.f32.mrb[4].mxu0  ;;  %v700_v59 = vpop.f32.mrb[8].mxu1 }
 0x24f   :  { %v4755_v60 = vpop.f32.mrb[5].mxu0  ;;  %v4760_v61 = vpop.f32.mrb[9].mxu1  ;;  %v872_v62 = vsel %vm237_vm2, %v622_v58, -inf  ;;  %v875_v1 = vsel %vm237_vm2, %v700_v59, -inf }
 0x250   :  { %873 = vmax.xlane.f32.xlu0 %v872_v62 }
 0x252   :  { %v778_v63 = vpop.f32.mrb[6].mxu0 }
 0x253   :  { %v4765_v0 = vpop.f32.mrb[7].mxu0  ;;  %v878_v2 = vsel %vm237_vm2, %v778_v63, -inf }
 0x254   :  { %876 = vmax.xlane.f32.xlu0 %v875_v1  ;;  %879 = vmax.xlane.f32.xlu1 %v878_v2 }
 0x256   :  { %v856_v3 = vpop.f32.mrb[10].mxu1 }
 0x257   :  { %v4770_v4 = vpop.f32.mrb[11].mxu1  ;;  %v881_v7 = vsel %vm237_vm2, %v856_v3, -inf }
 0x258   :  { %882 = vmax.xlane.f32.xlu0 %v881_v7 }
 0x2d0   :  { %v862_v8 = vpop.xlane.xlu0 %861 }
 0x2d1   :  { %v884_v9 = vsub.f32 %v309_v46, %v862_v8 }
 0x2d3   :  { %v892_v10 = vmul.f32 1.442695, %v884_v9 }
 0x2d4   :  { %v865_v13 = vpop.xlane.xlu1 %864 }
 0x2d5   :  { %5260 = vpow2.f32 %v892_v10  ;;  %v885_v14 = vsub.f32 %v387_v49, %v865_v13 }
 0x2d7   :  { %v894_v15 = vmul.f32 1.442695, %v885_v14 }
 0x2d8   :  { %v871_v16 = vpop.xlane.xlu0 %870 }
 0x2d9   :  { %5262 = vpow2.f32 %v894_v15  ;;  %v887_v17 = vsub.f32 %v543_v52, %v871_v16  ;;  %v868_v18 = vpop.xlane.xlu1 %867 }
 0x2da   :  { %v886_v19 = vsub.f32 %v465_v53, %v868_v18  ;;  %v1151_v18 = vld [vmem:[%s7688_s4 + $0x28] sm:$0xff] }
 0x2db   :  { %v898_v20 = vmul.f32 1.442695, %v887_v17  ;;  %v1150_v17 = vld [vmem:[%s7688_s4 + $0x20] sm:$0xff] }
 0x2dc   :  { %v896_v21 = vmul.f32 1.442695, %v886_v19  ;;  %v4968_v19 = vpack.c.bf16 %v1151_v18, %v1150_v17  ;;  %v7700_v18 = vmov 0  }
 0x2dd   :  { %5264 = vpow2.f32 %v898_v20  ;;  %v874_v22 = vpop.xlane.xlu0 %873  ;;  %v1152_v20 = vld [vmem:[%s7688_s4 + $0x30] sm:$0xff]  ;;  %5105 = vset.pattern.permute.xlu0 %v7700_v18  ;;  %5101 = vset.pattern.permute.xlu1 %v7700_v18 }
 0x2de   :  { %5266 = vpow2.f32 %v896_v21  ;;  %v888_v24 = vsub.f32 %v622_v58, %v874_v22  ;;  %v1153_v21 = vld [vmem:[%s7688_s4 + $0x38] sm:$0xff] }
 0x2df   :  { %v5261_v25 = vpop.eup %5260  ;;  %v4972_v22 = vpack.c.bf16 %v1153_v21, %v1152_v20 }
 0x2e0   :  { %v900_v26 = vmul.f32 1.442695, %v888_v24  ;;  %v908_v27 = vsel %vm237_vm2, %v5261_v25, 0.0 }
 0x2e1   :  { %v877_v28 = vpop.xlane.xlu0 %876  ;;  %909 = vadd.xlane.f32.xlu1 %v908_v27  ;;  %v880_v29 = vpop.xlane.xlu1 %879 }
 0x2e2   :  { %5268 = vpow2.f32 %v900_v26  ;;  %v889_v30 = vsub.f32 %v700_v59, %v877_v28  ;;  %v890_v31 = vsub.f32 %v778_v63, %v880_v29 }
 0x2e3   :  { %v5263_v32 = vpop.eup %5262 }
 0x2e4   :  { %v902_v33 = vmul.f32 1.442695, %v889_v30  ;;  %v904_v34 = vmul.f32 1.442695, %v890_v31  ;;  %v911_v35 = vsel %vm237_vm2, %v5263_v32, 0.0 }
 0x2e5   :  { %912 = vadd.xlane.f32.xlu0 %v911_v35  ;;  %v883_v37 = vpop.xlane.xlu0 %882 }
 0x2e6   :  { %5270 = vpow2.f32 %v902_v33  ;;  %v891_v38 = vsub.f32 %v856_v3, %v883_v37 }
 0x2e7   :  { %v5265_v39 = vpop.eup %5264  ;;  %5272 = vpow2.f32 %v904_v34 }
 0x2e8   :  { %v5267_v40 = vpop.eup %5266  ;;  %v906_v41 = vmul.f32 1.442695, %v891_v38  ;;  %v917_v42 = vsel %vm237_vm2, %v5265_v39, 0.0 }
 0x2e9   :  { %918 = vadd.xlane.f32.xlu0 %v917_v42  ;;  %v914_v43 = vsel %vm237_vm2, %v5267_v40, 0.0 }
 0x2ea   :  { %5274 = vpow2.f32 %v906_v41  ;;  %915 = vadd.xlane.f32.xlu1 %v914_v43 }
 0x2ec   :  { %v5269_v44 = vpop.eup %5268 }
 0x2ed   :  { %v920_v46 = vsel %vm237_vm2, %v5269_v44, 0.0 }
 0x2ee   :  { %921 = vadd.xlane.f32.xlu1 %v920_v46 }
 0x2f0   :  { %v5271_v47 = vpop.eup %5270 }
 0x2f1   :  { %v5273_v48 = vpop.eup %5272  ;;  %v923_v49 = vsel %vm237_vm2, %v5271_v47, 0.0 }
 0x2f2   :  { %924 = vadd.xlane.f32.xlu0 %v923_v49  ;;  %v926_v50 = vsel %vm237_vm2, %v5273_v48, 0.0 }
 0x2f3   :  { %927 = vadd.xlane.f32.xlu1 %v926_v50 }
 0x2f4   :  { %v5275_v51 = vpop.eup %5274 }
 0x2f5   :  { %v929_v52 = vsel %vm237_vm2, %v5275_v51, 0.0 }
 0x2f6   :  { %930 = vadd.xlane.f32.xlu0 %v929_v52 }
 0x304   :  { %149 = vrot.lane.b32.xlu1 %v5503_v23, %s5387_s16 }
 0x36e   :  { %v910_v53 = vpop.xlane.xlu1 %909 }
 0x36f   :  { %5276 = vrcp.f32 %v910_v53 }
 0x372   :  { %v913_v54 = vpop.xlane.xlu0 %912 }
 0x373   :  { %5278 = vrcp.f32 %v913_v54 }
 0x376   :  { %v919_v58 = vpop.xlane.xlu0 %918 }
 0x377   :  { %v916_v55 = vpop.xlane.xlu1 %915 }
 0x378   :  { %5280 = vrcp.f32 %v916_v55 }
 0x379   :  { %v5277_v56 = vpop.eup %5276 }
 0x37a   :  { %v940_v57 = vmul.f32 %v5277_v56, %v5261_v25 }
 0x37b   :  { %v922_v59 = vpop.xlane.xlu1 %921 }
 0x37c   :  { %5282 = vrcp.f32 %v922_v59  ;;  %4773 = vmatprep.mubr.msk.f32.mxu0 %vm237_vm2, %v940_v57  ;;  %v1541_v59 = vld [vmem:[%s7688_s4 + $0x70] sm:$0xff] }
 0x37d   :  { %5284 = vrcp.f32 %v919_v58  ;;  %v5279_v23 = vpop.eup %5278  ;;  %v1540_v58 = vld [vmem:[%s7688_s4 + $0x68] sm:$0xff] }
 0x37e   :  { %v941_v4 = vmul.f32 %v5279_v23, %v5263_v32 }
 0x37f   :  { %v925_v60 = vpop.xlane.xlu0 %924 }
 0x380   :  { %5286 = vrcp.f32 %v925_v60  ;;  %v928_v61 = vpop.xlane.xlu1 %927 }
 0x381   :  { %5288 = vrcp.f32 %v928_v61  ;;  %v1542_v61 = vld [vmem:[%s7688_s4 + $0x78] sm:$0xff] }
 0x382   :  { %v5281_v0 = vpop.eup %5280 }
 0x383   :  { %v931_v62 = vpop.xlane.xlu0 %930  ;;  %v942_v9 = vmul.f32 %v5281_v0, %v5267_v40 }
 0x384   :  { %5290 = vrcp.f32 %v931_v62  ;;  %v150_v63 = vpop.permute.xlu1 %149  ;;  %v4988_v62 = vpack.c.bf16 %v1542_v61, %v1541_v59 }
 0x385   :  { %v225_v1 = vadd.f32 %v5551_v45, %v150_v63  ;;  %v230_v2 = vadd.f32 %v5522_v36, %v150_v63 }
 0x386   :  { %v5283_v3 = vpop.eup %5282 }
 0x387   :  { %4771 = vmatprep.subr.mxu0 %v225_v1  ;;  %4779 = vmatprep.subr.mxu1 %v230_v2  ;;  %v944_v7 = vmul.f32 %v5283_v3, %v5269_v44  ;;  %v5285_v8 = vpop.eup %5284 }
 0x388   :  { %4772 = vmatpush3.msra.mxu0 %v225_v1  ;;  %4780 = vmatpush3.msra.mxu1 %v230_v2  ;;  %v943_v45 = vmul.f32 %v5285_v8, %v5265_v39  ;;  %v4515_v39 = vld [vmem:[%s7688_s4 + $0x101] ss:$0 sm:$0xff]  ;;  %v4518_v8 = vld [vmem:[%s7688_s4 + $0x102] ss:$0 sm:$0xff] }
 0x389   :  { %4774 = vmatmul.mubr.msk.f32.vlgmr.msra.gmra.mrb[8].mxu0 %vm237_vm2, %v941_v4  ;;  %4781 = vmatprep.mubr.msk.f32.mxu1 %vm237_vm2, %v944_v7 }
 0x38a   :  { %v5287_v10 = vpop.eup %5286  ;;  %4776 = vmatprep.mubr.msk.f32.mxu0 %vm237_vm2, %v942_v9  ;;  %4969 = vmatprep.subr.bf16.mxu0 %v4968_v19 }
 0x38b   :  { %v5289_v13 = vpop.eup %5288  ;;  %v945_v14 = vmul.f32 %v5287_v10, %v5271_v47  ;;  %4971 = vmatpush3.bf16.msra.mxu0 %v4968_v19  ;;  %v4541_v19 = vld [vmem:[%s7688_s4 + $0x105] ss:$0 sm:$0xff] }
 0x38c   :  { %v946_v36 = vmul.f32 %v5289_v13, %v5273_v48  ;;  %4973 = vmatprep.subr.bf16.mxu0 %v4972_v22  ;;  %v4519_v13 = vld [vmem:[%s7688_s4 + $0x103] ss:$0 sm:$0xff] }
 0x38d   :  { %4777 = vmatmul.mubr.msk.f32.gmra.mrb[10].mxu0 %vm237_vm2, %v943_v45  ;;  %4782 = vmatmul.mubr.msk.f32.vlgmr.msra.gmra.mrb[12].mxu1 %vm237_vm2, %v945_v14 }
 0x38e   :  { %v5291_v15 = vpop.eup %5290  ;;  %4784 = vmatprep.mubr.msk.f32.mxu1 %vm237_vm2, %v946_v36 }
 0x38f   :  { %v947_v16 = vmul.f32 %v5291_v15, %v5275_v51  ;;  %4975 = vmatpush3.bf16.msra.mxu0 %v4972_v22 }
 0x391   :  { %4785 = vmatmul.mubr.msk.f32.gmra.mrb[14].mxu1 %vm237_vm2, %v947_v16 }
 0x45c   :  { %v4775_v24 = vpop.f32.mrb[8].mxu0 }
 0x45d   :  { %v1026_v25 = vpop.f32.mrb[9].mxu0 }
 0x45e   :  { %v1045_v26 = vsel %vm237_vm2, %v1026_v25, %v4775_v24  ;;  %v1772_v24 = vld [vmem:[%s7687_s3 + $0x8] sm:$0xff] }
 0x45f   :  { %v2946_v25 = vmul.f32 8.0, %v1772_v24 }
 0x460   :  { %v4778_v27 = vpop.f32.mrb[10].mxu0  ;;  %v4783_v28 = vpop.f32.mrb[12].mxu1 }
 0x461   :  { %v1036_v29 = vpop.f32.mrb[11].mxu0  ;;  %v1128_v30 = vpop.f32.mrb[13].mxu1 }
 0x462   :  { %v1047_v31 = vsel %vm1046_vm3, %v1045_v26, %v1036_v29  ;;  %v1147_v32 = vsel %vm237_vm2, %v1128_v30, %v4783_v28  ;;  %v5681_v26 = vld [vmem:[%s7687_s3] sm:$0xff] }
 0x463   :  { %v1049_v33 = vsel %vm1048_vm4, %v1047_v31, %v4778_v27  ;;  %v5684_v27 = vadd.f32 -0.5, %v2946_v25  ;;  %v1784_v28 = vmul.f32 8.0, %v5681_v26 }
 0x464   :  { %4795 = vmatprep.mubr.msk.f32.mxu0 %vm50_vm0, %v1049_v33  ;;  %v4786_v34 = vpop.f32.mrb[14].mxu1 }
 0x465   :  { %v1138_v35 = vpop.f32.mrb[15].mxu1  ;;  %v5691_v30 = vadd.f32 -0.5, %v1784_v28 }
 0x466   :  { %v1148_v37 = vsel %vm1046_vm3, %v1147_v32, %v1138_v35 }
 0x467   :  { %v1149_v38 = vsel %vm1048_vm4, %v1148_v37, %v4786_v34 }
 0x468   :  { %4796 = vmatmul.mubr.msk.f32.vlgmr.msra.gmra.mrb[12].mxu0 %vm50_vm0, %v1149_v38  ;;  %v7695_v38 = vmov 1  }
 0x53b   :  { %v4797_v40 = vpop.f32.mrb[12].mxu0 }
 0x53c   :  { %v1237_v41 = vadd.f32 %v4797_v40, %v4515_v39  ;;  %v1231_v42 = vpop.f32.mrb[13].mxu0 }
 0x53d   :  { %v1232_v43 = vadd.f32 %v4515_v39, %v1231_v42 }
 0x53e   :  { %v1241_v44 = vadd.f32 %v1237_v41, %v5482_v11 }
 0x53f   :  { %v1240_v47 = vadd.f32 %v1232_v43, %v5471_v5  ;;  %v1539_v5 = vld [vmem:[%s7688_s4 + $0x60] sm:$0xff] }
 0x540   :  { %v1247_v46 = vsel %vm50_vm0, %v1241_v44, 0.0  ;;  %v4984_v60 = vpack.c.bf16 %v1540_v58, %v1539_v5 }
 0x541   :  { %1248 = vadd.xlane.f32.xlu0 %v1247_v46  ;;  %v1244_v48 = vsel %vm50_vm0, %v1240_v47, 0.0 }
 0x542   :  { %4985 = vmatprep.subr.bf16.mxu0 %v4984_v60 }
 0x543   :  { %4987 = vmatpush3.bf16.msra.mxu0 %v4984_v60  ;;  %v7692_v60 = vmov 2  }
 0x544   :  { %4989 = vmatprep.subr.bf16.mxu0 %v4988_v62 }
 0x545   :  { %1245 = vadd.xlane.f32.xlu0 %v1244_v48 }
 0x547   :  { %4991 = vmatpush3.bf16.msra.mxu0 %v4988_v62  ;;  %v3546_v62 = vmul.f32 4.0, %v1772_v24 }
 0x5ce   :  { %v1249_v49 = vpop.xlane.xlu0 %1248 }
 0x5cf   :  { %v1252_v50 = vmul.f32 0.03125, %v1249_v49 }
 0x5d1   :  { %v1254_v51 = vsub.f32 %v1241_v44, %v1252_v50 }
 0x5d2   :  { %v1246_v52 = vpop.xlane.xlu0 %1245 }
 0x5d3   :  { %v1251_v53 = vmul.f32 0.03125, %v1246_v52  ;;  %v1256_v54 = vmul.f32 %v1254_v51, %v1254_v51 }
 0x5d5   :  { %v1253_v55 = vsub.f32 %v1240_v47, %v1251_v53  ;;  %v1260_v56 = vsel %vm50_vm0, %v1256_v54, 0.0 }
 0x5d6   :  { %1261 = vadd.xlane.f32.xlu0 %v1260_v56 }
 0x5d7   :  { %v1255_v57 = vmul.f32 %v1253_v55, %v1253_v55 }
 0x5d9   :  { %v1257_v11 = vsel %vm50_vm0, %v1255_v57, 0.0 }
 0x5da   :  { %1258 = vadd.xlane.f32.xlu0 %v1257_v11 }
 0x663   :  { %v1262_v23 = vpop.xlane.xlu0 %1261 }
 0x664   :  { %v1264_v63 = vmul.f32 0.03125, %v1262_v23  ;;  %v5752_v23 = vadd.f32 -0.5, %v3546_v62 }
 0x666   :  { %v1266_v0 = vadd.f32 1e-05, %v1264_v63 }
 0x667   :  { %v1259_v1 = vpop.xlane.xlu0 %1258 }
 0x668   :  { %5292 = vrsqrt.f32 %v1266_v0  ;;  %v1263_v2 = vmul.f32 0.03125, %v1259_v1 }
 0x66a   :  { %v1265_v3 = vadd.f32 1e-05, %v1263_v2 }
 0x66c   :  { %5294 = vrsqrt.f32 %v1265_v3 }
 0x672   :  { %v5293_v4 = vpop.eup %5292 }
 0x673   :  { %v1270_v7 = vmul.f32 %v5293_v4, %v1254_v51 }
 0x675   :  { %v1276_v10 = vmul.f32 %v4518_v8, %v1270_v7 }
 0x676   :  { %v5295_v9 = vpop.eup %5294 }
 0x677   :  { %v1269_v45 = vmul.f32 %v5295_v9, %v1253_v55  ;;  %v5628_v36 = vadd.f32 %v4519_v13, %v1276_v10 }
 0x679   :  { %v1275_v14 = vmul.f32 %v4518_v8, %v1269_v45  ;;  %7763 = vst [vmem:[#allocation8_spill] sm:$0xff] %v5628_v36  ;;  %v1284_v17 = vadd.f32 %v5628_v36, %v5484_v12  ;;  %v7698_v8 = vmov 3  }
 0x67b   :  { %v5630_v15 = vadd.f32 %v4519_v13, %v1275_v14 }
 0x67d   :  { %7764 = vst [vmem:[#allocation9_spill] sm:$0xff] %v5630_v15  ;;  %v1283_v16 = vadd.f32 %v5630_v15, %v5473_v6 }
 0x67f   :  { %4844 = vmatprep.mubr.msk.f32.mxu0 %vm50_vm0, %v1283_v16 }
 0x680   :  { %4845 = vmatmul.mubr.msk.f32.vlgmr.msra.gmra.mrb[14].mxu0 %vm50_vm0, %v1284_v17 }
 0x753   :  { %v4846_v20 = vpop.f32.mrb[14].mxu0 }
 0x754   :  { %v5643_v21 = vadd.f32 %v4846_v20, %v4541_v19  ;;  %v1620_v6 = vpop.f32.mrb[15].mxu0 }
 0x755   :  { %v5657_v12 = vadd.f32 %v4541_v19, %v1620_v6 }
 0x756   :  { %7765 = vst [vmem:[#allocation10_spill] sm:$0xff] %v5643_v21  ;;  %3131 = vrot.lane.b32.xlu0 %v5643_v21, %s5398_s7  ;;  %1633 = vrot.lane.b32.xlu1 %v5643_v21, %s5399_s8  ;;  %v1653_v22 = vsel %vm1649_vm5, %v5643_v21, -inf  ;;  %v2948_v29 = vadd.f32 %v5684_v27, %v5643_v21 }
 0x757   :  { %v1786_v32 = vadd.f32 %v5691_v30, %v5657_v12  ;;  %v1650_v33 = vsel %vm1649_vm5, %v5657_v12, -inf }
 0x758   :  { %v2949_v31 = vfloor.f32 %v2948_v29 }
 0x759   :  { %v1787_v35 = vfloor.f32 %v1786_v32 }
 0x75a   :  { %3257 = vrot.lane.b32.xlu0 %v5643_v21, %s5400_s9  ;;  %1639 = vrot.lane.b32.xlu1 %v5643_v21, %s5393_s23  ;;  %v2969_v34 = vadd.f32 1.0, %v2949_v31  ;;  %v5713_v44 = vsub.f32 %v2948_v29, %v2949_v31 }
 0x75b   :  { %v1807_v37 = vadd.f32 1.0, %v1787_v35  ;;  %v5723_v51 = vsub.f32 %v1786_v32, %v1787_v35 }
 0x75c   :  { %7767 = vst [vmem:[#allocation12_spill] sm:$0xff] %v5713_v44  ;;  %v7691_v55 = vsub.f32 1.0, %v5713_v44 }
 0x75d   :  { %7768 = vst [vmem:[#allocation13_spill] sm:$0xff] %v5723_v51  ;;  %v7690_v11 = vsub.f32 1.0, %v5723_v51 }
 0x75e   :  { %3320 = vrot.lane.b32.xlu0 %v5643_v21, %s5395_s25  ;;  %1645 = vrot.lane.b32.xlu1 %v5643_v21, %s5401_s10 }
 0x762   :  { %3946 = vrot.lane.b32.xlu0 %v5643_v21, %s5402_s11  ;;  %3008 = vrot.lane.b32.xlu1 %v5643_v21, %s5403_s12 }
 0x766   :  { %3194 = vrot.lane.b32.xlu1 %v5643_v21, %s5396_s26  ;;  %1637 = vrot.lane.b32.xlu0 %v5657_v12, %s5393_s23 }
 0x76a   :  { %3830 = vrot.lane.b32.xlu1 %v5643_v21, %s5404_s13 }
 0x76e   :  { %3383 = vrot.lane.b32.xlu1 %v5643_v21, %s5405_s14 }
 0x772   :  { %1631 = vrot.lane.b32.xlu1 %v5657_v12, %s5399_s8 }
 0x776   :  { %1643 = vrot.lane.b32.xlu1 %v5657_v12, %s5401_s10 }
 0x77a   :  { %1969 = vrot.lane.b32.xlu1 %v5657_v12, %s5398_s7 }
 0x77e   :  { %2032 = vrot.lane.b32.xlu1 %v5657_v12, %s5396_s26 }
 0x782   :  { %2158 = vrot.lane.b32.xlu1 %v5657_v12, %s5395_s25 }
 0x785   :  { %1654 = vmax.xlane.f32.xlu0 %v1653_v22 }
 0x786   :  { %2669 = vrot.lane.b32.xlu1 %v5657_v12, %s5404_s13  ;;  %s5409_s13 = smov 95  }
 0x79b   :  { %1846 = vrot.lane.b32.xlu0 %v5657_v12, %s5403_s12  ;;  %s5410_s12 = smov [#allocation5]  }
 0x79f   :  { %2095 = vrot.lane.b32.xlu0 %v5657_v12, %s5400_s9 }
 0x7a3   :  { %2221 = vrot.lane.b32.xlu0 %v5657_v12, %s5405_s14 }
 0x7a7   :  { %2785 = vrot.lane.b32.xlu0 %v5657_v12, %s5402_s11 }
 0x7aa   :  { %1651 = vmax.xlane.f32.xlu1 %v1650_v33 }
 0x7ab   :  { %2972 = vperm.xlu0 %5105, %v2969_v34  }
 0x7af   :  { %1810 = vperm.xlu0 %5105, %v1807_v37  }
 0x7bb   :  { %2953 = vperm.xlu1 %5101, %v2949_v31  }
 0x7bf   :  { %5102 = vset.pattern.permute.xlu1 %v7695_v38 }
 0x7c0   :  { %2985 = vperm.xlu1 %5102, %v2949_v31  }
 0x7c4   :  { %5103 = vset.pattern.permute.xlu1 %v7700_v18 }
 0x7c5   :  { %1791 = vperm.xlu1 %5103, %v1787_v35  }
 0x7c8   :  { %v5702_v39 = vpop.permute.xlu1 %1633  ;;  %v5707_v41 = vpop.permute.xlu0 %3131 }
 0x7c9   :  { %5104 = vset.pattern.permute.xlu1 %v7695_v38  ;;  %v5757_v63 = vadd.f32 %v5752_v23, %v5702_v39  ;;  %v1659_v0 = vsel %vm1649_vm5, %v5702_v39, -inf  ;;  %v5776_v7 = vadd.f32 %v5684_v27, %v5707_v41  ;;  %v5843_v31 = vadd.f32 %v5752_v23, %v5707_v41 }
 0x7ca   :  { %1823 = vperm.xlu1 %5104, %v1787_v35  }
 0x7cb   :  { %v5764_v1 = vfloor.f32 %v5757_v63  ;;  %v5781_v9 = vfloor.f32 %v5776_v7  ;;  %v5852_v33 = vfloor.f32 %v5843_v31 }
 0x7cc   :  { %v5705_v40 = vpop.permute.xlu1 %1639  ;;  %v5716_v46 = vpop.permute.xlu0 %3257 }
 0x7cd   :  { %7766 = vst [vmem:[#allocation11_spill] sm:$0xff] %v5705_v40  ;;  %v1665_v42 = vsel %vm1649_vm5, %v5705_v40, -inf  ;;  %v5816_v22 = vadd.f32 %v5684_v27, %v5716_v46  ;;  %v5821_v24 = vadd.f32 %v5684_v27, %v5705_v40 }
 0x7ce   :  { %2996 = vperm.xlu1 %5104, %v2969_v34   ;;  %1666 = vmax.xlane.f32.xlu0 %v1665_v42 }
 0x7cf   :  { %v5827_v25 = vfloor.f32 %v5816_v22  ;;  %v5831_v28 = vfloor.f32 %v5821_v24 }
 0x7d0   :  { %v5711_v43 = vpop.permute.xlu1 %1645  ;;  %v5728_v53 = vpop.permute.xlu0 %3320 }
 0x7d1   :  { %v1671_v2 = vsel %vm1649_vm5, %v5711_v43, -inf  ;;  %v5793_v14 = vadd.f32 %v5752_v23, %v5711_v43 }
 0x7d2   :  { %3002 = vperm.xlu1 %5104, %v5713_v44   ;;  %v7791_v44 = vmov 0  }
 0x7d3   :  { %v5806_v20 = vfloor.f32 %v5793_v14 }
 0x7d4   :  { %v3009_v47 = vpop.permute.xlu1 %3008  ;;  %v5736_v56 = vpop.permute.xlu0 %3946 }
 0x7d5   :  { %v3011_v48 = vadd.f32 %v5684_v27, %v3009_v47  ;;  %v5797_v16 = vadd.f32 %v5752_v23, %v3009_v47  ;;  %v5884_v47 = vadd.f32 %v5752_v23, %v5736_v56  ;;  %v5907_v56 = vadd.f32 %v5684_v27, %v5728_v53 }
 0x7d6   :  { %1834 = vperm.xlu1 %5104, %v1807_v37  }
 0x7d7   :  { %v5719_v49 = vfloor.f32 %v3011_v48  ;;  %v5809_v6 = vfloor.f32 %v5797_v16  ;;  %7775 = vst [vmem:[#allocation20_spill] sm:$0xff] %v5884_v47  ;;  %7779 = vst [vmem:[#allocation24_spill] sm:$0xff] %v5907_v56 }
 0x7d8   :  { %v5721_v50 = vpop.permute.xlu1 %3194  ;;  %v5747_v59 = vpop.permute.xlu0 %1637 }
 0x7d9   :  { %v5726_v52 = vsub.f32 %v3011_v48, %v5719_v49  ;;  %7770 = vst [vmem:[#allocation15_spill] sm:$0xff] %v5747_v59  ;;  %v1662_v61 = vsel %vm1649_vm5, %v5747_v59, -inf  ;;  %v5865_v35 = vadd.f32 %v5684_v27, %v5721_v50  ;;  %v5889_v48 = vadd.f32 %v5752_v23, %v5716_v46 }
 0x7da   :  { %1840 = vperm.xlu1 %5104, %v5723_v51  }
 0x7db   :  { %7774 = vst [vmem:[#allocation19_spill] sm:$0xff] %v5865_v35  ;;  %v5874_v41 = vfloor.f32 %v5865_v35  ;;  %7776 = vst [vmem:[#allocation21_spill] sm:$0xff] %v5889_v48 }
 0x7dc   :  { %v5731_v54 = vpop.permute.xlu1 %3830 }
 0x7dd   :  { %v5838_v29 = vadd.f32 %v5752_v23, %v5731_v54  ;;  %v5895_v54 = vfloor.f32 %v5884_v47 }
 0x7de   :  { %2991 = vperm.xlu1 %5104, %v7691_v55  }
 0x7df   :  { %v5849_v32 = vfloor.f32 %v5838_v29  ;;  %7777 = vst [vmem:[#allocation22_spill] sm:$0xff] %v5895_v54 }
 0x7e0   :  { %v5738_v57 = vpop.permute.xlu1 %3383 }
 0x7e1   :  { %v5860_v34 = vadd.f32 %v5684_v27, %v5738_v57 }
 0x7e2   :  { %1829 = vperm.xlu1 %5104, %v7690_v11   ;;  %v5956_v11 = vadd.f32 %v5691_v30, %v5747_v59 }
 0x7e3   :  { %v5871_v37 = vfloor.f32 %v5860_v34 }
 0x7e4   :  { %v5743_v5 = vpop.permute.xlu1 %1631  ;;  %7784 = vst [vmem:[#allocation29_spill] sm:$0xff] %v5956_v11  ;;  %v5968_v15 = vfloor.f32 %v5956_v11 }
 0x7e5   :  { %7769 = vst [vmem:[#allocation14_spill] sm:$0xff] %v5743_v5  ;;  %v1656_v58 = vsel %vm1649_vm5, %v5743_v5, -inf }
 0x7e6   :  { %1657 = vmax.xlane.f32.xlu0 %v1656_v58  ;;  %5107 = vset.pattern.permute.xlu1 %v7692_v60  ;;  %v5898_v58 = vfloor.f32 %v5889_v48  ;;  %7786 = vst [vmem:[#allocation31_spill] sm:$0xff] %v5968_v15 }
 0x7e8   :  { %v5769_v3 = vpop.permute.xlu1 %1643  ;;  %7778 = vst [vmem:[#allocation23_spill] sm:$0xff] %v5898_v58 }
 0x7e9   :  { %7771 = vst [vmem:[#allocation16_spill] sm:$0xff] %v5769_v3  ;;  %v1668_v4 = vsel %vm1649_vm5, %v5769_v3, -inf }
 0x7ea   :  { %1663 = vmax.xlane.f32.xlu0 %v1662_v61  ;;  %v5913_v61 = vfloor.f32 %v5907_v56  ;;  %v3565_v56 = vadd.f32 1.0, %v5809_v6 }
 0x7ec   :  { %v5879_v42 = vpop.permute.xlu1 %1969  ;;  %7780 = vst [vmem:[#allocation25_spill] sm:$0xff] %v5913_v61  ;;  %v6148_v35 = vadd.f32 1.0, %v5913_v61 }
 0x7ed   :  { %v5925_v53 = vadd.f32 %v5691_v30, %v5879_v42 }
 0x7f0   :  { %v2033_v50 = vpop.permute.xlu1 %2032 }
 0x7f4   :  { %v2159_v46 = vpop.permute.xlu1 %2158 }
 0x7f8   :  { %v5915_v62 = vpop.permute.xlu1 %2669 }
 0x800   :  { %3016 = vperm.xlu0 %5105, %v5719_v49  }
 0x804   :  { %5106 = vset.pattern.permute.xlu0 %v7695_v38 }
 0x805   :  { %3047 = vperm.xlu0 %5106, %v5719_v49  }
 0x806   :  { %1660 = vmax.xlane.f32.xlu1 %v1659_v0  ;;  %v5930_v0 = vadd.f32 %v5752_v23, %v5738_v57 }
 0x808   :  { %7781 = vst [vmem:[#allocation26_spill] sm:$0xff] %v5930_v0 }
 0x809   :  { %5109 = vset.pattern.permute.xlu0 %v7692_v60 }
 0x80a   :  { %3609 = vperm.xlu0 %5109, %v5764_v1   ;;  %1672 = vmax.xlane.f32.xlu1 %v1671_v2  ;;  %v5936_v2 = vfloor.f32 %v5925_v53 }
 0x80e   :  { %5110 = vset.pattern.permute.xlu0 %v7698_v8  ;;  %1669 = vmax.xlane.f32.xlu1 %v1668_v4  ;;  %v5939_v4 = vfloor.f32 %v5930_v0 }
 0x80f   :  { %3637 = vperm.xlu0 %5110, %v5764_v1  }
 0x810   :  { %7782 = vst [vmem:[#allocation27_spill] sm:$0xff] %v5939_v4 }
 0x812   :  { %v5783_v10 = vpop.xlane.xlu0 %1654 }
 0x813   :  { %7772 = vst [vmem:[#allocation17_spill] sm:$0xff] %v5783_v10  ;;  %5113 = vset.pattern.permute.xlu0 %v7700_v18 }
 0x814   :  { %3139 = vperm.xlu0 %5113, %v5781_v9  }
 0x816   :  { %v5787_v13 = vpop.permute.xlu0 %1846 }
 0x817   :  { %v1849_v45 = vadd.f32 %v5691_v30, %v5787_v13 }
 0x818   :  { %5114 = vset.pattern.permute.xlu0 %v7695_v38 }
 0x819   :  { %v5799_v17 = vfloor.f32 %v1849_v45  ;;  %3170 = vperm.xlu0 %5114, %v5781_v9  }
 0x81a   :  { %v5946_v57 = vpop.permute.xlu0 %2095 }
 0x81b   :  { %7773 = vst [vmem:[#allocation18_spill] sm:$0xff] %v5799_v17  ;;  %v5803_v19 = vsub.f32 %v1849_v45, %v5799_v17  ;;  %v5951_v23 = vadd.f32 %v5691_v30, %v5946_v57 }
 0x81d   :  { %5117 = vset.pattern.permute.xlu0 %v7692_v60 }
 0x81e   :  { %3722 = vperm.xlu0 %5117, %v5806_v20  }
 0x81f   :  { %3553 = vperm.xlu1 %5107, %v5809_v6  }
 0x822   :  { %5118 = vset.pattern.permute.xlu0 %v7698_v8 }
 0x823   :  { %3750 = vperm.xlu0 %5118, %v5806_v20   ;;  %5108 = vset.pattern.permute.xlu1 %v7698_v8 }
 0x824   :  { %3581 = vperm.xlu1 %5108, %v5809_v6  }
 0x827   :  { %5121 = vset.pattern.permute.xlu0 %v7700_v18 }
 0x828   :  { %3265 = vperm.xlu0 %5121, %v5827_v25   ;;  %5111 = vset.pattern.permute.xlu1 %v7700_v18 }
 0x829   :  { %3076 = vperm.xlu1 %5111, %v5831_v28  }
 0x82c   :  { %5122 = vset.pattern.permute.xlu0 %v7695_v38 }
 0x82d   :  { %3296 = vperm.xlu0 %5122, %v5827_v25   ;;  %5112 = vset.pattern.permute.xlu1 %v7695_v38 }
 0x82e   :  { %3108 = vperm.xlu1 %5112, %v5831_v28  }
 0x831   :  { %5125 = vset.pattern.permute.xlu0 %v7692_v60 }
 0x832   :  { %3838 = vperm.xlu0 %5125, %v5849_v32   ;;  %5115 = vset.pattern.permute.xlu1 %v7692_v60 }
 0x833   :  { %3666 = vperm.xlu1 %5115, %v5852_v33  }
 0x836   :  { %5126 = vset.pattern.permute.xlu0 %v7698_v8 }
 0x837   :  { %3866 = vperm.xlu0 %5126, %v5849_v32   ;;  %5116 = vset.pattern.permute.xlu1 %v7698_v8  ;;  %v5921_v27 = vpop.xlane.xlu1 %1651 }
 0x838   :  { %3694 = vperm.xlu1 %5116, %v5852_v33  }
 0x83b   :  { %5129 = vset.pattern.permute.xlu0 %v7700_v18  ;;  %v5941_v45 = vpop.permute.xlu1 %2953 }
 0x83c   :  { %3391 = vperm.xlu0 %5129, %v5871_v37   ;;  %5119 = vset.pattern.permute.xlu1 %v7700_v18  ;;  %7783 = vst [vmem:[#allocation28_spill] sm:$0xff] %v5941_v45  ;;  %v5983_v45 = vadd.f32 %v5691_v30, %v2033_v50 }
 0x83d   :  { %3202 = vperm.xlu1 %5119, %v5874_v41  }
 0x83e   :  { %7789 = vst [vmem:[#allocation33_spill] sm:$0xff] %v5983_v45  ;;  %v5995_v51 = vfloor.f32 %v5983_v45 }
 0x83f   :  { %v5958_v55 = vpop.permute.xlu1 %2985 }
 0x840   :  { %5130 = vset.pattern.permute.xlu0 %v7695_v38  ;;  %7785 = vst [vmem:[#allocation30_spill] sm:$0xff] %v5958_v55  ;;  %v7788_v55 = vmov 1  }
 0x841   :  { %3422 = vperm.xlu0 %5130, %v5871_v37   ;;  %5120 = vset.pattern.permute.xlu1 %v7695_v38 }
 0x842   :  { %3234 = vperm.xlu1 %5120, %v5874_v41  }
 0x844   :  { %v5974_v36 = vpop.permute.xlu1 %1791 }
 0x845   :  { %5133 = vset.pattern.permute.xlu0 %v7692_v60  ;;  %7787 = vst [vmem:[#allocation32_spill] sm:$0xff] %v5974_v36 }
 0x846   :  { %3954 = vperm.xlu0 %5133, %v5895_v54   ;;  %5123 = vset.pattern.permute.xlu1 %v7692_v60 }
 0x847   :  { %3779 = vperm.xlu1 %5123, %v5898_v58  }
 0x849   :  { %v5989_v36 = vpop.permute.xlu1 %1823 }
 0x84a   :  { %5134 = vset.pattern.permute.xlu0 %v7698_v8  ;;  %7790 = vst [vmem:[#allocation34_spill] sm:$0xff] %v5989_v36  ;;  %v6008_v36 = vadd.f32 %v5691_v30, %v2159_v46  ;;  %v7797_v46 = vmov 3  }
 0x84b   :  { %3982 = vperm.xlu0 %5134, %v5895_v54   ;;  %5124 = vset.pattern.permute.xlu1 %v7698_v8 }
 0x84c   :  { %3807 = vperm.xlu1 %5124, %v5898_v58   ;;  %7793 = vst [vmem:[#allocation36_spill] sm:$0xff] %v6008_v36  ;;  %v6017_v40 = vfloor.f32 %v6008_v36 }
 0x84e   :  { %7794 = vst [vmem:[#allocation37_spill] sm:$0xff] %v6017_v40 }
 0x84f   :  { %5135 = vset.pattern.permute.xlu0 %v7700_v18 }
 0x850   :  { %1854 = vperm.xlu0 %5135, %v5799_v17   ;;  %5127 = vset.pattern.permute.xlu1 %v7700_v18 }
 0x851   :  { %3328 = vperm.xlu1 %5127, %v5913_v61  }
 0x854   :  { %5136 = vset.pattern.permute.xlu0 %v7695_v38 }
 0x855   :  { %1885 = vperm.xlu0 %5136, %v5799_v17   ;;  %5128 = vset.pattern.permute.xlu1 %v7695_v38 }
 0x856   :  { %3360 = vperm.xlu1 %5128, %v5913_v61   ;;  %v6167_v61 = vadd.f32 1.0, %v5968_v15 }
 0x858   :  { %7817 = vst [vmem:[#allocation58_spill] sm:$0xff] %v6167_v61 }
 0x859   :  { %5139 = vset.pattern.permute.xlu0 %v7700_v18 }
 0x85a   :  { %1977 = vperm.xlu0 %5139, %v5936_v2   ;;  %5131 = vset.pattern.permute.xlu1 %v7692_v60  ;;  %v5964_v60 = vfloor.f32 %v5951_v23 }
 0x85b   :  { %3895 = vperm.xlu1 %5131, %v5939_v4  }
 0x85e   :  { %5140 = vset.pattern.permute.xlu0 %v7695_v38  ;;  %v5972_v38 = vpop.permute.xlu0 %2221 }
 0x85f   :  { %2008 = vperm.xlu0 %5140, %v5936_v2   ;;  %5132 = vset.pattern.permute.xlu1 %v7698_v8  ;;  %v5979_v8 = vadd.f32 %v5691_v30, %v5972_v38 }
 0x860   :  { %3923 = vperm.xlu1 %5132, %v5939_v4  }
 0x861   :  { %v5992_v47 = vfloor.f32 %v5979_v8 }
 0x863   :  { %5143 = vset.pattern.permute.xlu0 %v7700_v18 }
 0x864   :  { %2103 = vperm.xlu0 %5143, %v5964_v60   ;;  %5137 = vset.pattern.permute.xlu1 %v7700_v18  ;;  %v2385_v18 = vmul.f32 4.0, %v5681_v26  ;;  %v6001_v26 = vpop.permute.xlu1 %2996 }
 0x865   :  { %1914 = vperm.xlu1 %5137, %v5968_v15   ;;  %7792 = vst [vmem:[#allocation35_spill] sm:$0xff] %v6001_v26 }
 0x866   :  { %v4549_v50 = vadd.f32 -0.5, %v2385_v18 }
 0x868   :  { %5144 = vset.pattern.permute.xlu0 %v7788_v55  ;;  %v6004_v59 = vadd.f32 %v4549_v50, %v5743_v5  ;;  %v6019_v26 = vpop.permute.xlu1 %3002  ;;  %v7796_v5 = vmov 2   ;;  %v6026_v30 = vadd.f32 %v4549_v50, %v5769_v3  ;;  %v6030_v21 = vadd.f32 %v4549_v50, %v5787_v13 }
 0x869   :  { %2134 = vperm.xlu0 %5144, %v5964_v60   ;;  %5138 = vset.pattern.permute.xlu1 %v7788_v55  ;;  %7795 = vst [vmem:[#allocation38_spill] sm:$0xff] %v6019_v26  ;;  %v6054_v45 = vadd.f32 %v4549_v50, %v5879_v42  ;;  %v2786_v42 = vpop.permute.xlu0 %2785  ;;  %v3031_v3 = vadd.f32 1.0, %v5719_v49  ;;  %v6140_v49 = vadd.f32 1.0, %v5898_v58  ;;  %v6157_v58 = vadd.f32 1.0, %v5939_v4 }
 0x86a   :  { %1946 = vperm.xlu1 %5138, %v5968_v15   ;;  %v6014_v18 = vfloor.f32 %v6004_v59  ;;  %7798 = vst [vmem:[#allocation39_spill] sm:$0xff] %v6030_v21  ;;  %v6038_v26 = vfloor.f32 %v6026_v30  ;;  %v6041_v36 = vfloor.f32 %v6030_v21  ;;  %v6073_v17 = vadd.f32 %v4549_v50, %v2786_v42 }
 0x86b   :  { %7802 = vst [vmem:[#allocation43_spill] sm:$0xff] %v6054_v45  ;;  %v6065_v11 = vfloor.f32 %v6054_v45  ;;  %v6098_v42 = vadd.f32 %v4549_v50, %v5972_v38 }
 0x86c   :  { %v6032_v10 = vpop.permute.xlu1 %1834  ;;  %7800 = vst [vmem:[#allocation41_spill] sm:$0xff] %v6041_v36  ;;  %v6085_v0 = vfloor.f32 %v6073_v17 }
 0x86d   :  { %5147 = vset.pattern.permute.xlu0 %v7791_v44  ;;  %7799 = vst [vmem:[#allocation40_spill] sm:$0xff] %v6032_v10  ;;  %v6050_v10 = vadd.f32 %v4549_v50, %v5915_v62  ;;  %7806 = vst [vmem:[#allocation47_spill] sm:$0xff] %v6098_v42  ;;  %v6107_v54 = vfloor.f32 %v6098_v42 }
 0x86e   :  { %2229 = vperm.xlu0 %5147, %v5992_v47   ;;  %5141 = vset.pattern.permute.xlu1 %v7791_v44 }
 0x86f   :  { %2040 = vperm.xlu1 %5141, %v5995_v51  }
 0x870   :  { %v6046_v13 = vpop.permute.xlu1 %1840 }
 0x871   :  { %7801 = vst [vmem:[#allocation42_spill] sm:$0xff] %v6046_v13  ;;  %v6062_v13 = vfloor.f32 %v6050_v10 }
 0x872   :  { %5148 = vset.pattern.permute.xlu0 %v7788_v55 }
 0x873   :  { %2260 = vperm.xlu0 %5148, %v5992_v47   ;;  %5142 = vset.pattern.permute.xlu1 %v7788_v55 }
 0x874   :  { %2072 = vperm.xlu1 %5142, %v5995_v51   ;;  %v6059_v21 = vpop.permute.xlu1 %2991 }
 0x875   :  { %7803 = vst [vmem:[#allocation44_spill] sm:$0xff] %v6059_v21  ;;  %v6077_v21 = vadd.f32 %v4549_v50, %v5946_v57  ;;  %v3092_v50 = vadd.f32 1.0, %v5831_v28 }
 0x877   :  { %5151 = vset.pattern.permute.xlu0 %v7796_v5  ;;  %7805 = vst [vmem:[#allocation46_spill] sm:$0xff] %v6077_v21 }
 0x878   :  { %2448 = vperm.xlu0 %5151, %v6014_v18   ;;  %5145 = vset.pattern.permute.xlu1 %v7791_v44  ;;  %v6071_v62 = vpop.permute.xlu1 %1829 }
 0x879   :  { %2166 = vperm.xlu1 %5145, %v6017_v40   ;;  %7804 = vst [vmem:[#allocation45_spill] sm:$0xff] %v6071_v62  ;;  %v6088_v62 = vfloor.f32 %v6077_v21 }
 0x87c   :  { %5152 = vset.pattern.permute.xlu0 %v7797_v46 }
 0x87d   :  { %2476 = vperm.xlu0 %5152, %v6014_v18   ;;  %5146 = vset.pattern.permute.xlu1 %v7788_v55 }
 0x87e   :  { %2198 = vperm.xlu1 %5146, %v6017_v40  }
 0x881   :  { %5155 = vset.pattern.permute.xlu0 %v7796_v5 }
 0x882   :  { %2561 = vperm.xlu0 %5155, %v6038_v26   ;;  %5149 = vset.pattern.permute.xlu1 %v7796_v5 }
 0x883   :  { %2392 = vperm.xlu1 %5149, %v6041_v36  }
 0x886   :  { %5156 = vset.pattern.permute.xlu0 %v7797_v46 }
 0x887   :  { %2589 = vperm.xlu0 %5156, %v6038_v26   ;;  %5150 = vset.pattern.permute.xlu1 %v7797_v46 }
 0x888   :  { %2420 = vperm.xlu1 %5150, %v6041_v36  }
 0x88b   :  { %5159 = vset.pattern.permute.xlu0 %v7796_v5 }
 0x88c   :  { %2677 = vperm.xlu0 %5159, %v6062_v13   ;;  %5153 = vset.pattern.permute.xlu1 %v7796_v5 }
 0x88d   :  { %2505 = vperm.xlu1 %5153, %v6065_v11  }
 0x890   :  { %5160 = vset.pattern.permute.xlu0 %v7797_v46 }
 0x891   :  { %2705 = vperm.xlu0 %5160, %v6062_v13   ;;  %5154 = vset.pattern.permute.xlu1 %v7797_v46 }
 0x892   :  { %2533 = vperm.xlu1 %5154, %v6065_v11  }
 0x893   :  { %v6082_v45 = vpop.xlane.xlu1 %1660 }
 0x895   :  { %5163 = vset.pattern.permute.xlu0 %v7796_v5 }
 0x896   :  { %2793 = vperm.xlu0 %5163, %v6085_v0   ;;  %5157 = vset.pattern.permute.xlu1 %v7796_v5 }
 0x897   :  { %2618 = vperm.xlu1 %5157, %v6088_v62   ;;  %v6094_v57 = vpop.xlane.xlu1 %1672 }
 0x89a   :  { %5164 = vset.pattern.permute.xlu0 %v7797_v46 }
 0x89b   :  { %2821 = vperm.xlu0 %5164, %v6085_v0   ;;  %5158 = vset.pattern.permute.xlu1 %v7797_v46  ;;  %v6102_v21 = vpop.xlane.xlu1 %1669 }
 0x89c   :  { %7807 = vst [vmem:[#allocation48_spill] sm:$0xff] %v6102_v21  ;;  %2646 = vperm.xlu1 %5158, %v6088_v62   ;;  %v6132_v21 = vadd.f32 1.0, %v5874_v41 }
 0x89f   :  { %5167 = vset.pattern.permute.xlu0 %v7796_v5  ;;  %v6110_v48 = vpop.permute.xlu1 %3553 }
 0x8a0   :  { %7808 = vst [vmem:[#allocation49_spill] sm:$0xff] %v6110_v48  ;;  %3568 = vperm.xlu0 %5167, %v3565_v56   ;;  %5161 = vset.pattern.permute.xlu1 %v7796_v5  ;;  %v6123_v48 = vadd.f32 1.0, %v5852_v33 }
 0x8a1   :  { %2734 = vperm.xlu1 %5161, %v6107_v54  }
 0x8a3   :  { %v6114_v38 = vpop.permute.xlu1 %3581 }
 0x8a4   :  { %7809 = vst [vmem:[#allocation50_spill] sm:$0xff] %v6114_v38  ;;  %5172 = vset.pattern.permute.xlu0 %v7791_v44 }
 0x8a5   :  { %3095 = vperm.xlu0 %5172, %v3092_v50   ;;  %5162 = vset.pattern.permute.xlu1 %v7797_v46 }
 0x8a6   :  { %2762 = vperm.xlu1 %5162, %v6107_v54  }
 0x8a8   :  { %v6120_v42 = vpop.permute.xlu1 %3076 }
 0x8a9   :  { %7810 = vst [vmem:[#allocation51_spill] sm:$0xff] %v6120_v42  ;;  %5176 = vset.pattern.permute.xlu0 %v7796_v5 }
 0x8aa   :  { %3681 = vperm.xlu0 %5176, %v6123_v48   ;;  %5165 = vset.pattern.permute.xlu1 %v7791_v44 }
 0x8ab   :  { %3034 = vperm.xlu1 %5165, %v3031_v3  }
 0x8ad   :  { %v6129_v38 = vpop.permute.xlu1 %3108 }
 0x8ae   :  { %7811 = vst [vmem:[#allocation52_spill] sm:$0xff] %v6129_v38  ;;  %5181 = vset.pattern.permute.xlu0 %v7791_v44 }
 0x8af   :  { %3221 = vperm.xlu0 %5181, %v6132_v21   ;;  %5166 = vset.pattern.permute.xlu1 %v7788_v55 }
 0x8b0   :  { %3058 = vperm.xlu1 %5166, %v3031_v3   ;;  %v3621_v3 = vadd.f32 1.0, %v5764_v1 }
 0x8b2   :  { %v6137_v42 = vpop.permute.xlu1 %3666 }
 0x8b3   :  { %7812 = vst [vmem:[#allocation53_spill] sm:$0xff] %v6137_v42  ;;  %5185 = vset.pattern.permute.xlu0 %v7796_v5 }
 0x8b4   :  { %3794 = vperm.xlu0 %5185, %v6140_v49   ;;  %5168 = vset.pattern.permute.xlu1 %v7797_v46 }
 0x8b5   :  { %3592 = vperm.xlu1 %5168, %v3565_v56   ;;  %v6160_v56 = vpop.permute.xlu0 %2972 }
 0x8b6   :  { %7815 = vst [vmem:[#allocation56_spill] sm:$0xff] %v6160_v56  ;;  %v6176_v56 = vadd.f32 1.0, %v5995_v51 }
 0x8b7   :  { %v6145_v38 = vpop.permute.xlu1 %3694 }
 0x8b8   :  { %7813 = vst [vmem:[#allocation54_spill] sm:$0xff] %v6145_v38  ;;  %5190 = vset.pattern.permute.xlu0 %v7791_v44 }
 0x8b9   :  { %3347 = vperm.xlu0 %5190, %v6148_v35   ;;  %5169 = vset.pattern.permute.xlu1 %v7796_v5 }
 0x8ba   :  { %3624 = vperm.xlu1 %5169, %v3621_v3  }
 0x8bc   :  { %v6154_v42 = vpop.permute.xlu1 %3202 }
 0x8bd   :  { %7814 = vst [vmem:[#allocation55_spill] sm:$0xff] %v6154_v42  ;;  %5194 = vset.pattern.permute.xlu0 %v7796_v5  ;;  %v6172_v42 = vpop.permute.xlu0 %1810 }
 0x8be   :  { %3910 = vperm.xlu0 %5194, %v6157_v58   ;;  %5170 = vset.pattern.permute.xlu1 %v7797_v46  ;;  %7818 = vst [vmem:[#allocation59_spill] sm:$0xff] %v6172_v42  ;;  %v3154_v42 = vadd.f32 1.0, %v5781_v9 }
 0x8bf   :  { %3648 = vperm.xlu1 %5170, %v3621_v3  }
 0x8c1   :  { %v6164_v38 = vpop.permute.xlu1 %3234  ;;  %v6181_v3 = vpop.xlane.xlu0 %1666 }
 0x8c2   :  { %7816 = vst [vmem:[#allocation57_spill] sm:$0xff] %v6164_v38  ;;  %5201 = vset.pattern.permute.xlu0 %v7791_v44  ;;  %7820 = vst [vmem:[#allocation61_spill] sm:$0xff] %v6181_v3  ;;  %v6184_v38 = vadd.f32 1.0, %v6017_v40 }
 0x8c3   :  { %1933 = vperm.xlu0 %5201, %v6167_v61   ;;  %5171 = vset.pattern.permute.xlu1 %v7788_v55 }
 0x8c4   :  { %3064 = vperm.xlu1 %5171, %v5726_v52  }
 0x8c5   :  { %v6190_v61 = vpop.xlane.xlu0 %1657 }
 0x8c6   :  { %v6178_v4 = vpop.permute.xlu1 %3779  ;;  %7822 = vst [vmem:[#allocation63_spill] sm:$0xff] %v6190_v61  ;;  %v6209_v61 = vsub.f32 %v5797_v16, %v5809_v6  ;;  %v6228_v16 = vadd.f32 1.0, %v6107_v54 }
 0x8c7   :  { %7819 = vst [vmem:[#allocation60_spill] sm:$0xff] %v6178_v4  ;;  %2059 = vperm.xlu0 %5201, %v6176_v56   ;;  %v6194_v4 = vadd.f32 1.0, %v6041_v36 }
 0x8c8   :  { %3119 = vperm.xlu1 %5171, %v3092_v50  }
 0x8c9   :  { %v6201_v3 = vpop.xlane.xlu0 %1663 }
 0x8ca   :  { %7824 = vst [vmem:[#allocation65_spill] sm:$0xff] %v6201_v3 }
 0x8cb   :  { %2185 = vperm.xlu0 %5201, %v6184_v38   ;;  %v6187_v15 = vpop.permute.xlu1 %3807 }
 0x8cc   :  { %7821 = vst [vmem:[#allocation62_spill] sm:$0xff] %v6187_v15  ;;  %5173 = vset.pattern.permute.xlu1 %v7791_v44  ;;  %v6204_v15 = vadd.f32 1.0, %v6065_v11 }
 0x8cd   :  { %3157 = vperm.xlu1 %5173, %v3154_v42   ;;  %v6213_v40 = vpop.permute.xlu0 %3016 }
 0x8ce   :  { %7826 = vst [vmem:[#allocation67_spill] sm:$0xff] %v6213_v40  ;;  %v7733_v40 = vsub.f32 1.0, %v5726_v52 }
 0x8cf   :  { %5208 = vset.pattern.permute.xlu0 %v7796_v5 }
 0x8d0   :  { %2407 = vperm.xlu0 %5208, %v6194_v4   ;;  %v6198_v50 = vpop.permute.xlu1 %3328 }
 0x8d1   :  { %7823 = vst [vmem:[#allocation64_spill] sm:$0xff] %v6198_v50  ;;  %5174 = vset.pattern.permute.xlu1 %v7788_v55  ;;  %v6217_v50 = vadd.f32 1.0, %v6088_v62  ;;  %v6231_v6 = vpop.permute.xlu0 %3047 }
 0x8d2   :  { %3181 = vperm.xlu1 %5174, %v3154_v42   ;;  %v6223_v42 = vsub.f32 %v5757_v63, %v5764_v1  ;;  %v3734_v1 = vadd.f32 1.0, %v5806_v20 }
 0x8d4   :  { %2520 = vperm.xlu0 %5208, %v6204_v15  }
 0x8d5   :  { %v6211_v36 = vpop.permute.xlu1 %3360  ;;  %v6241_v63 = vpop.permute.xlu0 %3609 }
 0x8d6   :  { %7825 = vst [vmem:[#allocation66_spill] sm:$0xff] %v6211_v36  ;;  %5175 = vset.pattern.permute.xlu1 %v7797_v46  ;;  %7829 = vst [vmem:[#allocation70_spill] sm:$0xff] %v6241_v63 }
 0x8d7   :  { %3598 = vperm.xlu1 %5175, %v6209_v61  }
 0x8d8   :  { %2633 = vperm.xlu0 %5208, %v6217_v50  }
 0x8da   :  { %v6225_v3 = vpop.permute.xlu1 %3895 }
 0x8db   :  { %7827 = vst [vmem:[#allocation68_spill] sm:$0xff] %v6225_v3  ;;  %3654 = vperm.xlu1 %5175, %v6223_v42  }
 0x8dc   :  { %2749 = vperm.xlu0 %5208, %v6228_v16  }
 0x8df   :  { %3705 = vperm.xlu1 %5175, %v6123_v48   ;;  %v6235_v36 = vpop.permute.xlu1 %3923  ;;  %v7734_v48 = vsub.f32 1.0, %v6223_v42 }
 0x8e0   :  { %7828 = vst [vmem:[#allocation69_spill] sm:$0xff] %v6235_v36  ;;  %5218 = vset.pattern.permute.xlu0 %v7788_v55  ;;  %v6250_v36 = vsub.f32 %v5776_v7, %v5781_v9  ;;  %v6264_v7 = vsub.f32 %v5793_v14, %v5806_v20  ;;  %v6270_v9 = vsub.f32 %v5821_v24, %v5831_v28 }
 0x8e1   :  { %3053 = vperm.xlu0 %5218, %v7733_v40   ;;  %v6255_v40 = vpop.permute.xlu0 %3637  ;;  %v6281_v14 = vsub.f32 %v5816_v22, %v5827_v25  ;;  %v6292_v28 = vsub.f32 %v5838_v29, %v5849_v32  ;;  %v6299_v22 = vsub.f32 %v5843_v31, %v5852_v33 }
 0x8e3   :  { %5177 = vset.pattern.permute.xlu1 %v7796_v5  ;;  %v7738_v24 = vsub.f32 1.0, %v6281_v14  ;;  %v7737_v29 = vsub.f32 1.0, %v6292_v28 }
 0x8e4   :  { %3737 = vperm.xlu1 %5177, %v3734_v1   ;;  %v6245_v3 = vpop.permute.xlu1 %1914 }
 0x8e5   :  { %7830 = vst [vmem:[#allocation71_spill] sm:$0xff] %v6245_v3  ;;  %5219 = vset.pattern.permute.xlu0 %v7797_v46  ;;  %v7735_v3 = vsub.f32 1.0, %v6250_v36 }
 0x8e6   :  { %3643 = vperm.xlu0 %5219, %v7734_v48  }
 0x8e8   :  { %5178 = vset.pattern.permute.xlu1 %v7797_v46 }
 0x8e9   :  { %3761 = vperm.xlu1 %5178, %v3734_v1   ;;  %v6258_v63 = vpop.permute.xlu1 %1946  ;;  %v6273_v1 = vpop.permute.xlu0 %3139 }
 0x8ea   :  { %7831 = vst [vmem:[#allocation72_spill] sm:$0xff] %v6258_v63  ;;  %5221 = vset.pattern.permute.xlu0 %v7788_v55  ;;  %7832 = vst [vmem:[#allocation73_spill] sm:$0xff] %v6273_v1  ;;  %v7736_v63 = vsub.f32 1.0, %v6264_v7  ;;  %v7868_v1 = vld [vmem:[#allocation27_spill] sm:$0xff] }
 0x8eb   :  { %3176 = vperm.xlu0 %5221, %v7735_v3  }
 0x8ed   :  { %5179 = vset.pattern.permute.xlu1 %v7788_v55  ;;  %v6294_v3 = vpop.permute.xlu0 %3170 }
 0x8ee   :  { %3125 = vperm.xlu1 %5179, %v6270_v9   ;;  %v6276_v48 = vpop.permute.xlu1 %2040  ;;  %7835 = vst [vmem:[#allocation76_spill] sm:$0xff] %v6294_v3 }
 0x8ef   :  { %7833 = vst [vmem:[#allocation74_spill] sm:$0xff] %v6276_v48  ;;  %5223 = vset.pattern.permute.xlu0 %v7797_v46  ;;  %v6310_v48 = vsub.f32 %v5860_v34, %v5871_v37 }
 0x8f0   :  { %3756 = vperm.xlu0 %5223, %v7736_v63  }
 0x8f1   :  { %v7739_v33 = vsub.f32 1.0, %v6310_v48 }
 0x8f2   :  { %3187 = vperm.xlu1 %5179, %v6250_v36  }
 0x8f3   :  { %v6287_v20 = vpop.permute.xlu1 %2072 }
 0x8f4   :  { %7834 = vst [vmem:[#allocation75_spill] sm:$0xff] %v6287_v20  ;;  %5225 = vset.pattern.permute.xlu0 %v7788_v55  ;;  %v6313_v20 = vpop.permute.xlu0 %3722 }
 0x8f5   :  { %3302 = vperm.xlu0 %5225, %v7738_v24   ;;  %7837 = vst [vmem:[#allocation78_spill] sm:$0xff] %v6313_v20  ;;  %v7740_v24 = vsub.f32 1.0, %v5803_v19 }
 0x8f6   :  { %5180 = vset.pattern.permute.xlu1 %v7797_v46 }
 0x8f7   :  { %3711 = vperm.xlu1 %5180, %v6299_v22  }
 0x8f8   :  { %v6305_v63 = vpop.permute.xlu1 %2166  ;;  %v6325_v34 = vpop.permute.xlu0 %3750 }
 0x8f9   :  { %7836 = vst [vmem:[#allocation77_spill] sm:$0xff] %v6305_v63  ;;  %5227 = vset.pattern.permute.xlu0 %v7797_v46  ;;  %7839 = vst [vmem:[#allocation80_spill] sm:$0xff] %v6325_v34  ;;  %v3850_v34 = vadd.f32 1.0, %v5849_v32 }
 0x8fa   :  { %3872 = vperm.xlu0 %5227, %v7737_v29   ;;  %v6330_v29 = vsub.f32 %v5925_v53, %v5936_v2 }
 0x8fb   :  { %3767 = vperm.xlu1 %5180, %v6264_v7  }
 0x8fc   :  { %v6344_v53 = vpop.permute.xlu0 %3265 }
 0x8fd   :  { %v6318_v31 = vpop.permute.xlu1 %2198  ;;  %7841 = vst [vmem:[#allocation82_spill] sm:$0xff] %v6344_v53 }
 0x8fe   :  { %7838 = vst [vmem:[#allocation79_spill] sm:$0xff] %v6318_v31  ;;  %5229 = vset.pattern.permute.xlu0 %v7788_v55  ;;  %v3280_v31 = vadd.f32 1.0, %v5827_v25 }
 0x8ff   :  { %3428 = vperm.xlu0 %5229, %v7739_v33   ;;  %5182 = vset.pattern.permute.xlu1 %v7788_v55  ;;  %v6341_v33 = vsub.f32 %v5951_v23, %v5964_v60 }
 0x900   :  { %3245 = vperm.xlu1 %5182, %v6132_v21   ;;  %v7741_v21 = vsub.f32 1.0, %v6330_v29  ;;  %v6358_v23 = vpop.permute.xlu0 %3296 }
 0x901   :  { %v7742_v25 = vsub.f32 1.0, %v6341_v33  ;;  %7843 = vst [vmem:[#allocation84_spill] sm:$0xff] %v6358_v23 }
 0x902   :  { %v6333_v63 = vpop.permute.xlu1 %2392 }
 0x903   :  { %7840 = vst [vmem:[#allocation81_spill] sm:$0xff] %v6333_v63  ;;  %1891 = vperm.xlu0 %5229, %v7740_v24   ;;  %v6352_v24 = vsub.f32 %v5979_v8, %v5992_v47  ;;  %v6366_v8 = vsub.f32 %v6004_v59, %v6014_v18  ;;  %v6381_v59 = vsub.f32 %v6026_v30, %v6038_v26 }
 0x904   :  { %5183 = vset.pattern.permute.xlu1 %v7791_v44  ;;  %v6375_v23 = vpop.permute.xlu0 %3838 }
 0x905   :  { %3283 = vperm.xlu1 %5183, %v3280_v31   ;;  %7846 = vst [vmem:[#allocation87_spill] sm:$0xff] %v6375_v23  ;;  %v7747_v30 = vsub.f32 1.0, %v6381_v59  ;;  %v7865_v23 = vld [vmem:[#allocation24_spill] sm:$0xff] }
 0x907   :  { %2014 = vperm.xlu0 %5229, %v7741_v21   ;;  %v6348_v20 = vpop.permute.xlu1 %2420  ;;  %v7743_v21 = vsub.f32 1.0, %v6352_v24 }
 0x908   :  { %7842 = vst [vmem:[#allocation83_spill] sm:$0xff] %v6348_v20  ;;  %v7869_v20 = vld [vmem:[#allocation26_spill] sm:$0xff] }
 0x909   :  { %5184 = vset.pattern.permute.xlu1 %v7788_v55  ;;  %v6495_v63 = vsub.f32 %v7869_v20, %v7868_v1 }
 0x90a   :  { %3307 = vperm.xlu1 %5184, %v3280_v31   ;;  %v1674_v31 = vsub.f32 %v5657_v12, %v5921_v27  ;;  %v1677_v27 = vsub.f32 %v5702_v39, %v6082_v45  ;;  %v1681_v39 = vsub.f32 %v5711_v43, %v6094_v57  ;;  %v7852_v43 = vld [vmem:[#allocation16_spill] sm:$0xff] }
 0x90b   :  { %2140 = vperm.xlu0 %5229, %v7742_v25  }
 0x90c   :  { %v6360_v53 = vpop.permute.xlu1 %2505  ;;  %v1682_v12 = vmul.f32 1.442695, %v1674_v31  ;;  %v1688_v31 = vmul.f32 1.442695, %v1677_v27  ;;  %v7851_v27 = vld [vmem:[#allocation48_spill] sm:$0xff] }
 0x90d   :  { %7844 = vst [vmem:[#allocation85_spill] sm:$0xff] %v6360_v53  ;;  %v7744_v53 = vsub.f32 1.0, %v6366_v8  ;;  %v1680_v57 = vsub.f32 %v7852_v43, %v7851_v27 }
 0x90e   :  { %5186 = vset.pattern.permute.xlu1 %v7797_v46  ;;  %5296 = vpow2.f32 %v1682_v12  ;;  %v1696_v12 = vmul.f32 1.442695, %v1681_v39 }
 0x90f   :  { %2266 = vperm.xlu0 %5229, %v7743_v21   ;;  %3818 = vperm.xlu1 %5186, %v6140_v49   ;;  %v6391_v49 = vsub.f32 %v6050_v10, %v6062_v13  ;;  %v6396_v21 = vpop.permute.xlu0 %3866  ;;  %v6405_v10 = vsub.f32 %v6073_v17, %v6085_v0  ;;  %5298 = vpow2.f32 %v1688_v31 }
 0x910   :  { %7848 = vst [vmem:[#allocation89_spill] sm:$0xff] %v6396_v21  ;;  %5300 = vpow2.f32 %v1696_v12  ;;  %v3406_v12 = vadd.f32 1.0, %v5871_v37  ;;  %v7859_v37 = vld [vmem:[#allocation23_spill] sm:$0xff] }
 0x911   :  { %v6373_v25 = vpop.permute.xlu1 %2533  ;;  %v7746_v45 = vsub.f32 1.0, %v6391_v49 }
 0x912   :  { %7845 = vst [vmem:[#allocation86_spill] sm:$0xff] %v6373_v25 }
 0x913   :  { %5233 = vset.pattern.permute.xlu0 %v7797_v46  ;;  %5187 = vset.pattern.permute.xlu1 %v7796_v5  ;;  %v6419_v17 = vpop.permute.xlu0 %3391 }
 0x914   :  { %2482 = vperm.xlu0 %5233, %v7744_v53   ;;  %3853 = vperm.xlu1 %5187, %v3850_v34  }
 0x916   :  { %v6393_v32 = vpop.permute.xlu1 %2618 }
 0x917   :  { %7847 = vst [vmem:[#allocation88_spill] sm:$0xff] %v6393_v32  ;;  %v7850_v32 = vld [vmem:[#allocation19_spill] sm:$0xff]  ;;  %v6430_v39 = vpop.permute.xlu0 %3422 }
 0x918   :  { %2595 = vperm.xlu0 %5233, %v7747_v30   ;;  %5188 = vset.pattern.permute.xlu1 %v7797_v46  ;;  %v6412_v25 = vsub.f32 %v7850_v32, %v5874_v41  ;;  %7853 = vst [vmem:[#allocation19_spill] sm:$0xff] %v6419_v17  ;;  %v1694_v32 = vmul.f32 1.442695, %v1680_v57  ;;  %v6428_v31 = vpop.eup %5296  ;;  %7855 = vst [vmem:[#allocation16_spill] sm:$0xff] %v6430_v39  ;;  %v7862_v39 = vld [vmem:[#allocation22_spill] sm:$0xff]  ;;  %v7864_v17 = vld [vmem:[#allocation25_spill] sm:$0xff] }
 0x919   :  { %3877 = vperm.xlu1 %5188, %v3850_v34   ;;  %v7745_v34 = vsub.f32 1.0, %v6405_v10  ;;  %v6438_v43 = vpop.eup %5298  ;;  %v6484_v21 = vsub.f32 %v7865_v23, %v7864_v17  ;;  %v7871_v17 = vld [vmem:[#allocation18_spill] sm:$0xff] }
 0x91a   :  { %5302 = vpow2.f32 %v1694_v32  ;;  %v6448_v32 = vpop.eup %5300 }
 0x91b   :  { %v6408_v53 = vpop.permute.xlu1 %2646  ;;  %v6443_v57 = vpop.permute.xlu0 %3954 }
 0x91c   :  { %7849 = vst [vmem:[#allocation90_spill] sm:$0xff] %v6408_v53  ;;  %2711 = vperm.xlu0 %5233, %v7746_v45   ;;  %7857 = vst [vmem:[#allocation92_spill] sm:$0xff] %v6443_v57  ;;  %v7860_v57 = vld [vmem:[#allocation21_spill] sm:$0xff] }
 0x91d   :  { %5189 = vset.pattern.permute.xlu1 %v7788_v55 }
 0x91e   :  { %3251 = vperm.xlu1 %5189, %v6412_v25  }
 0x91f   :  { %v6457_v30 = vpop.permute.xlu0 %3982 }
 0x920   :  { %2827 = vperm.xlu0 %5233, %v7745_v34   ;;  %v6425_v41 = vpop.permute.xlu1 %2734  ;;  %7858 = vst [vmem:[#allocation93_spill] sm:$0xff] %v6457_v30 }
 0x921   :  { %7854 = vst [vmem:[#allocation48_spill] sm:$0xff] %v6425_v41  ;;  %v6463_v41 = vsub.f32 %v7860_v57, %v7859_v37 }
 0x922   :  { %3313 = vperm.xlu1 %5189, %v6281_v14  }
 0x924   :  { %1706 = vrot.lane.b32.xlu0 %v6428_v31, %s5391_s21 }
 0x925   :  { %v6434_v27 = vpop.permute.xlu1 %2762  ;;  %5235 = vset.pattern.permute.xlu0 %v7791_v44 }
 0x926   :  { %7856 = vst [vmem:[#allocation91_spill] sm:$0xff] %v6434_v27  ;;  %3371 = vperm.xlu1 %5189, %v6148_v35   ;;  %v6452_v35 = vpop.eup %5302 }
 0x928   :  { %1712 = vrot.lane.b32.xlu0 %v6438_v43, %s5391_s21 }
 0x92a   :  { %5191 = vset.pattern.permute.xlu1 %v7791_v44  ;;  %v6446_v34 = vpop.permute.xlu1 %3034 }
 0x92b   :  { %3409 = vperm.xlu1 %5191, %v3406_v12  }
 0x92c   :  { %1720 = vrot.lane.b32.xlu0 %v6448_v32, %s5391_s21 }
 0x92f   :  { %5192 = vset.pattern.permute.xlu1 %v7788_v55  ;;  %v6455_v45 = vpop.permute.xlu1 %3058 }
 0x930   :  { %1718 = vrot.lane.b32.xlu0 %v6452_v35, %s5391_s21  ;;  %3433 = vperm.xlu1 %5192, %v3406_v12   ;;  %v3966_v12 = vadd.f32 1.0, %v7862_v39 }
 0x934   :  { %5193 = vset.pattern.permute.xlu1 %v7797_v46  ;;  %v6466_v27 = vpop.permute.xlu1 %3592 }
 0x935   :  { %3824 = vperm.xlu1 %5193, %v6463_v41  }
 0x939   :  { %3883 = vperm.xlu1 %5193, %v6292_v28   ;;  %v6470_v53 = vpop.permute.xlu1 %3624 }
 0x93a   :  { %7861 = vst [vmem:[#allocation23_spill] sm:$0xff] %v6470_v53 }
 0x93d   :  { %3934 = vperm.xlu1 %5193, %v6157_v58  }
 0x93e   :  { %v6473_v30 = vpop.permute.xlu1 %3648 }
 0x941   :  { %5195 = vset.pattern.permute.xlu1 %v7796_v5 }
 0x942   :  { %3969 = vperm.xlu1 %5195, %v3966_v12  }
 0x943   :  { %v6477_v57 = vpop.permute.xlu1 %3064 }
 0x946   :  { %5196 = vset.pattern.permute.xlu1 %v7797_v46 }
 0x947   :  { %3993 = vperm.xlu1 %5196, %v3966_v12   ;;  %v6480_v37 = vpop.permute.xlu1 %3119  ;;  %v1869_v12 = vadd.f32 1.0, %v7871_v17  ;;  %v7878_v17 = vld [vmem:[#allocation58_spill] sm:$0xff] }
 0x948   :  { %7863 = vst [vmem:[#allocation21_spill] sm:$0xff] %v6480_v37  ;;  %v6503_v37 = vpop.permute.xlu0 %1854 }
 0x949   :  { %7872 = vst [vmem:[#allocation27_spill] sm:$0xff] %v6503_v37  ;;  %v1992_v37 = vadd.f32 1.0, %v5936_v2 }
 0x94b   :  { %5197 = vset.pattern.permute.xlu1 %v7788_v55 }
 0x94c   :  { %3377 = vperm.xlu1 %5197, %v6484_v21   ;;  %v6488_v58 = vpop.permute.xlu1 %3157  ;;  %v6510_v1 = vpop.permute.xlu0 %1885 }
 0x94d   :  { %7866 = vst [vmem:[#allocation22_spill] sm:$0xff] %v6488_v58  ;;  %7875 = vst [vmem:[#allocation94_spill] sm:$0xff] %v6510_v1 }
 0x950   :  { %3439 = vperm.xlu1 %5197, %v6310_v48  }
 0x951   :  { %v6491_v3 = vpop.permute.xlu1 %3181 }
 0x952   :  { %7867 = vst [vmem:[#allocation25_spill] sm:$0xff] %v6491_v3 }
 0x954   :  { %5198 = vset.pattern.permute.xlu1 %v7797_v46 }
 0x955   :  { %3940 = vperm.xlu1 %5198, %v6495_v63  }
 0x956   :  { %v6499_v23 = vpop.permute.xlu1 %3598 }
 0x957   :  { %7870 = vst [vmem:[#allocation24_spill] sm:$0xff] %v6499_v23  ;;  %v6515_v23 = vpop.permute.xlu0 %1977 }
 0x958   :  { %7877 = vst [vmem:[#allocation96_spill] sm:$0xff] %v6515_v23  ;;  %v7884_v23 = vld [vmem:[#allocation31_spill] sm:$0xff] }
 0x959   :  { %5199 = vset.pattern.permute.xlu1 %v7791_v44 }
 0x95a   :  { %1872 = vperm.xlu1 %5199, %v1869_v12   ;;  %v6505_v58 = vpop.permute.xlu1 %3654 }
 0x95b   :  { %7873 = vst [vmem:[#allocation26_spill] sm:$0xff] %v6505_v58  ;;  %v6522_v58 = vpop.permute.xlu0 %2008 }
 0x95c   :  { %7880 = vst [vmem:[#allocation97_spill] sm:$0xff] %v6522_v58 }
 0x95e   :  { %5200 = vset.pattern.permute.xlu1 %v7788_v55  ;;  %v6508_v3 = vpop.permute.xlu1 %3705 }
 0x95f   :  { %7874 = vst [vmem:[#allocation18_spill] sm:$0xff] %v6508_v3  ;;  %1896 = vperm.xlu1 %5200, %v1869_v12  }
 0x963   :  { %1902 = vperm.xlu1 %5200, %v5803_v19   ;;  %v6513_v20 = vpop.permute.xlu1 %3737 }
 0x964   :  { %7876 = vst [vmem:[#allocation95_spill] sm:$0xff] %v6513_v20  ;;  %v6529_v20 = vpop.permute.xlu0 %2103 }
 0x965   :  { %7883 = vst [vmem:[#allocation100_spill] sm:$0xff] %v6529_v20  ;;  %v2118_v20 = vadd.f32 1.0, %v5964_v60 }
 0x967   :  { %1957 = vperm.xlu1 %5200, %v7878_v17   ;;  %v7885_v17 = vld [vmem:[#allocation29_spill] sm:$0xff] }
 0x968   :  { %v6518_v53 = vpop.permute.xlu1 %3761  ;;  %v6533_v1 = vsub.f32 %v7885_v17, %v7884_v23 }
 0x969   :  { %7879 = vst [vmem:[#allocation58_spill] sm:$0xff] %v6518_v53  ;;  %v6538_v53 = vpop.permute.xlu0 %2134 }
 0x96a   :  { %7887 = vst [vmem:[#allocation29_spill] sm:$0xff] %v6538_v53  ;;  %v7893_v53 = vld [vmem:[#allocation33_spill] sm:$0xff] }
 0x96b   :  { %5202 = vset.pattern.permute.xlu1 %v7791_v44 }
 0x96c   :  { %1995 = vperm.xlu1 %5202, %v1992_v37  }
 0x96d   :  { %v6524_v12 = vpop.permute.xlu1 %3125 }
 0x96e   :  { %7881 = vst [vmem:[#allocation98_spill] sm:$0xff] %v6524_v12 }
 0x970   :  { %5203 = vset.pattern.permute.xlu1 %v7788_v55 }
 0x971   :  { %2019 = vperm.xlu1 %5203, %v1992_v37   ;;  %v6527_v3 = vpop.permute.xlu1 %3187  ;;  %v6544_v37 = vpop.permute.xlu0 %2229 }
 0x972   :  { %7882 = vst [vmem:[#allocation99_spill] sm:$0xff] %v6527_v3  ;;  %7889 = vst [vmem:[#allocation102_spill] sm:$0xff] %v6544_v37 }
 0x975   :  { %1963 = vperm.xlu1 %5203, %v6533_v1   ;;  %v6550_v23 = vpop.permute.xlu0 %2260 }
 0x976   :  { %v6536_v2 = vpop.permute.xlu1 %3711  ;;  %7891 = vst [vmem:[#allocation104_spill] sm:$0xff] %v6550_v23 }
 0x977   :  { %7886 = vst [vmem:[#allocation31_spill] sm:$0xff] %v6536_v2  ;;  %v6557_v2 = vsub.f32 %v7893_v53, %v5995_v51  ;;  %v2244_v51 = vadd.f32 1.0, %v5992_v47 }
 0x979   :  { %2025 = vperm.xlu1 %5203, %v6330_v29   ;;  %v6561_v37 = vpop.permute.xlu0 %2448 }
 0x97a   :  { %v6541_v58 = vpop.permute.xlu1 %3767  ;;  %7895 = vst [vmem:[#allocation106_spill] sm:$0xff] %v6561_v37 }
 0x97b   :  { %7888 = vst [vmem:[#allocation101_spill] sm:$0xff] %v6541_v58 }
 0x97d   :  { %2083 = vperm.xlu1 %5203, %v6176_v56   ;;  %v6567_v23 = vpop.permute.xlu0 %2476 }
 0x97e   :  { %7897 = vst [vmem:[#allocation108_spill] sm:$0xff] %v6567_v23 }
 0x97f   :  { %v6546_v12 = vpop.permute.xlu1 %3245 }
 0x980   :  { %7890 = vst [vmem:[#allocation103_spill] sm:$0xff] %v6546_v12 }
 0x981   :  { %5204 = vset.pattern.permute.xlu1 %v7791_v44 }
 0x982   :  { %2121 = vperm.xlu1 %5204, %v2118_v20  }
 0x984   :  { %v6552_v17 = vpop.permute.xlu1 %3283 }
 0x985   :  { %7892 = vst [vmem:[#allocation105_spill] sm:$0xff] %v6552_v17 }
 0x986   :  { %5205 = vset.pattern.permute.xlu1 %v7788_v55 }
 0x987   :  { %2145 = vperm.xlu1 %5205, %v2118_v20   ;;  %v6572_v20 = vpop.permute.xlu0 %2561 }
 0x988   :  { %7899 = vst [vmem:[#allocation110_spill] sm:$0xff] %v6572_v20 }
 0x989   :  { %v6559_v56 = vpop.permute.xlu1 %3307 }
 0x98a   :  { %7894 = vst [vmem:[#allocation33_spill] sm:$0xff] %v6559_v56  ;;  %v7903_v56 = vld [vmem:[#allocation37_spill] sm:$0xff] }
 0x98b   :  { %2089 = vperm.xlu1 %5205, %v6557_v2   ;;  %v6578_v12 = vpop.permute.xlu0 %2589 }
 0x98c   :  { %7901 = vst [vmem:[#allocation112_spill] sm:$0xff] %v6578_v12 }
 0x98e   :  { %v6564_v60 = vpop.permute.xlu1 %3818 }
 0x98f   :  { %7896 = vst [vmem:[#allocation107_spill] sm:$0xff] %v6564_v60  ;;  %2151 = vperm.xlu1 %5205, %v6341_v33   ;;  %v6590_v47 = vpop.permute.xlu0 %2677 }
 0x993   :  { %2209 = vperm.xlu1 %5205, %v6184_v38   ;;  %v6570_v17 = vpop.permute.xlu1 %3853  ;;  %v7904_v38 = vld [vmem:[#allocation36_spill] sm:$0xff]  ;;  %v6595_v12 = vpop.permute.xlu0 %2705 }
 0x994   :  { %7898 = vst [vmem:[#allocation109_spill] sm:$0xff] %v6570_v17  ;;  %v6585_v58 = vsub.f32 %v7904_v38, %v7903_v56  ;;  %7906 = vst [vmem:[#allocation36_spill] sm:$0xff] %v6590_v47  ;;  %v2460_v56 = vadd.f32 1.0, %v6014_v18 }
 0x995   :  { %7908 = vst [vmem:[#allocation115_spill] sm:$0xff] %v6595_v12 }
 0x997   :  { %5206 = vset.pattern.permute.xlu1 %v7791_v44  ;;  %v6602_v38 = vpop.permute.xlu0 %2793 }
 0x998   :  { %2247 = vperm.xlu1 %5206, %v2244_v51   ;;  %v6576_v53 = vpop.permute.xlu1 %3877  ;;  %7910 = vst [vmem:[#allocation117_spill] sm:$0xff] %v6602_v38 }
 0x999   :  { %7900 = vst [vmem:[#allocation111_spill] sm:$0xff] %v6576_v53  ;;  %v7914_v53 = vld [vmem:[#allocation41_spill] sm:$0xff] }
 0x99c   :  { %5207 = vset.pattern.permute.xlu1 %v7788_v55 }
 0x99d   :  { %2271 = vperm.xlu1 %5207, %v2244_v51   ;;  %v6581_v60 = vpop.permute.xlu1 %3251 }
 0x99e   :  { %7902 = vst [vmem:[#allocation113_spill] sm:$0xff] %v6581_v60 }
 0x9a1   :  { %2215 = vperm.xlu1 %5207, %v6585_v58   ;;  %v6588_v20 = vpop.permute.xlu1 %3313 }
 0x9a2   :  { %7905 = vst [vmem:[#allocation37_spill] sm:$0xff] %v6588_v20 }
 0x9a5   :  { %2277 = vperm.xlu1 %5207, %v6352_v24   ;;  %v6593_v17 = vpop.permute.xlu1 %3371 }
 0x9a6   :  { %7907 = vst [vmem:[#allocation114_spill] sm:$0xff] %v6593_v17  ;;  %v6608_v17 = vpop.permute.xlu0 %2821 }
 0x9a7   :  { %7912 = vst [vmem:[#allocation119_spill] sm:$0xff] %v6608_v17  ;;  %v2573_v17 = vadd.f32 1.0, %v6038_v26 }
 0x9a9   :  { %5209 = vset.pattern.permute.xlu1 %v7797_v46 }
 0x9aa   :  { %2431 = vperm.xlu1 %5209, %v6194_v4   ;;  %v6599_v51 = vpop.permute.xlu1 %3409  ;;  %v7915_v4 = vld [vmem:[#allocation39_spill] sm:$0xff]  ;;  %v6619_v38 = vpop.permute.xlu0 %3568 }
 0x9ab   :  { %7909 = vst [vmem:[#allocation116_spill] sm:$0xff] %v6599_v51  ;;  %v6614_v60 = vsub.f32 %v7915_v4, %v7914_v53 }
 0x9ae   :  { %5210 = vset.pattern.permute.xlu1 %v7796_v5 }
 0x9af   :  { %2463 = vperm.xlu1 %5210, %v2460_v56   ;;  %v6605_v47 = vpop.permute.xlu1 %3433 }
 0x9b0   :  { %7911 = vst [vmem:[#allocation118_spill] sm:$0xff] %v6605_v47  ;;  %v6624_v47 = vpop.permute.xlu0 %3095 }
 0x9b1   :  { %7918 = vst [vmem:[#allocation121_spill] sm:$0xff] %v6624_v47  ;;  %v7965_v47 = vld [vmem:[#allocation61_spill] sm:$0xff] }
 0x9b3   :  { %5211 = vset.pattern.permute.xlu1 %v7797_v46 }
 0x9b4   :  { %2487 = vperm.xlu1 %5211, %v2460_v56   ;;  %v6610_v12 = vpop.permute.xlu1 %3824  ;;  %v6631_v53 = vpop.permute.xlu0 %3681 }
 0x9b5   :  { %7913 = vst [vmem:[#allocation120_spill] sm:$0xff] %v6610_v12  ;;  %7920 = vst [vmem:[#allocation123_spill] sm:$0xff] %v6631_v53 }
 0x9b8   :  { %2437 = vperm.xlu1 %5211, %v6614_v60   ;;  %v6617_v18 = vpop.permute.xlu1 %3883 }
 0x9b9   :  { %7916 = vst [vmem:[#allocation41_spill] sm:$0xff] %v6617_v18 }
 0x9bc   :  { %2493 = vperm.xlu1 %5211, %v6366_v8   ;;  %v6622_v51 = vpop.permute.xlu1 %3934 }
 0x9bd   :  { %7917 = vst [vmem:[#allocation39_spill] sm:$0xff] %v6622_v51  ;;  %v7923_v51 = vld [vmem:[#allocation43_spill] sm:$0xff] }
 0x9be   :  { %v6640_v18 = vsub.f32 %v7923_v51, %v6065_v11  ;;  %v2689_v11 = vadd.f32 1.0, %v6062_v13 }
 0x9c0   :  { %2544 = vperm.xlu1 %5211, %v6204_v15   ;;  %v6642_v15 = vpop.permute.xlu0 %3221 }
 0x9c1   :  { %v6627_v56 = vpop.permute.xlu1 %3969  ;;  %7924 = vst [vmem:[#allocation43_spill] sm:$0xff] %v6642_v15 }
 0x9c2   :  { %7919 = vst [vmem:[#allocation122_spill] sm:$0xff] %v6627_v56 }
 0x9c4   :  { %5212 = vset.pattern.permute.xlu1 %v7796_v5  ;;  %v6647_v56 = vpop.permute.xlu0 %3794 }
 0x9c5   :  { %2576 = vperm.xlu1 %5212, %v2573_v17   ;;  %7926 = vst [vmem:[#allocation127_spill] sm:$0xff] %v6647_v56 }
 0x9c6   :  { %v6633_v4 = vpop.permute.xlu1 %3993 }
 0x9c7   :  { %7921 = vst [vmem:[#allocation124_spill] sm:$0xff] %v6633_v4 }
 0x9c9   :  { %5213 = vset.pattern.permute.xlu1 %v7797_v46 }
 0x9ca   :  { %2600 = vperm.xlu1 %5213, %v2573_v17   ;;  %v6653_v17 = vpop.permute.xlu0 %3347 }
 0x9cb   :  { %v6636_v12 = vpop.permute.xlu1 %3377  ;;  %7928 = vst [vmem:[#allocation129_spill] sm:$0xff] %v6653_v17 }
 0x9cc   :  { %7922 = vst [vmem:[#allocation125_spill] sm:$0xff] %v6636_v12 }
 0x9ce   :  { %2550 = vperm.xlu1 %5213, %v6640_v18   ;;  %v6659_v51 = vpop.permute.xlu0 %3910 }
 0x9cf   :  { %v6645_v26 = vpop.permute.xlu1 %3439  ;;  %7930 = vst [vmem:[#allocation131_spill] sm:$0xff] %v6659_v51 }
 0x9d0   :  { %7925 = vst [vmem:[#allocation126_spill] sm:$0xff] %v6645_v26 }
 0x9d2   :  { %2606 = vperm.xlu1 %5213, %v6381_v59   ;;  %v6670_v17 = vpop.permute.xlu0 %1933 }
 0x9d3   :  { %7933 = vst [vmem:[#allocation132_spill] sm:$0xff] %v6670_v17 }
 0x9d4   :  { %v6650_v4 = vpop.permute.xlu1 %3940 }
 0x9d5   :  { %7927 = vst [vmem:[#allocation128_spill] sm:$0xff] %v6650_v4  ;;  %v7931_v4 = vld [vmem:[#allocation46_spill] sm:$0xff] }
 0x9d6   :  { %2657 = vperm.xlu1 %5213, %v6217_v50   ;;  %v6666_v56 = vsub.f32 %v7931_v4, %v6088_v62  ;;  %v6676_v51 = vpop.permute.xlu0 %2059 }
 0x9d7   :  { %7935 = vst [vmem:[#allocation134_spill] sm:$0xff] %v6676_v51  ;;  %v7941_v51 = vld [vmem:[#allocation47_spill] sm:$0xff] }
 0x9d9   :  { %v6655_v12 = vpop.permute.xlu1 %1872 }
 0x9da   :  { %7929 = vst [vmem:[#allocation130_spill] sm:$0xff] %v6655_v12  ;;  %5214 = vset.pattern.permute.xlu1 %v7796_v5  ;;  %v6682_v62 = vpop.permute.xlu0 %2185 }
 0x9db   :  { %2692 = vperm.xlu1 %5214, %v2689_v11   ;;  %7937 = vst [vmem:[#allocation136_spill] sm:$0xff] %v6682_v62 }
 0x9de   :  { %v6661_v26 = vpop.permute.xlu1 %1896 }
 0x9df   :  { %5215 = vset.pattern.permute.xlu1 %v7797_v46 }
 0x9e0   :  { %2716 = vperm.xlu1 %5215, %v2689_v11   ;;  %v2805_v11 = vadd.f32 1.0, %v6085_v0 }
 0x9e2   :  { %v6668_v50 = vpop.permute.xlu1 %1902 }
 0x9e3   :  { %7932 = vst [vmem:[#allocation46_spill] sm:$0xff] %v6668_v50 }
 0x9e4   :  { %2663 = vperm.xlu1 %5215, %v6666_v56  }
 0x9e6   :  { %v6673_v13 = vpop.permute.xlu1 %1957 }
 0x9e7   :  { %7934 = vst [vmem:[#allocation133_spill] sm:$0xff] %v6673_v13  ;;  %v6690_v13 = vpop.permute.xlu0 %2407 }
 0x9e8   :  { %2722 = vperm.xlu1 %5215, %v6391_v49   ;;  %7940 = vst [vmem:[#allocation139_spill] sm:$0xff] %v6690_v13 }
 0x9eb   :  { %v6678_v20 = vpop.permute.xlu1 %1995  ;;  %v6699_v0 = vpop.permute.xlu0 %2520 }
 0x9ec   :  { %7936 = vst [vmem:[#allocation135_spill] sm:$0xff] %v6678_v20  ;;  %2773 = vperm.xlu1 %5215, %v6228_v16   ;;  %v6694_v20 = vsub.f32 %v7941_v51, %v6107_v54  ;;  %7943 = vst [vmem:[#allocation140_spill] sm:$0xff] %v6699_v0  ;;  %v7750_v54 = vsub.f32 1.0, %v6270_v9 }
 0x9ef   :  { %v6707_v15 = vpop.permute.xlu0 %2633 }
 0x9f0   :  { %5216 = vset.pattern.permute.xlu1 %v7796_v5  ;;  %v6685_v4 = vpop.permute.xlu1 %2019  ;;  %7946 = vst [vmem:[#allocation143_spill] sm:$0xff] %v6707_v15 }
 0x9f1   :  { %7938 = vst [vmem:[#allocation137_spill] sm:$0xff] %v6685_v4  ;;  %2808 = vperm.xlu1 %5216, %v2805_v11  }
 0x9f4   :  { %v6687_v17 = vpop.permute.xlu1 %1963 }
 0x9f5   :  { %7939 = vst [vmem:[#allocation138_spill] sm:$0xff] %v6687_v17  ;;  %5217 = vset.pattern.permute.xlu1 %v7797_v46  ;;  %v7749_v17 = vsub.f32 1.0, %v6209_v61 }
 0x9f6   :  { %2832 = vperm.xlu1 %5217, %v2805_v11   ;;  %v6717_v11 = vpop.permute.xlu0 %2749 }
 0x9f7   :  { %7948 = vst [vmem:[#allocation145_spill] sm:$0xff] %v6717_v11 }
 0x9f8   :  { %v6696_v16 = vpop.permute.xlu1 %2025 }
 0x9f9   :  { %7942 = vst [vmem:[#allocation47_spill] sm:$0xff] %v6696_v16 }
 0x9fa   :  { %2779 = vperm.xlu1 %5217, %v6694_v20  }
 0x9fc   :  { %v6701_v62 = vpop.permute.xlu1 %2083 }
 0x9fd   :  { %7944 = vst [vmem:[#allocation141_spill] sm:$0xff] %v6701_v62  ;;  %v7752_v62 = vsub.f32 1.0, %v6412_v25 }
 0x9fe   :  { %2838 = vperm.xlu1 %5217, %v6405_v10  }
 0xa01   :  { %v6705_v4 = vpop.permute.xlu1 %2121 }
 0xa02   :  { %7945 = vst [vmem:[#allocation142_spill] sm:$0xff] %v6705_v4  ;;  %3587 = vperm.xlu1 %5217, %v7749_v17   ;;  %v7751_v4 = vsub.f32 1.0, %v6299_v22  ;;  %v6725_v17 = vpop.permute.xlu0 %3053 }
 0xa06   :  { %5220 = vset.pattern.permute.xlu1 %v7788_v55  ;;  %v6713_v51 = vpop.permute.xlu1 %2145  ;;  %v6735_v11 = vpop.permute.xlu0 %3643 }
 0xa07   :  { %7947 = vst [vmem:[#allocation144_spill] sm:$0xff] %v6713_v51  ;;  %3114 = vperm.xlu1 %5220, %v7750_v54  }
 0xa0a   :  { %v6719_v0 = vpop.permute.xlu1 %2089  ;;  %v6744_v51 = vpop.permute.xlu0 %3176 }
 0xa0b   :  { %7949 = vst [vmem:[#allocation146_spill] sm:$0xff] %v6719_v0  ;;  %5222 = vset.pattern.permute.xlu1 %v7797_v46  ;;  %v7753_v0 = vsub.f32 1.0, %v6463_v41  ;;  %7953 = vst [vmem:[#allocation150_spill] sm:$0xff] %v6744_v51 }
 0xa0c   :  { %3700 = vperm.xlu1 %5222, %v7751_v4  }
 0xa0e   :  { %v6727_v15 = vpop.permute.xlu1 %2151  ;;  %v6753_v16 = vpop.permute.xlu0 %3756 }
 0xa0f   :  { %7950 = vst [vmem:[#allocation147_spill] sm:$0xff] %v6727_v15  ;;  %v7754_v15 = vsub.f32 1.0, %v6484_v21  ;;  %7955 = vst [vmem:[#allocation152_spill] sm:$0xff] %v6753_v16 }
 0xa10   :  { %5224 = vset.pattern.permute.xlu1 %v7788_v55 }
 0xa11   :  { %3240 = vperm.xlu1 %5224, %v7752_v62  }
 0xa12   :  { %v6733_v54 = vpop.permute.xlu1 %2209 }
 0xa13   :  { %7951 = vst [vmem:[#allocation148_spill] sm:$0xff] %v6733_v54  ;;  %v7755_v54 = vsub.f32 1.0, %v6495_v63 }
 0xa15   :  { %5226 = vset.pattern.permute.xlu1 %v7797_v46 }
 0xa16   :  { %3813 = vperm.xlu1 %5226, %v7753_v0  }
 0xa17   :  { %v6741_v4 = vpop.permute.xlu1 %2247 }
 0xa18   :  { %7952 = vst [vmem:[#allocation149_spill] sm:$0xff] %v6741_v4  ;;  %v7756_v4 = vsub.f32 1.0, %v6533_v1 }
 0xa1a   :  { %5228 = vset.pattern.permute.xlu1 %v7788_v55 }
 0xa1b   :  { %3366 = vperm.xlu1 %5228, %v7754_v15   ;;  %v6765_v15 = vpop.permute.xlu0 %3302 }
 0xa1c   :  { %v6749_v62 = vpop.permute.xlu1 %2271  ;;  %7958 = vst [vmem:[#allocation155_spill] sm:$0xff] %v6765_v15  ;;  %v7759_v15 = vsub.f32 1.0, %v6614_v60 }
 0xa1d   :  { %7954 = vst [vmem:[#allocation151_spill] sm:$0xff] %v6749_v62  ;;  %v7757_v62 = vsub.f32 1.0, %v6557_v2 }
 0xa1f   :  { %5230 = vset.pattern.permute.xlu1 %v7797_v46 }
 0xa20   :  { %3929 = vperm.xlu1 %5230, %v7755_v54   ;;  %v6757_v0 = vpop.permute.xlu1 %2215  ;;  %v7758_v54 = vsub.f32 1.0, %v6585_v58 }
 0xa21   :  { %7956 = vst [vmem:[#allocation153_spill] sm:$0xff] %v6757_v0  ;;  %v6773_v0 = vpop.permute.xlu0 %3872 }
 0xa22   :  { %7960 = vst [vmem:[#allocation157_spill] sm:$0xff] %v6773_v0  ;;  %v7966_v0 = vld [vmem:[#allocation11_spill] sm:$0xff] }
 0xa23   :  { %v1679_v37 = vsub.f32 %v7966_v0, %v7965_v47  ;;  %v7972_v0 = vld [vmem:[#allocation65_spill] sm:$0xff] }
 0xa24   :  { %5231 = vset.pattern.permute.xlu1 %v7788_v55  ;;  %v6761_v53 = vpop.permute.xlu1 %2277 }
 0xa25   :  { %7957 = vst [vmem:[#allocation154_spill] sm:$0xff] %v6761_v53  ;;  %1952 = vperm.xlu1 %5231, %v7756_v4   ;;  %v7962_v53 = vld [vmem:[#allocation17_spill] sm:$0xff]  ;;  %v7963_v4 = vld [vmem:[#allocation10_spill] sm:$0xff]  ;;  %v6783_v3 = vpop.permute.xlu0 %3428 }
 0xa26   :  { %v1675_v51 = vsub.f32 %v7963_v4, %v7962_v53  ;;  %7964 = vst [vmem:[#allocation17_spill] sm:$0xff] %v6783_v3  ;;  %v1692_v53 = vmul.f32 1.442695, %v1679_v37  ;;  %v7968_v4 = vld [vmem:[#allocation63_spill] sm:$0xff]  ;;  %v7761_v37 = vsub.f32 1.0, %v6694_v20 }
 0xa29   :  { %2078 = vperm.xlu1 %5231, %v7757_v62   ;;  %v6770_v16 = vpop.permute.xlu1 %2431  ;;  %v1684_v62 = vmul.f32 1.442695, %v1675_v51  ;;  %v6798_v13 = vpop.permute.xlu0 %1891  ;;  %v7762_v51 = vsub.f32 1.0, %v6666_v56 }
 0xa2a   :  { %7959 = vst [vmem:[#allocation156_spill] sm:$0xff] %v6770_v16  ;;  %7971 = vst [vmem:[#allocation11_spill] sm:$0xff] %v6798_v13 }
 0xa2b   :  { %5304 = vpow2.f32 %v1684_v62 }
 0xa2c   :  { %5306 = vpow2.f32 %v1692_v53 }
 0xa2d   :  { %2204 = vperm.xlu1 %5231, %v7758_v54   ;;  %v7760_v54 = vsub.f32 1.0, %v6640_v18  ;;  %v6808_v62 = vpop.permute.xlu0 %2014 }
 0xa2e   :  { %v6777_v55 = vpop.permute.xlu1 %2463 }
 0xa2f   :  { %7961 = vst [vmem:[#allocation158_spill] sm:$0xff] %v6777_v55  ;;  %v7969_v55 = vld [vmem:[#allocation14_spill] sm:$0xff] }
 0xa30   :  { %v1676_v23 = vsub.f32 %v7969_v55, %v7968_v4  ;;  %7975 = vst [vmem:[#allocation14_spill] sm:$0xff] %v6808_v62 }
 0xa31   :  { %5232 = vset.pattern.permute.xlu1 %v7797_v46 }
 0xa32   :  { %2426 = vperm.xlu1 %5232, %v7759_v15   ;;  %v1686_v47 = vmul.f32 1.442695, %v1676_v23  ;;  %v7973_v15 = vld [vmem:[#allocation15_spill] sm:$0xff]  ;;  %v6819_v23 = vpop.permute.xlu0 %2140 }
 0xa33   :  { %v6789_v16 = vpop.permute.xlu1 %2487  ;;  %7977 = vst [vmem:[#allocation15_spill] sm:$0xff] %v6819_v23 }
 0xa34   :  { %7967 = vst [vmem:[#allocation10_spill] sm:$0xff] %v6789_v16  ;;  %v1678_v16 = vsub.f32 %v7973_v15, %v7972_v0  ;;  %5308 = vpow2.f32 %v1686_v47 }
 0xa36   :  { %2539 = vperm.xlu1 %5232, %v7760_v54   ;;  %v1690_v55 = vmul.f32 1.442695, %v1678_v16  ;;  %v6831_v0 = vpop.permute.xlu0 %2266 }
 0xa37   :  { %v6796_v3 = vpop.permute.xlu1 %2437  ;;  %7980 = vst [vmem:[#allocation161_spill] sm:$0xff] %v6831_v0 }
 0xa38   :  { %7970 = vst [vmem:[#allocation61_spill] sm:$0xff] %v6796_v3  ;;  %v6814_v3 = vpop.eup %5304  ;;  %5310 = vpow2.f32 %v1690_v55 }
 0xa39   :  { %v6823_v53 = vpop.eup %5306 }
 0xa3a   :  { %2652 = vperm.xlu1 %5232, %v7762_v51   ;;  %v6841_v51 = vpop.permute.xlu0 %2482 }
 0xa3b   :  { %v6805_v54 = vpop.permute.xlu1 %2493  ;;  %7982 = vst [vmem:[#allocation163_spill] sm:$0xff] %v6841_v51 }
 0xa3c   :  { %7974 = vst [vmem:[#allocation63_spill] sm:$0xff] %v6805_v54 }
 0xa3e   :  { %2768 = vperm.xlu1 %5232, %v7761_v37   ;;  %v6827_v16 = vpop.eup %5308  ;;  %v6847_v23 = vpop.permute.xlu0 %2595 }
 0xa3f   :  { %v6812_v4 = vpop.permute.xlu1 %2544  ;;  %7985 = vst [vmem:[#allocation166_spill] sm:$0xff] %v6847_v23 }
 0xa40   :  { %7976 = vst [vmem:[#allocation65_spill] sm:$0xff] %v6812_v4 }
 0xa42   :  { %1708 = vrot.lane.b32.xlu1 %v6814_v3, %s5391_s21  ;;  %v6835_v55 = vpop.eup %5310  ;;  %v6851_v0 = vpop.permute.xlu0 %2711 }
 0xa43   :  { %5234 = vset.pattern.permute.xlu1 %v7791_v44  ;;  %7987 = vst [vmem:[#allocation168_spill] sm:$0xff] %v6851_v0 }
 0xa44   :  { %v6821_v15 = vpop.permute.xlu1 %2576 }
 0xa45   :  { %7978 = vst [vmem:[#allocation159_spill] sm:$0xff] %v6821_v15 }
 0xa46   :  { %1716 = vrot.lane.b32.xlu1 %v6823_v53, %s5391_s21  ;;  %v6855_v54 = vpop.permute.xlu0 %2827 }
 0xa47   :  { %7989 = vst [vmem:[#allocation170_spill] sm:$0xff] %v6855_v54 }
 0xa49   :  { %v6829_v47 = vpop.permute.xlu1 %2600 }
 0xa4a   :  { %7979 = vst [vmem:[#allocation160_spill] sm:$0xff] %v6829_v47  ;;  %1710 = vrot.lane.b32.xlu1 %v6827_v16, %s5391_s21  ;;  %v1707_v12 = vpop.permute.xlu0 %1706 }
 0xa4b   :  { %v1731_v23 = vsel %vm1730_vm6, %v1707_v12, 0.0 }
 0xa4d   :  { %v6837_v37 = vpop.permute.xlu1 %2550 }
 0xa4e   :  { %7981 = vst [vmem:[#allocation162_spill] sm:$0xff] %v6837_v37  ;;  %1714 = vrot.lane.b32.xlu1 %v6835_v55, %s5391_s21 }
 0xa51   :  { %v6843_v15 = vpop.permute.xlu1 %2606 }
 0xa52   :  { %7983 = vst [vmem:[#allocation164_spill] sm:$0xff] %v6843_v15  ;;  %v1713_v15 = vpop.permute.xlu0 %1712 }
 0xa55   :  { %v6845_v4 = vpop.permute.xlu1 %2657 }
 0xa56   :  { %7984 = vst [vmem:[#allocation165_spill] sm:$0xff] %v6845_v4 }
 0xa5a   :  { %v6849_v47 = vpop.permute.xlu1 %2692 }
 0xa5b   :  { %7986 = vst [vmem:[#allocation167_spill] sm:$0xff] %v6849_v47  ;;  %v1721_v47 = vpop.permute.xlu0 %1720 }
 0xa5f   :  { %v6853_v62 = vpop.permute.xlu1 %2716 }
 0xa60   :  { %7988 = vst [vmem:[#allocation169_spill] sm:$0xff] %v6853_v62  ;;  %v1740_v62 = vsel %vm1730_vm6, %v1713_v15, 0.0 }
 0xa63   :  { %v6857_v37 = vpop.permute.xlu1 %2663 }
 0xa64   :  { %7990 = vst [vmem:[#allocation171_spill] sm:$0xff] %v6857_v37  ;;  %v1752_v37 = vsel %vm1730_vm6, %v1721_v47, 0.0 }
 0xa67   :  { %v6859_v13 = vpop.permute.xlu1 %2722 }
 0xa68   :  { %7991 = vst [vmem:[#allocation172_spill] sm:$0xff] %v6859_v13  ;;  %v1719_v13 = vpop.permute.xlu0 %1718 }
 0xa69   :  { %v1749_v50 = vsel %vm1730_vm6, %v1719_v13, 0.0 }
 0xa6b   :  { %v6861_v51 = vpop.permute.xlu1 %2773 }
 0xa6c   :  { %7992 = vst [vmem:[#allocation173_spill] sm:$0xff] %v6861_v51 }
 0xa70   :  { %v6863_v4 = vpop.permute.xlu1 %2808 }
 0xa71   :  { %7993 = vst [vmem:[#allocation174_spill] sm:$0xff] %v6863_v4 }
 0xa72   :  { %1732 = vadd.xlane.f32.xlu1 %v1731_v23 }
 0xa75   :  { %v6866_v0 = vpop.permute.xlu1 %2832 }
 0xa76   :  { %7994 = vst [vmem:[#allocation175_spill] sm:$0xff] %v6866_v0  ;;  %1741 = vadd.xlane.f32.xlu1 %v1740_v62 }
 0xa79   :  { %v6869_v54 = vpop.permute.xlu1 %2779 }
 0xa7a   :  { %7995 = vst [vmem:[#allocation176_spill] sm:$0xff] %v6869_v54  ;;  %1753 = vadd.xlane.f32.xlu1 %v1752_v37 }
 0xa7d   :  { %v6872_v51 = vpop.permute.xlu1 %2838 }
 0xa7e   :  { %7996 = vst [vmem:[#allocation177_spill] sm:$0xff] %v6872_v51  ;;  %1750 = vadd.xlane.f32.xlu1 %v1749_v50 }
 0xa81   :  { %v6875_v4 = vpop.permute.xlu1 %3587 }
 0xa86   :  { %v6877_v12 = vpop.permute.xlu1 %3114 }
 0xa87   :  { %7997 = vst [vmem:[#allocation178_spill] sm:$0xff] %v6877_v12 }
 0xa8b   :  { %v6879_v23 = vpop.permute.xlu1 %3700 }
 0xa8c   :  { %7998 = vst [vmem:[#allocation179_spill] sm:$0xff] %v6879_v23 }
 0xa90   :  { %v6881_v0 = vpop.permute.xlu1 %3240 }
 0xa91   :  { %7999 = vst [vmem:[#allocation180_spill] sm:$0xff] %v6881_v0 }
 0xa95   :  { %v6883_v62 = vpop.permute.xlu1 %3813 }
 0xa96   :  { %8000 = vst [vmem:[#allocation181_spill] sm:$0xff] %v6883_v62 }
 0xa9a   :  { %v6885_v15 = vpop.permute.xlu1 %3366 }
 0xa9b   :  { %8001 = vst [vmem:[#allocation182_spill] sm:$0xff] %v6885_v15 }
 0xa9f   :  { %v6887_v47 = vpop.permute.xlu1 %3929 }
 0xaa0   :  { %8002 = vst [vmem:[#allocation183_spill] sm:$0xff] %v6887_v47 }
 0xaa4   :  { %v6889_v37 = vpop.permute.xlu1 %1952 }
 0xaa5   :  { %8003 = vst [vmem:[#allocation184_spill] sm:$0xff] %v6889_v37 }
 0xaa8   :  { %v6891_v54 = vpop.permute.xlu1 %2078 }
 0xaa9   :  { %8004 = vst [vmem:[#allocation185_spill] sm:$0xff] %v6891_v54 }
 0xaac   :  { %v6893_v13 = vpop.permute.xlu1 %2204 }
 0xaad   :  { %8005 = vst [vmem:[#allocation186_spill] sm:$0xff] %v6893_v13 }
 0xab1   :  { %v6895_v50 = vpop.permute.xlu1 %2426 }
 0xab2   :  { %8006 = vst [vmem:[#allocation187_spill] sm:$0xff] %v6895_v50 }
 0xab5   :  { %v6897_v51 = vpop.permute.xlu1 %2539 }
 0xab9   :  { %v6899_v12 = vpop.permute.xlu1 %2652 }
 0xaba   :  { %8007 = vst [vmem:[#allocation188_spill] sm:$0xff] %v6899_v12 }
 0xabd   :  { %v6901_v23 = vpop.permute.xlu1 %2768 }
 0xabe   :  { %8008 = vst [vmem:[#allocation189_spill] sm:$0xff] %v6901_v23  ;;  %v1305_v23 = vld [vmem:[%s7688_s4 + $0x40] sm:$0xff] }
 0xac1   :  { %v1709_v0 = vpop.permute.xlu1 %1708 }
 0xac2   :  { %v1734_v62 = vsel %vm1730_vm6, %v1709_v0, 0.0  ;;  %v1306_v0 = vld [vmem:[%s7688_s4 + $0x48] sm:$0xff] }
 0xac3   :  { %1735 = vadd.xlane.f32.xlu0 %v1734_v62  ;;  %v1307_v62 = vld [vmem:[%s7688_s4 + $0x50] sm:$0xff] }
 0xac5   :  { %v1717_v15 = vpop.permute.xlu1 %1716 }
 0xac6   :  { %v1746_v47 = vsel %vm1730_vm6, %v1717_v15, 0.0  ;;  %v4976_v15 = vpack.c.bf16 %v1306_v0, %v1305_v23  ;;  %v1287_v23 = vld [vmem:[%s7686_s2 + $0x10] sm:$0xff]  ;;  %v1289_v0 = vld [vmem:[%s7686_s2 + $0x20] sm:$0xff] }
 0xac7   :  { %1747 = vadd.xlane.f32.xlu0 %v1746_v47  ;;  %v1285_v47 = vld [vmem:[%s7686_s2] sm:$0xff] }
 0xac8   :  { %4806 = vmatprep.mubr.msk.f32.mxu1 %vm50_vm0, %v1285_v47  ;;  %4977 = vmatprep.subr.bf16.mxu1 %v4976_v15  ;;  %v1293_v47 = vld [vmem:[%s7686_s2 + $0x40] sm:$0xff] }
 0xac9   :  { %v1711_v37 = vpop.permute.xlu1 %1710  ;;  %4979 = vmatpush3.bf16.msra.mxu1 %v4976_v15  ;;  %v1291_v15 = vld [vmem:[%s7686_s2 + $0x30] sm:$0xff] }
 0xaca   :  { %v1737_v54 = vsel %vm1730_vm6, %v1711_v37, 0.0 }
 0xacb   :  { %1738 = vadd.xlane.f32.xlu0 %v1737_v54  ;;  %v1308_v54 = vld [vmem:[%s7688_s4 + $0x58] sm:$0xff] }
 0xacc   :  { %v4980_v37 = vpack.c.bf16 %v1308_v54, %v1307_v62  ;;  %v1290_v62 = vld [vmem:[%s7686_s2 + $0x28] sm:$0xff]  ;;  %v1292_v54 = vld [vmem:[%s7686_s2 + $0x38] sm:$0xff] }
 0xacd   :  { %v1715_v13 = vpop.permute.xlu1 %1714 }
 0xace   :  { %v1743_v50 = vsel %vm1730_vm6, %v1715_v13, 0.0  ;;  %4981 = vmatprep.subr.bf16.mxu1 %v4980_v37  ;;  %v1286_v13 = vld [vmem:[%s7686_s2 + $0x8] sm:$0xff] }
 0xacf   :  { %1744 = vadd.xlane.f32.xlu0 %v1743_v50  ;;  %4983 = vmatpush3.bf16.msra.mxu1 %v4980_v37  ;;  %v1288_v50 = vld [vmem:[%s7686_s2 + $0x18] sm:$0xff]  ;;  %v1294_v37 = vld [vmem:[%s7686_s2 + $0x48] sm:$0xff] }
 0xad2   :  { %4807 = vmatmul.mubr.msk.f32.vlgmr.msra.gmra.mrb[16].mxu1 %vm50_vm0, %v1286_v13  ;;  %v1295_v13 = vld [vmem:[%s7686_s2 + $0x50] sm:$0xff] }
 0xad3   :  { %4809 = vmatprep.mubr.msk.f32.mxu1 %vm50_vm0, %v1287_v23  ;;  %v1296_v23 = vld [vmem:[%s7686_s2 + $0x58] sm:$0xff] }
 0xad6   :  { %4810 = vmatmul.mubr.msk.f32.gmra.mrb[18].mxu1 %vm50_vm0, %v1288_v50  ;;  %v1297_v50 = vld [vmem:[%s7686_s2 + $0x60] sm:$0xff] }
 0xad7   :  { %4812 = vmatprep.mubr.msk.f32.mxu1 %vm50_vm0, %v1289_v0  ;;  %v1298_v0 = vld [vmem:[%s7686_s2 + $0x68] sm:$0xff] }
 0xada   :  { %4813 = vmatmul.mubr.msk.f32.gmra.mrb[20].mxu1 %vm50_vm0, %v1290_v62  ;;  %v1299_v62 = vld [vmem:[%s7686_s2 + $0x70] sm:$0xff] }
 0xadb   :  { %4815 = vmatprep.mubr.msk.f32.mxu1 %vm50_vm0, %v1291_v15  ;;  %v1300_v15 = vld [vmem:[%s7686_s2 + $0x78] sm:$0xff] }
 0xade   :  { %4816 = vmatmul.mubr.msk.f32.gmra.mrb[22].mxu1 %vm50_vm0, %v1292_v54  ;;  %v1301_v54 = vld [vmem:[%s7686_s2 + $0x80] sm:$0xff] }
 0xadf   :  { %4818 = vmatprep.mubr.msk.f32.mxu1 %vm50_vm0, %v1293_v47  ;;  %v1302_v47 = vld [vmem:[%s7686_s2 + $0x88] sm:$0xff] }
 0xae2   :  { %4819 = vmatmul.mubr.msk.f32.gmra.mrb[24].mxu1 %vm50_vm0, %v1294_v37 }
 0xae3   :  { %4821 = vmatprep.mubr.msk.f32.mxu1 %vm50_vm0, %v1295_v13 }
 0xae6   :  { %4822 = vmatmul.mubr.msk.f32.gmra.mrb[26].mxu1 %vm50_vm0, %v1296_v23 }
 0xae7   :  { %4824 = vmatprep.mubr.msk.f32.mxu1 %vm50_vm0, %v1297_v50 }
 0xaea   :  { %4825 = vmatmul.mubr.msk.f32.gmra.mrb[28].mxu1 %vm50_vm0, %v1298_v0 }
 0xaeb   :  { %4827 = vmatprep.mubr.msk.f32.mxu1 %vm50_vm0, %v1299_v62 }
 0xaee   :  { %4828 = vmatmul.mubr.msk.f32.gmra.mrb[30].mxu1 %vm50_vm0, %v1300_v15 }
 0xaef   :  { %4830 = vmatprep.mubr.msk.f32.mxu1 %vm50_vm0, %v1301_v54 }
 0xaf2   :  { %4831 = vmatmul.mubr.msk.f32.gmra.mrb[32].mxu1 %vm50_vm0, %v1302_v47 }
 0xaff   :  { %v1733_v37 = vpop.xlane.xlu1 %1732 }
 0xb03   :  { %v1742_v23 = vpop.xlane.xlu1 %1741 }
 0xb07   :  { %v1754_v62 = vpop.xlane.xlu1 %1753 }
 0xb50   :  { %v1736_v13 = vpop.xlane.xlu0 %1735 }
 0xb51   :  { %5312 = vrcp.f32 %v1736_v13 }
 0xb52   :  { %5314 = vrcp.f32 %v1733_v37 }
 0xb53   :  { %5316 = vrcp.f32 %v1742_v23 }
 0xb54   :  { %v1748_v50 = vpop.xlane.xlu0 %1747 }
 0xb55   :  { %5318 = vrcp.f32 %v1748_v50  ;;  %v1751_v50 = vpop.xlane.xlu1 %1750 }
 0xb56   :  { %5320 = vrcp.f32 %v1754_v62 }
 0xb58   :  { %v1739_v54 = vpop.xlane.xlu0 %1738 }
 0xb59   :  { %5322 = vrcp.f32 %v1739_v54 }
 0xb5b   :  { %v5313_v0 = vpop.eup %5312 }
 0xb5c   :  { %v1764_v15 = vmul.f32 %v5313_v0, %v6814_v3  ;;  %v5315_v12 = vpop.eup %5314  ;;  %v1745_v37 = vpop.xlane.xlu0 %1744 }
 0xb5d   :  { %v1763_v47 = vmul.f32 %v5315_v12, %v6428_v31  ;;  %v5317_v13 = vpop.eup %5316  ;;  %5324 = vrcp.f32 %v1745_v37 }
 0xb5e   :  { %2959 = vrot.lane.b32.xlu1 %v1764_v15, %s5391_s21  ;;  %3021 = vrot.lane.b32.xlu0 %v1764_v15, %s5409_s13  ;;  %v1766_v23 = vmul.f32 %v5317_v13, %v6438_v43  ;;  %5326 = vrcp.f32 %v1751_v50  ;;  %v8009_v13 = vld [vmem:[#allocation12_spill] sm:$0xff]  ;;  %v8011_v50 = vsub.f32 1.0, %v5726_v52 }
 0xb5f   :  { %v5319_v3 = vpop.eup %5318  ;;  %v8010_v37 = vsub.f32 1.0, %v8009_v13 }
 0xb60   :  { %v1768_v0 = vmul.f32 %v5319_v3, %v6823_v53  ;;  %v5321_v62 = vpop.eup %5320 }
 0xb61   :  { %v1770_v31 = vmul.f32 %v5321_v62, %v6448_v32 }
 0xb62   :  { %1859 = vrot.lane.b32.xlu0 %v1763_v47, %s5409_s13  ;;  %1797 = vrot.lane.b32.xlu1 %v1763_v47, %s5391_s21 }
 0xb63   :  { %v5323_v12 = vpop.eup %5322 }
 0xb64   :  { %v1765_v43 = vmul.f32 %v5323_v12, %v6827_v16  ;;  %v1303_v16 = vld [vmem:[%s7686_s2 + $0x90] sm:$0xff]  ;;  %v8012_v12 = vsub.f32 1.0, %v6209_v61 }
 0xb65   :  { %4833 = vmatprep.mubr.msk.f32.mxu1 %vm50_vm0, %v1303_v16 }
 0xb66   :  { %3144 = vrot.lane.b32.xlu0 %v1766_v23, %s5409_s13  ;;  %3082 = vrot.lane.b32.xlu1 %v1766_v23, %s5391_s21 }
 0xb67   :  { %v5325_v15 = vpop.eup %5324 }
 0xb68   :  { %v1767_v53 = vmul.f32 %v5325_v15, %v6835_v55  ;;  %v5327_v54 = vpop.eup %5326  ;;  %v1304_v55 = vld [vmem:[%s7686_s2 + $0x98] sm:$0xff]  ;;  %v8013_v15 = vsub.f32 1.0, %v6223_v42 }
 0xb69   :  { %v1769_v32 = vmul.f32 %v5327_v54, %v6452_v35  ;;  %4834 = vmatmul.mubr.msk.f32.gmra.mrb[34].mxu1 %vm50_vm0, %v1304_v55 }
 0xb6a   :  { %3270 = vrot.lane.b32.xlu0 %v1768_v0, %s5409_s13  ;;  %3208 = vrot.lane.b32.xlu1 %v1768_v0, %s5391_s21 }
 0xb6e   :  { %3396 = vrot.lane.b32.xlu0 %v1770_v31, %s5409_s13  ;;  %3334 = vrot.lane.b32.xlu1 %v1770_v31, %s5391_s21 }
 0xb72   :  { %1982 = vrot.lane.b32.xlu0 %v1765_v43, %s5409_s13  ;;  %1920 = vrot.lane.b32.xlu1 %v1765_v43, %s5391_s21 }
 0xb76   :  { %2108 = vrot.lane.b32.xlu0 %v1767_v53, %s5409_s13  ;;  %2046 = vrot.lane.b32.xlu1 %v1767_v53, %s5391_s21 }
 0xb7a   :  { %2234 = vrot.lane.b32.xlu1 %v1769_v32, %s5409_s13  ;;  %2172 = vrot.lane.b32.xlu0 %v1769_v32, %s5391_s21  ;;  %v8014_v32 = vld [vmem:[#allocation13_spill] sm:$0xff]  ;;  %s4474_s13 = sshll.u32 %s5410_s12, 4  ;;  %s4475_s13 = int_to_ptr.vmem [resolvable:$true] %s4474_s13 }
 0xb7b   :  { %v8015_v16 = vsub.f32 1.0, %v8014_v32  ;;  %s5358_s14 = scalar_lea.vmem %s4475_s13, 256  ;;  %p5363_p9 = scmp.lt.s32.totalorder %s4475_s13, %s4475_s13 }
 0xb7c   :  { %p5359_p8 = scmp.ne.s32.totalorder %s4475_s13, %s5358_s14  ;;  %p5364_p10 = scmp.lt.s32.totalorder %s5358_s14, %s5358_s14 }
 0xb7e   :  { %p5365_p11 = por %p5364_p10, %p5363_p9 }
 0xb80   :  { %p5366_p12 = pnand %p5365_p11, %p5359_p8 }
 0xbd0   :  { %v2960_v47 = vpop.permute.xlu1 %2959  ;;  %v3022_v3 = vpop.permute.xlu0 %3021 }
 0xbd1   :  { %v2962_v35 = vmul.f32 %v2960_v47, %v8010_v37  ;;  %v2976_v23 = vmul.f32 %v2960_v47, %v8009_v13  ;;  %v3024_v0 = vmul.f32 %v3022_v3, %v8011_v50  ;;  %v3038_v62 = vmul.f32 %v3022_v3, %v5726_v52 }
 0xbd2   :  { %v3572_v31 = vmul.f32 %v6209_v61, %v2960_v47  ;;  %v3558_v43 = vmul.f32 %v8012_v12, %v2960_v47  ;;  %v3614_v53 = vmul.f32 %v8013_v15, %v3022_v3  ;;  %v3628_v54 = vmul.f32 %v6223_v42, %v3022_v3  ;;  %v4808_v47 = vpop.f32.mrb[16].mxu1  ;;  %v7045_v42 = vld [vmem:[%s7688_s4 + $0x104] ss:$0 sm:$0xff] }
 0xbd3   :  { %2979 = vperm.xlu0 %5235, %v2976_v23   ;;  %2965 = vperm.xlu1 %5234, %v2962_v35   ;;  %v1440_v37 = vpop.f32.mrb[17].mxu1  ;;  %v1446_v23 = vadd.f32 %v4808_v47, %v7045_v42  ;;  %v8016_v50 = vsub.f32 1.0, %v5803_v19 }
 0xbd4   :  { %v1798_v52 = vpop.permute.xlu1 %1797  ;;  %v1860_v13 = vpop.permute.xlu0 %1859  ;;  %v1441_v3 = vadd.f32 %v7045_v42, %v1440_v37 }
 0xbd5   :  { %v1800_v55 = vmul.f32 %v1798_v52, %v8015_v16  ;;  %v1814_v61 = vmul.f32 %v1798_v52, %v8014_v32  ;;  %v4811_v35 = vpop.f32.mrb[18].mxu1 }
 0xbd6   :  { %v1456_v12 = vadd.f32 %v4811_v35, %v7045_v42  ;;  %v4992_v15 = vpack.c.bf16 %v1446_v23, %v1441_v3 }
 0xbd7   :  { %3027 = vperm.xlu0 %5235, %v3024_v0   ;;  %3041 = vperm.xlu1 %5234, %v3038_v62   ;;  %v1862_v0 = vmul.f32 %v1860_v13, %v8016_v50  ;;  %v1876_v62 = vmul.f32 %v1860_v13, %v5803_v19  ;;  %v2411_v19 = vmul.f32 %v6614_v60, %v1798_v52 }
 0xbd8   :  { %4993 = vmatprep.subr.bf16.mxu0 %v4992_v15 }
 0xbd9   :  { %4995 = vmatpush3.bf16.msra.mxu0 %v4992_v15 }
 0xbdb   :  { %5237 = vset.pattern.permute.xlu0 %v7796_v5  ;;  %5236 = vset.pattern.permute.xlu1 %v7796_v5 }
 0xbdc   :  { %3575 = vperm.xlu0 %5237, %v3572_v31   ;;  %3561 = vperm.xlu1 %5236, %v3558_v43   ;;  %v1450_v31 = vpop.f32.mrb[19].mxu1 }
 0xbdd   :  { %v4814_v43 = vpop.f32.mrb[20].mxu1 }
 0xbde   :  { %v1460_v32 = vpop.f32.mrb[21].mxu1 }
 0xbdf   :  { %v1461_v16 = vadd.f32 %v7045_v42, %v1460_v32 }
 0xbe0   :  { %3617 = vperm.xlu0 %5237, %v3614_v53   ;;  %3631 = vperm.xlu1 %5236, %v3628_v54   ;;  %v1451_v53 = vadd.f32 %v7045_v42, %v1450_v31  ;;  %v1466_v54 = vadd.f32 %v4814_v43, %v7045_v42  ;;  %v8018_v43 = vsub.f32 1.0, %v6366_v8 }
 0xbe2   :  { %v4996_v35 = vpack.c.bf16 %v1456_v12, %v1451_v53  ;;  %v5000_v23 = vpack.c.bf16 %v1466_v54, %v1461_v16  ;;  %v2453_v15 = vmul.f32 %v8018_v43, %v1860_v13  ;;  %v2467_v12 = vmul.f32 %v6366_v8, %v1860_v13 }
 0xbe3   :  { %v8019_v13 = vsub.f32 1.0, %v6270_v9 }
 0xbe4   :  { %5239 = vset.pattern.permute.xlu0 %v7791_v44  ;;  %5238 = vset.pattern.permute.xlu1 %v7791_v44 }
 0xbe5   :  { %1817 = vperm.xlu0 %5239, %v1814_v61   ;;  %1803 = vperm.xlu1 %5238, %v1800_v55   ;;  %v4817_v55 = vpop.f32.mrb[22].mxu1  ;;  %v8017_v61 = vsub.f32 1.0, %v6614_v60 }
 0xbe6   :  { %v1470_v37 = vpop.f32.mrb[23].mxu1  ;;  %v1476_v3 = vadd.f32 %v4817_v55, %v7045_v42  ;;  %4997 = vmatprep.subr.bf16.mxu0 %v4996_v35 }
 0xbe7   :  { %v2397_v47 = vmul.f32 %v8017_v61, %v1798_v52  ;;  %v4820_v50 = vpop.f32.mrb[24].mxu1  ;;  %4999 = vmatpush3.bf16.msra.mxu0 %v4996_v35 }
 0xbe8   :  { %v1480_v31 = vpop.f32.mrb[25].mxu1  ;;  %5001 = vmatprep.subr.bf16.mxu0 %v5000_v23 }
 0xbe9   :  { %1865 = vperm.xlu0 %5239, %v1862_v0   ;;  %1879 = vperm.xlu1 %5238, %v1876_v62   ;;  %v1471_v0 = vadd.f32 %v7045_v42, %v1470_v37  ;;  %v1486_v62 = vadd.f32 %v4820_v50, %v7045_v42  ;;  %v1481_v60 = vadd.f32 %v7045_v42, %v1480_v31  ;;  %v4823_v52 = vpop.f32.mrb[26].mxu1  ;;  %v3145_v31 = vpop.permute.xlu0 %3144 }
 0xbea   :  { %v1496_v54 = vadd.f32 %v4823_v52, %v7045_v42  ;;  %v1490_v32 = vpop.f32.mrb[27].mxu1 }
 0xbeb   :  { %v5004_v53 = vpack.c.bf16 %v1476_v3, %v1471_v0  ;;  %v7069_v16 = vpack.c.bf16 %v1486_v62, %v1481_v60  ;;  %v1491_v55 = vadd.f32 %v7045_v42, %v1490_v32  ;;  %v4826_v61 = vpop.f32.mrb[28].mxu1  ;;  %5003 = vmatpush3.bf16.msra.mxu0 %v5000_v23 }
 0xbec   :  { %v1500_v37 = vpop.f32.mrb[29].mxu1 }
 0xbed   :  { %5241 = vset.pattern.permute.xlu0 %v7796_v5  ;;  %5240 = vset.pattern.permute.xlu1 %v7796_v5  ;;  %v5012_v50 = vpack.c.bf16 %v1496_v54, %v1491_v55  ;;  %v1501_v8 = vadd.f32 %v7045_v42, %v1500_v37  ;;  %v4829_v62 = vpop.f32.mrb[30].mxu1 }
 0xbee   :  { %2414 = vperm.xlu0 %5241, %v2411_v19   ;;  %2400 = vperm.xlu1 %5240, %v2397_v47   ;;  %v3083_v47 = vpop.permute.xlu1 %3082  ;;  %v1506_v19 = vadd.f32 %v4826_v61, %v7045_v42  ;;  %v1510_v60 = vpop.f32.mrb[31].mxu1  ;;  %v1516_v52 = vadd.f32 %v4829_v62, %v7045_v42  ;;  %v8024_v62 = vsub.f32 1.0, %v6281_v14 }
 0xbef   :  { %v3085_v3 = vmul.f32 %v3083_v47, %v8019_v13  ;;  %v3099_v35 = vmul.f32 %v3083_v47, %v6270_v9  ;;  %5013 = vmatprep.subr.bf16.mxu1 %v5012_v50  ;;  %5005 = vmatprep.subr.bf16.mxu0 %v5004_v53  ;;  %v1511_v23 = vadd.f32 %v7045_v42, %v1510_v60  ;;  %v8020_v9 = vsub.f32 1.0, %v6250_v36  ;;  %v4832_v54 = vpop.f32.mrb[32].mxu1 }
 0xbf0   :  { %v5016_v0 = vpack.c.bf16 %v1506_v19, %v1501_v8  ;;  %5015 = vmatpush3.bf16.msra.mxu1 %v5012_v50  ;;  %5007 = vmatpush3.bf16.msra.mxu0 %v5004_v53  ;;  %v1526_v32 = vadd.f32 %v4832_v54, %v7045_v42  ;;  %v1520_v55 = vpop.f32.mrb[33].mxu1  ;;  %v8021_v53 = vsub.f32 1.0, %v6299_v22  ;;  %v8022_v50 = vsub.f32 1.0, %v6264_v7 }
 0xbf1   :  { %v3147_v43 = vmul.f32 %v3145_v31, %v8020_v9  ;;  %5009 = vmatprep.subr.bf16.mxu0 %v7069_v16  ;;  %v1521_v61 = vadd.f32 %v7045_v42, %v1520_v55  ;;  %v3741_v13 = vmul.f32 %v6264_v7, %v3145_v31  ;;  %v8025_v60 = vsub.f32 1.0, %v6463_v41 }
 0xbf2   :  { %2456 = vperm.xlu0 %5241, %v2453_v15   ;;  %2470 = vperm.xlu1 %5240, %v2467_v12   ;;  %v3161_v15 = vmul.f32 %v3145_v31, %v6250_v36  ;;  %v5020_v12 = vpack.c.bf16 %v1516_v52, %v1511_v23  ;;  %v3671_v37 = vmul.f32 %v8021_v53, %v3083_v47 }
 0xbf3   :  { %5017 = vmatprep.subr.bf16.mxu1 %v5016_v0  ;;  %v5024_v19 = vpack.c.bf16 %v1526_v32, %v1521_v61  ;;  %v3685_v36 = vmul.f32 %v6299_v22, %v3083_v47  ;;  %v3727_v8 = vmul.f32 %v8022_v50, %v3145_v31  ;;  %v8028_v32 = vsub.f32 1.0, %v6310_v48  ;;  %v8029_v61 = vld [vmem:[#allocation20_spill] sm:$0xff] }
 0xbf4   :  { %5019 = vmatpush3.bf16.msra.mxu1 %v5016_v0  ;;  %v3271_v0 = vpop.permute.xlu0 %3270 }
 0xbf5   :  { %5021 = vmatprep.subr.bf16.mxu1 %v5020_v12  ;;  %v3273_v7 = vmul.f32 %v3271_v0, %v8024_v62  ;;  %v3287_v31 = vmul.f32 %v3271_v0, %v6281_v14  ;;  %v8027_v14 = vsub.f32 1.0, %v6484_v21  ;;  %v8033_v62 = vsub.f32 1.0, %v6557_v2 }
 0xbf6   :  { %5243 = vset.pattern.permute.xlu0 %v7791_v44  ;;  %5242 = vset.pattern.permute.xlu1 %v7791_v44 }
 0xbf7   :  { %3102 = vperm.xlu0 %5243, %v3099_v35   ;;  %3088 = vperm.xlu1 %5242, %v3085_v3   ;;  %v3209_v3 = vpop.permute.xlu1 %3208  ;;  %v8023_v35 = vsub.f32 1.0, %v6412_v25 }
 0xbf8   :  { %5023 = vmatpush3.bf16.msra.mxu1 %v5020_v12  ;;  %v3225_v47 = vmul.f32 %v3209_v3, %v6412_v25  ;;  %v3784_v52 = vmul.f32 %v8025_v60, %v3209_v3  ;;  %v3798_v23 = vmul.f32 %v6463_v41, %v3209_v3  ;;  %v8026_v25 = vsub.f32 1.0, %v6292_v28  ;;  %v7114_v41 = vpop.permute.xlu0 %3396 }
 0xbf9   :  { %5025 = vmatprep.subr.bf16.mxu1 %v5024_v19  ;;  %v3211_v22 = vmul.f32 %v3209_v3, %v8023_v35  ;;  %v3413_v55 = vmul.f32 %v7114_v41, %v6310_v48 }
 0xbfa   :  { %v3843_v9 = vmul.f32 %v8026_v25, %v3271_v0  ;;  %v8035_v25 = vsub.f32 1.0, %v6585_v58 }
 0xbfb   :  { %3150 = vperm.xlu0 %5243, %v3147_v43   ;;  %3164 = vperm.xlu1 %5242, %v3161_v15   ;;  %v3857_v43 = vmul.f32 %v6292_v28, %v3271_v0  ;;  %v3335_v15 = vpop.permute.xlu1 %3334  ;;  %v3399_v28 = vmul.f32 %v7114_v41, %v8028_v32 }
 0xbfc   :  { %5027 = vmatpush3.bf16.msra.mxu1 %v5024_v19  ;;  %v3337_v12 = vmul.f32 %v3335_v15, %v8027_v14  ;;  %v3351_v54 = vmul.f32 %v3335_v15, %v6484_v21  ;;  %v7125_v21 = vsub.f32 %v8029_v61, %v7862_v39  ;;  %v8030_v19 = vsub.f32 1.0, %v6495_v63 }
 0xbfd   :  { %v8031_v39 = vsub.f32 1.0, %v6533_v1 }
 0xbfe   :  { %v3900_v53 = vmul.f32 %v8030_v19, %v3335_v15 }
 0xbff   :  { %5245 = vset.pattern.permute.xlu0 %v7796_v5  ;;  %5244 = vset.pattern.permute.xlu1 %v7796_v5  ;;  %v1921_v50 = vpop.permute.xlu1 %1920 }
 0xc00   :  { %3688 = vperm.xlu0 %5245, %v3685_v36   ;;  %3674 = vperm.xlu1 %5244, %v3671_v37   ;;  %v3914_v37 = vmul.f32 %v6495_v63, %v3335_v15  ;;  %v3958_v36 = vsub.f32 1.0, %v7125_v21  ;;  %v1937_v3 = vmul.f32 %v1921_v50, %v6533_v1  ;;  %v1773_v1 = vlaneseq }
 0xc02   :  { %v3959_v48 = vmul.f32 %v3958_v36, %v7114_v41 }
 0xc03   :  { %v2047_v35 = vpop.permute.xlu1 %2046 }
 0xc04   :  { %3730 = vperm.xlu0 %5245, %v3727_v8   ;;  %3744 = vperm.xlu1 %5244, %v3741_v13   ;;  %v1923_v8 = vmul.f32 %v1921_v50, %v8031_v39  ;;  %v1983_v13 = vpop.permute.xlu0 %1982  ;;  %v2063_v60 = vmul.f32 %v2047_v35, %v6557_v2 }
 0xc05   :  { %v1999_v63 = vmul.f32 %v1983_v13, %v6330_v29 }
 0xc08   :  { %5247 = vset.pattern.permute.xlu0 %v7791_v44  ;;  %5246 = vset.pattern.permute.xlu1 %v7791_v44 }
 0xc09   :  { %3228 = vperm.xlu0 %5247, %v3225_v47   ;;  %3214 = vperm.xlu1 %5246, %v3211_v22   ;;  %v2109_v22 = vpop.permute.xlu0 %2108  ;;  %v8032_v47 = vsub.f32 1.0, %v6330_v29 }
 0xc0b   :  { %v1985_v0 = vmul.f32 %v1983_v13, %v8032_v47  ;;  %v8042_v47 = vld [vmem:[#allocation56_spill] sm:$0xff] }
 0xc0d   :  { %3276 = vperm.xlu0 %5247, %v3273_v7   ;;  %3290 = vperm.xlu1 %5246, %v3287_v31   ;;  %v2049_v7 = vmul.f32 %v2047_v35, %v8033_v62  ;;  %v2125_v31 = vmul.f32 %v2109_v22, %v6341_v33  ;;  %v8043_v62 = vld [vmem:[#allocation28_spill] sm:$0xff] }
 0xc11   :  { %5249 = vset.pattern.permute.xlu0 %v7796_v5  ;;  %5248 = vset.pattern.permute.xlu1 %v7796_v5 }
 0xc12   :  { %3801 = vperm.xlu0 %5249, %v3798_v23   ;;  %3787 = vperm.xlu1 %5248, %v3784_v52   ;;  %v2173_v52 = vpop.permute.xlu0 %2172 }
 0xc13   :  { %v2175_v29 = vmul.f32 %v2173_v52, %v8035_v25  ;;  %v2189_v15 = vmul.f32 %v2173_v52, %v6585_v58  ;;  %v2580_v58 = vmul.f32 %v6381_v59, %v1983_v13 }
 0xc16   :  { %3846 = vperm.xlu0 %5249, %v3843_v9   ;;  %3860 = vperm.xlu1 %5248, %v3857_v43   ;;  %v7152_v9 = vpop.permute.xlu1 %2234  ;;  %v1774_v43 = vand.u32 127, %v1773_v1 }
 0xc17   :  { %v2251_v2 = vmul.f32 %v7152_v9, %v6352_v24  ;;  %v2812_v25 = vmul.f32 %v6405_v10, %v7152_v9 }
 0xc18   :  { %v7157_v14 = vcvt.s32.f32 %v1774_v43  ;;  %v8047_v43 = vld [vmem:[#allocation67_spill] sm:$0xff] }
 0xc1a   :  { %5251 = vset.pattern.permute.xlu0 %v7791_v44  ;;  %5250 = vset.pattern.permute.xlu1 %v7791_v44  ;;  %v1780_v39 = vmul.f32 0.25, %v7157_v14 }
 0xc1b   :  { %3354 = vperm.xlu0 %5251, %v3351_v54   ;;  %3340 = vperm.xlu1 %5250, %v3337_v12   ;;  %v8037_v54 = vsub.f32 1.0, %v6640_v18 }
 0xc1d   :  { %v2510_v32 = vmul.f32 %v8037_v54, %v1921_v50 }
 0xc1f   :  { %3402 = vperm.xlu0 %5251, %v3399_v28   ;;  %3416 = vperm.xlu1 %5250, %v3413_v55   ;;  %v1776_v28 = vmul.f32 0.125, %v7157_v14  ;;  %v2524_v55 = vmul.f32 %v6640_v18, %v1921_v50  ;;  %v2696_v18 = vmul.f32 %v6391_v49, %v2109_v22  ;;  %v2637_v50 = vmul.f32 %v6666_v56, %v2047_v35 }
 0xc21   :  { %v7168_v61 = vfloor.f32 %v1776_v28  ;;  %v3973_v28 = vmul.f32 %v7125_v21, %v7114_v41 }
 0xc23   :  { %5253 = vset.pattern.permute.xlu0 %v7796_v5  ;;  %5252 = vset.pattern.permute.xlu1 %v7796_v5  ;;  %vm3050_vm11 = vcmp.eq.f32.partialorder %v7168_v61, %v6231_v6  ;;  %vm3061_vm12 = vcmp.eq.f32.partialorder %v7168_v61, %v6455_v45 }
 0xc24   :  { %3917 = vperm.xlu0 %5253, %v3914_v37   ;;  %3903 = vperm.xlu1 %5252, %v3900_v53   ;;  %v8039_v53 = vsub.f32 1.0, %v6666_v56 }
 0xc26   :  { %v2623_v37 = vmul.f32 %v8039_v53, %v2047_v35 }
 0xc28   :  { %3962 = vperm.xlu0 %5253, %v3959_v48   ;;  %5254 = vset.pattern.permute.xlu1 %v7791_v44  ;;  %v1778_v48 = vmul.f32 8.0, %v7168_v61 }
 0xc29   :  { %1926 = vperm.xlu1 %5254, %v1923_v8   ;;  %v8040_v8 = vsub.f32 1.0, %v6391_v49  ;;  %v8045_v49 = vld [vmem:[#allocation35_spill] sm:$0xff] }
 0xc2a   :  { %vm2999_vm10 = vcmp.eq.f32.partialorder %v7168_v61, %v8045_v49 }
 0xc2c   :  { %5255 = vset.pattern.permute.xlu0 %v7791_v44  ;;  %v8034_v44 = vsub.f32 1.0, %v6341_v33  ;;  %v8036_v33 = vsub.f32 1.0, %v6352_v24  ;;  %v8038_v24 = vsub.f32 1.0, %v6381_v59  ;;  %v7182_v59 = vfloor.f32 %v1780_v39 }
 0xc2d   :  { %1940 = vperm.xlu0 %5255, %v1937_v3   ;;  %2002 = vperm.xlu1 %5254, %v1999_v63   ;;  %v8041_v63 = vsub.f32 1.0, %v6694_v20 }
 0xc2e   :  { %v2111_v23 = vmul.f32 %v2109_v22, %v8034_v44  ;;  %v2237_v12 = vmul.f32 %v7152_v9, %v8036_v33  ;;  %v2566_v19 = vmul.f32 %v8038_v24, %v1983_v13  ;;  %v2682_v13 = vmul.f32 %v8040_v8, %v2109_v22 }
 0xc2f   :  { %v2739_v3 = vmul.f32 %v8041_v63, %v2173_v52  ;;  %v1782_v22 = vmul.f32 4.0, %v7182_v59  ;;  %v3056_v44 = vsel %vm3050_vm11, %v6725_v17, 0.0  ;;  %v3067_v17 = vsel %vm3061_vm12, %v6477_v57, 0.0 }
 0xc30   :  { %v3068_v54 = vadd.f32 %v3067_v17, %v3056_v44  ;;  %vm3640_vm6 = vcmp.eq.f32.partialorder %v7182_v59, %v6255_v40  ;;  %v8058_v44 = vld [vmem:[#allocation34_spill] sm:$0xff] }
 0xc31   :  { %1988 = vperm.xlu0 %5255, %v1985_v0   ;;  %2052 = vperm.xlu1 %5254, %v2049_v7  }
 0xc35   :  { %2066 = vperm.xlu0 %5255, %v2063_v60   ;;  %2128 = vperm.xlu1 %5254, %v2125_v31   ;;  %v8044_v31 = vld [vmem:[#allocation30_spill] sm:$0xff]  ;;  %v8046_v60 = vld [vmem:[#allocation44_spill] sm:$0xff] }
 0xc36   :  { %vm2988_vm9 = vcmp.eq.f32.partialorder %v7168_v61, %v8044_v31  ;;  %v8056_v31 = vld [vmem:[#allocation59_spill] sm:$0xff] }
 0xc37   :  { %v2994_v1 = vsel %vm2988_vm9, %v8046_v60, 0.0  ;;  %vm3595_vm9 = vcmp.eq.f32.partialorder %v7182_v59, %v6466_v27 }
 0xc39   :  { %2114 = vperm.xlu0 %5255, %v2111_v23   ;;  %2178 = vperm.xlu1 %5254, %v2175_v29   ;;  %v2753_v23 = vmul.f32 %v6694_v20, %v2173_v52 }
 0xc3d   :  { %2192 = vperm.xlu0 %5255, %v2189_v15   ;;  %2254 = vperm.xlu1 %5254, %v2251_v2   ;;  %v8048_v2 = vld [vmem:[#allocation38_spill] sm:$0xff] }
 0xc3e   :  { %v3005_v33 = vsel %vm2999_vm10, %v8048_v2, 0.0  ;;  %vm3651_vm10 = vcmp.eq.f32.partialorder %v7182_v59, %v6473_v30 }
 0xc41   :  { %5256 = vset.pattern.permute.xlu1 %v7796_v5  ;;  %2240 = vperm.xlu0 %5255, %v2237_v12   ;;  %v3006_v12 = vadd.f32 %v3005_v33, %v2994_v1  ;;  %v8063_v33 = vld [vmem:[#allocation27_spill] sm:$0xff] }
 0xc42   :  { %2513 = vperm.xlu1 %5256, %v2510_v32   ;;  %v4835_v32 = vpop.f32.mrb[34].mxu1 }
 0xc43   :  { %v1536_v57 = vadd.f32 %v4835_v32, %v7045_v42  ;;  %v1530_v24 = vpop.f32.mrb[35].mxu1 }
 0xc45   :  { %5257 = vset.pattern.permute.xlu0 %v7796_v5  ;;  %v7180_v5 = vsub.f32 %v7157_v14, %v1778_v48 }
 0xc46   :  { %2583 = vperm.xlu1 %5256, %v2580_v58   ;;  %2527 = vperm.xlu0 %5257, %v2524_v55   ;;  %v8049_v58 = vsub.f32 1.0, %v6405_v10  ;;  %v7218_v55 = vsub.f32 %v7157_v14, %v1782_v22 }
 0xc47   :  { %vm2975_vm7 = vcmp.eq.f32.partialorder %v7180_v5, %v8042_v47  ;;  %vm2956_vm8 = vcmp.eq.f32.partialorder %v7180_v5, %v8043_v62  ;;  %vm3019_vm13 = vcmp.eq.f32.partialorder %v7180_v5, %v8047_v43  ;;  %vm3037_vm14 = vcmp.eq.f32.partialorder %v7180_v5, %v6446_v34  ;;  %v8055_v47 = vld [vmem:[#allocation26_spill] sm:$0xff] }
 0xc48   :  { %v2798_v34 = vmul.f32 %v8049_v58, %v7152_v9  ;;  %vm3571_vm15 = vcmp.eq.f32.partialorder %v7218_v55, %v6619_v38  ;;  %v8050_v9 = vld [vmem:[#allocation49_spill] sm:$0xff]  ;;  %v3646_v38 = vsel %vm3640_vm6, %v6735_v11, 0.0  ;;  %v8053_v11 = vld [vmem:[#allocation23_spill] sm:$0xff]  ;;  %vm1813_vm12 = vcmp.eq.f32.partialorder %v7180_v5, %v8056_v31  ;;  %v8061_v43 = vld [vmem:[#allocation46_spill] sm:$0xff] }
 0xc49   :  { %vm3556_vm5 = vcmp.eq.f32.partialorder %v7218_v55, %v8050_v9  ;;  %vm3627_vm11 = vcmp.eq.f32.partialorder %v7218_v55, %v8053_v11  ;;  %v8074_v11 = vld [vmem:[#allocation156_spill] sm:$0xff] }
 0xc4a   :  { %2626 = vperm.xlu1 %5256, %v2623_v37   ;;  %2569 = vperm.xlu0 %5257, %v2566_v19   ;;  %v1531_v37 = vadd.f32 %v7045_v42, %v1530_v24  ;;  %v8051_v42 = vld [vmem:[#allocation50_spill] sm:$0xff] }
 0xc4c   :  { %v7226_v39 = vpack.c.bf16 %v1536_v57, %v1531_v37 }
 0xc4e   :  { %2699 = vperm.xlu1 %5256, %v2696_v18   ;;  %2640 = vperm.xlu0 %5257, %v2637_v50  }
 0xc52   :  { %v2980_v0 = vpop.permute.xlu0 %2979  ;;  %v2966_v56 = vpop.permute.xlu1 %2965  ;;  %2742 = vperm.xlu1 %5256, %v2739_v3   ;;  %2685 = vperm.xlu0 %5257, %v2682_v13   ;;  %v8052_v13 = vld [vmem:[#allocation70_spill] sm:$0xff] }
 0xc53   :  { %v2982_v35 = vsel %vm2975_vm7, %v2980_v0, 0.0  ;;  %v2968_v7 = vsel %vm2956_vm8, %v2966_v56, 0.0  ;;  %vm3584_vm7 = vcmp.eq.f32.partialorder %v7182_v59, %v8051_v42  ;;  %vm3612_vm8 = vcmp.eq.f32.partialorder %v7218_v55, %v8052_v13  ;;  %v8070_v42 = vld [vmem:[#allocation10_spill] sm:$0xff]  ;;  %v8072_v13 = vld [vmem:[#allocation187_spill] sm:$0xff] }
 0xc54   :  { %v2983_v29 = vadd.f32 %v2982_v35, %v2968_v7  ;;  %v3590_v8 = vsel %vm3584_vm7, %v6875_v4, 0.0  ;;  %v8054_v4 = vld [vmem:[#allocation24_spill] sm:$0xff]  ;;  %v3657_v0 = vsel %vm3651_vm10, %v8055_v47, 0.0  ;;  %vm1857_vm7 = vcmp.eq.f32.partialorder %v7180_v5, %v8063_v33 }
 0xc55   :  { %v3601_v3 = vsel %vm3595_vm9, %v8054_v4, 0.0  ;;  %v3658_v56 = vadd.f32 %v3657_v0, %v3646_v38  ;;  %v8071_v38 = vld [vmem:[#allocation63_spill] sm:$0xff] }
 0xc56   :  { %v3028_v15 = vpop.permute.xlu0 %3027  ;;  %v3042_v6 = vpop.permute.xlu1 %3041  ;;  %2756 = vperm.xlu0 %5257, %v2753_v23   ;;  %2815 = vperm.xlu1 %5256, %v2812_v25   ;;  %v3007_v19 = vmul.f32 %v3006_v12, %v2983_v29  ;;  %v3602_v27 = vadd.f32 %v3601_v3, %v3590_v8  ;;  %v8059_v23 = vld [vmem:[#allocation40_spill] sm:$0xff]  ;;  %v8060_v25 = vld [vmem:[#allocation45_spill] sm:$0xff]  ;;  %v8076_v3 = vld [vmem:[#allocation158_spill] sm:$0xff] }
 0xc57   :  { %v3030_v20 = vsel %vm3019_vm13, %v3028_v15, 0.0  ;;  %v3044_v52 = vsel %vm3037_vm14, %v3042_v6, 0.0  ;;  %vm1826_vm14 = vcmp.eq.f32.partialorder %v7168_v61, %v8058_v44  ;;  %v8062_v6 = vld [vmem:[#allocation94_spill] sm:$0xff]  ;;  %v8077_v0 = vld [vmem:[#allocation163_spill] sm:$0xff] }
 0xc58   :  { %v3045_v45 = vadd.f32 %v3044_v52, %v3030_v20  ;;  %v1832_v29 = vsel %vm1826_vm14, %v8060_v25, 0.0  ;;  %vm1888_vm6 = vcmp.eq.f32.partialorder %v7168_v61, %v8062_v6  ;;  %v8064_v20 = vld [vmem:[#allocation130_spill] sm:$0xff]  ;;  %vm2434_vm14 = vcmp.eq.f32.partialorder %v7182_v59, %v8074_v11  ;;  %v8080_v44 = vld [vmem:[#allocation51_spill] sm:$0xff]  ;;  %v8082_v6 = vld [vmem:[#allocation25_spill] sm:$0xff] }
 0xc5a   :  { %v3069_v53 = vmul.f32 %v3068_v54, %v3045_v45  ;;  %3976 = vperm.xlu1 %5256, %v3973_v28   ;;  %2801 = vperm.xlu0 %5257, %v2798_v34   ;;  %v8066_v54 = vld [vmem:[#allocation11_spill] sm:$0xff] }
 0xc5b   :  { %v3576_v41 = vpop.permute.xlu0 %3575  ;;  %v3562_v14 = vpop.permute.xlu1 %3561  ;;  %v1894_v45 = vsel %vm1888_vm6, %v8066_v54, 0.0 }
 0xc5c   :  { %v3070_v48 = vadd.f32 %v3069_v53, %v3007_v19  ;;  %v3578_v10 = vsel %vm3571_vm15, %v3576_v41, 0.0  ;;  %v3564_v18 = vsel %vm3556_vm5, %v3562_v14, 0.0  ;;  %vm1899_vm15 = vcmp.eq.f32.partialorder %v7168_v61, %v6661_v26  ;;  %v8065_v26 = vld [vmem:[#allocation42_spill] sm:$0xff]  ;;  %v8067_v53 = vld [vmem:[#allocation139_spill] sm:$0xff]  ;;  %v8068_v41 = vld [vmem:[#allocation81_spill] sm:$0xff] }
 0xc5d   :  { %v3579_v50 = vadd.f32 %v3578_v10, %v3564_v18  ;;  %vm1837_vm5 = vcmp.eq.f32.partialorder %v7168_v61, %v8059_v23  ;;  %v1905_v15 = vsel %vm1899_vm15, %v8061_v43, 0.0  ;;  %vm2410_vm9 = vcmp.eq.f32.partialorder %v7218_v55, %v8067_v53  ;;  %v8069_v18 = vld [vmem:[#allocation83_spill] sm:$0xff] }
 0xc5e   :  { %4895 = vmatprep.mubr.msk.f32.mxu1 %vm2284_vm1, %v3070_v48  ;;  %5259 = vset.pattern.permute.xlu1 %v7797_v46  ;;  %v1843_v12 = vsel %vm1837_vm5, %v8065_v26, 0.0  ;;  %v1906_v34 = vadd.f32 %v1905_v15, %v1894_v45  ;;  %vm2395_vm10 = vcmp.eq.f32.partialorder %v7218_v55, %v8068_v41  ;;  %vm2466_vm5 = vcmp.eq.f32.partialorder %v7218_v55, %v8076_v3  ;;  %v8081_v15 = vld [vmem:[#allocation52_spill] sm:$0xff]  ;;  %v8096_v3 = vld [vmem:[#allocation179_spill] sm:$0xff] }
 0xc5f   :  { %5258 = vset.pattern.permute.xlu0 %v7797_v46  ;;  %v3618_v63 = vpop.permute.xlu0 %3617  ;;  %3999 = vperm.xlu1 %5259, %v7125_v21   ;;  %v3632_v46 = vpop.permute.xlu1 %3631  ;;  %v3603_v7 = vmul.f32 %v3602_v27, %v3579_v50  ;;  %v8057_v21 = vld [vmem:[#allocation32_spill] sm:$0xff]  ;;  %v1844_v58 = vadd.f32 %v1843_v12, %v1832_v29  ;;  %v8087_v12 = vld [vmem:[#allocation21_spill] sm:$0xff] }
 0xc60   :  { %v3620_v40 = vsel %vm3612_vm8, %v3618_v63, 0.0  ;;  %3988 = vperm.xlu0 %5258, %v3958_v36   ;;  %v3634_v62 = vsel %vm3627_vm11, %v3632_v46, 0.0  ;;  %vm1794_vm13 = vcmp.eq.f32.partialorder %v7180_v5, %v8057_v21  ;;  %vm1875_vm8 = vcmp.eq.f32.partialorder %v7180_v5, %v8064_v20  ;;  %v8075_v46 = vld [vmem:[#allocation106_spill] sm:$0xff]  ;;  %v8086_v26 = vld [vmem:[#allocation76_spill] sm:$0xff] }
 0xc61   :  { %v3635_v35 = vadd.f32 %v3634_v62, %v3620_v40  ;;  %vm2423_vm11 = vcmp.eq.f32.partialorder %v7182_v59, %v8069_v18  ;;  %v8073_v40 = vld [vmem:[#allocation108_spill] sm:$0xff]  ;;  %vm2451_vm15 = vcmp.eq.f32.partialorder %v7218_v55, %v8075_v46  ;;  %v8095_v46 = vld [vmem:[#allocation101_spill] sm:$0xff] }
 0xc62   :  { %v2429_v63 = vsel %vm2423_vm11, %v8072_v13, 0.0  ;;  %vm3173_vm11 = vcmp.eq.f32.partialorder %v7168_v61, %v8086_v26  ;;  %v8105_v26 = vld [vmem:[#allocation57_spill] sm:$0xff] }
 0xc63   :  { %v3659_v30 = vmul.f32 %v3658_v56, %v3635_v35  ;;  %v8078_v56 = vld [vmem:[#allocation61_spill] sm:$0xff] }
 0xc64   :  { %v1818_v49 = vpop.permute.xlu0 %1817  ;;  %v1804_v36 = vpop.permute.xlu1 %1803  ;;  %v2440_v27 = vsel %vm2434_vm14, %v8078_v56, 0.0  ;;  %v8099_v56 = vld [vmem:[#allocation78_spill] sm:$0xff] }
 0xc65   :  { %v7254_v22 = vadd.f32 %v3659_v30, %v3603_v7  ;;  %v1820_v60 = vsel %vm1813_vm12, %v1818_v49, 0.0  ;;  %v1806_v1 = vsel %vm1794_vm13, %v1804_v36, 0.0  ;;  %vm2490_vm12 = vcmp.eq.f32.partialorder %v7182_v59, %v8070_v42  ;;  %v8092_v42 = vld [vmem:[#allocation53_spill] sm:$0xff] }
 0xc66   :  { %v1821_v2 = vadd.f32 %v1820_v60, %v1806_v1  ;;  %v2496_v8 = vsel %vm2490_vm12, %v8071_v38, 0.0  ;;  %vm2479_vm13 = vcmp.eq.f32.partialorder %v7182_v59, %v8073_v40  ;;  %v2441_v31 = vadd.f32 %v2440_v27, %v2429_v63  ;;  %v8079_v60 = vld [vmem:[#allocation121_spill] sm:$0xff]  ;;  %v8093_v63 = vld [vmem:[#allocation54_spill] sm:$0xff] }
 0xc67   :  { %v2485_v62 = vsel %vm2479_vm13, %v8077_v0, 0.0  ;;  %vm3098_vm6 = vcmp.eq.f32.partialorder %v7180_v5, %v8079_v60  ;;  %vm3122_vm12 = vcmp.eq.f32.partialorder %v7168_v61, %v8087_v12  ;;  %v8094_v40 = vld [vmem:[#allocation58_spill] sm:$0xff]  ;;  %v8097_v0 = vld [vmem:[#allocation80_spill] sm:$0xff]  ;;  %v8106_v12 = vld [vmem:[#allocation33_spill] sm:$0xff] }
 0xc68   :  { %v1866_v17 = vpop.permute.xlu0 %1865  ;;  %v1880_v52 = vpop.permute.xlu1 %1879  ;;  %v1845_v24 = vmul.f32 %v1844_v58, %v1821_v2  ;;  %v2497_v30 = vadd.f32 %v2496_v8, %v2485_v62  ;;  %v8083_v2 = vld [vmem:[#allocation99_spill] sm:$0xff]  ;;  %v8089_v58 = vld [vmem:[#allocation150_spill] sm:$0xff] }
 0xc69   :  { %v1868_v32 = vsel %vm1857_vm7, %v1866_v17, 0.0  ;;  %v1882_v28 = vsel %vm1875_vm8, %v1880_v52, 0.0  ;;  %vm3079_vm7 = vcmp.eq.f32.partialorder %v7180_v5, %v8080_v44  ;;  %vm3111_vm8 = vcmp.eq.f32.partialorder %v7168_v61, %v8081_v15  ;;  %v8084_v17 = vld [vmem:[#allocation178_spill] sm:$0xff]  ;;  %v8085_v52 = vld [vmem:[#allocation73_spill] sm:$0xff]  ;;  %v8103_v15 = vld [vmem:[#allocation43_spill] sm:$0xff] }
 0xc6a   :  { %v1883_v57 = vadd.f32 %v1882_v28, %v1868_v32  ;;  %v3117_v20 = vsel %vm3111_vm8, %v8084_v17, 0.0  ;;  %v8088_v32 = vld [vmem:[#allocation22_spill] sm:$0xff] }
 0xc6b   :  { %vm3160_vm13 = vcmp.eq.f32.partialorder %v7180_v5, %v8088_v32  ;;  %v8098_v62 = vld [vmem:[#allocation18_spill] sm:$0xff]  ;;  %v8108_v32 = vld [vmem:[#allocation180_spill] sm:$0xff] }
 0xc6c   :  { %v1907_v19 = vmul.f32 %v1906_v34, %v1883_v57  ;;  %v3179_v34 = vsel %vm3173_vm11, %v8089_v58, 0.0  ;;  %v8090_v57 = vld [vmem:[#allocation98_spill] sm:$0xff]  ;;  %vm3708_vm8 = vcmp.eq.f32.partialorder %v7182_v59, %v8098_v62  ;;  %vm3224_vm11 = vcmp.eq.f32.partialorder %v7180_v5, %v8103_v15  ;;  %v8118_v62 = vld [vmem:[#allocation111_spill] sm:$0xff] }
 0xc6d   :  { %v2415_v37 = vpop.permute.xlu0 %2414  ;;  %v2401_v48 = vpop.permute.xlu1 %2400  ;;  %v8109_v58 = vld [vmem:[#allocation82_spill] sm:$0xff] }
 0xc6e   :  { %v1908_v10 = vadd.f32 %v1907_v19, %v1845_v24  ;;  %v2417_v9 = vsel %vm2410_vm9, %v2415_v37, 0.0  ;;  %v2403_v14 = vsel %vm2395_vm10, %v2401_v48, 0.0  ;;  %vm3184_vm9 = vcmp.eq.f32.partialorder %v7168_v61, %v8082_v6 }
 0xc6f   :  { %v2418_v50 = vadd.f32 %v2417_v9, %v2403_v14  ;;  %v3190_v33 = vsel %vm3184_vm9, %v8083_v2, 0.0  ;;  %vm3142_vm10 = vcmp.eq.f32.partialorder %v7180_v5, %v8085_v52  ;;  %v3128_v24 = vsel %vm3122_vm12, %v8090_v57, 0.0  ;;  %v8091_v14 = vld [vmem:[#allocation123_spill] sm:$0xff] }
 0xc70   :  { %4863 = vmatprep.mubr.msk.f32.mxu0 %vm2284_vm1, %v1908_v10  ;;  %v3191_v37 = vadd.f32 %v3190_v33, %v3179_v34  ;;  %v3129_v41 = vadd.f32 %v3128_v24, %v3117_v20  ;;  %vm3684_vm14 = vcmp.eq.f32.partialorder %v7218_v55, %v8091_v14  ;;  %vm3725_vm9 = vcmp.eq.f32.partialorder %v7218_v55, %v8099_v56  ;;  %v8104_v2 = vld [vmem:[#allocation55_spill] sm:$0xff]  ;;  %v8110_v34 = vld [vmem:[#allocation84_spill] sm:$0xff] }
 0xc71   :  { %v2457_v4 = vpop.permute.xlu0 %2456  ;;  %v2471_v47 = vpop.permute.xlu1 %2470  ;;  %v2442_v21 = vmul.f32 %v2441_v31, %v2418_v50  ;;  %vm3205_vm12 = vcmp.eq.f32.partialorder %v7180_v5, %v8104_v2  ;;  %v8111_v57 = vld [vmem:[#allocation103_spill] sm:$0xff] }
 0xc72   :  { %v2459_v35 = vsel %vm2451_vm15, %v2457_v4, 0.0  ;;  %v2473_v7 = vsel %vm2466_vm5, %v2471_v47, 0.0  ;;  %vm3669_vm15 = vcmp.eq.f32.partialorder %v7218_v55, %v8092_v42  ;;  %vm3697_vm5 = vcmp.eq.f32.partialorder %v7182_v59, %v8093_v63  ;;  %v8115_v63 = vld [vmem:[#allocation127_spill] sm:$0xff] }
 0xc73   :  { %v2474_v49 = vadd.f32 %v2473_v7, %v2459_v35  ;;  %v3703_v47 = vsel %vm3697_vm5, %v8096_v3, 0.0  ;;  %v8100_v35 = vld [vmem:[#allocation95_spill] sm:$0xff]  ;;  %vm3299_vm5 = vcmp.eq.f32.partialorder %v7168_v61, %v8110_v34 }
 0xc75   :  { %v2498_v36 = vmul.f32 %v2497_v30, %v2474_v49  ;;  %v8101_v30 = vld [vmem:[#allocation152_spill] sm:$0xff]  ;;  %v8102_v49 = vld [vmem:[#allocation31_spill] sm:$0xff] }
 0xc76   :  { %v3103_v1 = vpop.permute.xlu0 %3102  ;;  %v3089_v23 = vpop.permute.xlu1 %3088 }
 0xc77   :  { %v7297_v25 = vadd.f32 %v2498_v36, %v2442_v21  ;;  %v3105_v29 = vsel %vm3098_vm6, %v3103_v1, 0.0  ;;  %v3091_v43 = vsel %vm3079_vm7, %v3089_v23, 0.0  ;;  %vm3764_vm6 = vcmp.eq.f32.partialorder %v7182_v59, %v8094_v40 }
 0xc78   :  { %v3106_v54 = vadd.f32 %v3105_v29, %v3091_v43  ;;  %v3770_v4 = vsel %vm3764_vm6, %v8095_v46, 0.0  ;;  %vm3753_vm7 = vcmp.eq.f32.partialorder %v7182_v59, %v8097_v0  ;;  %v3714_v21 = vsel %vm3708_vm8, %v8102_v49, 0.0  ;;  %v8117_v0 = vld [vmem:[#allocation62_spill] sm:$0xff]  ;;  %v8122_v49 = vld [vmem:[#allocation107_spill] sm:$0xff] }
 0xc79   :  { %v3759_v31 = vsel %vm3753_vm7, %v8101_v30, 0.0  ;;  %v3715_v44 = vadd.f32 %v3714_v21, %v3703_v47  ;;  %vm3248_vm6 = vcmp.eq.f32.partialorder %v7168_v61, %v8111_v57  ;;  %vm3797_vm8 = vcmp.eq.f32.partialorder %v7218_v55, %v8115_v63  ;;  %v8123_v21 = vld [vmem:[#allocation87_spill] sm:$0xff]  ;;  %v8129_v57 = vld [vmem:[#allocation66_spill] sm:$0xff] }
 0xc7a   :  { %v3151_v45 = vpop.permute.xlu0 %3150  ;;  %v3165_v28 = vpop.permute.xlu1 %3164  ;;  %v3130_v10 = vmul.f32 %v3129_v41, %v3106_v54  ;;  %v3771_v1 = vadd.f32 %v3770_v4, %v3759_v31  ;;  %v8107_v54 = vld [vmem:[#allocation37_spill] sm:$0xff]  ;;  %v8113_v41 = vld [vmem:[#allocation155_spill] sm:$0xff] }
 0xc7b   :  { %v3153_v19 = vsel %vm3142_vm10, %v3151_v45, 0.0  ;;  %v3167_v53 = vsel %vm3160_vm13, %v3165_v28, 0.0  ;;  %vm3740_vm10 = vcmp.eq.f32.partialorder %v7218_v55, %v8100_v35  ;;  %vm3237_vm13 = vcmp.eq.f32.partialorder %v7168_v61, %v8105_v26  ;;  %v8121_v31 = vld [vmem:[#allocation89_spill] sm:$0xff] }
 0xc7c   :  { %v3168_v48 = vadd.f32 %v3167_v53, %v3153_v19  ;;  %v3243_v28 = vsel %vm3237_vm13, %v8108_v32, 0.0  ;;  %v8112_v53 = vld [vmem:[#allocation105_spill] sm:$0xff]  ;;  %vm3821_vm13 = vcmp.eq.f32.partialorder %v7182_v59, %v8122_v49 }
 0xc7d   :  { %vm3286_vm7 = vcmp.eq.f32.partialorder %v7180_v5, %v8112_v53 }
 0xc7e   :  { %v3192_v9 = vmul.f32 %v3191_v37, %v3168_v48  ;;  %v3305_v48 = vsel %vm3299_vm5, %v8113_v41, 0.0 }
 0xc7f   :  { %v3689_v18 = vpop.permute.xlu0 %3688  ;;  %v3675_v50 = vpop.permute.xlu1 %3674 }
 0xc80   :  { %v3193_v38 = vadd.f32 %v3192_v9, %v3130_v10  ;;  %v3691_v8 = vsel %vm3684_vm14, %v3689_v18, 0.0  ;;  %v3677_v13 = vsel %vm3669_vm15, %v3675_v50, 0.0  ;;  %vm3310_vm14 = vcmp.eq.f32.partialorder %v7168_v61, %v8106_v12  ;;  %v8114_v10 = vld [vmem:[#allocation113_spill] sm:$0xff] }
 0xc81   :  { %v3692_v11 = vadd.f32 %v3691_v8, %v3677_v13  ;;  %v3316_v45 = vsel %vm3310_vm14, %v8107_v54, 0.0  ;;  %vm3268_vm15 = vcmp.eq.f32.partialorder %v7180_v5, %v8109_v58  ;;  %v3254_v9 = vsel %vm3248_vm6, %v8114_v10, 0.0  ;;  %v8127_v12 = vld [vmem:[#allocation129_spill] sm:$0xff]  ;;  %v8134_v10 = vld [vmem:[#allocation16_spill] sm:$0xff] }
 0xc82   :  { %4896 = vmatmul.mubr.msk.f32.vlgmr.msra.gmra.mrb[36].mxu1 %vm2284_vm1, %v3193_v38  ;;  %v3317_v42 = vadd.f32 %v3316_v45, %v3305_v48  ;;  %v3255_v50 = vadd.f32 %v3254_v9, %v3243_v28  ;;  %vm3841_vm14 = vcmp.eq.f32.partialorder %v7218_v55, %v8123_v21  ;;  %vm3350_vm5 = vcmp.eq.f32.partialorder %v7180_v5, %v8127_v12  ;;  %v8128_v45 = vld [vmem:[#allocation64_spill] sm:$0xff]  ;;  %v8133_v48 = vld [vmem:[#allocation19_spill] sm:$0xff]  ;;  %v8135_v9 = vld [vmem:[#allocation114_spill] sm:$0xff] }
 0xc83   :  { %v3731_v27 = vpop.permute.xlu0 %3730  ;;  %v3745_v7 = vpop.permute.xlu1 %3744  ;;  %v3716_v29 = vmul.f32 %v3715_v44, %v3692_v11  ;;  %v8116_v11 = vld [vmem:[#allocation60_spill] sm:$0xff]  ;;  %v8125_v44 = vld [vmem:[#allocation157_spill] sm:$0xff]  ;;  %vm3331_vm6 = vcmp.eq.f32.partialorder %v7180_v5, %v8128_v45 }
 0xc84   :  { %v3733_v36 = vsel %vm3725_vm9, %v3731_v27, 0.0  ;;  %v3747_v60 = vsel %vm3740_vm10, %v3745_v7, 0.0  ;;  %vm3782_vm9 = vcmp.eq.f32.partialorder %v7218_v55, %v8116_v11  ;;  %vm3810_vm10 = vcmp.eq.f32.partialorder %v7182_v59, %v8117_v0  ;;  %v8119_v27 = vld [vmem:[#allocation41_spill] sm:$0xff] }
 0xc85   :  { %v3748_v23 = vadd.f32 %v3747_v60, %v3733_v36  ;;  %v8120_v7 = vld [vmem:[#allocation181_spill] sm:$0xff] }
 0xc86   :  { %v3816_v30 = vsel %vm3810_vm10, %v8120_v7, 0.0  ;;  %v8124_v60 = vld [vmem:[#allocation109_spill] sm:$0xff]  ;;  %vm3425_vm10 = vcmp.eq.f32.partialorder %v7168_v61, %v8134_v10 }
 0xc87   :  { %v3772_v43 = vmul.f32 %v3771_v1, %v3748_v23 }
 0xc88   :  { %v3229_v6 = vpop.permute.xlu0 %3228  ;;  %v3215_v33 = vpop.permute.xlu1 %3214 }
 0xc89   :  { %v7340_v17 = vadd.f32 %v3772_v43, %v3716_v29  ;;  %v3231_v20 = vsel %vm3224_vm11, %v3229_v6, 0.0  ;;  %v3217_v52 = vsel %vm3205_vm12, %v3215_v33, 0.0  ;;  %vm3880_vm11 = vcmp.eq.f32.partialorder %v7182_v59, %v8118_v62  ;;  %v8126_v29 = vld [vmem:[#allocation120_spill] sm:$0xff] }
 0xc8a   :  { %v3232_v24 = vadd.f32 %v3231_v20, %v3217_v52  ;;  %v3886_v35 = vsel %vm3880_vm11, %v8119_v27, 0.0  ;;  %vm3869_vm12 = vcmp.eq.f32.partialorder %v7182_v59, %v8121_v31  ;;  %v3827_v43 = vsel %vm3821_vm13, %v8126_v29, 0.0  ;;  %v8144_v29 = vld [vmem:[#allocation184_spill] sm:$0xff] }
 0xc8b   :  { %v3875_v23 = vsel %vm3869_vm12, %v8125_v44, 0.0  ;;  %v3828_v33 = vadd.f32 %v3827_v43, %v3816_v30  ;;  %vm3374_vm11 = vcmp.eq.f32.partialorder %v7168_v61, %v8135_v9  ;;  %v8139_v30 = vld [vmem:[#allocation132_spill] sm:$0xff]  ;;  %v8143_v44 = vld [vmem:[#allocation47_spill] sm:$0xff] }
 0xc8c   :  { %v3277_v19 = vpop.permute.xlu0 %3276  ;;  %v3291_v37 = vpop.permute.xlu1 %3290  ;;  %v3256_v8 = vmul.f32 %v3255_v50, %v3232_v24  ;;  %v3887_v2 = vadd.f32 %v3886_v35, %v3875_v23  ;;  %v8130_v24 = vld [vmem:[#allocation118_spill] sm:$0xff]  ;;  %vm1936_vm13 = vcmp.eq.f32.partialorder %v7180_v5, %v8139_v30  ;;  %v8161_v30 = vld [vmem:[#allocation15_spill] sm:$0xff] }
 0xc8d   :  { %v3279_v14 = vsel %vm3268_vm15, %v3277_v19, 0.0  ;;  %v3293_v18 = vsel %vm3286_vm7, %v3291_v37, 0.0  ;;  %vm3856_vm15 = vcmp.eq.f32.partialorder %v7218_v55, %v8124_v60  ;;  %vm3363_vm7 = vcmp.eq.f32.partialorder %v7168_v61, %v8129_v57  ;;  %v8131_v19 = vld [vmem:[#allocation126_spill] sm:$0xff]  ;;  %v8141_v60 = vld [vmem:[#allocation137_spill] sm:$0xff] }
 0xc8e   :  { %v3294_v38 = vadd.f32 %v3293_v18, %v3279_v14  ;;  %v8132_v37 = vld [vmem:[#allocation182_spill] sm:$0xff] }
 0xc8f   :  { %v3369_v41 = vsel %vm3363_vm7, %v8132_v37, 0.0 }
 0xc90   :  { %v3318_v13 = vmul.f32 %v3317_v42, %v3294_v38  ;;  %v8136_v42 = vld [vmem:[#allocation116_spill] sm:$0xff]  ;;  %v8137_v38 = vld [vmem:[#allocation17_spill] sm:$0xff] }
 0xc91   :  { %v3802_v40 = vpop.permute.xlu0 %3801  ;;  %v3788_v46 = vpop.permute.xlu1 %3787  ;;  %vm3412_vm12 = vcmp.eq.f32.partialorder %v7180_v5, %v8136_v42  ;;  %v8153_v42 = vld [vmem:[#allocation144_spill] sm:$0xff] }
 0xc92   :  { %v3319_v4 = vadd.f32 %v3318_v13, %v3256_v8  ;;  %v3804_v3 = vsel %vm3797_vm8, %v3802_v40, 0.0  ;;  %v3790_v47 = vsel %vm3782_vm9, %v3788_v46, 0.0  ;;  %vm3436_vm8 = vcmp.eq.f32.partialorder %v7168_v61, %v8130_v24  ;;  %v8138_v13 = vld [vmem:[#allocation125_spill] sm:$0xff] }
 0xc93   :  { %v3805_v56 = vadd.f32 %v3804_v3, %v3790_v47  ;;  %v3442_v53 = vsel %vm3436_vm8, %v8131_v19, 0.0  ;;  %vm3394_vm9 = vcmp.eq.f32.partialorder %v7180_v5, %v8133_v48  ;;  %v3431_v8 = vsel %vm3425_vm10, %v8137_v38, 0.0  ;;  %v8151_v48 = vld [vmem:[#allocation134_spill] sm:$0xff] }
 0xc94   :  { %4898 = vmatprep.mubr.msk.f32.mxu1 %vm2284_vm1, %v3319_v4  ;;  %v3380_v63 = vsel %vm3374_vm11, %v8138_v13, 0.0  ;;  %v3443_v46 = vadd.f32 %v3442_v53, %v3431_v8  ;;  %vm2062_vm10 = vcmp.eq.f32.partialorder %v7180_v5, %v8151_v48  ;;  %v8154_v38 = vld [vmem:[#allocation74_spill] sm:$0xff]  ;;  %v8155_v8 = vld [vmem:[#allocation147_spill] sm:$0xff] }
 0xc95   :  { %v3847_v36 = vpop.permute.xlu0 %3846  ;;  %v3861_v1 = vpop.permute.xlu1 %3860  ;;  %v3829_v52 = vmul.f32 %v3828_v33, %v3805_v56  ;;  %v3381_v4 = vadd.f32 %v3380_v63, %v3369_v41  ;;  %v8147_v33 = vld [vmem:[#allocation133_spill] sm:$0xff] }
 0xc96   :  { %v3849_v15 = vsel %vm3841_vm14, %v3847_v36, 0.0  ;;  %v3863_v6 = vsel %vm3856_vm15, %v3861_v1, 0.0  ;;  %v8140_v36 = vld [vmem:[#allocation72_spill] sm:$0xff]  ;;  %vm2022_vm15 = vcmp.eq.f32.partialorder %v7168_v61, %v8141_v60  ;;  %v8142_v1 = vld [vmem:[#allocation71_spill] sm:$0xff]  ;;  %vm1960_vm8 = vcmp.eq.f32.partialorder %v7168_v61, %v8147_v33  ;;  %v8156_v63 = vld [vmem:[#allocation185_spill] sm:$0xff] }
 0xc97   :  { %v3864_v20 = vadd.f32 %v3863_v6, %v3849_v15  ;;  %vm1949_vm14 = vcmp.eq.f32.partialorder %v7168_v61, %v8140_v36  ;;  %v2028_v23 = vsel %vm2022_vm15, %v8143_v44, 0.0  ;;  %v8145_v6 = vld [vmem:[#allocation96_spill] sm:$0xff] }
 0xc98   :  { %v1955_v43 = vsel %vm1949_vm14, %v8144_v29, 0.0 }
 0xc99   :  { %v3888_v26 = vmul.f32 %v3887_v2, %v3864_v20  ;;  %v8146_v2 = vld [vmem:[#allocation97_spill] sm:$0xff] }
 0xc9a   :  { %v3355_v54 = vpop.permute.xlu0 %3354  ;;  %v3341_v32 = vpop.permute.xlu1 %3340  ;;  %vm2011_vm7 = vcmp.eq.f32.partialorder %v7168_v61, %v8146_v2 }
 0xc9b   :  { %v7383_v28 = vadd.f32 %v3888_v26, %v3829_v52  ;;  %v3357_v58 = vsel %vm3350_vm5, %v3355_v54, 0.0  ;;  %v3343_v34 = vsel %vm3331_vm6, %v3341_v32, 0.0  ;;  %vm1917_vm5 = vcmp.eq.f32.partialorder %v7180_v5, %v8142_v1  ;;  %v8148_v52 = vld [vmem:[#allocation135_spill] sm:$0xff]  ;;  %v8149_v54 = vld [vmem:[#allocation14_spill] sm:$0xff] }
 0xc9c   :  { %v3358_v14 = vadd.f32 %v3357_v58, %v3343_v34  ;;  %vm1980_vm6 = vcmp.eq.f32.partialorder %v7180_v5, %v8145_v6  ;;  %v2017_v45 = vsel %vm2011_vm7, %v8149_v54, 0.0  ;;  %v8150_v32 = vld [vmem:[#allocation138_spill] sm:$0xff] }
 0xc9d   :  { %v1966_v58 = vsel %vm1960_vm8, %v8150_v32, 0.0  ;;  %v2029_v24 = vadd.f32 %v2028_v23, %v2017_v45  ;;  %v8168_v45 = vld [vmem:[#allocation186_spill] sm:$0xff] }
 0xc9e   :  { %v3403_v18 = vpop.permute.xlu0 %3402  ;;  %v3417_v50 = vpop.permute.xlu1 %3416  ;;  %v3382_v47 = vmul.f32 %v3381_v4, %v3358_v14  ;;  %v1967_v19 = vadd.f32 %v1966_v58, %v1955_v43  ;;  %v8158_v4 = vld [vmem:[#allocation29_spill] sm:$0xff] }
 0xc9f   :  { %v3405_v40 = vsel %vm3394_vm9, %v3403_v18, 0.0  ;;  %v3419_v11 = vsel %vm3412_vm12, %v3417_v50, 0.0  ;;  %vm1998_vm9 = vcmp.eq.f32.partialorder %v7180_v5, %v8148_v52  ;;  %v8152_v18 = vld [vmem:[#allocation75_spill] sm:$0xff]  ;;  %vm2148_vm12 = vcmp.eq.f32.partialorder %v7168_v61, %v8153_v42 }
 0xca0   :  { %v3420_v3 = vadd.f32 %v3419_v11, %v3405_v40  ;;  %vm2075_vm11 = vcmp.eq.f32.partialorder %v7168_v61, %v8152_v18  ;;  %v2154_v13 = vsel %vm2148_vm12, %v8155_v8, 0.0  ;;  %vm2137_vm15 = vcmp.eq.f32.partialorder %v7168_v61, %v8158_v4  ;;  %v8165_v52 = vld [vmem:[#allocation151_spill] sm:$0xff]  ;;  %v8176_v4 = vld [vmem:[#allocation86_spill] sm:$0xff] }
 0xca1   :  { %v2081_v40 = vsel %vm2075_vm11, %v8156_v63, 0.0 }
 0xca2   :  { %v3444_v0 = vmul.f32 %v3443_v46, %v3420_v3  ;;  %v8157_v46 = vld [vmem:[#allocation100_spill] sm:$0xff]  ;;  %v8159_v3 = vld [vmem:[#allocation141_spill] sm:$0xff] }
 0xca3   :  { %v7401_v62 = vpop.permute.xlu0 %3917  ;;  %v7403_v56 = vpop.permute.xlu1 %3903  ;;  %vm2106_vm14 = vcmp.eq.f32.partialorder %v7180_v5, %v8157_v46 }
 0xca4   :  { %v3445_v27 = vadd.f32 %v3444_v0, %v3382_v47  ;;  %v8160_v0 = vld [vmem:[#allocation142_spill] sm:$0xff] }
 0xca6   :  { %4899 = vmatmul.mubr.msk.f32.gmra.mrb[38].mxu1 %vm2284_vm1, %v3445_v27 }
 0xca7   :  { %v7406_v35 = vpop.permute.xlu0 %3962 }
 0xca8   :  { %v1927_v7 = vpop.permute.xlu1 %1926 }
 0xca9   :  { %v1929_v15 = vsel %vm1917_vm5, %v1927_v7, 0.0  ;;  %vm2086_vm5 = vcmp.eq.f32.partialorder %v7168_v61, %v8159_v3  ;;  %v8177_v3 = vld [vmem:[#allocation160_spill] sm:$0xff] }
 0xcac   :  { %v1941_v31 = vpop.permute.xlu0 %1940  ;;  %v2003_v49 = vpop.permute.xlu1 %2002 }
 0xcad   :  { %v1943_v21 = vsel %vm1936_vm13, %v1941_v31, 0.0  ;;  %v2005_v34 = vsel %vm1998_vm9, %v2003_v49, 0.0  ;;  %vm2043_vm13 = vcmp.eq.f32.partialorder %v7180_v5, %v8154_v38  ;;  %v2143_v31 = vsel %vm2137_vm15, %v8161_v30, 0.0  ;;  %v8162_v49 = vld [vmem:[#allocation146_spill] sm:$0xff] }
 0xcae   :  { %v1944_v20 = vadd.f32 %v1943_v21, %v1929_v15  ;;  %v2092_v21 = vsel %vm2086_vm5, %v8162_v49, 0.0  ;;  %v2155_v1 = vadd.f32 %v2154_v13, %v2143_v31  ;;  %v8163_v15 = vld [vmem:[#allocation136_spill] sm:$0xff]  ;;  %vm2274_vm9 = vcmp.eq.f32.partialorder %v7168_v61, %v8165_v52  ;;  %v8180_v31 = vld [vmem:[#allocation110_spill] sm:$0xff] }
 0xcaf   :  { %v2093_v44 = vadd.f32 %v2092_v21, %v2081_v40  ;;  %vm2188_vm7 = vcmp.eq.f32.partialorder %v7180_v5, %v8163_v15  ;;  %vm2536_vm5 = vcmp.eq.f32.partialorder %v7182_v59, %v8176_v4  ;;  %v8181_v49 = vld [vmem:[#allocation112_spill] sm:$0xff]  ;;  %v8182_v21 = vld [vmem:[#allocation65_spill] sm:$0xff] }
 0xcb0   :  { %v1989_v26 = vpop.permute.xlu0 %1988  ;;  %v2053_v12 = vpop.permute.xlu1 %2052  ;;  %v1968_v37 = vmul.f32 %v1967_v19, %v1944_v20  ;;  %v8164_v20 = vld [vmem:[#allocation79_spill] sm:$0xff] }
 0xcb1   :  { %v1991_v57 = vsel %vm1980_vm6, %v1989_v26, 0.0  ;;  %v2055_v11 = vsel %vm2043_vm13, %v2053_v12, 0.0  ;;  %vm2124_vm6 = vcmp.eq.f32.partialorder %v7180_v5, %v8160_v0  ;;  %vm2201_vm8 = vcmp.eq.f32.partialorder %v7168_v61, %v8164_v20  ;;  %v8166_v26 = vld [vmem:[#allocation77_spill] sm:$0xff]  ;;  %v8167_v12 = vld [vmem:[#allocation154_spill] sm:$0xff]  ;;  %v8179_v0 = vld [vmem:[#allocation164_spill] sm:$0xff] }
 0xcb2   :  { %v2006_v53 = vadd.f32 %v2005_v34, %v1991_v57  ;;  %v2280_v54 = vsel %vm2274_vm9, %v8167_v12, 0.0  ;;  %v2207_v32 = vsel %vm2201_vm8, %v8168_v45, 0.0  ;;  %v8169_v34 = vld [vmem:[#allocation102_spill] sm:$0xff]  ;;  %v8170_v57 = vld [vmem:[#allocation104_spill] sm:$0xff]  ;;  %vm2564_vm8 = vcmp.eq.f32.partialorder %v7218_v55, %v8180_v31 }
 0xcb3   :  { %vm2232_vm11 = vcmp.eq.f32.partialorder %v7180_v5, %v8169_v34  ;;  %vm2263_vm12 = vcmp.eq.f32.partialorder %v7168_v61, %v8170_v57  ;;  %vm2592_vm9 = vcmp.eq.f32.partialorder %v7182_v59, %v8181_v49  ;;  %v8189_v34 = vld [vmem:[#allocation88_spill] sm:$0xff] }
 0xcb4   :  { %v2030_v41 = vmul.f32 %v2029_v24, %v2006_v53  ;;  %v2067_v10 = vpop.permute.xlu0 %2066  ;;  %v2129_v9 = vpop.permute.xlu1 %2128  ;;  %v8171_v24 = vld [vmem:[#allocation148_spill] sm:$0xff]  ;;  %v8172_v53 = vld [vmem:[#allocation149_spill] sm:$0xff] }
 0xcb5   :  { %v2069_v14 = vsel %vm2062_vm10, %v2067_v10, 0.0  ;;  %v2131_v36 = vsel %vm2124_vm6, %v2129_v9, 0.0  ;;  %vm2169_vm10 = vcmp.eq.f32.partialorder %v7180_v5, %v8166_v26  ;;  %vm2212_vm13 = vcmp.eq.f32.partialorder %v7168_v61, %v8171_v24  ;;  %v8174_v10 = vld [vmem:[#allocation153_spill] sm:$0xff]  ;;  %v8175_v61 = vld [vmem:[#allocation140_spill] sm:$0xff]  ;;  %v8186_v26 = vld [vmem:[#allocation143_spill] sm:$0xff] }
 0xcb6   :  { %v2031_v50 = vadd.f32 %v2030_v41, %v1968_v37  ;;  %v2070_v47 = vadd.f32 %v2069_v14, %v2055_v11  ;;  %v8173_v41 = vld [vmem:[#allocation161_spill] sm:$0xff]  ;;  %v2218_v9 = vsel %vm2212_vm13, %v8174_v10, 0.0  ;;  %vm2523_vm15 = vcmp.eq.f32.partialorder %v7218_v55, %v8175_v61  ;;  %v8190_v57 = vld [vmem:[#allocation172_spill] sm:$0xff] }
 0xcb7   :  { %v2269_v48 = vsel %vm2263_vm12, %v8173_v41, 0.0  ;;  %v2219_v38 = vadd.f32 %v2218_v9, %v2207_v32  ;;  %vm2603_vm6 = vcmp.eq.f32.partialorder %v7182_v59, %v8177_v3  ;;  %vm2636_vm12 = vcmp.eq.f32.partialorder %v7218_v55, %v8186_v26  ;;  %v8187_v32 = vld [vmem:[#allocation90_spill] sm:$0xff]  ;;  %v8192_v41 = vld [vmem:[#allocation36_spill] sm:$0xff]  ;;  %v8194_v10 = vld [vmem:[#allocation165_spill] sm:$0xff] }
 0xcb8   :  { %v2115_v27 = vpop.permute.xlu0 %2114  ;;  %4864 = vmatmul.mubr.msk.f32.vlgmr.msra.gmra.mrb[16].mxu0 %vm2284_vm1, %v2031_v50  ;;  %v2179_v7 = vpop.permute.xlu1 %2178  ;;  %v2094_v29 = vmul.f32 %v2093_v44, %v2070_v47  ;;  %v2281_v50 = vadd.f32 %v2280_v54, %v2269_v48  ;;  %v8178_v47 = vld [vmem:[#allocation85_spill] sm:$0xff]  ;;  %v8184_v44 = vld [vmem:[#allocation166_spill] sm:$0xff]  ;;  %vm2649_vm13 = vcmp.eq.f32.partialorder %v7182_v59, %v8187_v32  ;;  %v8193_v48 = vld [vmem:[#allocation115_spill] sm:$0xff] }
 0xcb9   :  { %v2117_v60 = vsel %vm2106_vm14, %v2115_v27, 0.0  ;;  %5011 = vmatpush3.bf16.msra.mxu0 %v7069_v16  ;;  %v2181_v58 = vsel %vm2169_vm10, %v2179_v7, 0.0  ;;  %vm2250_vm14 = vcmp.eq.f32.partialorder %v7180_v5, %v8172_v53  ;;  %v2609_v27 = vsel %vm2603_vm6, %v8179_v0, 0.0  ;;  %v8198_v3 = vld [vmem:[#allocation145_spill] sm:$0xff]  ;;  %v8201_v49 = vld [vmem:[#allocation48_spill] sm:$0xff] }
 0xcba   :  { %v2132_v23 = vadd.f32 %v2131_v36, %v2117_v60  ;;  %5029 = vmatprep.subr.bf16.mxu0 %v7226_v39  ;;  %v2542_v7 = vsel %vm2536_vm5, %v6897_v51, 0.0  ;;  %vm2547_vm10 = vcmp.eq.f32.partialorder %v7182_v59, %v8182_v21  ;;  %v8183_v60 = vld [vmem:[#allocation159_spill] sm:$0xff]  ;;  %vm2680_vm5 = vcmp.eq.f32.partialorder %v7218_v55, %v8192_v41  ;;  %v8210_v32 = vld [vmem:[#allocation68_spill] sm:$0xff] }
 0xcbb   :  { %vm2708_vm6 = vcmp.eq.f32.partialorder %v7182_v59, %v8193_v48 }
 0xcbc   :  { %v2156_v43 = vmul.f32 %v2155_v1, %v2132_v23  ;;  %v2193_v6 = vpop.permute.xlu0 %2192  ;;  %v2255_v2 = vpop.permute.xlu1 %2254  ;;  %v2598_v23 = vsel %vm2592_vm9, %v8184_v44, 0.0  ;;  %vm2752_vm9 = vcmp.eq.f32.partialorder %v7218_v55, %v8198_v3  ;;  %v8205_v44 = vld [vmem:[#allocation119_spill] sm:$0xff] }
 0xcbd   :  { %v2195_v33 = vsel %vm2188_vm7, %v2193_v6, 0.0  ;;  %v2257_v14 = vsel %vm2250_vm14, %v2255_v2, 0.0  ;;  %vm2508_vm7 = vcmp.eq.f32.partialorder %v7218_v55, %v8178_v47  ;;  %v2610_v2 = vadd.f32 %v2609_v27, %v2598_v23  ;;  %v8206_v23 = vld [vmem:[#allocation173_spill] sm:$0xff] }
 0xcbe   :  { %v2157_v16 = vadd.f32 %v2156_v43, %v2094_v29  ;;  %v2196_v19 = vadd.f32 %v2195_v33, %v2181_v58  ;;  %v8185_v29 = vld [vmem:[#allocation162_spill] sm:$0xff] }
 0xcbf   :  { %v2553_v43 = vsel %vm2547_vm10, %v8185_v29, 0.0 }
 0xcc0   :  { %v2241_v37 = vpop.permute.xlu0 %2240  ;;  %4866 = vmatprep.mubr.msk.f32.mxu0 %vm2284_vm1, %v2157_v16  ;;  %v2220_v13 = vmul.f32 %v2219_v38, %v2196_v19  ;;  %v2554_v33 = vadd.f32 %v2553_v43, %v2542_v7  ;;  %v8191_v19 = vld [vmem:[#allocation188_spill] sm:$0xff]  ;;  %v8199_v7 = vld [vmem:[#allocation91_spill] sm:$0xff]  ;;  %v8207_v43 = vld [vmem:[#allocation174_spill] sm:$0xff] }
 0xcc1   :  { %v2243_v18 = vsel %vm2232_vm11, %v2241_v37, 0.0  ;;  %v2514_v42 = vpop.permute.xlu1 %2513  ;;  %vm2579_vm11 = vcmp.eq.f32.partialorder %v7218_v55, %v8183_v60  ;;  %v2655_v53 = vsel %vm2649_vm13, %v8191_v19, 0.0  ;;  %vm2765_vm10 = vcmp.eq.f32.partialorder %v7182_v59, %v8199_v7  ;;  %v8214_v19 = vld [vmem:[#allocation122_spill] sm:$0xff] }
 0xcc2   :  { %v2258_v8 = vadd.f32 %v2257_v14, %v2243_v18  ;;  %v2516_v30 = vsel %vm2508_vm7, %v2514_v42, 0.0  ;;  %vm2660_vm7 = vcmp.eq.f32.partialorder %v7182_v59, %v8194_v10  ;;  %v8195_v14 = vld [vmem:[#allocation167_spill] sm:$0xff]  ;;  %v8215_v10 = vld [vmem:[#allocation124_spill] sm:$0xff] }
 0xcc4   :  { %v2282_v63 = vmul.f32 %v2281_v50, %v2258_v8  ;;  %v8196_v50 = vld [vmem:[#allocation168_spill] sm:$0xff]  ;;  %v8197_v8 = vld [vmem:[#allocation171_spill] sm:$0xff] }
 0xcc5   :  { %v2528_v40 = vpop.permute.xlu0 %2527  ;;  %v2584_v5 = vpop.permute.xlu1 %2583  ;;  %v2714_v38 = vsel %vm2708_vm6, %v8196_v50, 0.0  ;;  %vm3898_vm6 = vcmp.eq.f32.partialorder %v7218_v55, %v8210_v32 }
 0xcc6   :  { %v2283_v11 = vadd.f32 %v2282_v63, %v2220_v13  ;;  %v2530_v46 = vsel %vm2523_vm15, %v2528_v40, 0.0  ;;  %v2586_v15 = vsel %vm2579_vm11, %v2584_v5, 0.0  ;;  %vm2621_vm15 = vcmp.eq.f32.partialorder %v7218_v55, %v8189_v34  ;;  %v8213_v34 = vld [vmem:[#allocation131_spill] sm:$0xff] }
 0xcc7   :  { %v2531_v36 = vadd.f32 %v2530_v46, %v2516_v30  ;;  %v2666_v13 = vsel %vm2660_vm7, %v8197_v8, 0.0  ;;  %v8200_v30 = vld [vmem:[#allocation175_spill] sm:$0xff] }
 0xcc8   :  { %4867 = vmatmul.mubr.msk.f32.gmra.mrb[18].mxu0 %vm2284_vm1, %v2283_v11  ;;  %v2667_v5 = vadd.f32 %v2666_v13, %v2655_v53  ;;  %vm2835_vm11 = vcmp.eq.f32.partialorder %v7182_v59, %v8200_v30  ;;  %v8218_v13 = vld [vmem:[#allocation39_spill] sm:$0xff] }
 0xcc9   :  { %v2570_v1 = vpop.permute.xlu0 %2569  ;;  %4873 = vmatprep.mubr.msk.f32.mxu0 %vm1046_vm3, %v7297_v25  ;;  %v2627_v51 = vpop.permute.xlu1 %2626  ;;  %v2555_v52 = vmul.f32 %v2554_v33, %v2531_v36  ;;  %v8188_v25 = vld [vmem:[#allocation169_spill] sm:$0xff] }
 0xcca   :  { %v2572_v6 = vsel %vm2564_vm8, %v2570_v1, 0.0  ;;  %vm2719_vm14 = vcmp.eq.f32.partialorder %v7182_v59, %v8188_v25  ;;  %v2629_v37 = vsel %vm2621_vm15, %v2627_v51, 0.0  ;;  %vm2695_vm8 = vcmp.eq.f32.partialorder %v7218_v55, %v8195_v14  ;;  %v8203_v36 = vld [vmem:[#allocation189_spill] sm:$0xff]  ;;  %v8211_v25 = vld [vmem:[#allocation92_spill] sm:$0xff] }
 0xccb   :  { %v2587_v20 = vadd.f32 %v2586_v15, %v2572_v6  ;;  %v2725_v24 = vsel %vm2719_vm14, %v8190_v57, 0.0  ;;  %v2771_v60 = vsel %vm2765_vm10, %v8203_v36, 0.0  ;;  %v8204_v51 = vld [vmem:[#allocation117_spill] sm:$0xff]  ;;  %vm2824_vm14 = vcmp.eq.f32.partialorder %v7182_v59, %v8205_v44 }
 0xccc   :  { %v2726_v40 = vadd.f32 %v2725_v24, %v2714_v38  ;;  %vm2796_vm13 = vcmp.eq.f32.partialorder %v7218_v55, %v8204_v51  ;;  %vm2776_vm15 = vcmp.eq.f32.partialorder %v7182_v59, %v8206_v23  ;;  %vm3957_vm7 = vcmp.eq.f32.partialorder %v7218_v55, %v8211_v25  ;;  %v8216_v14 = vld [vmem:[#allocation69_spill] sm:$0xff]  ;;  %v8217_v38 = vld [vmem:[#allocation183_spill] sm:$0xff] }
 0xccd   :  { %v2611_v16 = vmul.f32 %v2610_v2, %v2587_v20  ;;  %v2641_v12 = vpop.permute.xlu0 %2640  ;;  %v2700_v54 = vpop.permute.xlu1 %2699  ;;  %v8208_v2 = vld [vmem:[#allocation170_spill] sm:$0xff]  ;;  %v8209_v20 = vld [vmem:[#allocation176_spill] sm:$0xff]  ;;  %vm3972_vm10 = vcmp.eq.f32.partialorder %v7218_v55, %v8214_v19 }
 0xcce   :  { %v2643_v45 = vsel %vm2636_vm12, %v2641_v12, 0.0  ;;  %v2702_v63 = vsel %vm2695_vm8, %v2700_v54, 0.0  ;;  %vm2737_vm12 = vcmp.eq.f32.partialorder %v7218_v55, %v8201_v49  ;;  %v2830_v33 = vsel %vm2824_vm14, %v8208_v2, 0.0 }
 0xccf   :  { %v2612_v58 = vadd.f32 %v2611_v16, %v2555_v52  ;;  %v2644_v9 = vadd.f32 %v2643_v45, %v2629_v37  ;;  %v2782_v52 = vsel %vm2776_vm15, %v8209_v20, 0.0  ;;  %v3906_v37 = vsel %vm3898_vm6, %v7403_v56, 0.0 }
 0xcd0   :  { %v2783_v54 = vadd.f32 %v2782_v52, %v2771_v60 }
 0xcd1   :  { %v2686_v18 = vpop.permute.xlu0 %2685  ;;  %4874 = vmatmul.mubr.msk.f32.vlgmr.msra.gmra.mrb[20].mxu0 %vm1046_vm3, %v2612_v58  ;;  %v2743_v42 = vpop.permute.xlu1 %2742  ;;  %v2668_v46 = vmul.f32 %v2667_v5, %v2644_v9  ;;  %v8212_v58 = vld [vmem:[#allocation93_spill] sm:$0xff] }
 0xcd2   :  { %v2688_v61 = vsel %vm2680_vm5, %v2686_v18, 0.0  ;;  %5031 = vmatpush3.bf16.msra.mxu0 %v7226_v39  ;;  %v8202_v39 = vld [vmem:[#allocation177_spill] sm:$0xff]  ;;  %v2745_v1 = vsel %vm2737_vm12, %v2743_v42, 0.0  ;;  %vm2811_vm5 = vcmp.eq.f32.partialorder %v7218_v55, %v8207_v43  ;;  %vm3985_vm8 = vcmp.eq.f32.partialorder %v7182_v59, %v8212_v58  ;;  %v4564_v58 = vld [vmem:[%s7688_s4 + $0x106] ss:$0 sm:$0xff] }
 0xcd3   :  { %v2703_v11 = vadd.f32 %v2702_v63, %v2688_v61  ;;  %v2841_v21 = vsel %vm2835_vm11, %v8202_v39, 0.0  ;;  %vm3996_vm11 = vcmp.eq.f32.partialorder %v7182_v59, %v8215_v10  ;;  %vm3926_vm12 = vcmp.eq.f32.partialorder %v7182_v59, %v8216_v14 }
 0xcd4   :  { %v2842_v12 = vadd.f32 %v2841_v21, %v2830_v33  ;;  %v3932_v8 = vsel %vm3926_vm12, %v8217_v38, 0.0 }
 0xcd5   :  { %v2727_v4 = vmul.f32 %v2726_v40, %v2703_v11  ;;  %v2757_v47 = vpop.permute.xlu0 %2756  ;;  %v2816_v0 = vpop.permute.xlu1 %2815  ;;  %v8219_v40 = vld [vmem:[#allocation128_spill] sm:$0xff] }
 0xcd6   :  { %v2759_v27 = vsel %vm2752_vm9, %v2757_v47, 0.0  ;;  %v2818_v16 = vsel %vm2811_vm5, %v2816_v0, 0.0  ;;  %vm3913_vm9 = vcmp.eq.f32.partialorder %v7218_v55, %v8213_v34 }
 0xcd7   :  { %v2728_v31 = vadd.f32 %v2727_v4, %v2668_v46  ;;  %v2760_v29 = vadd.f32 %v2759_v27, %v2745_v1  ;;  %v3920_v53 = vsel %vm3913_vm9, %v7401_v62, 0.0  ;;  %v3965_v62 = vsel %vm3957_vm7, %v7406_v35, 0.0 }
 0xcd8   :  { %v3921_v63 = vadd.f32 %v3920_v53, %v3906_v37  ;;  %v8220_v53 = vld [vmem:[#allocation8_spill] sm:$0xff] }
 0xcd9   :  { %v2802_v15 = vpop.permute.xlu0 %2801  ;;  %4876 = vmatprep.mubr.msk.f32.mxu0 %vm1046_vm3, %v2728_v31  ;;  %v3977_v6 = vpop.permute.xlu1 %3976  ;;  %v2784_v57 = vmul.f32 %v2783_v54, %v2760_v29 }
 0xcda   :  { %v2804_v26 = vsel %vm2796_vm13, %v2802_v15, 0.0  ;;  %v3979_v41 = vsel %vm3972_vm10, %v3977_v6, 0.0  ;;  %vm3937_vm13 = vcmp.eq.f32.partialorder %v7182_v59, %v8218_v13  ;;  %v4107_v59 = vld [vmem:[%s7688_s4 + $0x80] sm:$0xff] }
 0xcdb   :  { %v2819_v45 = vadd.f32 %v2818_v16, %v2804_v26  ;;  %v3980_v61 = vadd.f32 %v3979_v41, %v3965_v62  ;;  %v3943_v5 = vsel %vm3937_vm13, %v8219_v40, 0.0  ;;  %v8221_v41 = vld [vmem:[#allocation9_spill] sm:$0xff] }
 0xcdc   :  { %v3944_v11 = vadd.f32 %v3943_v5, %v3932_v8  ;;  %v4240_v40 = vld [vmem:[%s7688_s4 + $0xa8] sm:$0xff] }
 0xcdd   :  { %v2843_v24 = vmul.f32 %v2842_v12, %v2819_v45 }
 0xcde   :  { %v4000_v9 = vpop.permute.xlu1 %3999  ;;  %v3945_v4 = vmul.f32 %v3944_v11, %v3921_v63  ;;  %v4241_v11 = vld [vmem:[%s7688_s4 + $0xb0] sm:$0xff] }
 0xcdf   :  { %v3989_v48 = vpop.permute.xlu0 %3988  ;;  %v2844_v18 = vadd.f32 %v2843_v24, %v2784_v57  ;;  %v4002_v50 = vsel %vm3996_vm11, %v4000_v9, 0.0 }
 0xce0   :  { %v3991_v42 = vsel %vm3985_vm8, %v3989_v48, 0.0 }
 0xce1   :  { %v4003_v56 = vadd.f32 %v4002_v50, %v3991_v42  ;;  %4877 = vmatmul.mubr.msk.f32.gmra.mrb[22].mxu0 %vm1046_vm3, %v2844_v18 }
 0xce2   :  { %4905 = vmatprep.mubr.msk.f32.mxu0 %vm1046_vm3, %v7254_v22  ;;  %v4108_v22 = vld [vmem:[%s7688_s4 + $0x88] sm:$0xff] }
 0xce3   :  { %v4004_v46 = vmul.f32 %v4003_v56, %v3980_v61  ;;  %v5032_v35 = vpack.c.bf16 %v4108_v22, %v4107_v59  ;;  %v4239_v61 = vld [vmem:[%s7688_s4 + $0xa0] sm:$0xff]  ;;  %v4332_v59 = vld [vmem:[%s7688_s4 + $0xc8] sm:$0xff]  ;;  %v4333_v22 = vld [vmem:[%s7688_s4 + $0xd0] sm:$0xff] }
 0xce4   :  { %v5040_v5 = vpack.c.bf16 %v4240_v40, %v4239_v61 }
 0xce5   :  { %4906 = vmatmul.mubr.msk.f32.vlgmr.msra.gmra.mrb[24].mxu0 %vm1046_vm3, %v7340_v17  ;;  %v4005_v55 = vadd.f32 %v4004_v46, %v3945_v4  ;;  %5033 = vmatprep.subr.bf16.mxu0 %v5032_v35  ;;  %v4109_v17 = vld [vmem:[%s7688_s4 + $0x90] sm:$0xff]  ;;  %v4242_v46 = vld [vmem:[%s7688_s4 + $0xb8] sm:$0xff] }
 0xce6   :  { %4908 = vmatprep.mubr.msk.f32.mxu0 %vm1046_vm3, %v7383_v28  ;;  %5035 = vmatpush3.bf16.msra.mxu0 %v5032_v35  ;;  %v4110_v28 = vld [vmem:[%s7688_s4 + $0x98] sm:$0xff]  ;;  %v5044_v4 = vpack.c.bf16 %v4242_v46, %v4241_v11  ;;  %v4575_v11 = vld [vmem:[%s7688_s4 + $0x10b] ss:$0 sm:$0xff] }
 0xce7   :  { %v5036_v3 = vpack.c.bf16 %v4110_v28, %v4109_v17  ;;  %5041 = vmatprep.subr.bf16.mxu1 %v5040_v5  ;;  %v4334_v17 = vld [vmem:[%s7688_s4 + $0xd8] sm:$0xff] }
 0xce8   :  { %5043 = vmatpush3.bf16.msra.mxu1 %v5040_v5  ;;  %v5052_v28 = vpack.c.bf16 %v4334_v17, %v4333_v22 }
 0xce9   :  { %4909 = vmatmul.mubr.msk.f32.gmra.mrb[26].mxu0 %vm1046_vm3, %v4005_v55  ;;  %5037 = vmatprep.subr.bf16.mxu0 %v5036_v3  ;;  %v4331_v55 = vld [vmem:[%s7688_s4 + $0xc0] sm:$0xff] }
 0xcea   :  { %5039 = vmatpush3.bf16.msra.mxu0 %v5036_v3  ;;  %5045 = vmatprep.subr.bf16.mxu1 %v5044_v4  ;;  %v5048_v35 = vpack.c.bf16 %v4332_v59, %v4331_v55  ;;  %v4335_v3 = vld [vmem:[%s7688_s4 + $0xe0] sm:$0xff]  ;;  %v4576_v59 = vld [vmem:[%s7688_s4 + $0x10c] ss:$0 sm:$0xff] }
 0xcec   :  { %5047 = vmatpush3.bf16.msra.mxu1 %v5044_v4  ;;  %5049 = vmatprep.subr.bf16.mxu0 %v5048_v35 }
 0xd55   :  { %v4897_v47 = vpop.f32.mrb[36].mxu1 }
 0xd56   :  { %v3524_v0 = vpop.f32.mrb[37].mxu1 }
 0xd57   :  { %v3543_v27 = vsel %vm237_vm2, %v3524_v0, %v4897_v47  ;;  %v4336_v47 = vld [vmem:[%s7688_s4 + $0xe8] sm:$0xff] }
 0xd58   :  { %v5056_v0 = vpack.c.bf16 %v4336_v47, %v4335_v3 }
 0xd79   :  { %v4900_v7 = vpop.f32.mrb[38].mxu1 }
 0xd7a   :  { %v3534_v30 = vpop.f32.mrb[39].mxu1 }
 0xd7b   :  { %v3544_v31 = vsel %vm1046_vm3, %v3543_v27, %v3534_v30 }
 0xd7c   :  { %v3545_v49 = vsel %vm1048_vm4, %v3544_v31, %v4900_v7 }
 0xd8b   :  { %v4865_v39 = vpop.f32.mrb[16].mxu0 }
 0xd8c   :  { %v2363_v21 = vpop.f32.mrb[17].mxu0 }
 0xd8d   :  { %v2382_v36 = vsel %vm237_vm2, %v2363_v21, %v4865_v39 }
 0xd9b   :  { %v4868_v60 = vpop.f32.mrb[18].mxu0 }
 0xd9c   :  { %v2373_v1 = vpop.f32.mrb[19].mxu0 }
 0xd9d   :  { %v2383_v51 = vsel %vm1046_vm3, %v2382_v36, %v2373_v1  ;;  %v4567_v36 = vld [vmem:[%s7688_s4 + $0x107] ss:$0 sm:$0xff] }
 0xd9e   :  { %v2384_v44 = vsel %vm1048_vm4, %v2383_v51, %v4868_v60 }
 0xda4   :  { %v4875_v23 = vpop.f32.mrb[20].mxu0 }
 0xda5   :  { %v2923_v29 = vpop.f32.mrb[21].mxu0 }
 0xda6   :  { %v2942_v43 = vsel %vm237_vm2, %v2923_v29, %v4875_v23 }
 0xdb4   :  { %v4878_v15 = vpop.f32.mrb[22].mxu0 }
 0xdb5   :  { %v2933_v6 = vpop.f32.mrb[23].mxu0 }
 0xdb6   :  { %v2943_v2 = vsel %vm1046_vm3, %v2942_v43, %v2933_v6  ;;  %v4337_v6 = vld [vmem:[%s7688_s4 + $0xf0] sm:$0xff] }
 0xdb7   :  { %v2944_v33 = vsel %vm1048_vm4, %v2943_v2, %v4878_v15  ;;  %v4338_v2 = vld [vmem:[%s7688_s4 + $0xf8] sm:$0xff] }
 0xdb8   :  { %v2945_v20 = vadd.f32 %v2944_v33, %v2384_v44  ;;  %v4907_v52 = vpop.f32.mrb[24].mxu0  ;;  %v4568_v44 = vld [vmem:[%s7688_s4 + $0x108] ss:$0 sm:$0xff]  ;;  %v5060_v33 = vpack.c.bf16 %v4338_v2, %v4337_v6 }
 0xdb9   :  { %v4084_v16 = vpop.f32.mrb[25].mxu0 }
 0xdba   :  { %v4103_v26 = vsel %vm237_vm2, %v4084_v16, %v4907_v52  ;;  %4919 = vmatprep.mubr.msk.f32.mxu0 %vm50_vm0, %v2945_v20  ;;  %v4569_v20 = vld [vmem:[%s7688_s4 + $0x109] ss:$0 sm:$0xff] }
 0xdbc   :  { %v4910_v12 = vpop.f32.mrb[26].mxu0 }
 0xdbd   :  { %v4094_v54 = vpop.f32.mrb[27].mxu0 }
 0xdbe   :  { %v4104_v45 = vsel %vm1046_vm3, %v4103_v26, %v4094_v54 }
 0xdbf   :  { %v4105_v32 = vsel %vm1048_vm4, %v4104_v45, %v4910_v12 }
 0xdc0   :  { %v4106_v25 = vadd.f32 %v4105_v32, %v3545_v49  ;;  %v4572_v32 = vld [vmem:[%s7688_s4 + $0x10a] ss:$0 sm:$0xff] }
 0xdc2   :  { %4920 = vmatmul.mubr.msk.f32.vlgmr.msra.gmra.mrb[28].mxu0 %vm50_vm0, %v4106_v25 }
 0xdc3   :  { %5051 = vmatpush3.bf16.msra.mxu0 %v5048_v35 }
 0xdc4   :  { %5053 = vmatprep.subr.bf16.mxu0 %v5052_v28 }
 0xdc7   :  { %5055 = vmatpush3.bf16.msra.mxu0 %v5052_v28 }
 0xdc8   :  { %5057 = vmatprep.subr.bf16.mxu0 %v5056_v0 }
 0xdcb   :  { %5059 = vmatpush3.bf16.msra.mxu0 %v5056_v0 }
 0xdcc   :  { %5061 = vmatprep.subr.bf16.mxu0 %v5060_v33 }
 0xdcf   :  { %5063 = vmatpush3.bf16.msra.mxu0 %v5060_v33 }
 0xe95   :  { %v4921_v34 = vpop.f32.mrb[28].mxu0 }
 0xe96   :  { %v4194_v57 = vadd.f32 %v4921_v34, %v4564_v58  ;;  %v4188_v24 = vpop.f32.mrb[29].mxu0 }
 0xe97   :  { %v4189_v19 = vadd.f32 %v4564_v58, %v4188_v24 }
 0xe98   :  { %v4198_v37 = vadd.f32 %v4194_v57, %v8220_v53 }
 0xe99   :  { %v4197_v48 = vadd.f32 %v4189_v19, %v8221_v41 }
 0xe9a   :  { %v4204_v10 = vsel %vm50_vm0, %v4198_v37, 0.0 }
 0xe9b   :  { %4205 = vadd.xlane.f32.xlu0 %v4204_v10  ;;  %v4201_v9 = vsel %vm50_vm0, %v4197_v48, 0.0 }
 0xe9c   :  { %4202 = vadd.xlane.f32.xlu1 %v4201_v9 }
 0xf28   :  { %v4206_v14 = vpop.xlane.xlu0 %4205 }
 0xf29   :  { %v4208_v18 = vmul.f32 0.03125, %v4206_v14  ;;  %v4203_v42 = vpop.xlane.xlu1 %4202 }
 0xf2a   :  { %v4207_v50 = vmul.f32 0.03125, %v4203_v42 }
 0xf2b   :  { %v4210_v38 = vsub.f32 %v4198_v37, %v4208_v18 }
 0xf2c   :  { %v4209_v8 = vsub.f32 %v4197_v48, %v4207_v50 }
 0xf2d   :  { %v4212_v62 = vmul.f32 %v4210_v38, %v4210_v38 }
 0xf2e   :  { %v4211_v56 = vmul.f32 %v4209_v8, %v4209_v8 }
 0xf2f   :  { %v4216_v13 = vsel %vm50_vm0, %v4212_v62, 0.0 }
 0xf30   :  { %4217 = vadd.xlane.f32.xlu1 %v4216_v13  ;;  %v4213_v63 = vsel %vm50_vm0, %v4211_v56, 0.0 }
 0xf31   :  { %4214 = vadd.xlane.f32.xlu0 %v4213_v63 }
 0xfbd   :  { %v4218_v27 = vpop.xlane.xlu1 %4217 }
 0xfbe   :  { %v4220_v7 = vmul.f32 0.03125, %v4218_v27  ;;  %v4215_v30 = vpop.xlane.xlu0 %4214 }
 0xfbf   :  { %v4219_v31 = vmul.f32 0.03125, %v4215_v30 }
 0xfc0   :  { %v4222_v49 = vadd.f32 1e-05, %v4220_v7 }
 0xfc1   :  { %v4221_v39 = vadd.f32 1e-05, %v4219_v31 }
 0xfc2   :  { %5328 = vrsqrt.f32 %v4222_v49 }
 0xfc3   :  { %5330 = vrsqrt.f32 %v4221_v39 }
 0xfcc   :  { %v5329_v21 = vpop.eup %5328 }
 0xfcd   :  { %v5331_v60 = vpop.eup %5330  ;;  %v4226_v1 = vmul.f32 %v5329_v21, %v4210_v38 }
 0xfce   :  { %v4225_v51 = vmul.f32 %v5331_v60, %v4209_v8 }
 0xfcf   :  { %v4232_v23 = vmul.f32 %v4567_v36, %v4226_v1 }
 0xfd0   :  { %v4231_v29 = vmul.f32 %v4567_v36, %v4225_v51 }
 0xfd1   :  { %v4238_v15 = vadd.f32 %v4568_v44, %v4232_v23 }
 0xfd2   :  { %v4237_v43 = vadd.f32 %v4568_v44, %v4231_v29 }
 0xfd4   :  { %4930 = vmatprep.mubr.msk.f32.mxu1 %vm50_vm0, %v4237_v43 }
 0xfd5   :  { %4931 = vmatmul.mubr.msk.f32.vlgmr.msra.gmra.mrb[40].mxu1 %vm50_vm0, %v4238_v15 }
0x10a8   :  { %v4932_v52 = vpop.f32.mrb[40].mxu1 }
0x10a9   :  { %v4326_v16 = vadd.f32 %v4932_v52, %v4569_v20  ;;  %v4320_v26 = vpop.f32.mrb[41].mxu1 }
0x10aa   :  { %v4321_v12 = vadd.f32 %v4569_v20, %v4320_v26 }
0x10ab   :  { %v4330_v45 = vmax.f32 %v4326_v16, 0.0 }
0x10ac   :  { %v4329_v54 = vmax.f32 %v4321_v12, 0.0 }
0x10ae   :  { %4949 = vmatprep.mubr.msk.f32.mxu0 %vm2284_vm1, %v4329_v54 }
0x10af   :  { %4950 = vmatmul.mubr.msk.f32.vlgmr.msra.gmra.mrb[30].mxu0 %vm2284_vm1, %v4330_v45 }
0x1182   :  { %v4951_v25 = vpop.f32.mrb[30].mxu0 }
0x1183   :  { %v4422_v58 = vadd.f32 %v4951_v25, %v4572_v32  ;;  %v4416_v34 = vpop.f32.mrb[31].mxu0 }
0x1184   :  { %v4417_v57 = vadd.f32 %v4572_v32, %v4416_v34 }
0x1185   :  { %v4426_v24 = vadd.f32 %v4422_v58, %v4238_v15 }
0x1186   :  { %v4425_v19 = vadd.f32 %v4417_v57, %v4237_v43 }
0x1187   :  { %v4432_v53 = vsel %vm50_vm0, %v4426_v24, 0.0 }
0x1188   :  { %4433 = vadd.xlane.f32.xlu1 %v4432_v53  ;;  %v4429_v37 = vsel %vm50_vm0, %v4425_v19, 0.0 }
0x1189   :  { %4430 = vadd.xlane.f32.xlu0 %v4429_v37 }
0x1215   :  { %v4434_v41 = vpop.xlane.xlu1 %4433 }
0x1216   :  { %v4436_v48 = vmul.f32 0.03125, %v4434_v41  ;;  %v4431_v10 = vpop.xlane.xlu0 %4430 }
0x1217   :  { %v4435_v9 = vmul.f32 0.03125, %v4431_v10 }
0x1218   :  { %v4438_v14 = vsub.f32 %v4426_v24, %v4436_v48 }
0x1219   :  { %v4437_v18 = vsub.f32 %v4425_v19, %v4435_v9 }
0x121a   :  { %v4440_v42 = vmul.f32 %v4438_v14, %v4438_v14 }
0x121b   :  { %v4439_v50 = vmul.f32 %v4437_v18, %v4437_v18 }
0x121c   :  { %v4444_v38 = vsel %vm50_vm0, %v4440_v42, 0.0 }
0x121d   :  { %4445 = vadd.xlane.f32.xlu1 %v4444_v38  ;;  %v4441_v8 = vsel %vm50_vm0, %v4439_v50, 0.0 }
0x121e   :  { %4442 = vadd.xlane.f32.xlu0 %v4441_v8 }
0x12aa   :  { %v4446_v62 = vpop.xlane.xlu1 %4445 }
0x12ab   :  { %v4448_v56 = vmul.f32 0.03125, %v4446_v62  ;;  %v4443_v13 = vpop.xlane.xlu0 %4442 }
0x12ac   :  { %v4447_v63 = vmul.f32 0.03125, %v4443_v13 }
0x12ad   :  { %v4450_v61 = vadd.f32 1e-05, %v4448_v56 }
0x12ae   :  { %v4449_v40 = vadd.f32 1e-05, %v4447_v63 }
0x12af   :  { %5332 = vrsqrt.f32 %v4450_v61 }
0x12b0   :  { %5334 = vrsqrt.f32 %v4449_v40 }
0x12b9   :  { %v5333_v5 = vpop.eup %5332 }
0x12ba   :  { %v5335_v46 = vpop.eup %5334  ;;  %v4454_v4 = vmul.f32 %v5333_v5, %v4438_v14 }
0x12bb   :  { %v4453_v55 = vmul.f32 %v5335_v46, %v4437_v18 }
0x12bc   :  { %v4460_v22 = vmul.f32 %v4575_v11, %v4454_v4 }
0x12bd   :  { %v4459_v35 = vmul.f32 %v4575_v11, %v4453_v55 }
0x12be   :  { %v4466_v17 = vadd.f32 %v4576_v59, %v4460_v22 }
0x12bf   :  { %v4465_v28 = vadd.f32 %v4576_v59, %v4459_v35 }
0x12c0   :  { %4468 = vst.msk [vmem:[#allocation5 + $0x8] sm:$0xff] %vm50_vm0, %v4466_v17 }
0x12c1   :  { %4467 = vst.msk [vmem:[#allocation5] sm:$0xff] %vm50_vm0, %v4465_v28 }
0x12c2   :  { %5369 = shalt.err (!%p5366_p12)
}
0x12c3   :  { %s5370_s1 = scalar_lea.hbm %s7689_s5, 256 }
0x12c4   :  { %p5371_p13 = scmp.ne.s32.totalorder %s7689_s5, %s5370_s1  ;;  %p5374_p0 = scmp.lt.u32.totalorder %s5370_s1, %s7689_s5 }
0x12c6   :  { %p5376_p1 = pnand %p5374_p0, %p5371_p13 }
0x12c8   :  { %5379 = shalt.err (!%p5376_p1)
}
0x12c9   :  { %4480 = dma.vmem_to_hbm [thread:$0]  %s4475_s13, 256, %s7689_s5, [#allocation4], %s5385_s28, %s5385_s28, %s5386_s29  }
0x12ca   :  { %5382 = dma.done.wait [#allocation4], 256  }
0x12cb   :  { %5383 = vsyncadd [#allocation4], 4294967040 }
0x12cc   :  { %4484 = vsyncpa [#allocation3], 1 }
0x12cd   :  { %4485 = vsyncpa [#allocation4], 1 }

</bundles_post_ra>
